<compile_context>
chip_gen: v7x
topology: tpu7x:2x2x1
jax: 0.10.0
libtpu: 0.0.40
codegen_flags: <defaults>
</compile_context>

<pallas_src>
import numpy as np
import jax
import jax.numpy as jnp
from jax.experimental import pallas as pl
from jax.experimental.pallas import tpu as pltpu

NUM_CLASSES = 7      # face-emotion classes (nn.Linear(50, num_classes))
LANE = 128           # lane-dense padded class dim for the output store


# ---------------------------- fused Pallas kernel ----------------------------

def _net_fused_kernel(x_ref, w1_ref, b1_ref, w2_ref, b2_ref,
                      wf1_ref, bf1_ref, wf2_ref, bf2_ref, o_ref):
    x = x_ref[...]            # (tb, 896) bf16 : 7 quad-rows x 128 lanes per image
    w1 = w1_ref[...]          # (256, 1024) bf16
    b1 = b1_ref[...]          # (1, 128) f32
    w2 = w2_ref[...]          # (768, 512) bf16
    b2 = b2_ref[...]          # (1, 128) f32

    # ---- conv1 (1->10,k5) + fused 2x2 max-pool + relu ----
    # One matmul per pooled-row PAIR j (6 total): input = two adjacent quad-rows
    # (128-aligned lane slice), output = 8 N-groups of 128 lanes
    # (pooled-row parity s, row phase rp, col phase cp) x (pooled_col*10 + ch).
    h1_parts = []
    for j in range(6):
        a = x[:, 128 * j: 128 * j + 256]                          # (tb, 256)
        y = jnp.dot(a, w1, preferred_element_type=jnp.float32)    # (tb, 1024) f32
        for s in range(2):
            base = (4 * s) * 128
            m = jnp.maximum(
                jnp.maximum(y[:, base:base + 128],       y[:, base + 128:base + 256]),
                jnp.maximum(y[:, base + 256:base + 384], y[:, base + 384:base + 512]))
            h1_parts.append(jnp.maximum(m + b1, 0.0).astype(jnp.bfloat16))
    h1 = jnp.concatenate(h1_parts, axis=-1)                       # (tb, 12*128)

    # ---- conv2 (10->20,k5) + [dropout2d: identity] + fused 2x2 max-pool + relu ----
    # One matmul per pooled output row q (4 total): input = 6 h1 rows
    # (128-aligned 768-lane slice), output = 4 phase groups of 128 lanes.
    h2_parts = []
    for q in range(4):
        a = h1[:, 256 * q: 256 * q + 768]                         # (tb, 768)
        y = jnp.dot(a, w2, preferred_element_type=jnp.float32)    # (tb, 512) f32
        m = jnp.maximum(jnp.maximum(y[:, 0:128],   y[:, 128:256]),
                        jnp.maximum(y[:, 256:384], y[:, 384:512]))
        h2_parts.append(jnp.maximum(m + b2, 0.0).astype(jnp.bfloat16))
    h2 = jnp.concatenate(h2_parts, axis=-1)                       # (tb, 4*128)

    # ---- fc1 (320->50, NCHW flatten folded into wf1) + relu [+ dropout: identity] ----
    h = jnp.maximum(
        jnp.dot(h2, wf1_ref[...], preferred_element_type=jnp.float32) + bf1_ref[...],
        0.0)                                                      # (tb, 128) f32

    # ---- fc2 (50 -> num_classes, lane-padded to 128) + log_softmax ----
    logits = jnp.dot(h.astype(jnp.bfloat16), wf2_ref[...],
                     preferred_element_type=jnp.float32) + bf2_ref[...]   # (tb, 128)
    mx = jnp.max(logits, axis=-1, keepdims=True)
    sh = logits - mx
    lse = jnp.log(jnp.sum(jnp.exp(sh), axis=-1, keepdims=True))
    o_ref[...] = sh - lse


# ---------------------------- host-side one-time weight prep ----------------------------

def prepare_params(params, num_classes=NUM_CLASSES):
    c1w = np.asarray(params["conv1_w"], np.float32)      # (10, 1, 5, 5)
    c1b = np.asarray(params["conv1_b"], np.float32)
    c2w = np.asarray(params["conv2_w"], np.float32)      # (20, 10, 5, 5)
    c2b = np.asarray(params["conv2_b"], np.float32)
    f1w = np.asarray(params["fc1_w"], np.float32)        # (50, 320)
    f1b = np.asarray(params["fc1_b"], np.float32)
    f2w = np.asarray(params["fc2_w"], np.float32)        # (num_classes, 50)
    f2b = np.asarray(params["fc2_b"], np.float32)

    # conv1: K = two quad-rows (2*128 lanes, lane = 128*dq + 28*dr + col),
    #        N = 8 groups of 128 (group = s*4 + rp*2 + cp, lane = pc*10 + ch).
    w1 = np.zeros((256, 1024), np.float32)
    for s in range(2):                       # pooled-row parity within the pair
        for rp in range(2):                  # conv-output row phase (height pool)
            for cp in range(2):              # conv-output col phase (width pool)
                g = s * 4 + rp * 2 + cp
                for pc in range(12):         # pooled column
                    ncol0 = g * 128 + pc * 10
                    for kh in range(5):
                        d = 2 * s + rp + kh                  # input-row offset 0..7
                        dq, dr = divmod(d, 4)
                        for kw in range(5):
                            col = 2 * pc + cp + kw           # input col 0..27
                            krow = 128 * dq + 28 * dr + col
                            w1[krow, ncol0:ncol0 + 10] = c1w[:, 0, kh, kw]
    b1 = np.zeros((1, 128), np.float32)
    b1[0, :120] = np.tile(c1b, 12)

    # conv2: K = 6 h1 rows (lane = 128*dpr + pc*10 + ci),
    #        N = 4 groups of 128 (group = rp*2 + cp, lane = pc2*20 + co).
    w2 = np.zeros((768, 512), np.float32)
    for rp in range(2):
        for cp in range(2):
            g = rp * 2 + cp
            for pc2 in range(4):
                ncol0 = g * 128 + pc2 * 20
                for kh in range(5):
                    dpr = rp + kh                            # h1-row offset 0..5
                    for kw in range(5):
                        h1col = 2 * pc2 + cp + kw            # h1 col 0..11
                        for ci in range(10):
                            krow = 128 * dpr + h1col * 10 + ci
                            w2[krow, ncol0:ncol0 + 20] = c2w[:, ci, kh, kw]
    b2 = np.zeros((1, 128), np.float32)
    b2[0, :80] = np.tile(c2b, 4)

    # fc1 with the PyTorch NCHW flatten order (co*16 + q*4 + pc2) folded in.
    # h2 lane layout is 128*q + pc2*20 + co.
    wf1 = np.zeros((512, 128), np.float32)
    for q in range(4):
        for pc2 in range(4):
            for co in range(20):
                krow = 128 * q + pc2 * 20 + co
                wf1[krow, :50] = f1w[:, co * 16 + q * 4 + pc2]
    bf1 = np.zeros((1, 128), np.float32)
    bf1[0, :50] = f1b

    # fc2 lane-padded to 128 outputs; pad lanes get -1e30 bias so they vanish
    # inside the log_softmax and are simply sliced off afterwards.
    wf2 = np.zeros((128, 128), np.float32)
    wf2[:50, :num_classes] = f2w.T
    bf2 = np.full((1, 128), -1e30, np.float32)
    bf2[0, :num_classes] = f2b

    return {
        "w1": jnp.asarray(w1, jnp.bfloat16),  "b1": jnp.asarray(b1),
        "w2": jnp.asarray(w2, jnp.bfloat16),  "b2": jnp.asarray(b2),
        "wf1": jnp.asarray(wf1, jnp.bfloat16), "bf1": jnp.asarray(bf1),
        "wf2": jnp.asarray(wf2, jnp.bfloat16), "bf2": jnp.asarray(bf2),
    }


# ---------------------------- forward wrapper (single pallas_call) ----------------------------

def net_forward(x, prep, *, batch_tile=256):
    """x: (B, 1, 28, 28) NCHW float32 -> (B, NUM_CLASSES) log-probabilities."""
    B = x.shape[0]

    # Host-side layout: each image -> 7 "quad rows" (4 image rows = 112 px,
    # lane-padded to 128) -> flat (B, 896) bf16.  All in-kernel conv slices are
    # then 128-aligned lane windows of a 2-D (batch, lanes) array.
    xr = x.reshape(B, 7, 112).astype(jnp.float32)
    xr = jnp.pad(xr, ((0, 0), (0, 0), (0, 16)))
    x2d = xr.reshape(B, 7 * 128).astype(jnp.bfloat16)

    bt = min(batch_tile, ((B + 7) // 8) * 8)            # clamp for tiny batches
    bpad = ((B + bt - 1) // bt) * bt
    if bpad != B:
        x2d = jnp.pad(x2d, ((0, bpad - B), (0, 0)))
    grid = (bpad // bt,)

    def const2(shape):
        return pl.BlockSpec(shape, lambda i: (0, 0))    # weights resident in VMEM

    order = ["w1", "b1", "w2", "b2", "wf1", "bf1", "wf2", "bf2"]
    in_specs = [pl.BlockSpec((bt, 7 * 128), lambda i: (i, 0))]
    in_specs += [const2(prep[name].shape) for name in order]

    out = pl.pallas_call(
        _net_fused_kernel,
        grid=grid,
        out_shape=jax.ShapeDtypeStruct((bpad, LANE), jnp.float32),
        in_specs=in_specs,
        out_specs=pl.BlockSpec((bt, LANE), lambda i: (i, 0)),
        compiler_params=pltpu.CompilerParams(
            dimension_semantics=("parallel",),
            vmem_limit_bytes=32 * 1024 * 1024),
    )(x2d, *[prep[name] for name in order])

    return out[:B, :NUM_CLASSES]


# ---------------------------- pure-JAX reference (for validation only) ----------------------------

def net_forward_reference(x, params):
    def pool2(y):
        b, c, h, w = y.shape
        return y.reshape(b, c, h // 2, 2, w // 2, 2).max(axis=(3, 5))

    y = jax.lax.conv_general_dilated(
        x, params["conv1_w"], (1, 1), "VALID",
        dimension_numbers=("NCHW", "OIHW", "NCHW"))
    y = jnp.maximum(pool2(y + params["conv1_b"].reshape(1, -1, 1, 1)), 0.0)
    y = jax.lax.conv_general_dilated(
        y, params["conv2_w"], (1, 1), "VALID",
        dimension_numbers=("NCHW", "OIHW", "NCHW"))
    y = jnp.maximum(pool2(y + params["conv2_b"].reshape(1, -1, 1, 1)), 0.0)
    flat = y.reshape(x.shape[0], 320)
    h = jnp.maximum(flat @ params["fc1_w"].T + params["fc1_b"], 0.0)
    logits = h @ params["fc2_w"].T + params["fc2_b"]
    return jax.nn.log_softmax(logits, axis=-1)


# ---------------------------- parameter init (matches torch defaults) ----------------------------

def init_params(key, num_classes=NUM_CLASSES):
    ks = jax.random.split(key, 8)

    def u(k, shape, fan_in):
        bound = 1.0 / np.sqrt(fan_in)
        return jax.random.uniform(k, shape, jnp.float32, -bound, bound)

    return {
        "conv1_w": u(ks[0], (10, 1, 5, 5), 1 * 5 * 5),
        "conv1_b": u(ks[1], (10,), 1 * 5 * 5),
        "conv2_w": u(ks[2], (20, 10, 5, 5), 10 * 5 * 5),
        "conv2_b": u(ks[3], (20,), 10 * 5 * 5),
        "fc1_w":   u(ks[4], (50, 320), 320),
        "fc1_b":   u(ks[5], (50,), 320),
        "fc2_w":   u(ks[6], (num_classes, 50), 50),
        "fc2_b":   u(ks[7], (num_classes,), 50),
    }


if __name__ == "__main__":
    key = jax.random.PRNGKey(0)
    kx, kp = jax.random.split(key)

    # 28x28 single-channel input is implied by fc1's in_features = 320 = 20*4*4
    x = jax.random.normal(kx, (2, 1, 28, 28), dtype=jnp.float32)   # NCHW, like PyTorch
    params = init_params(kp)
    prep = prepare_params(params)          # one-time host-side weight preparation

    fwd = jax.jit(net_forward)
    out = jax.block_until_ready(fwd(x, prep))
    ref = jax.block_until_ready(net_forward_reference(x, params))

    assert out.shape == (2, NUM_CLASSES) and out.dtype == jnp.float32
    # log_softmax rows must exponentiate-sum to 1
    assert np.allclose(np.exp(np.asarray(out)).sum(axis=-1), 1.0, atol=1e-4)
    # match the pure-f32 XLA reference (bf16 matmuls -> loosened tolerance)
    assert np.allclose(np.asarray(out), np.asarray(ref), atol=2e-2, rtol=2e-2)
    print("KERNEL_OK")
</pallas_src>

<mosaic_0001>
module attributes {stable_mosaic.version = 11 : i64} {
  func.func @_net_fused_kernel(%arg0: i32, %arg1: memref<8x896xbf16, #tpu.memory_space<vmem>>, %arg2: memref<256x1024xbf16, #tpu.memory_space<vmem>>, %arg3: memref<1x128xf32, #tpu.memory_space<vmem>>, %arg4: memref<768x512xbf16, #tpu.memory_space<vmem>>, %arg5: memref<1x128xf32, #tpu.memory_space<vmem>>, %arg6: memref<512x128xbf16, #tpu.memory_space<vmem>>, %arg7: memref<1x128xf32, #tpu.memory_space<vmem>>, %arg8: memref<128x128xbf16, #tpu.memory_space<vmem>>, %arg9: memref<1x128xf32, #tpu.memory_space<vmem>>, %arg10: memref<8x128xf32, #tpu.memory_space<vmem>>) attributes {dimension_semantics = [#tpu.dimension_semantics<parallel>], iteration_bounds = array<i64: 1>, scalar_prefetch = 0 : i64, scratch_operands = 0 : i64, tpu.core_type = #tpu.core_type<tc>, window_params = [{transform_indices = @transform_0, window_bounds = array<i64: 8, 896>}, {pipeline_mode = #tpu.pipeline_mode<synchronous>, transform_indices = @transform_1, window_bounds = array<i64: 256, 1024>}, {pipeline_mode = #tpu.pipeline_mode<synchronous>, transform_indices = @transform_2, window_bounds = array<i64: 1, 128>}, {pipeline_mode = #tpu.pipeline_mode<synchronous>, transform_indices = @transform_3, window_bounds = array<i64: 768, 512>}, {pipeline_mode = #tpu.pipeline_mode<synchronous>, transform_indices = @transform_4, window_bounds = array<i64: 1, 128>}, {pipeline_mode = #tpu.pipeline_mode<synchronous>, transform_indices = @transform_5, window_bounds = array<i64: 512, 128>}, {pipeline_mode = #tpu.pipeline_mode<synchronous>, transform_indices = @transform_6, window_bounds = array<i64: 1, 128>}, {pipeline_mode = #tpu.pipeline_mode<synchronous>, transform_indices = @transform_7, window_bounds = array<i64: 128, 128>}, {pipeline_mode = #tpu.pipeline_mode<synchronous>, transform_indices = @transform_8, window_bounds = array<i64: 1, 128>}, {transform_indices = @transform_9, window_bounds = array<i64: 8, 128>}]} {
    %c0 = arith.constant 0 : index
    %c0_0 = arith.constant 0 : index
    %0 = vector.load %arg1[%c0, %c0_0] : memref<8x896xbf16, #tpu.memory_space<vmem>>, vector<8x896xbf16>
    %c0_1 = arith.constant 0 : index
    %c0_2 = arith.constant 0 : index
    %1 = vector.load %arg2[%c0_1, %c0_2] : memref<256x1024xbf16, #tpu.memory_space<vmem>>, vector<256x1024xbf16>
    %c0_3 = arith.constant 0 : index
    %c0_4 = arith.constant 0 : index
    %2 = vector.load %arg3[%c0_3, %c0_4] : memref<1x128xf32, #tpu.memory_space<vmem>>, vector<1x128xf32>
    %c0_5 = arith.constant 0 : index
    %c0_6 = arith.constant 0 : index
    %3 = vector.load %arg4[%c0_5, %c0_6] : memref<768x512xbf16, #tpu.memory_space<vmem>>, vector<768x512xbf16>
    %c0_7 = arith.constant 0 : index
    %c0_8 = arith.constant 0 : index
    %4 = vector.load %arg5[%c0_7, %c0_8] : memref<1x128xf32, #tpu.memory_space<vmem>>, vector<1x128xf32>
    %5 = vector.extract_strided_slice %0 {offsets = [0, 0], sizes = [8, 256], strides = [1, 1]} : vector<8x896xbf16> to vector<8x256xbf16>
    %cst = arith.constant dense<0.000000e+00> : vector<8x1024xf32>
    %6 = tpu.matmul %5, %1, %cst {dimension_numbers = #tpu.dot_dimension_numbers<[1], [0], [0], [1], [0, 0, 1, 1], [], []>} : vector<8x256xbf16>, vector<256x1024xbf16>, vector<8x1024xf32> -> vector<8x1024xf32>
    %7 = vector.extract_strided_slice %6 {offsets = [0, 0], sizes = [8, 128], strides = [1, 1]} : vector<8x1024xf32> to vector<8x128xf32>
    %8 = vector.extract_strided_slice %6 {offsets = [0, 128], sizes = [8, 128], strides = [1, 1]} : vector<8x1024xf32> to vector<8x128xf32>
    %9 = arith.maximumf %7, %8 : vector<8x128xf32>
    %10 = vector.extract_strided_slice %6 {offsets = [0, 256], sizes = [8, 128], strides = [1, 1]} : vector<8x1024xf32> to vector<8x128xf32>
    %11 = vector.extract_strided_slice %6 {offsets = [0, 384], sizes = [8, 128], strides = [1, 1]} : vector<8x1024xf32> to vector<8x128xf32>
    %12 = arith.maximumf %10, %11 : vector<8x128xf32>
    %13 = arith.maximumf %9, %12 : vector<8x128xf32>
    %14 = vector.broadcast %2 : vector<1x128xf32> to vector<8x128xf32>
    %15 = arith.addf %13, %14 : vector<8x128xf32>
    %cst_9 = arith.constant 0.000000e+00 : f32
    %16 = vector.broadcast %cst_9 : f32 to vector<8x128xf32>
    %17 = arith.maximumf %15, %16 : vector<8x128xf32>
    %18 = arith.truncf %17 : vector<8x128xf32> to vector<8x128xbf16>
    %19 = vector.extract_strided_slice %6 {offsets = [0, 512], sizes = [8, 128], strides = [1, 1]} : vector<8x1024xf32> to vector<8x128xf32>
    %20 = vector.extract_strided_slice %6 {offsets = [0, 640], sizes = [8, 128], strides = [1, 1]} : vector<8x1024xf32> to vector<8x128xf32>
    %21 = arith.maximumf %19, %20 : vector<8x128xf32>
    %22 = vector.extract_strided_slice %6 {offsets = [0, 768], sizes = [8, 128], strides = [1, 1]} : vector<8x1024xf32> to vector<8x128xf32>
    %23 = vector.extract_strided_slice %6 {offsets = [0, 896], sizes = [8, 128], strides = [1, 1]} : vector<8x1024xf32> to vector<8x128xf32>
    %24 = arith.maximumf %22, %23 : vector<8x128xf32>
    %25 = arith.maximumf %21, %24 : vector<8x128xf32>
    %26 = vector.broadcast %2 : vector<1x128xf32> to vector<8x128xf32>
    %27 = arith.addf %25, %26 : vector<8x128xf32>
    %cst_10 = arith.constant 0.000000e+00 : f32
    %28 = vector.broadcast %cst_10 : f32 to vector<8x128xf32>
    %29 = arith.maximumf %27, %28 : vector<8x128xf32>
    %30 = arith.truncf %29 : vector<8x128xf32> to vector<8x128xbf16>
    %31 = vector.extract_strided_slice %0 {offsets = [0, 128], sizes = [8, 256], strides = [1, 1]} : vector<8x896xbf16> to vector<8x256xbf16>
    %cst_11 = arith.constant dense<0.000000e+00> : vector<8x1024xf32>
    %32 = tpu.matmul %31, %1, %cst_11 {dimension_numbers = #tpu.dot_dimension_numbers<[1], [0], [0], [1], [0, 0, 1, 1], [], []>} : vector<8x256xbf16>, vector<256x1024xbf16>, vector<8x1024xf32> -> vector<8x1024xf32>
    %33 = vector.extract_strided_slice %32 {offsets = [0, 0], sizes = [8, 128], strides = [1, 1]} : vector<8x1024xf32> to vector<8x128xf32>
    %34 = vector.extract_strided_slice %32 {offsets = [0, 128], sizes = [8, 128], strides = [1, 1]} : vector<8x1024xf32> to vector<8x128xf32>
    %35 = arith.maximumf %33, %34 : vector<8x128xf32>
    %36 = vector.extract_strided_slice %32 {offsets = [0, 256], sizes = [8, 128], strides = [1, 1]} : vector<8x1024xf32> to vector<8x128xf32>
    %37 = vector.extract_strided_slice %32 {offsets = [0, 384], sizes = [8, 128], strides = [1, 1]} : vector<8x1024xf32> to vector<8x128xf32>
    %38 = arith.maximumf %36, %37 : vector<8x128xf32>
    %39 = arith.maximumf %35, %38 : vector<8x128xf32>
    %40 = vector.broadcast %2 : vector<1x128xf32> to vector<8x128xf32>
    %41 = arith.addf %39, %40 : vector<8x128xf32>
    %cst_12 = arith.constant 0.000000e+00 : f32
    %42 = vector.broadcast %cst_12 : f32 to vector<8x128xf32>
    %43 = arith.maximumf %41, %42 : vector<8x128xf32>
    %44 = arith.truncf %43 : vector<8x128xf32> to vector<8x128xbf16>
    %45 = vector.extract_strided_slice %32 {offsets = [0, 512], sizes = [8, 128], strides = [1, 1]} : vector<8x1024xf32> to vector<8x128xf32>
    %46 = vector.extract_strided_slice %32 {offsets = [0, 640], sizes = [8, 128], strides = [1, 1]} : vector<8x1024xf32> to vector<8x128xf32>
    %47 = arith.maximumf %45, %46 : vector<8x128xf32>
    %48 = vector.extract_strided_slice %32 {offsets = [0, 768], sizes = [8, 128], strides = [1, 1]} : vector<8x1024xf32> to vector<8x128xf32>
    %49 = vector.extract_strided_slice %32 {offsets = [0, 896], sizes = [8, 128], strides = [1, 1]} : vector<8x1024xf32> to vector<8x128xf32>
    %50 = arith.maximumf %48, %49 : vector<8x128xf32>
    %51 = arith.maximumf %47, %50 : vector<8x128xf32>
    %52 = vector.broadcast %2 : vector<1x128xf32> to vector<8x128xf32>
    %53 = arith.addf %51, %52 : vector<8x128xf32>
    %cst_13 = arith.constant 0.000000e+00 : f32
    %54 = vector.broadcast %cst_13 : f32 to vector<8x128xf32>
    %55 = arith.maximumf %53, %54 : vector<8x128xf32>
    %56 = arith.truncf %55 : vector<8x128xf32> to vector<8x128xbf16>
    %57 = vector.extract_strided_slice %0 {offsets = [0, 256], sizes = [8, 256], strides = [1, 1]} : vector<8x896xbf16> to vector<8x256xbf16>
    %cst_14 = arith.constant dense<0.000000e+00> : vector<8x1024xf32>
    %58 = tpu.matmul %57, %1, %cst_14 {dimension_numbers = #tpu.dot_dimension_numbers<[1], [0], [0], [1], [0, 0, 1, 1], [], []>} : vector<8x256xbf16>, vector<256x1024xbf16>, vector<8x1024xf32> -> vector<8x1024xf32>
    %59 = vector.extract_strided_slice %58 {offsets = [0, 0], sizes = [8, 128], strides = [1, 1]} : vector<8x1024xf32> to vector<8x128xf32>
    %60 = vector.extract_strided_slice %58 {offsets = [0, 128], sizes = [8, 128], strides = [1, 1]} : vector<8x1024xf32> to vector<8x128xf32>
    %61 = arith.maximumf %59, %60 : vector<8x128xf32>
    %62 = vector.extract_strided_slice %58 {offsets = [0, 256], sizes = [8, 128], strides = [1, 1]} : vector<8x1024xf32> to vector<8x128xf32>
    %63 = vector.extract_strided_slice %58 {offsets = [0, 384], sizes = [8, 128], strides = [1, 1]} : vector<8x1024xf32> to vector<8x128xf32>
    %64 = arith.maximumf %62, %63 : vector<8x128xf32>
    %65 = arith.maximumf %61, %64 : vector<8x128xf32>
    %66 = vector.broadcast %2 : vector<1x128xf32> to vector<8x128xf32>
    %67 = arith.addf %65, %66 : vector<8x128xf32>
    %cst_15 = arith.constant 0.000000e+00 : f32
    %68 = vector.broadcast %cst_15 : f32 to vector<8x128xf32>
    %69 = arith.maximumf %67, %68 : vector<8x128xf32>
    %70 = arith.truncf %69 : vector<8x128xf32> to vector<8x128xbf16>
    %71 = vector.extract_strided_slice %58 {offsets = [0, 512], sizes = [8, 128], strides = [1, 1]} : vector<8x1024xf32> to vector<8x128xf32>
    %72 = vector.extract_strided_slice %58 {offsets = [0, 640], sizes = [8, 128], strides = [1, 1]} : vector<8x1024xf32> to vector<8x128xf32>
    %73 = arith.maximumf %71, %72 : vector<8x128xf32>
    %74 = vector.extract_strided_slice %58 {offsets = [0, 768], sizes = [8, 128], strides = [1, 1]} : vector<8x1024xf32> to vector<8x128xf32>
    %75 = vector.extract_strided_slice %58 {offsets = [0, 896], sizes = [8, 128], strides = [1, 1]} : vector<8x1024xf32> to vector<8x128xf32>
    %76 = arith.maximumf %74, %75 : vector<8x128xf32>
    %77 = arith.maximumf %73, %76 : vector<8x128xf32>
    %78 = vector.broadcast %2 : vector<1x128xf32> to vector<8x128xf32>
    %79 = arith.addf %77, %78 : vector<8x128xf32>
    %cst_16 = arith.constant 0.000000e+00 : f32
    %80 = vector.broadcast %cst_16 : f32 to vector<8x128xf32>
    %81 = arith.maximumf %79, %80 : vector<8x128xf32>
    %82 = arith.truncf %81 : vector<8x128xf32> to vector<8x128xbf16>
    %83 = vector.extract_strided_slice %0 {offsets = [0, 384], sizes = [8, 256], strides = [1, 1]} : vector<8x896xbf16> to vector<8x256xbf16>
    %cst_17 = arith.constant dense<0.000000e+00> : vector<8x1024xf32>
    %84 = tpu.matmul %83, %1, %cst_17 {dimension_numbers = #tpu.dot_dimension_numbers<[1], [0], [0], [1], [0, 0, 1, 1], [], []>} : vector<8x256xbf16>, vector<256x1024xbf16>, vector<8x1024xf32> -> vector<8x1024xf32>
    %85 = vector.extract_strided_slice %84 {offsets = [0, 0], sizes = [8, 128], strides = [1, 1]} : vector<8x1024xf32> to vector<8x128xf32>
    %86 = vector.extract_strided_slice %84 {offsets = [0, 128], sizes = [8, 128], strides = [1, 1]} : vector<8x1024xf32> to vector<8x128xf32>
    %87 = arith.maximumf %85, %86 : vector<8x128xf32>
    %88 = vector.extract_strided_slice %84 {offsets = [0, 256], sizes = [8, 128], strides = [1, 1]} : vector<8x1024xf32> to vector<8x128xf32>
    %89 = vector.extract_strided_slice %84 {offsets = [0, 384], sizes = [8, 128], strides = [1, 1]} : vector<8x1024xf32> to vector<8x128xf32>
    %90 = arith.maximumf %88, %89 : vector<8x128xf32>
    %91 = arith.maximumf %87, %90 : vector<8x128xf32>
    %92 = vector.broadcast %2 : vector<1x128xf32> to vector<8x128xf32>
    %93 = arith.addf %91, %92 : vector<8x128xf32>
    %cst_18 = arith.constant 0.000000e+00 : f32
    %94 = vector.broadcast %cst_18 : f32 to vector<8x128xf32>
    %95 = arith.maximumf %93, %94 : vector<8x128xf32>
    %96 = arith.truncf %95 : vector<8x128xf32> to vector<8x128xbf16>
    %97 = vector.extract_strided_slice %84 {offsets = [0, 512], sizes = [8, 128], strides = [1, 1]} : vector<8x1024xf32> to vector<8x128xf32>
    %98 = vector.extract_strided_slice %84 {offsets = [0, 640], sizes = [8, 128], strides = [1, 1]} : vector<8x1024xf32> to vector<8x128xf32>
    %99 = arith.maximumf %97, %98 : vector<8x128xf32>
    %100 = vector.extract_strided_slice %84 {offsets = [0, 768], sizes = [8, 128], strides = [1, 1]} : vector<8x1024xf32> to vector<8x128xf32>
    %101 = vector.extract_strided_slice %84 {offsets = [0, 896], sizes = [8, 128], strides = [1, 1]} : vector<8x1024xf32> to vector<8x128xf32>
    %102 = arith.maximumf %100, %101 : vector<8x128xf32>
    %103 = arith.maximumf %99, %102 : vector<8x128xf32>
    %104 = vector.broadcast %2 : vector<1x128xf32> to vector<8x128xf32>
    %105 = arith.addf %103, %104 : vector<8x128xf32>
    %cst_19 = arith.constant 0.000000e+00 : f32
    %106 = vector.broadcast %cst_19 : f32 to vector<8x128xf32>
    %107 = arith.maximumf %105, %106 : vector<8x128xf32>
    %108 = arith.truncf %107 : vector<8x128xf32> to vector<8x128xbf16>
    %109 = vector.extract_strided_slice %0 {offsets = [0, 512], sizes = [8, 256], strides = [1, 1]} : vector<8x896xbf16> to vector<8x256xbf16>
    %cst_20 = arith.constant dense<0.000000e+00> : vector<8x1024xf32>
    %110 = tpu.matmul %109, %1, %cst_20 {dimension_numbers = #tpu.dot_dimension_numbers<[1], [0], [0], [1], [0, 0, 1, 1], [], []>} : vector<8x256xbf16>, vector<256x1024xbf16>, vector<8x1024xf32> -> vector<8x1024xf32>
    %111 = vector.extract_strided_slice %110 {offsets = [0, 0], sizes = [8, 128], strides = [1, 1]} : vector<8x1024xf32> to vector<8x128xf32>
    %112 = vector.extract_strided_slice %110 {offsets = [0, 128], sizes = [8, 128], strides = [1, 1]} : vector<8x1024xf32> to vector<8x128xf32>
    %113 = arith.maximumf %111, %112 : vector<8x128xf32>
    %114 = vector.extract_strided_slice %110 {offsets = [0, 256], sizes = [8, 128], strides = [1, 1]} : vector<8x1024xf32> to vector<8x128xf32>
    %115 = vector.extract_strided_slice %110 {offsets = [0, 384], sizes = [8, 128], strides = [1, 1]} : vector<8x1024xf32> to vector<8x128xf32>
    %116 = arith.maximumf %114, %115 : vector<8x128xf32>
    %117 = arith.maximumf %113, %116 : vector<8x128xf32>
    %118 = vector.broadcast %2 : vector<1x128xf32> to vector<8x128xf32>
    %119 = arith.addf %117, %118 : vector<8x128xf32>
    %cst_21 = arith.constant 0.000000e+00 : f32
    %120 = vector.broadcast %cst_21 : f32 to vector<8x128xf32>
    %121 = arith.maximumf %119, %120 : vector<8x128xf32>
    %122 = arith.truncf %121 : vector<8x128xf32> to vector<8x128xbf16>
    %123 = vector.extract_strided_slice %110 {offsets = [0, 512], sizes = [8, 128], strides = [1, 1]} : vector<8x1024xf32> to vector<8x128xf32>
    %124 = vector.extract_strided_slice %110 {offsets = [0, 640], sizes = [8, 128], strides = [1, 1]} : vector<8x1024xf32> to vector<8x128xf32>
    %125 = arith.maximumf %123, %124 : vector<8x128xf32>
    %126 = vector.extract_strided_slice %110 {offsets = [0, 768], sizes = [8, 128], strides = [1, 1]} : vector<8x1024xf32> to vector<8x128xf32>
    %127 = vector.extract_strided_slice %110 {offsets = [0, 896], sizes = [8, 128], strides = [1, 1]} : vector<8x1024xf32> to vector<8x128xf32>
    %128 = arith.maximumf %126, %127 : vector<8x128xf32>
    %129 = arith.maximumf %125, %128 : vector<8x128xf32>
    %130 = vector.broadcast %2 : vector<1x128xf32> to vector<8x128xf32>
    %131 = arith.addf %129, %130 : vector<8x128xf32>
    %cst_22 = arith.constant 0.000000e+00 : f32
    %132 = vector.broadcast %cst_22 : f32 to vector<8x128xf32>
    %133 = arith.maximumf %131, %132 : vector<8x128xf32>
    %134 = arith.truncf %133 : vector<8x128xf32> to vector<8x128xbf16>
    %135 = vector.extract_strided_slice %0 {offsets = [0, 640], sizes = [8, 256], strides = [1, 1]} : vector<8x896xbf16> to vector<8x256xbf16>
    %cst_23 = arith.constant dense<0.000000e+00> : vector<8x1024xf32>
    %136 = tpu.matmul %135, %1, %cst_23 {dimension_numbers = #tpu.dot_dimension_numbers<[1], [0], [0], [1], [0, 0, 1, 1], [], []>} : vector<8x256xbf16>, vector<256x1024xbf16>, vector<8x1024xf32> -> vector<8x1024xf32>
    %137 = vector.extract_strided_slice %136 {offsets = [0, 0], sizes = [8, 128], strides = [1, 1]} : vector<8x1024xf32> to vector<8x128xf32>
    %138 = vector.extract_strided_slice %136 {offsets = [0, 128], sizes = [8, 128], strides = [1, 1]} : vector<8x1024xf32> to vector<8x128xf32>
    %139 = arith.maximumf %137, %138 : vector<8x128xf32>
    %140 = vector.extract_strided_slice %136 {offsets = [0, 256], sizes = [8, 128], strides = [1, 1]} : vector<8x1024xf32> to vector<8x128xf32>
    %141 = vector.extract_strided_slice %136 {offsets = [0, 384], sizes = [8, 128], strides = [1, 1]} : vector<8x1024xf32> to vector<8x128xf32>
    %142 = arith.maximumf %140, %141 : vector<8x128xf32>
    %143 = arith.maximumf %139, %142 : vector<8x128xf32>
    %144 = vector.broadcast %2 : vector<1x128xf32> to vector<8x128xf32>
    %145 = arith.addf %143, %144 : vector<8x128xf32>
    %cst_24 = arith.constant 0.000000e+00 : f32
    %146 = vector.broadcast %cst_24 : f32 to vector<8x128xf32>
    %147 = arith.maximumf %145, %146 : vector<8x128xf32>
    %148 = arith.truncf %147 : vector<8x128xf32> to vector<8x128xbf16>
    %149 = vector.extract_strided_slice %136 {offsets = [0, 512], sizes = [8, 128], strides = [1, 1]} : vector<8x1024xf32> to vector<8x128xf32>
    %150 = vector.extract_strided_slice %136 {offsets = [0, 640], sizes = [8, 128], strides = [1, 1]} : vector<8x1024xf32> to vector<8x128xf32>
    %151 = arith.maximumf %149, %150 : vector<8x128xf32>
    %152 = vector.extract_strided_slice %136 {offsets = [0, 768], sizes = [8, 128], strides = [1, 1]} : vector<8x1024xf32> to vector<8x128xf32>
    %153 = vector.extract_strided_slice %136 {offsets = [0, 896], sizes = [8, 128], strides = [1, 1]} : vector<8x1024xf32> to vector<8x128xf32>
    %154 = arith.maximumf %152, %153 : vector<8x128xf32>
    %155 = arith.maximumf %151, %154 : vector<8x128xf32>
    %156 = vector.broadcast %2 : vector<1x128xf32> to vector<8x128xf32>
    %157 = arith.addf %155, %156 : vector<8x128xf32>
    %cst_25 = arith.constant 0.000000e+00 : f32
    %158 = vector.broadcast %cst_25 : f32 to vector<8x128xf32>
    %159 = arith.maximumf %157, %158 : vector<8x128xf32>
    %160 = arith.truncf %159 : vector<8x128xf32> to vector<8x128xbf16>
    %161 = tpu.concatenate %18, %30, %44, %56, %70, %82, %96, %108, %122, %134, %148, %160 in 1 : vector<8x128xbf16>, vector<8x128xbf16>, vector<8x128xbf16>, vector<8x128xbf16>, vector<8x128xbf16>, vector<8x128xbf16>, vector<8x128xbf16>, vector<8x128xbf16>, vector<8x128xbf16>, vector<8x128xbf16>, vector<8x128xbf16>, vector<8x128xbf16> -> vector<8x1536xbf16>
    %162 = vector.extract_strided_slice %161 {offsets = [0, 0], sizes = [8, 768], strides = [1, 1]} : vector<8x1536xbf16> to vector<8x768xbf16>
    %cst_26 = arith.constant dense<0.000000e+00> : vector<8x512xf32>
    %163 = tpu.matmul %162, %3, %cst_26 {dimension_numbers = #tpu.dot_dimension_numbers<[1], [0], [0], [1], [0, 0, 1, 1], [], []>} : vector<8x768xbf16>, vector<768x512xbf16>, vector<8x512xf32> -> vector<8x512xf32>
    %164 = vector.extract_strided_slice %163 {offsets = [0, 0], sizes = [8, 128], strides = [1, 1]} : vector<8x512xf32> to vector<8x128xf32>
    %165 = vector.extract_strided_slice %163 {offsets = [0, 128], sizes = [8, 128], strides = [1, 1]} : vector<8x512xf32> to vector<8x128xf32>
    %166 = arith.maximumf %164, %165 : vector<8x128xf32>
    %167 = vector.extract_strided_slice %163 {offsets = [0, 256], sizes = [8, 128], strides = [1, 1]} : vector<8x512xf32> to vector<8x128xf32>
    %168 = vector.extract_strided_slice %163 {offsets = [0, 384], sizes = [8, 128], strides = [1, 1]} : vector<8x512xf32> to vector<8x128xf32>
    %169 = arith.maximumf %167, %168 : vector<8x128xf32>
    %170 = arith.maximumf %166, %169 : vector<8x128xf32>
    %171 = vector.broadcast %4 : vector<1x128xf32> to vector<8x128xf32>
    %172 = arith.addf %170, %171 : vector<8x128xf32>
    %cst_27 = arith.constant 0.000000e+00 : f32
    %173 = vector.broadcast %cst_27 : f32 to vector<8x128xf32>
    %174 = arith.maximumf %172, %173 : vector<8x128xf32>
    %175 = arith.truncf %174 : vector<8x128xf32> to vector<8x128xbf16>
    %176 = vector.extract_strided_slice %161 {offsets = [0, 256], sizes = [8, 768], strides = [1, 1]} : vector<8x1536xbf16> to vector<8x768xbf16>
    %cst_28 = arith.constant dense<0.000000e+00> : vector<8x512xf32>
    %177 = tpu.matmul %176, %3, %cst_28 {dimension_numbers = #tpu.dot_dimension_numbers<[1], [0], [0], [1], [0, 0, 1, 1], [], []>} : vector<8x768xbf16>, vector<768x512xbf16>, vector<8x512xf32> -> vector<8x512xf32>
    %178 = vector.extract_strided_slice %177 {offsets = [0, 0], sizes = [8, 128], strides = [1, 1]} : vector<8x512xf32> to vector<8x128xf32>
    %179 = vector.extract_strided_slice %177 {offsets = [0, 128], sizes = [8, 128], strides = [1, 1]} : vector<8x512xf32> to vector<8x128xf32>
    %180 = arith.maximumf %178, %179 : vector<8x128xf32>
    %181 = vector.extract_strided_slice %177 {offsets = [0, 256], sizes = [8, 128], strides = [1, 1]} : vector<8x512xf32> to vector<8x128xf32>
    %182 = vector.extract_strided_slice %177 {offsets = [0, 384], sizes = [8, 128], strides = [1, 1]} : vector<8x512xf32> to vector<8x128xf32>
    %183 = arith.maximumf %181, %182 : vector<8x128xf32>
    %184 = arith.maximumf %180, %183 : vector<8x128xf32>
    %185 = vector.broadcast %4 : vector<1x128xf32> to vector<8x128xf32>
    %186 = arith.addf %184, %185 : vector<8x128xf32>
    %cst_29 = arith.constant 0.000000e+00 : f32
    %187 = vector.broadcast %cst_29 : f32 to vector<8x128xf32>
    %188 = arith.maximumf %186, %187 : vector<8x128xf32>
    %189 = arith.truncf %188 : vector<8x128xf32> to vector<8x128xbf16>
    %190 = vector.extract_strided_slice %161 {offsets = [0, 512], sizes = [8, 768], strides = [1, 1]} : vector<8x1536xbf16> to vector<8x768xbf16>
    %cst_30 = arith.constant dense<0.000000e+00> : vector<8x512xf32>
    %191 = tpu.matmul %190, %3, %cst_30 {dimension_numbers = #tpu.dot_dimension_numbers<[1], [0], [0], [1], [0, 0, 1, 1], [], []>} : vector<8x768xbf16>, vector<768x512xbf16>, vector<8x512xf32> -> vector<8x512xf32>
    %192 = vector.extract_strided_slice %191 {offsets = [0, 0], sizes = [8, 128], strides = [1, 1]} : vector<8x512xf32> to vector<8x128xf32>
    %193 = vector.extract_strided_slice %191 {offsets = [0, 128], sizes = [8, 128], strides = [1, 1]} : vector<8x512xf32> to vector<8x128xf32>
    %194 = arith.maximumf %192, %193 : vector<8x128xf32>
    %195 = vector.extract_strided_slice %191 {offsets = [0, 256], sizes = [8, 128], strides = [1, 1]} : vector<8x512xf32> to vector<8x128xf32>
    %196 = vector.extract_strided_slice %191 {offsets = [0, 384], sizes = [8, 128], strides = [1, 1]} : vector<8x512xf32> to vector<8x128xf32>
    %197 = arith.maximumf %195, %196 : vector<8x128xf32>
    %198 = arith.maximumf %194, %197 : vector<8x128xf32>
    %199 = vector.broadcast %4 : vector<1x128xf32> to vector<8x128xf32>
    %200 = arith.addf %198, %199 : vector<8x128xf32>
    %cst_31 = arith.constant 0.000000e+00 : f32
    %201 = vector.broadcast %cst_31 : f32 to vector<8x128xf32>
    %202 = arith.maximumf %200, %201 : vector<8x128xf32>
    %203 = arith.truncf %202 : vector<8x128xf32> to vector<8x128xbf16>
    %204 = vector.extract_strided_slice %161 {offsets = [0, 768], sizes = [8, 768], strides = [1, 1]} : vector<8x1536xbf16> to vector<8x768xbf16>
    %cst_32 = arith.constant dense<0.000000e+00> : vector<8x512xf32>
    %205 = tpu.matmul %204, %3, %cst_32 {dimension_numbers = #tpu.dot_dimension_numbers<[1], [0], [0], [1], [0, 0, 1, 1], [], []>} : vector<8x768xbf16>, vector<768x512xbf16>, vector<8x512xf32> -> vector<8x512xf32>
    %206 = vector.extract_strided_slice %205 {offsets = [0, 0], sizes = [8, 128], strides = [1, 1]} : vector<8x512xf32> to vector<8x128xf32>
    %207 = vector.extract_strided_slice %205 {offsets = [0, 128], sizes = [8, 128], strides = [1, 1]} : vector<8x512xf32> to vector<8x128xf32>
    %208 = arith.maximumf %206, %207 : vector<8x128xf32>
    %209 = vector.extract_strided_slice %205 {offsets = [0, 256], sizes = [8, 128], strides = [1, 1]} : vector<8x512xf32> to vector<8x128xf32>
    %210 = vector.extract_strided_slice %205 {offsets = [0, 384], sizes = [8, 128], strides = [1, 1]} : vector<8x512xf32> to vector<8x128xf32>
    %211 = arith.maximumf %209, %210 : vector<8x128xf32>
    %212 = arith.maximumf %208, %211 : vector<8x128xf32>
    %213 = vector.broadcast %4 : vector<1x128xf32> to vector<8x128xf32>
    %214 = arith.addf %212, %213 : vector<8x128xf32>
    %cst_33 = arith.constant 0.000000e+00 : f32
    %215 = vector.broadcast %cst_33 : f32 to vector<8x128xf32>
    %216 = arith.maximumf %214, %215 : vector<8x128xf32>
    %217 = arith.truncf %216 : vector<8x128xf32> to vector<8x128xbf16>
    %218 = tpu.concatenate %175, %189, %203, %217 in 1 : vector<8x128xbf16>, vector<8x128xbf16>, vector<8x128xbf16>, vector<8x128xbf16> -> vector<8x512xbf16>
    %c0_34 = arith.constant 0 : index
    %c0_35 = arith.constant 0 : index
    %219 = vector.load %arg6[%c0_34, %c0_35] : memref<512x128xbf16, #tpu.memory_space<vmem>>, vector<512x128xbf16>
    %cst_36 = arith.constant dense<0.000000e+00> : vector<8x128xf32>
    %220 = tpu.matmul %218, %219, %cst_36 {dimension_numbers = #tpu.dot_dimension_numbers<[1], [0], [0], [1], [0, 0, 1, 1], [], []>} : vector<8x512xbf16>, vector<512x128xbf16>, vector<8x128xf32> -> vector<8x128xf32>
    %c0_37 = arith.constant 0 : index
    %c0_38 = arith.constant 0 : index
    %221 = vector.load %arg7[%c0_37, %c0_38] : memref<1x128xf32, #tpu.memory_space<vmem>>, vector<1x128xf32>
    %222 = vector.broadcast %221 : vector<1x128xf32> to vector<8x128xf32>
    %223 = arith.addf %220, %222 : vector<8x128xf32>
    %cst_39 = arith.constant 0.000000e+00 : f32
    %224 = vector.broadcast %cst_39 : f32 to vector<8x128xf32>
    %225 = arith.maximumf %223, %224 : vector<8x128xf32>
    %226 = arith.truncf %225 : vector<8x128xf32> to vector<8x128xbf16>
    %c0_40 = arith.constant 0 : index
    %c0_41 = arith.constant 0 : index
    %227 = vector.load %arg8[%c0_40, %c0_41] : memref<128x128xbf16, #tpu.memory_space<vmem>>, vector<128x128xbf16>
    %cst_42 = arith.constant dense<0.000000e+00> : vector<8x128xf32>
    %228 = tpu.matmul %226, %227, %cst_42 {dimension_numbers = #tpu.dot_dimension_numbers<[1], [0], [0], [1], [0, 0, 1, 1], [], []>} : vector<8x128xbf16>, vector<128x128xbf16>, vector<8x128xf32> -> vector<8x128xf32>
    %c0_43 = arith.constant 0 : index
    %c0_44 = arith.constant 0 : index
    %229 = vector.load %arg9[%c0_43, %c0_44] : memref<1x128xf32, #tpu.memory_space<vmem>>, vector<1x128xf32>
    %230 = vector.broadcast %229 : vector<1x128xf32> to vector<8x128xf32>
    %231 = arith.addf %228, %230 : vector<8x128xf32>
    %cst_45 = arith.constant dense<0xFF800000> : vector<8xf32>
    %232 = vector.multi_reduction <maximumf>, %231, %cst_45 [1] : vector<8x128xf32> to vector<8xf32>
    %233 = vector.shape_cast %232 : vector<8xf32> to vector<8x1xf32>
    %234 = vector.broadcast %233 : vector<8x1xf32> to vector<8x128xf32>
    %235 = arith.subf %231, %234 : vector<8x128xf32>
    %236 = math.exp %235 : vector<8x128xf32>
    %cst_46 = arith.constant dense<0.000000e+00> : vector<8xf32>
    %237 = vector.multi_reduction <add>, %236, %cst_46 [1] : vector<8x128xf32> to vector<8xf32>
    %238 = vector.shape_cast %237 : vector<8xf32> to vector<8x1xf32>
    %239 = math.log %238 : vector<8x1xf32>
    %240 = vector.broadcast %239 : vector<8x1xf32> to vector<8x128xf32>
    %241 = arith.subf %235, %240 : vector<8x128xf32>
    %c0_47 = arith.constant 0 : index
    %c0_48 = arith.constant 0 : index
    %242 = vector.load %arg10[%c0_47, %c0_48] : memref<8x128xf32, #tpu.memory_space<vmem>>, vector<8x128xf32>
    tpu.vector_store %arg10[%c0_47, %c0_48], %241 {strides = array<i32>} : memref<8x128xf32, #tpu.memory_space<vmem>>, vector<8x128xf32>,
    return
  }
  func.func @transform_0(%arg0: i32) -> (i32, i32) {
    %c0_i32 = arith.constant 0 : i32
    %c0_i32_0 = arith.constant 0 : i32
    return %arg0, %c0_i32 : i32, i32
  }
  func.func @transform_1(%arg0: i32) -> (i32, i32) {
    %c0_i32 = arith.constant 0 : i32
    %c0_i32_0 = arith.constant 0 : i32
    %c0_i32_1 = arith.constant 0 : i32
    return %c0_i32, %c0_i32_0 : i32, i32
  }
  func.func @transform_2(%arg0: i32) -> (i32, i32) {
    %c0_i32 = arith.constant 0 : i32
    %c0_i32_0 = arith.constant 0 : i32
    %c0_i32_1 = arith.constant 0 : i32
    return %c0_i32, %c0_i32_0 : i32, i32
  }
  func.func @transform_3(%arg0: i32) -> (i32, i32) {
    %c0_i32 = arith.constant 0 : i32
    %c0_i32_0 = arith.constant 0 : i32
    %c0_i32_1 = arith.constant 0 : i32
    return %c0_i32, %c0_i32_0 : i32, i32
  }
  func.func @transform_4(%arg0: i32) -> (i32, i32) {
    %c0_i32 = arith.constant 0 : i32
    %c0_i32_0 = arith.constant 0 : i32
    %c0_i32_1 = arith.constant 0 : i32
    return %c0_i32, %c0_i32_0 : i32, i32
  }
  func.func @transform_5(%arg0: i32) -> (i32, i32) {
    %c0_i32 = arith.constant 0 : i32
    %c0_i32_0 = arith.constant 0 : i32
    %c0_i32_1 = arith.constant 0 : i32
    return %c0_i32, %c0_i32_0 : i32, i32
  }
  func.func @transform_6(%arg0: i32) -> (i32, i32) {
    %c0_i32 = arith.constant 0 : i32
    %c0_i32_0 = arith.constant 0 : i32
    %c0_i32_1 = arith.constant 0 : i32
    return %c0_i32, %c0_i32_0 : i32, i32
  }
  func.func @transform_7(%arg0: i32) -> (i32, i32) {
    %c0_i32 = arith.constant 0 : i32
    %c0_i32_0 = arith.constant 0 : i32
    %c0_i32_1 = arith.constant 0 : i32
    return %c0_i32, %c0_i32_0 : i32, i32
  }
  func.func @transform_8(%arg0: i32) -> (i32, i32) {
    %c0_i32 = arith.constant 0 : i32
    %c0_i32_0 = arith.constant 0 : i32
    %c0_i32_1 = arith.constant 0 : i32
    return %c0_i32, %c0_i32_0 : i32, i32
  }
  func.func @transform_9(%arg0: i32) -> (i32, i32) {
    %c0_i32 = arith.constant 0 : i32
    %c0_i32_0 = arith.constant 0 : i32
    return %arg0, %c0_i32 : i32, i32
  }
}

</mosaic_0001>

<bundles_post_ra>
// kernel: net_forward.1
= control target key start
LH: loop header
LB: loop body
LE: loop exit
PB: predicated region body
PF: predicated region fallthrough
CT: control target
= control target key end

     0   :  { %14 = vsyncpa [#allocation3], 0  ;;  %s8444_s0 = inlined_call_operand.vmem [shape: bf16[8,896], index: 0, kind: input, shape index: {}]   ;;  %s8445_s1 = inlined_call_operand.hbm [shape: bf16[256,1024], index: 1, kind: input, shape index: {}]   ;;  %s8446_s2 = inlined_call_operand.vmem [shape: f32[1,128], index: 2, kind: input, shape index: {}]   ;;  %s8447_s3 = inlined_call_operand.hbm [shape: bf16[768,512], index: 3, kind: input, shape index: {}]   ;;  %s8448_s4 = inlined_call_operand.vmem [shape: f32[1,128], index: 4, kind: input, shape index: {}]   ;;  %s8449_s5 = inlined_call_operand.hbm [shape: bf16[512,128], index: 5, kind: input, shape index: {}]   ;;  %s8450_s6 = inlined_call_operand.vmem [shape: f32[1,128], index: 6, kind: input, shape index: {}]   ;;  %s8451_s7 = inlined_call_operand.vmem [shape: bf16[128,128], index: 7, kind: input, shape index: {}]   ;;  %s8452_s8 = inlined_call_operand.vmem [shape: f32[1,128], index: 8, kind: input, shape index: {}]   ;;  %s8453_s9 = inlined_call_operand.vmem [shape: f32[8,128], index: 9, kind: output, shape index: {}]  }
   0x1   :  { %15 = vsyncpa [#allocation5], 0  ;;  %s5695_s30 = smov [#allocation4]   ;;  %s5625_s13 = scalar_lea.hbm %s8447_s3, 24576 }
   0x2   :  { %s37_s10 = sshll.u32 %s5695_s30, 4  ;;  %p5626_p0 = scmp.ne.s32.totalorder %s8447_s3, %s5625_s13  ;;  %s38_s10 = int_to_ptr.vmem [resolvable:$true] %s37_s10 }
   0x3   :  { %p5629_p1 = scmp.lt.u32.totalorder %s5625_s13, %s8447_s3 }
   0x5   :  { %p5631_p2 = pnand %p5629_p1, %p5626_p0 }
   0x7   :  { %5634 = shalt.err (!%p5631_p2)
}
   0x8   :  { %s5635_s18 = scalar_lea.vmem %s38_s10, 24576  ;;  %p5640_p4 = scmp.lt.s32.totalorder %s38_s10, %s38_s10 }
   0x9   :  { %p5636_p3 = scmp.ne.s32.totalorder %s38_s10, %s5635_s18  ;;  %p5641_p5 = scmp.lt.s32.totalorder %s5635_s18, %s5635_s18 }
   0xb   :  { %p5642_p6 = por %p5641_p5, %p5640_p4 }
   0xd   :  { %p5643_p7 = pnand %p5642_p6, %p5636_p3 }
   0xf   :  { %5646 = shalt.err (!%p5643_p7)
}
  0x10   :  { %s5696_s19 = smov 256   ;;  %s5697_s20 = smov 16  }
  0x11   :  { %43 = dma.hbm_to_vmem [thread:$0]  %s8447_s3, 24576, %s38_s10, [#allocation5], %s5696_s19, %s5696_s19, %s5697_s20  }
  0x12   :  { %s5698_s23 = smov [#allocation2]   ;;  %s5647_s27 = scalar_lea.hbm %s8445_s1, 16384 }
  0x13   :  { %s23_s24 = sshll.u32 %s5698_s23, 4  ;;  %p5648_p8 = scmp.ne.s32.totalorder %s8445_s1, %s5647_s27  ;;  %s24_s24 = int_to_ptr.vmem [resolvable:$true] %s23_s24 }
  0x14   :  { %p5651_p9 = scmp.lt.u32.totalorder %s5647_s27, %s8445_s1 }
  0x16   :  { %p5653_p10 = pnand %p5651_p9, %p5648_p8 }
  0x18   :  { %5656 = shalt.err (!%p5653_p10)
}
  0x19   :  { %s5657_s12 = scalar_lea.vmem %s24_s24, 16384  ;;  %p5662_p12 = scmp.lt.s32.totalorder %s24_s24, %s24_s24 }
  0x1a   :  { %p5658_p11 = scmp.ne.s32.totalorder %s24_s24, %s5657_s12  ;;  %p5663_p13 = scmp.lt.s32.totalorder %s5657_s12, %s5657_s12 }
  0x1c   :  { %p5664_p0 = por %p5663_p13, %p5662_p12 }
  0x1e   :  { %p5665_p1 = pnand %p5664_p0, %p5658_p11 }
  0x20   :  { %5668 = shalt.err (!%p5665_p1)
}
  0x21   :  { %s5699_s3 = smov 512   ;;  %s5700_s10 = smov 32  }
  0x22   :  { %29 = dma.hbm_to_vmem [thread:$0]  %s8445_s1, 16384, %s24_s24, [#allocation3], %s5699_s3, %s5699_s3, %s5700_s10  }
  0x23   :  { %s5701_s15 = smov [#allocation6]   ;;  %s5669_s19 = scalar_lea.hbm %s8449_s5, 4096 }
  0x24   :  { %s51_s16 = sshll.u32 %s5701_s15, 4  ;;  %p5670_p2 = scmp.ne.s32.totalorder %s8449_s5, %s5669_s19  ;;  %s52_s16 = int_to_ptr.vmem [resolvable:$true] %s51_s16 }
  0x25   :  { %p5673_p3 = scmp.lt.u32.totalorder %s5669_s19, %s8449_s5 }
  0x27   :  { %p5675_p4 = pnand %p5673_p3, %p5670_p2 }
  0x29   :  { %5678 = shalt.err (!%p5675_p4)
}
  0x2a   :  { %s5679_s25 = scalar_lea.vmem %s52_s16, 4096  ;;  %p5684_p6 = scmp.lt.s32.totalorder %s52_s16, %s52_s16 }
  0x2b   :  { %p5680_p5 = scmp.ne.s32.totalorder %s52_s16, %s5679_s25  ;;  %p5685_p7 = scmp.lt.s32.totalorder %s5679_s25, %s5679_s25 }
  0x2d   :  { %p5686_p8 = por %p5685_p7, %p5684_p6 }
  0x2f   :  { %p5687_p9 = pnand %p5686_p8, %p5680_p5 }
  0x31   :  { %5690 = shalt.err (!%p5687_p9)
}
  0x32   :  { %s5702_s1 = smov 64   ;;  %s5703_s24 = smov 4  }
  0x33   :  { %57 = dma.hbm_to_vmem [thread:$0]  %s8449_s5, 4096, %s52_s16, [#allocation5], %s5702_s1, %s5702_s1, %s5703_s24  }
  0x34   :  { %5691 = dma.done.wait [#allocation3], 16384  }
  0x35   :  { %5692 = vsyncadd [#allocation3], 4294950912 }
  0x36   :  { %5693 = dma.done.wait [#allocation5], 28672  }
  0x37   :  { %5694 = vsyncadd [#allocation5], 4294938624  ;;  %v78_v0 = vld [vmem:[#allocation2] sm:$0xff]  ;;  %v79_v2 = vld [vmem:[#allocation2 + $0x8] sm:$0xff]  ;;  %vm5705_vm0 = vmmov 0  }
  0x38   :  { %v82_v1 = vld [vmem:[#allocation2 + $0x20] sm:$0xff]  ;;  %v83_v4 = vld [vmem:[#allocation2 + $0x28] sm:$0xff] }
  0x39   :  { %v5792_v3 = vcombine.high %v78_v0, %v82_v1  ;;  %v5794_v5 = vcombine.low %v78_v0, %v82_v1  ;;  %v86_v6 = vld [vmem:[#allocation2 + $0x40] sm:$0xff]  ;;  %v5796_v8 = vcombine.high %v79_v2, %v83_v4  ;;  %v5798_v9 = vcombine.low %v79_v2, %v83_v4  ;;  %v87_v11 = vld [vmem:[#allocation2 + $0x48] sm:$0xff] }
  0x3a   :  { %v90_v7 = vld [vmem:[#allocation2 + $0x60] sm:$0xff]  ;;  %v91_v12 = vld [vmem:[#allocation2 + $0x68] sm:$0xff] }
  0x3b   :  { %8989 = vst [vmem:[#allocation9_spill] sm:$0xff] %v5792_v3  ;;  %8990 = vst [vmem:[#allocation10_spill] sm:$0xff] %v5794_v5  ;;  %v5800_v10 = vcombine.high %v86_v6, %v90_v7  ;;  %v94_v13 = vld [vmem:[#allocation2 + $0x80] sm:$0xff]  ;;  %1047 = vmatprep.subr.bf16.mxu0 %v5792_v3  ;;  %v5803_v14 = vcombine.high %v87_v11, %v91_v12  ;;  %v95_v16 = vld [vmem:[#allocation2 + $0x88] sm:$0xff]  ;;  %1088 = vmatprep.subr.bf16.mxu1 %v5796_v8 }
  0x3c   :  { %8991 = vst [vmem:[#allocation11_spill] sm:$0xff] %v5796_v8  ;;  %8992 = vst [vmem:[#allocation12_spill] sm:$0xff] %v5798_v9  ;;  %v98_v15 = vld [vmem:[#allocation2 + $0xa0] sm:$0xff]  ;;  %v99_v17 = vld [vmem:[#allocation2 + $0xa8] sm:$0xff]  ;;  %1048 = vmatpush1.bf16.msra.mxu0 %v5794_v5  ;;  %v5807_v18 = vcombine.low %v86_v6, %v90_v7  ;;  %1089 = vmatpush1.bf16.msra.mxu1 %v5798_v9  ;;  %v5811_v19 = vcombine.low %v87_v11, %v91_v12 }
  0x3d   :  { %8993 = vst [vmem:[#allocation13_spill] sm:$0xff] %v5800_v10  ;;  %8994 = vst [vmem:[#allocation14_spill] sm:$0xff] %v5803_v14  ;;  %1049 = vmatprep.subr.bf16.mxu0 %v5800_v10  ;;  %v5813_v20 = vcombine.high %v94_v13, %v98_v15  ;;  %1090 = vmatprep.subr.bf16.mxu1 %v5803_v14  ;;  %v5816_v21 = vcombine.high %v95_v16, %v99_v17  ;;  %v102_v22 = vld [vmem:[#allocation2 + $0xc0] sm:$0xff]  ;;  %v103_v24 = vld [vmem:[#allocation2 + $0xc8] sm:$0xff] }
  0x3e   :  { %8995 = vst [vmem:[#allocation15_spill] sm:$0xff] %v5807_v18  ;;  %8996 = vst [vmem:[#allocation16_spill] sm:$0xff] %v5811_v19  ;;  %v106_v23 = vld [vmem:[#allocation2 + $0xe0] sm:$0xff]  ;;  %v107_v25 = vld [vmem:[#allocation2 + $0xe8] sm:$0xff]  ;;  %v5819_v26 = vcombine.low %v94_v13, %v98_v15  ;;  %v5823_v27 = vcombine.low %v95_v16, %v99_v17 }
  0x3f   :  { %8997 = vst [vmem:[#allocation17_spill] sm:$0xff] %v5813_v20  ;;  %8998 = vst [vmem:[#allocation18_spill] sm:$0xff] %v5816_v21  ;;  %v5825_v28 = vcombine.high %v102_v22, %v106_v23  ;;  %v5828_v29 = vcombine.high %v103_v24, %v107_v25  ;;  %v110_v30 = vld [vmem:[#allocation2 + $0x100] sm:$0xff]  ;;  %v111_v32 = vld [vmem:[#allocation2 + $0x108] sm:$0xff]  ;;  %v5831_v34 = vcombine.low %v102_v22, %v106_v23 }
  0x40   :  { %1050 = vmatpush1.bf16.msra.mxu0 %v5807_v18  ;;  %8999 = vst [vmem:[#allocation19_spill] sm:$0xff] %v5819_v26  ;;  %1091 = vmatpush1.bf16.msra.mxu1 %v5811_v19  ;;  %9000 = vst [vmem:[#allocation20_spill] sm:$0xff] %v5823_v27  ;;  %v114_v31 = vld [vmem:[#allocation2 + $0x120] sm:$0xff]  ;;  %v115_v33 = vld [vmem:[#allocation2 + $0x128] sm:$0xff]  ;;  %v5835_v35 = vcombine.low %v103_v24, %v107_v25 }
  0x41   :  { %1051 = vmatprep.subr.bf16.mxu0 %v5813_v20  ;;  %9001 = vst [vmem:[#allocation21_spill] sm:$0xff] %v5825_v28  ;;  %1092 = vmatprep.subr.bf16.mxu1 %v5816_v21  ;;  %9002 = vst [vmem:[#allocation22_spill] sm:$0xff] %v5828_v29  ;;  %v5837_v36 = vcombine.high %v110_v30, %v114_v31  ;;  %v5840_v37 = vcombine.high %v111_v32, %v115_v33  ;;  %v118_v38 = vld [vmem:[#allocation2 + $0x140] sm:$0xff]  ;;  %v119_v40 = vld [vmem:[#allocation2 + $0x148] sm:$0xff] }
  0x42   :  { %9003 = vst [vmem:[#allocation23_spill] sm:$0xff] %v5831_v34  ;;  %9004 = vst [vmem:[#allocation24_spill] sm:$0xff] %v5835_v35  ;;  %v122_v39 = vld [vmem:[#allocation2 + $0x160] sm:$0xff]  ;;  %v123_v41 = vld [vmem:[#allocation2 + $0x168] sm:$0xff]  ;;  %v5843_v42 = vcombine.low %v110_v30, %v114_v31  ;;  %v5847_v43 = vcombine.low %v111_v32, %v115_v33 }
  0x43   :  { %9005 = vst [vmem:[#allocation25_spill] sm:$0xff] %v5837_v36  ;;  %9006 = vst [vmem:[#allocation26_spill] sm:$0xff] %v5840_v37  ;;  %v5849_v44 = vcombine.high %v118_v38, %v122_v39  ;;  %v5852_v45 = vcombine.high %v119_v40, %v123_v41  ;;  %v126_v46 = vld [vmem:[#allocation2 + $0x180] sm:$0xff]  ;;  %v127_v48 = vld [vmem:[#allocation2 + $0x188] sm:$0xff]  ;;  %v5855_v50 = vcombine.low %v118_v38, %v122_v39 }
  0x44   :  { %1052 = vmatpush1.bf16.msra.mxu0 %v5819_v26  ;;  %1093 = vmatpush1.bf16.msra.mxu1 %v5823_v27  ;;  %9007 = vst [vmem:[#allocation27_spill] sm:$0xff] %v5847_v43  ;;  %v130_v47 = vld [vmem:[#allocation2 + $0x1a0] sm:$0xff]  ;;  %v131_v49 = vld [vmem:[#allocation2 + $0x1a8] sm:$0xff]  ;;  %v5859_v51 = vcombine.low %v119_v40, %v123_v41 }
  0x45   :  { %1053 = vmatprep.subr.bf16.mxu0 %v5825_v28  ;;  %1094 = vmatprep.subr.bf16.mxu1 %v5828_v29  ;;  %9008 = vst [vmem:[#allocation28_spill] sm:$0xff] %v5849_v44  ;;  %v5861_v52 = vcombine.high %v126_v46, %v130_v47  ;;  %v5866_v53 = vld [vmem:[%s8444_s0] sm:$0xff]  ;;  %v5869_v54 = vcombine.high %v127_v48, %v131_v49  ;;  %v135_v58 = vld [vmem:[#allocation2 + $0x1c8] sm:$0xff] }
  0x46   :  { %v134_v55 = vld [vmem:[#allocation2 + $0x1c0] sm:$0xff]  ;;  %v5873_v57 = vcombine.high %v5866_v53, %v5866_v53  ;;  %v139_v59 = vld [vmem:[#allocation2 + $0x1e8] sm:$0xff]  ;;  %v5876_v60 = vcombine.low %v126_v46, %v130_v47  ;;  %v5881_v61 = vcombine.low %v127_v48, %v131_v49 }
  0x47   :  { %v138_v56 = vld [vmem:[#allocation2 + $0x1e0] sm:$0xff]  ;;  %v5886_v63 = vcombine.high %v135_v58, %v139_v59  ;;  %v143_v2 = vld [vmem:[#allocation2 + $0x208] sm:$0xff]  ;;  %v5894_v7 = vcombine.low %v135_v58, %v139_v59 }
  0x48   :  { %1054 = vmatpush1.bf16.msra.mxu0 %v5831_v34  ;;  %1095 = vmatpush1.bf16.msra.mxu1 %v5835_v35  ;;  %v5883_v62 = vcombine.high %v134_v55, %v138_v56  ;;  %v142_v0 = vld [vmem:[#allocation2 + $0x200] sm:$0xff]  ;;  %v147_v4 = vld [vmem:[#allocation2 + $0x228] sm:$0xff]  ;;  %v5890_v6 = vcombine.low %v134_v55, %v138_v56 }
  0x49   :  { %1055 = vmatprep.subr.bf16.mxu0 %v5837_v36  ;;  %1096 = vmatprep.subr.bf16.mxu1 %v5840_v37  ;;  %v146_v1 = vld [vmem:[#allocation2 + $0x220] sm:$0xff]  ;;  %9010 = vst [vmem:[#allocation30_spill] sm:$0xff] %v5894_v7  ;;  %v5899_v12 = vcombine.high %v143_v2, %v147_v4  ;;  %v151_v16 = vld [vmem:[#allocation2 + $0x248] sm:$0xff]  ;;  %v5906_v23 = vcombine.low %v143_v2, %v147_v4 }
  0x4a   :  { %1079 = vmatprep.mubr.bf16.mxu0 %v5873_v57  ;;  %1120 = vmatprep.mubr.bf16.mxu1 %v5873_v57  ;;  %9009 = vst [vmem:[#allocation29_spill] sm:$0xff] %v5890_v6  ;;  %v5896_v11 = vcombine.high %v142_v0, %v146_v1  ;;  %v150_v13 = vld [vmem:[#allocation2 + $0x240] sm:$0xff]  ;;  %v155_v17 = vld [vmem:[#allocation2 + $0x268] sm:$0xff]  ;;  %v5902_v22 = vcombine.low %v142_v0, %v146_v1 }
  0x4b   :  { %9012 = vst [vmem:[#allocation32_spill] sm:$0xff] %v5899_v12  ;;  %v154_v15 = vld [vmem:[#allocation2 + $0x260] sm:$0xff]  ;;  %9014 = vst [vmem:[#allocation34_spill] sm:$0xff] %v5906_v23  ;;  %v5911_v25 = vcombine.high %v151_v16, %v155_v17  ;;  %v159_v32 = vld [vmem:[#allocation2 + $0x288] sm:$0xff]  ;;  %v5918_v39 = vcombine.low %v151_v16, %v155_v17 }
  0x4c   :  { %1056 = vmatpush1.bf16.msra.mxu0 %v5843_v42  ;;  %1097 = vmatpush1.bf16.msra.mxu1 %v5847_v43  ;;  %9011 = vst [vmem:[#allocation31_spill] sm:$0xff] %v5896_v11  ;;  %9013 = vst [vmem:[#allocation33_spill] sm:$0xff] %v5902_v22  ;;  %v5908_v24 = vcombine.high %v150_v13, %v154_v15  ;;  %v158_v30 = vld [vmem:[#allocation2 + $0x280] sm:$0xff]  ;;  %v163_v33 = vld [vmem:[#allocation2 + $0x2a8] sm:$0xff]  ;;  %v5914_v38 = vcombine.low %v150_v13, %v154_v15 }
  0x4d   :  { %1057 = vmatprep.subr.bf16.mxu0 %v5849_v44  ;;  %1098 = vmatprep.subr.bf16.mxu1 %v5852_v45  ;;  %9016 = vst [vmem:[#allocation36_spill] sm:$0xff] %v5911_v25  ;;  %v162_v31 = vld [vmem:[#allocation2 + $0x2a0] sm:$0xff]  ;;  %9018 = vst [vmem:[#allocation38_spill] sm:$0xff] %v5918_v39  ;;  %v5923_v41 = vcombine.high %v159_v32, %v163_v33  ;;  %v167_v48 = vld [vmem:[#allocation2 + $0x2c8] sm:$0xff]  ;;  %v5930_v56 = vcombine.low %v159_v32, %v163_v33 }
  0x4e   :  { %9015 = vst [vmem:[#allocation35_spill] sm:$0xff] %v5908_v24  ;;  %9017 = vst [vmem:[#allocation37_spill] sm:$0xff] %v5914_v38  ;;  %v5920_v40 = vcombine.high %v158_v30, %v162_v31  ;;  %v166_v46 = vld [vmem:[#allocation2 + $0x2c0] sm:$0xff]  ;;  %v171_v49 = vld [vmem:[#allocation2 + $0x2e8] sm:$0xff]  ;;  %v5926_v55 = vcombine.low %v158_v30, %v162_v31 }
  0x4f   :  { %9020 = vst [vmem:[#allocation40_spill] sm:$0xff] %v5923_v41  ;;  %v170_v47 = vld [vmem:[#allocation2 + $0x2e0] sm:$0xff]  ;;  %9022 = vst [vmem:[#allocation42_spill] sm:$0xff] %v5930_v56  ;;  %v5935_v0 = vcombine.high %v167_v48, %v171_v49  ;;  %v175_v2 = vld [vmem:[#allocation2 + $0x308] sm:$0xff]  ;;  %v5942_v17 = vcombine.low %v167_v48, %v171_v49 }
  0x50   :  { %1058 = vmatpush1.bf16.msra.mxu0 %v5855_v50  ;;  %1099 = vmatpush1.bf16.msra.mxu1 %v5859_v51  ;;  %9019 = vst [vmem:[#allocation39_spill] sm:$0xff] %v5920_v40  ;;  %9021 = vst [vmem:[#allocation41_spill] sm:$0xff] %v5926_v55  ;;  %v5932_v58 = vcombine.high %v166_v46, %v170_v47  ;;  %v174_v59 = vld [vmem:[#allocation2 + $0x300] sm:$0xff]  ;;  %v179_v4 = vld [vmem:[#allocation2 + $0x328] sm:$0xff]  ;;  %v5938_v13 = vcombine.low %v166_v46, %v170_v47 }
  0x51   :  { %1059 = vmatprep.subr.bf16.mxu0 %v5861_v52  ;;  %1100 = vmatprep.subr.bf16.mxu1 %v5869_v54  ;;  %9024 = vst [vmem:[#allocation44_spill] sm:$0xff] %v5935_v0  ;;  %v178_v1 = vld [vmem:[#allocation2 + $0x320] sm:$0xff]  ;;  %9026 = vst [vmem:[#allocation46_spill] sm:$0xff] %v5942_v17  ;;  %v183_v31 = vld [vmem:[#allocation2 + $0x348] sm:$0xff]  ;;  %v5947_v33 = vcombine.high %v175_v2, %v179_v4  ;;  %v5954_v48 = vcombine.low %v175_v2, %v179_v4 }
  0x52   :  { %9023 = vst [vmem:[#allocation43_spill] sm:$0xff] %v5932_v58  ;;  %9025 = vst [vmem:[#allocation45_spill] sm:$0xff] %v5938_v13  ;;  %v182_v15 = vld [vmem:[#allocation2 + $0x340] sm:$0xff]  ;;  %v5944_v30 = vcombine.high %v174_v59, %v178_v1  ;;  %v187_v32 = vld [vmem:[#allocation2 + $0x368] sm:$0xff]  ;;  %v5950_v46 = vcombine.low %v174_v59, %v178_v1 }
  0x53   :  { %v186_v16 = vld [vmem:[#allocation2 + $0x360] sm:$0xff]  ;;  %9028 = vst [vmem:[#allocation48_spill] sm:$0xff] %v5947_v33  ;;  %9030 = vst [vmem:[#allocation50_spill] sm:$0xff] %v5954_v48  ;;  %v5966_v2 = vcombine.low %v183_v31, %v187_v32 }
  0x54   :  { %1060 = vmatpush1.bf16.msra.mxu0 %v5876_v60  ;;  %1101 = vmatpush1.bf16.msra.mxu1 %v5881_v61  ;;  %9027 = vst [vmem:[#allocation47_spill] sm:$0xff] %v5944_v30  ;;  %9029 = vst [vmem:[#allocation49_spill] sm:$0xff] %v5950_v46  ;;  %v190_v47 = vld [vmem:[#allocation2 + $0x380] sm:$0xff]  ;;  %v5956_v49 = vcombine.high %v182_v15, %v186_v16  ;;  %v5962_v59 = vcombine.low %v182_v15, %v186_v16  ;;  %v80_v16 = vld [vmem:[#allocation2 + $0x10] sm:$0xff] }
  0x55   :  { %1061 = vmatprep.subr.bf16.mxu0 %v5883_v62  ;;  %1102 = vmatprep.subr.bf16.mxu1 %v5886_v63  ;;  %v198_v1 = vld [vmem:[#allocation2 + $0x3c0] sm:$0xff]  ;;  %9034 = vst [vmem:[#allocation54_spill] sm:$0xff] %v5966_v2 }
  0x56   :  { %9031 = vst [vmem:[#allocation51_spill] sm:$0xff] %v5956_v49  ;;  %9033 = vst [vmem:[#allocation53_spill] sm:$0xff] %v5962_v59 }
  0x58   :  { %1062 = vmatpush1.bf16.msra.mxu0 %v5890_v6  ;;  %1103 = vmatpush1.bf16.msra.mxu1 %v5894_v7 }
  0x59   :  { %1063 = vmatprep.subr.bf16.mxu0 %v5896_v11  ;;  %1104 = vmatprep.subr.bf16.mxu1 %v5899_v12 }
  0x5c   :  { %1064 = vmatpush1.bf16.msra.mxu0 %v5902_v22  ;;  %1105 = vmatpush1.bf16.msra.mxu1 %v5906_v23 }
  0x5d   :  { %1065 = vmatprep.subr.bf16.mxu0 %v5908_v24  ;;  %1106 = vmatprep.subr.bf16.mxu1 %v5911_v25 }
  0x60   :  { %1066 = vmatpush1.bf16.msra.mxu0 %v5914_v38  ;;  %1107 = vmatpush1.bf16.msra.mxu1 %v5918_v39 }
  0x61   :  { %1067 = vmatprep.subr.bf16.mxu0 %v5920_v40  ;;  %1108 = vmatprep.subr.bf16.mxu1 %v5923_v41 }
  0x64   :  { %1068 = vmatpush1.bf16.msra.mxu0 %v5926_v55  ;;  %1109 = vmatpush1.bf16.msra.mxu1 %v5930_v56  ;;  %v194_v55 = vld [vmem:[#allocation2 + $0x3a0] sm:$0xff]  ;;  %v195_v56 = vld [vmem:[#allocation2 + $0x3a8] sm:$0xff] }
  0x65   :  { %1069 = vmatprep.subr.bf16.mxu0 %v5932_v58  ;;  %1110 = vmatprep.subr.bf16.mxu1 %v5935_v0  ;;  %v191_v58 = vld [vmem:[#allocation2 + $0x388] sm:$0xff]  ;;  %v5959_v0 = vcombine.high %v183_v31, %v187_v32  ;;  %v5968_v4 = vcombine.high %v190_v47, %v194_v55  ;;  %v5974_v15 = vcombine.low %v190_v47, %v194_v55  ;;  %v88_v47 = vld [vmem:[#allocation2 + $0x50] sm:$0xff] }
  0x66   :  { %v5978_v31 = vcombine.low %v191_v58, %v195_v56 }
  0x67   :  { %9032 = vst [vmem:[#allocation52_spill] sm:$0xff] %v5959_v0  ;;  %9035 = vst [vmem:[#allocation55_spill] sm:$0xff] %v5968_v4 }
  0x68   :  { %1070 = vmatpush1.bf16.msra.mxu0 %v5938_v13  ;;  %1111 = vmatpush1.bf16.msra.mxu1 %v5942_v17  ;;  %v202_v13 = vld [vmem:[#allocation2 + $0x3e0] sm:$0xff]  ;;  %v203_v17 = vld [vmem:[#allocation2 + $0x3e8] sm:$0xff]  ;;  %9037 = vst [vmem:[#allocation57_spill] sm:$0xff] %v5974_v15  ;;  %9038 = vst [vmem:[#allocation58_spill] sm:$0xff] %v5978_v31 }
  0x69   :  { %1071 = vmatprep.subr.bf16.mxu0 %v5944_v30  ;;  %1112 = vmatprep.subr.bf16.mxu1 %v5947_v33  ;;  %v199_v30 = vld [vmem:[#allocation2 + $0x3c8] sm:$0xff]  ;;  %v5971_v33 = vcombine.high %v191_v58, %v195_v56  ;;  %v5980_v32 = vcombine.high %v198_v1, %v202_v13  ;;  %v5986_v55 = vcombine.low %v198_v1, %v202_v13 }
  0x6a   :  { %v5990_v56 = vcombine.low %v199_v30, %v203_v17  ;;  %v5999_v13 = vcombine.low %v5866_v53, %v5866_v53 }
  0x6b   :  { %9036 = vst [vmem:[#allocation56_spill] sm:$0xff] %v5971_v33  ;;  %9039 = vst [vmem:[#allocation59_spill] sm:$0xff] %v5980_v32 }
  0x6c   :  { %1072 = vmatpush1.bf16.msra.mxu0 %v5950_v46  ;;  %1113 = vmatpush1.bf16.msra.mxu1 %v5954_v48  ;;  %v84_v46 = vld [vmem:[#allocation2 + $0x30] sm:$0xff]  ;;  %v85_v48 = vld [vmem:[#allocation2 + $0x38] sm:$0xff]  ;;  %9041 = vst [vmem:[#allocation61_spill] sm:$0xff] %v5986_v55  ;;  %9042 = vst [vmem:[#allocation62_spill] sm:$0xff] %v5990_v56 }
  0x6d   :  { %1073 = vmatprep.subr.bf16.mxu0 %v5956_v49  ;;  %1114 = vmatprep.subr.bf16.mxu1 %v5959_v0  ;;  %v81_v49 = vld [vmem:[#allocation2 + $0x18] sm:$0xff]  ;;  %v5983_v0 = vcombine.high %v199_v30, %v203_v17  ;;  %v5992_v58 = vcombine.high %v80_v16, %v84_v46  ;;  %v6002_v1 = vcombine.low %v80_v16, %v84_v46  ;;  %v104_v16 = vld [vmem:[#allocation2 + $0xd0] sm:$0xff] }
  0x6e   :  { %v6006_v17 = vcombine.low %v81_v49, %v85_v48 }
  0x6f   :  { %9040 = vst [vmem:[#allocation60_spill] sm:$0xff] %v5983_v0  ;;  %9043 = vst [vmem:[#allocation63_spill] sm:$0xff] %v5992_v58 }
  0x70   :  { %1074 = vmatpush1.bf16.msra.mxu0 %v5962_v59  ;;  %1115 = vmatpush1.bf16.msra.mxu1 %v5966_v2  ;;  %v92_v59 = vld [vmem:[#allocation2 + $0x70] sm:$0xff]  ;;  %v93_v2 = vld [vmem:[#allocation2 + $0x78] sm:$0xff]  ;;  %9045 = vst [vmem:[#allocation65_spill] sm:$0xff] %v6002_v1  ;;  %9046 = vst [vmem:[#allocation66_spill] sm:$0xff] %v6006_v17 }
  0x71   :  { %1075 = vmatprep.subr.bf16.mxu0 %v5968_v4  ;;  %1116 = vmatprep.subr.bf16.mxu1 %v5971_v33  ;;  %v89_v4 = vld [vmem:[#allocation2 + $0x58] sm:$0xff]  ;;  %v5995_v33 = vcombine.high %v81_v49, %v85_v48  ;;  %v6008_v30 = vcombine.high %v88_v47, %v92_v59  ;;  %v6016_v46 = vcombine.low %v88_v47, %v92_v59  ;;  %v112_v47 = vld [vmem:[#allocation2 + $0x110] sm:$0xff] }
  0x72   :  { %v6011_v53 = vcombine.high %v89_v4, %v93_v2  ;;  %v6020_v48 = vcombine.low %v89_v4, %v93_v2 }
  0x73   :  { %9044 = vst [vmem:[#allocation64_spill] sm:$0xff] %v5995_v33  ;;  %9047 = vst [vmem:[#allocation67_spill] sm:$0xff] %v6008_v30 }
  0x74   :  { %1076 = vmatpush1.bf16.msra.mxu0 %v5974_v15  ;;  %1117 = vmatpush1.bf16.msra.mxu1 %v5978_v31  ;;  %v96_v31 = vld [vmem:[#allocation2 + $0x90] sm:$0xff]  ;;  %v101_v15 = vld [vmem:[#allocation2 + $0xb8] sm:$0xff]  ;;  %9048 = vst [vmem:[#allocation68_spill] sm:$0xff] %v6011_v53  ;;  %9049 = vst [vmem:[#allocation69_spill] sm:$0xff] %v6016_v46 }
  0x75   :  { %1077 = vmatprep.subr.bf16.mxu0 %v5980_v32  ;;  %1118 = vmatprep.subr.bf16.mxu1 %v5983_v0  ;;  %v100_v32 = vld [vmem:[#allocation2 + $0xb0] sm:$0xff]  ;;  %v97_v0 = vld [vmem:[#allocation2 + $0x98] sm:$0xff]  ;;  %9050 = vst [vmem:[#allocation70_spill] sm:$0xff] %v6020_v48 }
  0x76   :  { %v6022_v49 = vcombine.high %v96_v31, %v100_v32  ;;  %v6030_v59 = vcombine.low %v96_v31, %v100_v32  ;;  %v6034_v2 = vcombine.low %v97_v0, %v101_v15  ;;  %v120_v32 = vld [vmem:[#allocation2 + $0x150] sm:$0xff] }
  0x78   :  { %1078 = vmatpush1.bf16.msra.mxu0 %v5986_v55  ;;  %1119 = vmatpush1.bf16.msra.mxu1 %v5990_v56  ;;  %9051 = vst [vmem:[#allocation71_spill] sm:$0xff] %v6022_v49  ;;  %v109_v56 = vld [vmem:[#allocation2 + $0xf8] sm:$0xff]  ;;  %v6025_v55 = vcombine.high %v97_v0, %v101_v15  ;;  %9053 = vst [vmem:[#allocation73_spill] sm:$0xff] %v6030_v59 }
  0x79   :  { %1129 = vmatprep.subr.bf16.mxu0 %v5992_v58  ;;  %1170 = vmatprep.subr.bf16.mxu1 %v5995_v33  ;;  %v108_v58 = vld [vmem:[#allocation2 + $0xf0] sm:$0xff]  ;;  %v105_v33 = vld [vmem:[#allocation2 + $0xd8] sm:$0xff]  ;;  %9054 = vst [vmem:[#allocation74_spill] sm:$0xff] %v6034_v2 }
  0x7a   :  { %9052 = vst [vmem:[#allocation72_spill] sm:$0xff] %v6025_v55  ;;  %v6036_v4 = vcombine.high %v104_v16, %v108_v58  ;;  %v6042_v31 = vcombine.low %v104_v16, %v108_v58  ;;  %v6046_v0 = vcombine.low %v105_v33, %v109_v56  ;;  %v128_v16 = vld [vmem:[#allocation2 + $0x190] sm:$0xff] }
  0x7b   :  { %1080 = vmatmul.mubr.bf16.vlgmr.msra.gmra.mrb[0].mxu0 %v5999_v13  ;;  %1121 = vmatmul.mubr.bf16.vlgmr.msra.gmra.mrb[0].mxu1 %v5999_v13 }
  0x7c   :  { %1130 = vmatpush1.bf16.msra.mxu0 %v6002_v1  ;;  %1171 = vmatpush1.bf16.msra.mxu1 %v6006_v17  ;;  %9055 = vst [vmem:[#allocation75_spill] sm:$0xff] %v6036_v4  ;;  %v117_v17 = vld [vmem:[#allocation2 + $0x138] sm:$0xff]  ;;  %v6039_v1 = vcombine.high %v105_v33, %v109_v56  ;;  %9057 = vst [vmem:[#allocation77_spill] sm:$0xff] %v6042_v31 }
  0x7d   :  { %1131 = vmatprep.subr.bf16.mxu0 %v6008_v30  ;;  %1172 = vmatprep.subr.bf16.mxu1 %v6011_v53  ;;  %v116_v30 = vld [vmem:[#allocation2 + $0x130] sm:$0xff]  ;;  %v113_v53 = vld [vmem:[#allocation2 + $0x118] sm:$0xff]  ;;  %9058 = vst [vmem:[#allocation78_spill] sm:$0xff] %v6046_v0 }
  0x7e   :  { %1161 = vmatprep.mubr.bf16.mxu0 %v5873_v57  ;;  %1202 = vmatprep.mubr.bf16.mxu1 %v5873_v57  ;;  %9056 = vst [vmem:[#allocation76_spill] sm:$0xff] %v6039_v1  ;;  %v6048_v15 = vcombine.high %v112_v47, %v116_v30  ;;  %v6054_v58 = vcombine.low %v112_v47, %v116_v30  ;;  %v136_v47 = vld [vmem:[#allocation2 + $0x1d0] sm:$0xff] }
  0x7f   :  { %v6058_v33 = vcombine.low %v113_v53, %v117_v17 }
  0x80   :  { %1132 = vmatpush1.bf16.msra.mxu0 %v6016_v46  ;;  %1173 = vmatpush1.bf16.msra.mxu1 %v6020_v48  ;;  %v124_v46 = vld [vmem:[#allocation2 + $0x170] sm:$0xff]  ;;  %9059 = vst [vmem:[#allocation79_spill] sm:$0xff] %v6048_v15  ;;  %v125_v48 = vld [vmem:[#allocation2 + $0x178] sm:$0xff]  ;;  %9061 = vst [vmem:[#allocation81_spill] sm:$0xff] %v6054_v58 }
  0x81   :  { %1133 = vmatprep.subr.bf16.mxu0 %v6022_v49  ;;  %1174 = vmatprep.subr.bf16.mxu1 %v6025_v55  ;;  %v121_v49 = vld [vmem:[#allocation2 + $0x158] sm:$0xff]  ;;  %v6051_v55 = vcombine.high %v113_v53, %v117_v17  ;;  %9062 = vst [vmem:[#allocation82_spill] sm:$0xff] %v6058_v33  ;;  %v6060_v56 = vcombine.high %v120_v32, %v124_v46 }
  0x82   :  { %v6066_v30 = vcombine.low %v120_v32, %v124_v46  ;;  %v6070_v17 = vcombine.low %v121_v49, %v125_v48  ;;  %v144_v32 = vld [vmem:[#allocation2 + $0x210] sm:$0xff] }
  0x83   :  { %9060 = vst [vmem:[#allocation80_spill] sm:$0xff] %v6051_v55  ;;  %9063 = vst [vmem:[#allocation83_spill] sm:$0xff] %v6060_v56 }
  0x84   :  { %1134 = vmatpush1.bf16.msra.mxu0 %v6030_v59  ;;  %1175 = vmatpush1.bf16.msra.mxu1 %v6034_v2  ;;  %v132_v59 = vld [vmem:[#allocation2 + $0x1b0] sm:$0xff]  ;;  %v133_v2 = vld [vmem:[#allocation2 + $0x1b8] sm:$0xff]  ;;  %9065 = vst [vmem:[#allocation85_spill] sm:$0xff] %v6066_v30  ;;  %9066 = vst [vmem:[#allocation86_spill] sm:$0xff] %v6070_v17 }
  0x85   :  { %1135 = vmatprep.subr.bf16.mxu0 %v6036_v4  ;;  %1176 = vmatprep.subr.bf16.mxu1 %v6039_v1  ;;  %v129_v4 = vld [vmem:[#allocation2 + $0x198] sm:$0xff]  ;;  %v6063_v1 = vcombine.high %v121_v49, %v125_v48  ;;  %v6072_v53 = vcombine.high %v128_v16, %v132_v59  ;;  %v6078_v46 = vcombine.low %v128_v16, %v132_v59  ;;  %v152_v16 = vld [vmem:[#allocation2 + $0x250] sm:$0xff] }
  0x86   :  { %v6082_v48 = vcombine.low %v129_v4, %v133_v2 }
  0x87   :  { %9064 = vst [vmem:[#allocation84_spill] sm:$0xff] %v6063_v1  ;;  %9067 = vst [vmem:[#allocation87_spill] sm:$0xff] %v6072_v53 }
  0x88   :  { %1136 = vmatpush1.bf16.msra.mxu0 %v6042_v31  ;;  %1177 = vmatpush1.bf16.msra.mxu1 %v6046_v0  ;;  %v140_v31 = vld [vmem:[#allocation2 + $0x1f0] sm:$0xff]  ;;  %v141_v0 = vld [vmem:[#allocation2 + $0x1f8] sm:$0xff]  ;;  %9069 = vst [vmem:[#allocation89_spill] sm:$0xff] %v6078_v46  ;;  %9070 = vst [vmem:[#allocation90_spill] sm:$0xff] %v6082_v48 }
  0x89   :  { %1137 = vmatprep.subr.bf16.mxu0 %v6048_v15  ;;  %1178 = vmatprep.subr.bf16.mxu1 %v6051_v55  ;;  %v137_v15 = vld [vmem:[#allocation2 + $0x1d8] sm:$0xff]  ;;  %v6075_v55 = vcombine.high %v129_v4, %v133_v2  ;;  %v6084_v49 = vcombine.high %v136_v47, %v140_v31  ;;  %v6090_v59 = vcombine.low %v136_v47, %v140_v31  ;;  %v160_v47 = vld [vmem:[#allocation2 + $0x290] sm:$0xff] }
  0x8a   :  { %v6094_v2 = vcombine.low %v137_v15, %v141_v0 }
  0x8b   :  { %9068 = vst [vmem:[#allocation88_spill] sm:$0xff] %v6075_v55  ;;  %9071 = vst [vmem:[#allocation91_spill] sm:$0xff] %v6084_v49 }
  0x8c   :  { %1138 = vmatpush1.bf16.msra.mxu0 %v6054_v58  ;;  %1179 = vmatpush1.bf16.msra.mxu1 %v6058_v33  ;;  %v148_v58 = vld [vmem:[#allocation2 + $0x230] sm:$0xff]  ;;  %v149_v33 = vld [vmem:[#allocation2 + $0x238] sm:$0xff]  ;;  %9073 = vst [vmem:[#allocation93_spill] sm:$0xff] %v6090_v59  ;;  %9074 = vst [vmem:[#allocation94_spill] sm:$0xff] %v6094_v2 }
  0x8d   :  { %1139 = vmatprep.subr.bf16.mxu0 %v6060_v56  ;;  %1180 = vmatprep.subr.bf16.mxu1 %v6063_v1  ;;  %v145_v56 = vld [vmem:[#allocation2 + $0x218] sm:$0xff]  ;;  %v6087_v1 = vcombine.high %v137_v15, %v141_v0  ;;  %v6096_v4 = vcombine.high %v144_v32, %v148_v58  ;;  %v6102_v31 = vcombine.low %v144_v32, %v148_v58  ;;  %v168_v32 = vld [vmem:[#allocation2 + $0x2d0] sm:$0xff] }
  0x8e   :  { %v6106_v0 = vcombine.low %v145_v56, %v149_v33 }
  0x8f   :  { %9072 = vst [vmem:[#allocation92_spill] sm:$0xff] %v6087_v1  ;;  %9075 = vst [vmem:[#allocation95_spill] sm:$0xff] %v6096_v4 }
  0x90   :  { %1140 = vmatpush1.bf16.msra.mxu0 %v6066_v30  ;;  %1181 = vmatpush1.bf16.msra.mxu1 %v6070_v17  ;;  %v156_v30 = vld [vmem:[#allocation2 + $0x270] sm:$0xff]  ;;  %v157_v17 = vld [vmem:[#allocation2 + $0x278] sm:$0xff]  ;;  %9077 = vst [vmem:[#allocation97_spill] sm:$0xff] %v6102_v31  ;;  %9078 = vst [vmem:[#allocation98_spill] sm:$0xff] %v6106_v0 }
  0x91   :  { %1141 = vmatprep.subr.bf16.mxu0 %v6072_v53  ;;  %1182 = vmatprep.subr.bf16.mxu1 %v6075_v55  ;;  %v153_v53 = vld [vmem:[#allocation2 + $0x258] sm:$0xff]  ;;  %v6099_v55 = vcombine.high %v145_v56, %v149_v33  ;;  %v6108_v15 = vcombine.high %v152_v16, %v156_v30  ;;  %v6114_v58 = vcombine.low %v152_v16, %v156_v30  ;;  %v176_v16 = vld [vmem:[#allocation2 + $0x310] sm:$0xff] }
  0x92   :  { %v6118_v33 = vcombine.low %v153_v53, %v157_v17 }
  0x93   :  { %9076 = vst [vmem:[#allocation96_spill] sm:$0xff] %v6099_v55  ;;  %9079 = vst [vmem:[#allocation99_spill] sm:$0xff] %v6108_v15 }
  0x94   :  { %1142 = vmatpush1.bf16.msra.mxu0 %v6078_v46  ;;  %1183 = vmatpush1.bf16.msra.mxu1 %v6082_v48  ;;  %v164_v46 = vld [vmem:[#allocation2 + $0x2b0] sm:$0xff]  ;;  %v165_v48 = vld [vmem:[#allocation2 + $0x2b8] sm:$0xff]  ;;  %9081 = vst [vmem:[#allocation101_spill] sm:$0xff] %v6114_v58  ;;  %9082 = vst [vmem:[#allocation102_spill] sm:$0xff] %v6118_v33 }
  0x95   :  { %1143 = vmatprep.subr.bf16.mxu0 %v6084_v49  ;;  %1184 = vmatprep.subr.bf16.mxu1 %v6087_v1  ;;  %v161_v49 = vld [vmem:[#allocation2 + $0x298] sm:$0xff]  ;;  %v6111_v1 = vcombine.high %v153_v53, %v157_v17  ;;  %v6120_v56 = vcombine.high %v160_v47, %v164_v46  ;;  %v6126_v30 = vcombine.low %v160_v47, %v164_v46  ;;  %v184_v47 = vld [vmem:[#allocation2 + $0x350] sm:$0xff] }
  0x96   :  { %v6130_v17 = vcombine.low %v161_v49, %v165_v48 }
  0x97   :  { %9080 = vst [vmem:[#allocation100_spill] sm:$0xff] %v6111_v1  ;;  %9083 = vst [vmem:[#allocation103_spill] sm:$0xff] %v6120_v56 }
  0x98   :  { %1144 = vmatpush1.bf16.msra.mxu0 %v6090_v59  ;;  %1185 = vmatpush1.bf16.msra.mxu1 %v6094_v2  ;;  %v172_v59 = vld [vmem:[#allocation2 + $0x2f0] sm:$0xff]  ;;  %v173_v2 = vld [vmem:[#allocation2 + $0x2f8] sm:$0xff]  ;;  %9085 = vst [vmem:[#allocation105_spill] sm:$0xff] %v6126_v30  ;;  %9086 = vst [vmem:[#allocation106_spill] sm:$0xff] %v6130_v17 }
  0x99   :  { %1145 = vmatprep.subr.bf16.mxu0 %v6096_v4  ;;  %1186 = vmatprep.subr.bf16.mxu1 %v6099_v55  ;;  %v169_v4 = vld [vmem:[#allocation2 + $0x2d8] sm:$0xff]  ;;  %v6123_v55 = vcombine.high %v161_v49, %v165_v48  ;;  %v6132_v53 = vcombine.high %v168_v32, %v172_v59  ;;  %v6138_v46 = vcombine.low %v168_v32, %v172_v59  ;;  %v192_v32 = vld [vmem:[#allocation2 + $0x390] sm:$0xff] }
  0x9a   :  { %v6142_v48 = vcombine.low %v169_v4, %v173_v2 }
  0x9b   :  { %9084 = vst [vmem:[#allocation104_spill] sm:$0xff] %v6123_v55  ;;  %9087 = vst [vmem:[#allocation107_spill] sm:$0xff] %v6132_v53 }
  0x9c   :  { %1146 = vmatpush1.bf16.msra.mxu0 %v6102_v31  ;;  %1187 = vmatpush1.bf16.msra.mxu1 %v6106_v0  ;;  %v180_v31 = vld [vmem:[#allocation2 + $0x330] sm:$0xff]  ;;  %v181_v0 = vld [vmem:[#allocation2 + $0x338] sm:$0xff]  ;;  %9089 = vst [vmem:[#allocation109_spill] sm:$0xff] %v6138_v46  ;;  %9090 = vst [vmem:[#allocation110_spill] sm:$0xff] %v6142_v48 }
  0x9d   :  { %1147 = vmatprep.subr.bf16.mxu0 %v6108_v15  ;;  %1188 = vmatprep.subr.bf16.mxu1 %v6111_v1  ;;  %v177_v15 = vld [vmem:[#allocation2 + $0x318] sm:$0xff]  ;;  %v6135_v1 = vcombine.high %v169_v4, %v173_v2  ;;  %v6144_v49 = vcombine.high %v176_v16, %v180_v31  ;;  %v6150_v59 = vcombine.low %v176_v16, %v180_v31  ;;  %v200_v16 = vld [vmem:[#allocation2 + $0x3d0] sm:$0xff] }
  0x9e   :  { %v6154_v2 = vcombine.low %v177_v15, %v181_v0 }
  0x9f   :  { %9088 = vst [vmem:[#allocation108_spill] sm:$0xff] %v6135_v1  ;;  %9091 = vst [vmem:[#allocation111_spill] sm:$0xff] %v6144_v49 }
  0xa0   :  { %1148 = vmatpush1.bf16.msra.mxu0 %v6114_v58  ;;  %1189 = vmatpush1.bf16.msra.mxu1 %v6118_v33  ;;  %v188_v58 = vld [vmem:[#allocation2 + $0x370] sm:$0xff]  ;;  %v189_v33 = vld [vmem:[#allocation2 + $0x378] sm:$0xff] }
  0xa1   :  { %1149 = vmatprep.subr.bf16.mxu0 %v6120_v56  ;;  %1190 = vmatprep.subr.bf16.mxu1 %v6123_v55  ;;  %v185_v56 = vld [vmem:[#allocation2 + $0x358] sm:$0xff]  ;;  %v6147_v55 = vcombine.high %v177_v15, %v181_v0  ;;  %v6156_v4 = vcombine.high %v184_v47, %v188_v58  ;;  %v6162_v31 = vcombine.low %v184_v47, %v188_v58 }
  0xa2   :  { %v6166_v0 = vcombine.low %v185_v56, %v189_v33 }
  0xa3   :  { %9092 = vst [vmem:[#allocation112_spill] sm:$0xff] %v6147_v55 }
  0xa4   :  { %1150 = vmatpush1.bf16.msra.mxu0 %v6126_v30  ;;  %1191 = vmatpush1.bf16.msra.mxu1 %v6130_v17  ;;  %v196_v30 = vld [vmem:[#allocation2 + $0x3b0] sm:$0xff]  ;;  %v197_v17 = vld [vmem:[#allocation2 + $0x3b8] sm:$0xff] }
  0xa5   :  { %1151 = vmatprep.subr.bf16.mxu0 %v6132_v53  ;;  %1192 = vmatprep.subr.bf16.mxu1 %v6135_v1  ;;  %v193_v53 = vld [vmem:[#allocation2 + $0x398] sm:$0xff]  ;;  %v6159_v1 = vcombine.high %v185_v56, %v189_v33  ;;  %v6168_v15 = vcombine.high %v192_v32, %v196_v30  ;;  %v6174_v58 = vcombine.low %v192_v32, %v196_v30  ;;  %v9103_v32 = vld [vmem:[#allocation45_spill] sm:$0xff] }
  0xa6   :  { %v6178_v47 = vcombine.low %v193_v53, %v197_v17 }
  0xa7   :  { %9093 = vst [vmem:[#allocation113_spill] sm:$0xff] %v6159_v1  ;;  %9094 = vst [vmem:[#allocation114_spill] sm:$0xff] %v6168_v15 }
  0xa8   :  { %1152 = vmatpush1.bf16.msra.mxu0 %v6138_v46  ;;  %1193 = vmatpush1.bf16.msra.mxu1 %v6142_v48  ;;  %v204_v46 = vld [vmem:[#allocation2 + $0x3f0] sm:$0xff]  ;;  %v205_v48 = vld [vmem:[#allocation2 + $0x3f8] sm:$0xff]  ;;  %9095 = vst [vmem:[#allocation115_spill] sm:$0xff] %v6178_v47 }
  0xa9   :  { %1153 = vmatprep.subr.bf16.mxu0 %v6144_v49  ;;  %1194 = vmatprep.subr.bf16.mxu1 %v6147_v55  ;;  %v201_v49 = vld [vmem:[#allocation2 + $0x3d8] sm:$0xff]  ;;  %v6171_v55 = vcombine.high %v193_v53, %v197_v17  ;;  %v6180_v33 = vcombine.high %v200_v16, %v204_v46  ;;  %v6195_v17 = vld [vmem:[%s8444_s0 + $0x8] sm:$0xff] }
  0xaa   :  { %v6183_v56 = vcombine.high %v201_v49, %v205_v48  ;;  %v6190_v30 = vcombine.low %v201_v49, %v205_v48  ;;  %v6204_v53 = vcombine.low %v6195_v17, %v6195_v17  ;;  %v9101_v48 = vld [vmem:[#allocation43_spill] sm:$0xff]  ;;  %v9102_v49 = vld [vmem:[#allocation44_spill] sm:$0xff] }
  0xac   :  { %1154 = vmatpush1.bf16.msra.mxu0 %v6150_v59  ;;  %1195 = vmatpush1.bf16.msra.mxu1 %v6154_v2  ;;  %9097 = vst [vmem:[#allocation117_spill] sm:$0xff] %v6190_v30  ;;  %9098 = vst [vmem:[#allocation118_spill] sm:$0xff] %v6204_v53 }
  0xad   :  { %1155 = vmatprep.subr.bf16.mxu0 %v6156_v4  ;;  %1196 = vmatprep.subr.bf16.mxu1 %v6159_v1  ;;  %v6186_v1 = vcombine.low %v200_v16, %v204_v46  ;;  %v9100_v46 = vld [vmem:[#allocation42_spill] sm:$0xff] }
  0xae   :  { %v9104_v16 = vld [vmem:[#allocation46_spill] sm:$0xff] }
  0xaf   :  { %9096 = vst [vmem:[#allocation116_spill] sm:$0xff] %v6186_v1 }
  0xb0   :  { %1156 = vmatpush1.bf16.msra.mxu0 %v6162_v31  ;;  %1197 = vmatpush1.bf16.msra.mxu1 %v6166_v0 }
  0xb1   :  { %1157 = vmatprep.subr.bf16.mxu0 %v6168_v15  ;;  %1198 = vmatprep.subr.bf16.mxu1 %v6171_v55 }
  0xb4   :  { %1158 = vmatpush1.bf16.msra.mxu0 %v6174_v58  ;;  %1199 = vmatpush1.bf16.msra.mxu1 %v6178_v47 }
  0xb5   :  { %1159 = vmatprep.subr.bf16.mxu0 %v6180_v33  ;;  %1200 = vmatprep.subr.bf16.mxu1 %v6183_v56 }
  0xb8   :  { %1160 = vmatpush1.bf16.msra.mxu0 %v6186_v1  ;;  %1201 = vmatpush1.bf16.msra.mxu1 %v6190_v30 }
  0xb9   :  { %1233 = vmatprep.subr.bf16.mxu0 %v5792_v3  ;;  %1274 = vmatprep.subr.bf16.mxu1 %v5796_v8 }
  0xbb   :  { %1162 = vmatmul.mubr.bf16.vlgmr.msra.gmra.mrb[4].mxu0 %v5999_v13  ;;  %1203 = vmatmul.mubr.bf16.vlgmr.msra.gmra.mrb[4].mxu1 %v5999_v13  ;;  %v9099_v13 = vld [vmem:[#allocation41_spill] sm:$0xff] }
  0xbc   :  { %1234 = vmatpush1.bf16.msra.mxu0 %v5794_v5  ;;  %1275 = vmatpush1.bf16.msra.mxu1 %v5798_v9 }
  0xbd   :  { %1235 = vmatprep.subr.bf16.mxu0 %v5800_v10  ;;  %1276 = vmatprep.subr.bf16.mxu1 %v5803_v14 }
  0xbe   :  { %1265 = vmatprep.mubr.bf16.mxu0 %v6204_v53  ;;  %1306 = vmatprep.mubr.bf16.mxu1 %v6204_v53 }
  0xc0   :  { %1236 = vmatpush1.bf16.msra.mxu0 %v5807_v18  ;;  %1277 = vmatpush1.bf16.msra.mxu1 %v5811_v19 }
  0xc1   :  { %1237 = vmatprep.subr.bf16.mxu0 %v5813_v20  ;;  %1278 = vmatprep.subr.bf16.mxu1 %v5816_v21 }
  0xc4   :  { %1238 = vmatpush1.bf16.msra.mxu0 %v5819_v26  ;;  %1279 = vmatpush1.bf16.msra.mxu1 %v5823_v27 }
  0xc5   :  { %1239 = vmatprep.subr.bf16.mxu0 %v5825_v28  ;;  %1280 = vmatprep.subr.bf16.mxu1 %v5828_v29 }
  0xc8   :  { %1240 = vmatpush1.bf16.msra.mxu0 %v5831_v34  ;;  %1281 = vmatpush1.bf16.msra.mxu1 %v5835_v35 }
  0xc9   :  { %1241 = vmatprep.subr.bf16.mxu0 %v5837_v36  ;;  %1282 = vmatprep.subr.bf16.mxu1 %v5840_v37 }
  0xcc   :  { %1242 = vmatpush1.bf16.msra.mxu0 %v5843_v42  ;;  %1283 = vmatpush1.bf16.msra.mxu1 %v5847_v43 }
  0xcd   :  { %1243 = vmatprep.subr.bf16.mxu0 %v5849_v44  ;;  %1284 = vmatprep.subr.bf16.mxu1 %v5852_v45 }
  0xd0   :  { %1244 = vmatpush1.bf16.msra.mxu0 %v5855_v50  ;;  %1285 = vmatpush1.bf16.msra.mxu1 %v5859_v51 }
  0xd1   :  { %1245 = vmatprep.subr.bf16.mxu0 %v5861_v52  ;;  %1286 = vmatprep.subr.bf16.mxu1 %v5869_v54 }
  0xd4   :  { %1246 = vmatpush1.bf16.msra.mxu0 %v5876_v60  ;;  %1287 = vmatpush1.bf16.msra.mxu1 %v5881_v61 }
  0xd5   :  { %1247 = vmatprep.subr.bf16.mxu0 %v5883_v62  ;;  %1288 = vmatprep.subr.bf16.mxu1 %v5886_v63 }
  0xd8   :  { %1248 = vmatpush1.bf16.msra.mxu0 %v5890_v6  ;;  %1289 = vmatpush1.bf16.msra.mxu1 %v5894_v7 }
  0xd9   :  { %1249 = vmatprep.subr.bf16.mxu0 %v5896_v11  ;;  %1290 = vmatprep.subr.bf16.mxu1 %v5899_v12 }
  0xdc   :  { %1250 = vmatpush1.bf16.msra.mxu0 %v5902_v22  ;;  %1291 = vmatpush1.bf16.msra.mxu1 %v5906_v23 }
  0xdd   :  { %1251 = vmatprep.subr.bf16.mxu0 %v5908_v24  ;;  %1292 = vmatprep.subr.bf16.mxu1 %v5911_v25  ;;  %v9105_v25 = vld [vmem:[#allocation47_spill] sm:$0xff] }
  0xe0   :  { %1252 = vmatpush1.bf16.msra.mxu0 %v5914_v38  ;;  %1293 = vmatpush1.bf16.msra.mxu1 %v5918_v39  ;;  %v9106_v38 = vld [vmem:[#allocation48_spill] sm:$0xff]  ;;  %v9107_v39 = vld [vmem:[#allocation49_spill] sm:$0xff] }
  0xe1   :  { %1253 = vmatprep.subr.bf16.mxu0 %v5920_v40  ;;  %1294 = vmatprep.subr.bf16.mxu1 %v5923_v41  ;;  %v9108_v40 = vld [vmem:[#allocation50_spill] sm:$0xff]  ;;  %v9109_v41 = vld [vmem:[#allocation51_spill] sm:$0xff] }
  0xe4   :  { %1254 = vmatpush1.bf16.msra.mxu0 %v9099_v13  ;;  %1295 = vmatpush1.bf16.msra.mxu1 %v9100_v46  ;;  %v9110_v13 = vld [vmem:[#allocation52_spill] sm:$0xff]  ;;  %v9111_v46 = vld [vmem:[#allocation53_spill] sm:$0xff] }
  0xe5   :  { %1255 = vmatprep.subr.bf16.mxu0 %v9101_v48  ;;  %1296 = vmatprep.subr.bf16.mxu1 %v9102_v49  ;;  %v9112_v48 = vld [vmem:[#allocation54_spill] sm:$0xff]  ;;  %v9113_v49 = vld [vmem:[#allocation55_spill] sm:$0xff] }
  0xe8   :  { %1256 = vmatpush1.bf16.msra.mxu0 %v9103_v32  ;;  %1297 = vmatpush1.bf16.msra.mxu1 %v9104_v16  ;;  %v9114_v32 = vld [vmem:[#allocation56_spill] sm:$0xff]  ;;  %v9115_v16 = vld [vmem:[#allocation57_spill] sm:$0xff] }
  0xe9   :  { %1257 = vmatprep.subr.bf16.mxu0 %v9105_v25  ;;  %1298 = vmatprep.subr.bf16.mxu1 %v9106_v38  ;;  %v9116_v25 = vld [vmem:[#allocation58_spill] sm:$0xff]  ;;  %v9117_v38 = vld [vmem:[#allocation59_spill] sm:$0xff] }
  0xec   :  { %1258 = vmatpush1.bf16.msra.mxu0 %v9107_v39  ;;  %1299 = vmatpush1.bf16.msra.mxu1 %v9108_v40  ;;  %v9118_v39 = vld [vmem:[#allocation60_spill] sm:$0xff]  ;;  %v9119_v40 = vld [vmem:[#allocation61_spill] sm:$0xff] }
  0xed   :  { %1259 = vmatprep.subr.bf16.mxu0 %v9109_v41  ;;  %1300 = vmatprep.subr.bf16.mxu1 %v9110_v13  ;;  %v9120_v41 = vld [vmem:[#allocation62_spill] sm:$0xff]  ;;  %v9121_v13 = vld [vmem:[#allocation63_spill] sm:$0xff] }
  0xf0   :  { %1260 = vmatpush1.bf16.msra.mxu0 %v9111_v46  ;;  %1301 = vmatpush1.bf16.msra.mxu1 %v9112_v48  ;;  %v9122_v46 = vld [vmem:[#allocation64_spill] sm:$0xff] }
  0xf1   :  { %1261 = vmatprep.subr.bf16.mxu0 %v9113_v49  ;;  %1302 = vmatprep.subr.bf16.mxu1 %v9114_v32  ;;  %v9123_v32 = vld [vmem:[#allocation65_spill] sm:$0xff]  ;;  %v9136_v49 = vld [vmem:[#allocation78_spill] sm:$0xff] }
  0xf4   :  { %1262 = vmatpush1.bf16.msra.mxu0 %v9115_v16  ;;  %1303 = vmatpush1.bf16.msra.mxu1 %v9116_v25  ;;  %v9124_v16 = vld [vmem:[#allocation66_spill] sm:$0xff]  ;;  %v9125_v25 = vld [vmem:[#allocation67_spill] sm:$0xff] }
  0xf5   :  { %1263 = vmatprep.subr.bf16.mxu0 %v9117_v38  ;;  %1304 = vmatprep.subr.bf16.mxu1 %v9118_v39  ;;  %v9126_v38 = vld [vmem:[#allocation68_spill] sm:$0xff]  ;;  %v9131_v39 = vld [vmem:[#allocation73_spill] sm:$0xff] }
  0xf8   :  { %1264 = vmatpush1.bf16.msra.mxu0 %v9119_v40  ;;  %1305 = vmatpush1.bf16.msra.mxu1 %v9120_v41  ;;  %v9127_v41 = vld [vmem:[#allocation69_spill] sm:$0xff]  ;;  %v9130_v40 = vld [vmem:[#allocation72_spill] sm:$0xff] }
  0xf9   :  { %1315 = vmatprep.subr.bf16.mxu0 %v9121_v13  ;;  %1356 = vmatprep.subr.bf16.mxu1 %v9122_v46  ;;  %v9128_v13 = vld [vmem:[#allocation70_spill] sm:$0xff]  ;;  %v9129_v46 = vld [vmem:[#allocation71_spill] sm:$0xff] }
  0xfb   :  { %1266 = vmatmul.mubr.bf16.vlgmr.msra.gmra.mrb[8].mxu0 %v5873_v57  ;;  %1307 = vmatmul.mubr.bf16.vlgmr.msra.gmra.mrb[8].mxu1 %v5873_v57 }
  0xfc   :  { %1316 = vmatpush1.bf16.msra.mxu0 %v9123_v32  ;;  %1357 = vmatpush1.bf16.msra.mxu1 %v9124_v16  ;;  %v9132_v32 = vld [vmem:[#allocation74_spill] sm:$0xff]  ;;  %v9133_v16 = vld [vmem:[#allocation75_spill] sm:$0xff] }
  0xfd   :  { %1317 = vmatprep.subr.bf16.mxu0 %v9125_v25  ;;  %1358 = vmatprep.subr.bf16.mxu1 %v9126_v38  ;;  %v9134_v25 = vld [vmem:[#allocation76_spill] sm:$0xff]  ;;  %v9135_v38 = vld [vmem:[#allocation77_spill] sm:$0xff] }
  0xfe   :  { %1347 = vmatprep.mubr.bf16.mxu0 %v6204_v53  ;;  %1388 = vmatprep.mubr.bf16.mxu1 %v6204_v53  ;;  %v9137_v53 = vld [vmem:[#allocation79_spill] sm:$0xff] }
 0x100   :  { %1318 = vmatpush1.bf16.msra.mxu0 %v9127_v41  ;;  %1359 = vmatpush1.bf16.msra.mxu1 %v9128_v13  ;;  %v9138_v41 = vld [vmem:[#allocation80_spill] sm:$0xff]  ;;  %v9139_v13 = vld [vmem:[#allocation81_spill] sm:$0xff] }
 0x101   :  { %1319 = vmatprep.subr.bf16.mxu0 %v9129_v46  ;;  %1360 = vmatprep.subr.bf16.mxu1 %v9130_v40  ;;  %v9140_v46 = vld [vmem:[#allocation82_spill] sm:$0xff]  ;;  %v9141_v40 = vld [vmem:[#allocation83_spill] sm:$0xff] }
 0x104   :  { %1320 = vmatpush1.bf16.msra.mxu0 %v9131_v39  ;;  %1361 = vmatpush1.bf16.msra.mxu1 %v9132_v32  ;;  %v9142_v39 = vld [vmem:[#allocation84_spill] sm:$0xff]  ;;  %v9143_v32 = vld [vmem:[#allocation85_spill] sm:$0xff] }
 0x105   :  { %1321 = vmatprep.subr.bf16.mxu0 %v9133_v16  ;;  %1362 = vmatprep.subr.bf16.mxu1 %v9134_v25  ;;  %v9144_v16 = vld [vmem:[#allocation86_spill] sm:$0xff]  ;;  %v9145_v25 = vld [vmem:[#allocation87_spill] sm:$0xff] }
 0x108   :  { %1322 = vmatpush1.bf16.msra.mxu0 %v9135_v38  ;;  %1363 = vmatpush1.bf16.msra.mxu1 %v9136_v49  ;;  %v9146_v38 = vld [vmem:[#allocation88_spill] sm:$0xff]  ;;  %v9147_v49 = vld [vmem:[#allocation89_spill] sm:$0xff] }
 0x109   :  { %1323 = vmatprep.subr.bf16.mxu0 %v9137_v53  ;;  %1364 = vmatprep.subr.bf16.mxu1 %v9138_v41  ;;  %v9148_v53 = vld [vmem:[#allocation90_spill] sm:$0xff]  ;;  %v9149_v41 = vld [vmem:[#allocation91_spill] sm:$0xff] }
 0x10c   :  { %1324 = vmatpush1.bf16.msra.mxu0 %v9139_v13  ;;  %1365 = vmatpush1.bf16.msra.mxu1 %v9140_v46  ;;  %v9150_v13 = vld [vmem:[#allocation92_spill] sm:$0xff]  ;;  %v9151_v46 = vld [vmem:[#allocation93_spill] sm:$0xff] }
 0x10d   :  { %1325 = vmatprep.subr.bf16.mxu0 %v9141_v40  ;;  %1366 = vmatprep.subr.bf16.mxu1 %v9142_v39  ;;  %v9152_v40 = vld [vmem:[#allocation94_spill] sm:$0xff]  ;;  %v9153_v39 = vld [vmem:[#allocation95_spill] sm:$0xff] }
 0x110   :  { %1326 = vmatpush1.bf16.msra.mxu0 %v9143_v32  ;;  %1367 = vmatpush1.bf16.msra.mxu1 %v9144_v16  ;;  %v9154_v32 = vld [vmem:[#allocation96_spill] sm:$0xff]  ;;  %v9155_v16 = vld [vmem:[#allocation97_spill] sm:$0xff] }
 0x111   :  { %1327 = vmatprep.subr.bf16.mxu0 %v9145_v25  ;;  %1368 = vmatprep.subr.bf16.mxu1 %v9146_v38  ;;  %v9156_v25 = vld [vmem:[#allocation98_spill] sm:$0xff]  ;;  %v9157_v38 = vld [vmem:[#allocation99_spill] sm:$0xff] }
 0x114   :  { %1328 = vmatpush1.bf16.msra.mxu0 %v9147_v49  ;;  %1369 = vmatpush1.bf16.msra.mxu1 %v9148_v53  ;;  %v9158_v49 = vld [vmem:[#allocation100_spill] sm:$0xff]  ;;  %v9159_v53 = vld [vmem:[#allocation101_spill] sm:$0xff] }
 0x115   :  { %1329 = vmatprep.subr.bf16.mxu0 %v9149_v41  ;;  %1370 = vmatprep.subr.bf16.mxu1 %v9150_v13  ;;  %v9160_v41 = vld [vmem:[#allocation102_spill] sm:$0xff]  ;;  %v9161_v13 = vld [vmem:[#allocation103_spill] sm:$0xff] }
 0x118   :  { %1330 = vmatpush1.bf16.msra.mxu0 %v9151_v46  ;;  %1371 = vmatpush1.bf16.msra.mxu1 %v9152_v40  ;;  %v9162_v46 = vld [vmem:[#allocation104_spill] sm:$0xff]  ;;  %v9163_v40 = vld [vmem:[#allocation105_spill] sm:$0xff] }
 0x119   :  { %1331 = vmatprep.subr.bf16.mxu0 %v9153_v39  ;;  %1372 = vmatprep.subr.bf16.mxu1 %v9154_v32  ;;  %v9164_v39 = vld [vmem:[#allocation106_spill] sm:$0xff]  ;;  %v9165_v32 = vld [vmem:[#allocation107_spill] sm:$0xff] }
 0x11c   :  { %1332 = vmatpush1.bf16.msra.mxu0 %v9155_v16  ;;  %1373 = vmatpush1.bf16.msra.mxu1 %v9156_v25  ;;  %v9166_v16 = vld [vmem:[#allocation108_spill] sm:$0xff]  ;;  %v9167_v25 = vld [vmem:[#allocation109_spill] sm:$0xff] }
 0x11d   :  { %1333 = vmatprep.subr.bf16.mxu0 %v9157_v38  ;;  %1374 = vmatprep.subr.bf16.mxu1 %v9158_v49  ;;  %v9168_v38 = vld [vmem:[#allocation110_spill] sm:$0xff]  ;;  %v9169_v49 = vld [vmem:[#allocation111_spill] sm:$0xff] }
 0x120   :  { %1334 = vmatpush1.bf16.msra.mxu0 %v9159_v53  ;;  %1375 = vmatpush1.bf16.msra.mxu1 %v9160_v41  ;;  %v9170_v53 = vld [vmem:[#allocation112_spill] sm:$0xff] }
 0x121   :  { %1335 = vmatprep.subr.bf16.mxu0 %v9161_v13  ;;  %1376 = vmatprep.subr.bf16.mxu1 %v9162_v46 }
 0x124   :  { %1336 = vmatpush1.bf16.msra.mxu0 %v9163_v40  ;;  %1377 = vmatpush1.bf16.msra.mxu1 %v9164_v39  ;;  %v9171_v40 = vld [vmem:[#allocation113_spill] sm:$0xff] }
 0x125   :  { %1337 = vmatprep.subr.bf16.mxu0 %v9165_v32  ;;  %1378 = vmatprep.subr.bf16.mxu1 %v9166_v16 }
 0x128   :  { %1338 = vmatpush1.bf16.msra.mxu0 %v9167_v25  ;;  %1379 = vmatpush1.bf16.msra.mxu1 %v9168_v38 }
 0x129   :  { %1339 = vmatprep.subr.bf16.mxu0 %v9169_v49  ;;  %1380 = vmatprep.subr.bf16.mxu1 %v9170_v53 }
 0x12c   :  { %1340 = vmatpush1.bf16.msra.mxu0 %v6150_v59  ;;  %1381 = vmatpush1.bf16.msra.mxu1 %v6154_v2 }
 0x12d   :  { %1341 = vmatprep.subr.bf16.mxu0 %v6156_v4  ;;  %1382 = vmatprep.subr.bf16.mxu1 %v9171_v40 }
 0x130   :  { %1342 = vmatpush1.bf16.msra.mxu0 %v6162_v31  ;;  %1383 = vmatpush1.bf16.msra.mxu1 %v6166_v0 }
 0x131   :  { %1343 = vmatprep.subr.bf16.mxu0 %v6168_v15  ;;  %1384 = vmatprep.subr.bf16.mxu1 %v6171_v55  ;;  %v6344_v15 = vcombine.high %v6195_v17, %v6195_v17 }
 0x133   :  { %9172 = vst [vmem:[#allocation102_spill] sm:$0xff] %v6344_v15 }
 0x134   :  { %1344 = vmatpush1.bf16.msra.mxu0 %v6174_v58  ;;  %1385 = vmatpush1.bf16.msra.mxu1 %v6178_v47 }
 0x135   :  { %1345 = vmatprep.subr.bf16.mxu0 %v6180_v33  ;;  %1386 = vmatprep.subr.bf16.mxu1 %v6183_v56 }
 0x138   :  { %1346 = vmatpush1.bf16.msra.mxu0 %v6186_v1  ;;  %1387 = vmatpush1.bf16.msra.mxu1 %v6190_v30 }
 0x139   :  { %1412 = vmatprep.subr.bf16.mxu0 %v5792_v3  ;;  %1453 = vmatprep.subr.bf16.mxu1 %v5796_v8 }
 0x13b   :  { %1348 = vmatmul.mubr.bf16.vlgmr.msra.gmra.mrb[12].mxu0 %v5873_v57  ;;  %1389 = vmatmul.mubr.bf16.vlgmr.msra.gmra.mrb[12].mxu1 %v5873_v57 }
 0x13c   :  { %1413 = vmatpush1.bf16.msra.mxu0 %v5794_v5  ;;  %1454 = vmatpush1.bf16.msra.mxu1 %v5798_v9 }
 0x13d   :  { %1414 = vmatprep.subr.bf16.mxu0 %v5800_v10  ;;  %1455 = vmatprep.subr.bf16.mxu1 %v5803_v14 }
 0x13e   :  { %1444 = vmatprep.mubr.bf16.mxu0 %v6344_v15  ;;  %1485 = vmatprep.mubr.bf16.mxu1 %v6344_v15 }
 0x140   :  { %1415 = vmatpush1.bf16.msra.mxu0 %v5807_v18  ;;  %1456 = vmatpush1.bf16.msra.mxu1 %v5811_v19 }
 0x141   :  { %1416 = vmatprep.subr.bf16.mxu0 %v5813_v20  ;;  %1457 = vmatprep.subr.bf16.mxu1 %v5816_v21 }
 0x144   :  { %1417 = vmatpush1.bf16.msra.mxu0 %v5819_v26  ;;  %1458 = vmatpush1.bf16.msra.mxu1 %v5823_v27 }
 0x145   :  { %1418 = vmatprep.subr.bf16.mxu0 %v5825_v28  ;;  %1459 = vmatprep.subr.bf16.mxu1 %v5828_v29 }
 0x148   :  { %1419 = vmatpush1.bf16.msra.mxu0 %v5831_v34  ;;  %1460 = vmatpush1.bf16.msra.mxu1 %v5835_v35 }
 0x149   :  { %1420 = vmatprep.subr.bf16.mxu0 %v5837_v36  ;;  %1461 = vmatprep.subr.bf16.mxu1 %v5840_v37 }
 0x14c   :  { %1421 = vmatpush1.bf16.msra.mxu0 %v5843_v42  ;;  %1462 = vmatpush1.bf16.msra.mxu1 %v5847_v43 }
 0x14d   :  { %1422 = vmatprep.subr.bf16.mxu0 %v5849_v44  ;;  %1463 = vmatprep.subr.bf16.mxu1 %v5852_v45 }
 0x14e   :  { %v1081_v57 = vpop.f32.mrb[0].mxu0  ;;  %v1122_v17 = vpop.f32.mrb[0].mxu1 }
 0x14f   :  { %v1083_v28 = vpop.f32.mrb[1].mxu0  ;;  %v1124_v27 = vpop.f32.mrb[1].mxu1 }
 0x150   :  { %v1211_v29 = vmax.f32 %v1081_v57, %v1083_v28  ;;  %v1085_v34 = vpop.f32.mrb[2].mxu0  ;;  %1423 = vmatpush1.bf16.msra.mxu0 %v5855_v50  ;;  %v1212_v35 = vmax.f32 %v1122_v17, %v1124_v27  ;;  %v1126_v36 = vpop.f32.mrb[2].mxu1  ;;  %1464 = vmatpush1.bf16.msra.mxu1 %v5859_v51  ;;  %v9174_v27 = vld [vmem:[#allocation36_spill] sm:$0xff]  ;;  %v9175_v28 = vld [vmem:[#allocation37_spill] sm:$0xff] }
 0x151   :  { %v1086_v37 = vpop.f32.mrb[3].mxu0  ;;  %1424 = vmatprep.subr.bf16.mxu0 %v5861_v52  ;;  %v1127_v43 = vpop.f32.mrb[3].mxu1  ;;  %1465 = vmatprep.subr.bf16.mxu1 %v5869_v54  ;;  %v9177_v34 = vld [vmem:[#allocation39_spill] sm:$0xff]  ;;  %v9179_v36 = vld [vmem:[#allocation41_spill] sm:$0xff]  ;;  %v9182_v57 = vld [vmem:[#allocation44_spill] sm:$0xff] }
 0x152   :  { %v6374_v44 = vmax.f32 %v1211_v29, %v1212_v35  ;;  %v9176_v29 = vld [vmem:[#allocation38_spill] sm:$0xff]  ;;  %v9178_v35 = vld [vmem:[#allocation40_spill] sm:$0xff]  ;;  %v9181_v43 = vld [vmem:[#allocation43_spill] sm:$0xff] }
 0x153   :  { %v9180_v37 = vld [vmem:[#allocation42_spill] sm:$0xff]  ;;  %v9183_v17 = vld [vmem:[#allocation45_spill] sm:$0xff] }
 0x154   :  { %9173 = vst [vmem:[#allocation103_spill] sm:$0xff] %v6374_v44  ;;  %1425 = vmatpush1.bf16.msra.mxu0 %v5876_v60  ;;  %1466 = vmatpush1.bf16.msra.mxu1 %v5881_v61  ;;  %v9184_v44 = vld [vmem:[#allocation46_spill] sm:$0xff] }
 0x155   :  { %1426 = vmatprep.subr.bf16.mxu0 %v5883_v62  ;;  %1467 = vmatprep.subr.bf16.mxu1 %v5886_v63 }
 0x158   :  { %1427 = vmatpush1.bf16.msra.mxu0 %v5890_v6  ;;  %1468 = vmatpush1.bf16.msra.mxu1 %v5894_v7 }
 0x159   :  { %1428 = vmatprep.subr.bf16.mxu0 %v5896_v11  ;;  %1469 = vmatprep.subr.bf16.mxu1 %v5899_v12  ;;  %v9226_v12 = vld [vmem:[#allocation88_spill] sm:$0xff]  ;;  %v9229_v11 = vld [vmem:[#allocation90_spill] sm:$0xff] }
 0x15c   :  { %1429 = vmatpush1.bf16.msra.mxu0 %v5902_v22  ;;  %1470 = vmatpush1.bf16.msra.mxu1 %v5906_v23  ;;  %v9223_v23 = vld [vmem:[#allocation85_spill] sm:$0xff]  ;;  %v9224_v22 = vld [vmem:[#allocation86_spill] sm:$0xff] }
 0x15d   :  { %1430 = vmatprep.subr.bf16.mxu0 %v5908_v24  ;;  %1471 = vmatprep.subr.bf16.mxu1 %v9174_v27  ;;  %v9185_v27 = vld [vmem:[#allocation47_spill] sm:$0xff] }
 0x160   :  { %1431 = vmatpush1.bf16.msra.mxu0 %v9175_v28  ;;  %1472 = vmatpush1.bf16.msra.mxu1 %v9176_v29  ;;  %v9186_v28 = vld [vmem:[#allocation48_spill] sm:$0xff]  ;;  %v9187_v29 = vld [vmem:[#allocation49_spill] sm:$0xff] }
 0x161   :  { %1432 = vmatprep.subr.bf16.mxu0 %v9177_v34  ;;  %1473 = vmatprep.subr.bf16.mxu1 %v9178_v35  ;;  %v9188_v34 = vld [vmem:[#allocation50_spill] sm:$0xff]  ;;  %v9189_v35 = vld [vmem:[#allocation51_spill] sm:$0xff] }
 0x164   :  { %1433 = vmatpush1.bf16.msra.mxu0 %v9179_v36  ;;  %1474 = vmatpush1.bf16.msra.mxu1 %v9180_v37  ;;  %v9190_v36 = vld [vmem:[#allocation52_spill] sm:$0xff]  ;;  %v9191_v37 = vld [vmem:[#allocation53_spill] sm:$0xff] }
 0x165   :  { %1434 = vmatprep.subr.bf16.mxu0 %v9181_v43  ;;  %1475 = vmatprep.subr.bf16.mxu1 %v9182_v57  ;;  %v9192_v57 = vld [vmem:[#allocation55_spill] sm:$0xff] }
 0x168   :  { %1435 = vmatpush1.bf16.msra.mxu0 %v9183_v17  ;;  %1476 = vmatpush1.bf16.msra.mxu1 %v9184_v44  ;;  %v9193_v17 = vld [vmem:[#allocation56_spill] sm:$0xff]  ;;  %v9194_v44 = vld [vmem:[#allocation57_spill] sm:$0xff] }
 0x169   :  { %1436 = vmatprep.subr.bf16.mxu0 %v9185_v27  ;;  %1477 = vmatprep.subr.bf16.mxu1 %v9186_v28  ;;  %v9195_v27 = vld [vmem:[#allocation58_spill] sm:$0xff]  ;;  %v9196_v28 = vld [vmem:[#allocation59_spill] sm:$0xff] }
 0x16c   :  { %1437 = vmatpush1.bf16.msra.mxu0 %v9187_v29  ;;  %1478 = vmatpush1.bf16.msra.mxu1 %v9188_v34  ;;  %v9197_v29 = vld [vmem:[#allocation60_spill] sm:$0xff]  ;;  %v9198_v34 = vld [vmem:[#allocation61_spill] sm:$0xff] }
 0x16d   :  { %1438 = vmatprep.subr.bf16.mxu0 %v9189_v35  ;;  %1479 = vmatprep.subr.bf16.mxu1 %v9190_v36  ;;  %v9199_v35 = vld [vmem:[#allocation62_spill] sm:$0xff]  ;;  %v9200_v36 = vld [vmem:[#allocation63_spill] sm:$0xff] }
 0x170   :  { %1439 = vmatpush1.bf16.msra.mxu0 %v9191_v37  ;;  %1480 = vmatpush1.bf16.msra.mxu1 %v9112_v48  ;;  %v9201_v37 = vld [vmem:[#allocation64_spill] sm:$0xff]  ;;  %v9202_v48 = vld [vmem:[#allocation118_spill] sm:$0xff] }
 0x171   :  { %1440 = vmatprep.subr.bf16.mxu0 %v9192_v57  ;;  %1481 = vmatprep.subr.bf16.mxu1 %v9193_v17  ;;  %v9203_v17 = vld [vmem:[#allocation65_spill] sm:$0xff]  ;;  %v9216_v57 = vld [vmem:[#allocation78_spill] sm:$0xff] }
 0x174   :  { %1441 = vmatpush1.bf16.msra.mxu0 %v9194_v44  ;;  %1482 = vmatpush1.bf16.msra.mxu1 %v9195_v27  ;;  %v9204_v44 = vld [vmem:[#allocation66_spill] sm:$0xff]  ;;  %v9205_v27 = vld [vmem:[#allocation67_spill] sm:$0xff] }
 0x175   :  { %1442 = vmatprep.subr.bf16.mxu0 %v9196_v28  ;;  %1483 = vmatprep.subr.bf16.mxu1 %v9197_v29  ;;  %v9206_v28 = vld [vmem:[#allocation68_spill] sm:$0xff]  ;;  %v9211_v29 = vld [vmem:[#allocation73_spill] sm:$0xff] }
 0x178   :  { %1443 = vmatpush1.bf16.msra.mxu0 %v9198_v34  ;;  %1484 = vmatpush1.bf16.msra.mxu1 %v9199_v35  ;;  %v9207_v35 = vld [vmem:[#allocation69_spill] sm:$0xff]  ;;  %v9210_v34 = vld [vmem:[#allocation72_spill] sm:$0xff] }
 0x179   :  { %1494 = vmatprep.subr.bf16.mxu0 %v9200_v36  ;;  %1535 = vmatprep.subr.bf16.mxu1 %v9201_v37  ;;  %v9208_v36 = vld [vmem:[#allocation70_spill] sm:$0xff]  ;;  %v9209_v37 = vld [vmem:[#allocation71_spill] sm:$0xff] }
 0x17b   :  { %1445 = vmatmul.mubr.bf16.vlgmr.msra.gmra.mrb[16].mxu0 %v9202_v48  ;;  %1486 = vmatmul.mubr.bf16.vlgmr.msra.gmra.mrb[16].mxu1 %v9202_v48 }
 0x17c   :  { %1495 = vmatpush1.bf16.msra.mxu0 %v9203_v17  ;;  %1536 = vmatpush1.bf16.msra.mxu1 %v9204_v44  ;;  %v9212_v17 = vld [vmem:[#allocation74_spill] sm:$0xff]  ;;  %v9213_v44 = vld [vmem:[#allocation75_spill] sm:$0xff] }
 0x17d   :  { %1496 = vmatprep.subr.bf16.mxu0 %v9205_v27  ;;  %1537 = vmatprep.subr.bf16.mxu1 %v9206_v28  ;;  %v9214_v27 = vld [vmem:[#allocation76_spill] sm:$0xff]  ;;  %v9215_v28 = vld [vmem:[#allocation77_spill] sm:$0xff] }
 0x17e   :  { %1526 = vmatprep.mubr.bf16.mxu0 %v6344_v15  ;;  %1567 = vmatprep.mubr.bf16.mxu1 %v6344_v15  ;;  %v9217_v15 = vld [vmem:[#allocation79_spill] sm:$0xff] }
 0x180   :  { %1497 = vmatpush1.bf16.msra.mxu0 %v9207_v35  ;;  %1538 = vmatpush1.bf16.msra.mxu1 %v9208_v36  ;;  %v9218_v35 = vld [vmem:[#allocation80_spill] sm:$0xff]  ;;  %v9219_v36 = vld [vmem:[#allocation81_spill] sm:$0xff] }
 0x181   :  { %1498 = vmatprep.subr.bf16.mxu0 %v9209_v37  ;;  %1539 = vmatprep.subr.bf16.mxu1 %v9210_v34  ;;  %v9220_v37 = vld [vmem:[#allocation82_spill] sm:$0xff]  ;;  %v9221_v34 = vld [vmem:[#allocation83_spill] sm:$0xff] }
 0x184   :  { %1499 = vmatpush1.bf16.msra.mxu0 %v9211_v29  ;;  %1540 = vmatpush1.bf16.msra.mxu1 %v9212_v17  ;;  %v9222_v17 = vld [vmem:[#allocation84_spill] sm:$0xff] }
 0x185   :  { %1500 = vmatprep.subr.bf16.mxu0 %v9213_v44  ;;  %1541 = vmatprep.subr.bf16.mxu1 %v9214_v27 }
 0x188   :  { %1501 = vmatpush1.bf16.msra.mxu0 %v9215_v28  ;;  %1542 = vmatpush1.bf16.msra.mxu1 %v9216_v57 }
 0x189   :  { %1502 = vmatprep.subr.bf16.mxu0 %v9217_v15  ;;  %1543 = vmatprep.subr.bf16.mxu1 %v9218_v35 }
 0x18c   :  { %1503 = vmatpush1.bf16.msra.mxu0 %v9219_v36  ;;  %1544 = vmatpush1.bf16.msra.mxu1 %v9220_v37  ;;  %v9225_v36 = vld [vmem:[#allocation87_spill] sm:$0xff] }
 0x18d   :  { %1504 = vmatprep.subr.bf16.mxu0 %v9221_v34  ;;  %1545 = vmatprep.subr.bf16.mxu1 %v9222_v17  ;;  %v9228_v17 = vld [vmem:[#allocation89_spill] sm:$0xff] }
 0x18e   :  { %v1163_v29 = vpop.f32.mrb[4].mxu0  ;;  %v1204_v44 = vpop.f32.mrb[4].mxu1 }
 0x18f   :  { %v1165_v43 = vpop.f32.mrb[5].mxu0  ;;  %v1206_v24 = vpop.f32.mrb[5].mxu1 }
 0x190   :  { %v1223_v27 = vmax.f32 %v1163_v29, %v1165_v43  ;;  %v1167_v28 = vpop.f32.mrb[6].mxu0  ;;  %1505 = vmatpush1.bf16.msra.mxu0 %v9223_v23  ;;  %v1224_v57 = vmax.f32 %v1204_v44, %v1206_v24  ;;  %v1208_v15 = vpop.f32.mrb[6].mxu1  ;;  %1546 = vmatpush1.bf16.msra.mxu1 %v9224_v22  ;;  %v9230_v29 = vld [vmem:[#allocation91_spill] sm:$0xff]  ;;  %v9232_v44 = vld [vmem:[#allocation93_spill] sm:$0xff]  ;;  %v9233_v24 = vld [vmem:[#allocation94_spill] sm:$0xff] }
 0x191   :  { %v1168_v35 = vpop.f32.mrb[7].mxu0  ;;  %1506 = vmatprep.subr.bf16.mxu0 %v9225_v36  ;;  %v1209_v37 = vpop.f32.mrb[7].mxu1  ;;  %1547 = vmatprep.subr.bf16.mxu1 %v9226_v12  ;;  %v9231_v28 = vld [vmem:[#allocation92_spill] sm:$0xff]  ;;  %v9234_v15 = vld [vmem:[#allocation95_spill] sm:$0xff] }
 0x192   :  { %v6444_v34 = vmax.f32 %v1223_v27, %v1224_v57  ;;  %v9235_v35 = vld [vmem:[#allocation96_spill] sm:$0xff]  ;;  %v9236_v37 = vld [vmem:[#allocation97_spill] sm:$0xff]  ;;  %v9237_v27 = vld [vmem:[#allocation98_spill] sm:$0xff] }
 0x193   :  { %v9238_v43 = vld [vmem:[#allocation99_spill] sm:$0xff]  ;;  %v9239_v57 = vld [vmem:[#allocation100_spill] sm:$0xff] }
 0x194   :  { %9227 = vst [vmem:[#allocation104_spill] sm:$0xff] %v6444_v34  ;;  %1507 = vmatpush1.bf16.msra.mxu0 %v9228_v17  ;;  %1548 = vmatpush1.bf16.msra.mxu1 %v9229_v11  ;;  %v9240_v34 = vld [vmem:[#allocation101_spill] sm:$0xff] }
 0x195   :  { %1508 = vmatprep.subr.bf16.mxu0 %v9230_v29  ;;  %1549 = vmatprep.subr.bf16.mxu1 %v9231_v28 }
 0x198   :  { %1509 = vmatpush1.bf16.msra.mxu0 %v9232_v44  ;;  %1550 = vmatpush1.bf16.msra.mxu1 %v9233_v24  ;;  %v9241_v24 = vld [vmem:[#allocation105_spill] sm:$0xff] }
 0x199   :  { %1510 = vmatprep.subr.bf16.mxu0 %v9234_v15  ;;  %1551 = vmatprep.subr.bf16.mxu1 %v9235_v35 }
 0x19c   :  { %1511 = vmatpush1.bf16.msra.mxu0 %v9236_v37  ;;  %1552 = vmatpush1.bf16.msra.mxu1 %v9237_v27 }
 0x19d   :  { %1512 = vmatprep.subr.bf16.mxu0 %v9238_v43  ;;  %1553 = vmatprep.subr.bf16.mxu1 %v9239_v57 }
 0x1a0   :  { %1513 = vmatpush1.bf16.msra.mxu0 %v9240_v34  ;;  %1554 = vmatpush1.bf16.msra.mxu1 %v9160_v41 }
 0x1a1   :  { %1514 = vmatprep.subr.bf16.mxu0 %v9161_v13  ;;  %1555 = vmatprep.subr.bf16.mxu1 %v9162_v46 }
 0x1a4   :  { %1515 = vmatpush1.bf16.msra.mxu0 %v9241_v24  ;;  %1556 = vmatpush1.bf16.msra.mxu1 %v9164_v39 }
 0x1a5   :  { %1516 = vmatprep.subr.bf16.mxu0 %v9165_v32  ;;  %1557 = vmatprep.subr.bf16.mxu1 %v9166_v16  ;;  %v9242_v16 = vld [vmem:[#allocation114_spill] sm:$0xff] }
 0x1a8   :  { %1517 = vmatpush1.bf16.msra.mxu0 %v9167_v25  ;;  %1558 = vmatpush1.bf16.msra.mxu1 %v9168_v38 }
 0x1a9   :  { %1518 = vmatprep.subr.bf16.mxu0 %v9169_v49  ;;  %1559 = vmatprep.subr.bf16.mxu1 %v9170_v53 }
 0x1ac   :  { %1519 = vmatpush1.bf16.msra.mxu0 %v6150_v59  ;;  %1560 = vmatpush1.bf16.msra.mxu1 %v6154_v2 }
 0x1ad   :  { %1520 = vmatprep.subr.bf16.mxu0 %v6156_v4  ;;  %1561 = vmatprep.subr.bf16.mxu1 %v9171_v40  ;;  %v6485_v40 = vld [vmem:[%s8444_s0 + $0x10] sm:$0xff] }
 0x1ae   :  { %9243 = vst [vmem:[#allocation106_spill] sm:$0xff] %v6485_v40 }
 0x1b0   :  { %1521 = vmatpush1.bf16.msra.mxu0 %v6162_v31  ;;  %1562 = vmatpush1.bf16.msra.mxu1 %v6166_v0 }
 0x1b1   :  { %1522 = vmatprep.subr.bf16.mxu0 %v9242_v16  ;;  %1563 = vmatprep.subr.bf16.mxu1 %v6171_v55 }
 0x1b4   :  { %1523 = vmatpush1.bf16.msra.mxu0 %v6174_v58  ;;  %1564 = vmatpush1.bf16.msra.mxu1 %v6178_v47  ;;  %v6493_v47 = vcombine.low %v6485_v40, %v6485_v40  ;;  %v9250_v40 = vld [vmem:[#allocation25_spill] sm:$0xff] }
 0x1b5   :  { %1524 = vmatprep.subr.bf16.mxu0 %v6180_v33  ;;  %1565 = vmatprep.subr.bf16.mxu1 %v6183_v56 }
 0x1b6   :  { %9244 = vst [vmem:[#allocation107_spill] sm:$0xff] %v6493_v47 }
 0x1b8   :  { %1525 = vmatpush1.bf16.msra.mxu0 %v6186_v1  ;;  %1566 = vmatpush1.bf16.msra.mxu1 %v6190_v30 }
 0x1b9   :  { %1592 = vmatprep.subr.bf16.mxu0 %v5792_v3  ;;  %1633 = vmatprep.subr.bf16.mxu1 %v5796_v8 }
 0x1bb   :  { %1527 = vmatmul.mubr.bf16.vlgmr.msra.gmra.mrb[20].mxu0 %v9202_v48  ;;  %1568 = vmatmul.mubr.bf16.vlgmr.msra.gmra.mrb[20].mxu1 %v9202_v48  ;;  %v9245_v48 = vld [vmem:[#allocation20_spill] sm:$0xff] }
 0x1bc   :  { %1593 = vmatpush1.bf16.msra.mxu0 %v5794_v5  ;;  %1634 = vmatpush1.bf16.msra.mxu1 %v5798_v9  ;;  %v9246_v9 = vld [vmem:[#allocation21_spill] sm:$0xff]  ;;  %v9249_v5 = vld [vmem:[#allocation24_spill] sm:$0xff] }
 0x1bd   :  { %1594 = vmatprep.subr.bf16.mxu0 %v5800_v10  ;;  %1635 = vmatprep.subr.bf16.mxu1 %v5803_v14  ;;  %v9247_v10 = vld [vmem:[#allocation22_spill] sm:$0xff]  ;;  %v9248_v14 = vld [vmem:[#allocation23_spill] sm:$0xff] }
 0x1be   :  { %1624 = vmatprep.mubr.bf16.mxu0 %v6493_v47  ;;  %1665 = vmatprep.mubr.bf16.mxu1 %v6493_v47 }
 0x1c0   :  { %1595 = vmatpush1.bf16.msra.mxu0 %v5807_v18  ;;  %1636 = vmatpush1.bf16.msra.mxu1 %v5811_v19  ;;  %v9251_v18 = vld [vmem:[#allocation26_spill] sm:$0xff] }
 0x1c1   :  { %1596 = vmatprep.subr.bf16.mxu0 %v5813_v20  ;;  %1637 = vmatprep.subr.bf16.mxu1 %v5816_v21  ;;  %v9252_v20 = vld [vmem:[#allocation27_spill] sm:$0xff]  ;;  %v9253_v21 = vld [vmem:[#allocation28_spill] sm:$0xff] }
 0x1c4   :  { %1597 = vmatpush1.bf16.msra.mxu0 %v5819_v26  ;;  %1638 = vmatpush1.bf16.msra.mxu1 %v9245_v48 }
 0x1c5   :  { %1598 = vmatprep.subr.bf16.mxu0 %v9246_v9  ;;  %1639 = vmatprep.subr.bf16.mxu1 %v9247_v10 }
 0x1c8   :  { %1599 = vmatpush1.bf16.msra.mxu0 %v9248_v14  ;;  %1640 = vmatpush1.bf16.msra.mxu1 %v9249_v5 }
 0x1c9   :  { %1600 = vmatprep.subr.bf16.mxu0 %v9250_v40  ;;  %1641 = vmatprep.subr.bf16.mxu1 %v9251_v18 }
 0x1cc   :  { %1601 = vmatpush1.bf16.msra.mxu0 %v5843_v42  ;;  %1642 = vmatpush1.bf16.msra.mxu1 %v9252_v20 }
 0x1cd   :  { %1602 = vmatprep.subr.bf16.mxu0 %v9253_v21  ;;  %1643 = vmatprep.subr.bf16.mxu1 %v5852_v45 }
 0x1ce   :  { %v1267_v26 = vpop.f32.mrb[8].mxu0  ;;  %v1308_v9 = vpop.f32.mrb[8].mxu1 }
 0x1cf   :  { %v1269_v48 = vpop.f32.mrb[9].mxu0  ;;  %v1310_v19 = vpop.f32.mrb[9].mxu1 }
 0x1d0   :  { %v1397_v10 = vmax.f32 %v1267_v26, %v1269_v48  ;;  %v1271_v14 = vpop.f32.mrb[10].mxu0  ;;  %1603 = vmatpush1.bf16.msra.mxu0 %v5855_v50  ;;  %v1398_v5 = vmax.f32 %v1308_v9, %v1310_v19  ;;  %v1312_v40 = vpop.f32.mrb[10].mxu1  ;;  %1644 = vmatpush1.bf16.msra.mxu1 %v5859_v51  ;;  %v9255_v9 = vld [vmem:[#allocation31_spill] sm:$0xff]  ;;  %v9260_v19 = vld [vmem:[#allocation36_spill] sm:$0xff]  ;;  %v9262_v26 = vld [vmem:[#allocation38_spill] sm:$0xff] }
 0x1d1   :  { %v1272_v18 = vpop.f32.mrb[11].mxu0  ;;  %1604 = vmatprep.subr.bf16.mxu0 %v5861_v52  ;;  %v1313_v20 = vpop.f32.mrb[11].mxu1  ;;  %1645 = vmatprep.subr.bf16.mxu1 %v5869_v54  ;;  %v9256_v14 = vld [vmem:[#allocation32_spill] sm:$0xff]  ;;  %v9263_v40 = vld [vmem:[#allocation39_spill] sm:$0xff] }
 0x1d2   :  { %v6523_v21 = vmax.f32 %v1397_v10, %v1398_v5  ;;  %v9257_v18 = vld [vmem:[#allocation33_spill] sm:$0xff]  ;;  %v9258_v5 = vld [vmem:[#allocation34_spill] sm:$0xff]  ;;  %v9259_v10 = vld [vmem:[#allocation35_spill] sm:$0xff] }
 0x1d3   :  { %v9261_v20 = vld [vmem:[#allocation37_spill] sm:$0xff]  ;;  %v9264_v48 = vld [vmem:[#allocation40_spill] sm:$0xff] }
 0x1d4   :  { %9254 = vst [vmem:[#allocation109_spill] sm:$0xff] %v6523_v21  ;;  %1605 = vmatpush1.bf16.msra.mxu0 %v5876_v60  ;;  %1646 = vmatpush1.bf16.msra.mxu1 %v5881_v61  ;;  %v9265_v21 = vld [vmem:[#allocation41_spill] sm:$0xff] }
 0x1d5   :  { %1606 = vmatprep.subr.bf16.mxu0 %v5883_v62  ;;  %1647 = vmatprep.subr.bf16.mxu1 %v5886_v63 }
 0x1d8   :  { %1607 = vmatpush1.bf16.msra.mxu0 %v5890_v6  ;;  %1648 = vmatpush1.bf16.msra.mxu1 %v5894_v7 }
 0x1d9   :  { %1608 = vmatprep.subr.bf16.mxu0 %v9255_v9  ;;  %1649 = vmatprep.subr.bf16.mxu1 %v9256_v14  ;;  %v9266_v9 = vld [vmem:[#allocation42_spill] sm:$0xff]  ;;  %v9267_v14 = vld [vmem:[#allocation43_spill] sm:$0xff] }
 0x1dc   :  { %1609 = vmatpush1.bf16.msra.mxu0 %v9257_v18  ;;  %1650 = vmatpush1.bf16.msra.mxu1 %v9258_v5  ;;  %v9268_v18 = vld [vmem:[#allocation44_spill] sm:$0xff]  ;;  %v9269_v5 = vld [vmem:[#allocation45_spill] sm:$0xff] }
 0x1dd   :  { %1610 = vmatprep.subr.bf16.mxu0 %v9259_v10  ;;  %1651 = vmatprep.subr.bf16.mxu1 %v9260_v19  ;;  %v9270_v10 = vld [vmem:[#allocation46_spill] sm:$0xff]  ;;  %v9271_v19 = vld [vmem:[#allocation47_spill] sm:$0xff] }
 0x1e0   :  { %1611 = vmatpush1.bf16.msra.mxu0 %v9261_v20  ;;  %1652 = vmatpush1.bf16.msra.mxu1 %v9262_v26  ;;  %v9272_v20 = vld [vmem:[#allocation48_spill] sm:$0xff]  ;;  %v9273_v26 = vld [vmem:[#allocation49_spill] sm:$0xff] }
 0x1e1   :  { %1612 = vmatprep.subr.bf16.mxu0 %v9263_v40  ;;  %1653 = vmatprep.subr.bf16.mxu1 %v9264_v48  ;;  %v9274_v40 = vld [vmem:[#allocation50_spill] sm:$0xff]  ;;  %v9275_v48 = vld [vmem:[#allocation51_spill] sm:$0xff] }
 0x1e4   :  { %1613 = vmatpush1.bf16.msra.mxu0 %v9265_v21  ;;  %1654 = vmatpush1.bf16.msra.mxu1 %v9266_v9  ;;  %v9276_v21 = vld [vmem:[#allocation52_spill] sm:$0xff]  ;;  %v9277_v9 = vld [vmem:[#allocation53_spill] sm:$0xff] }
 0x1e5   :  { %1614 = vmatprep.subr.bf16.mxu0 %v9267_v14  ;;  %1655 = vmatprep.subr.bf16.mxu1 %v9268_v18  ;;  %v9278_v14 = vld [vmem:[#allocation54_spill] sm:$0xff]  ;;  %v9279_v18 = vld [vmem:[#allocation55_spill] sm:$0xff] }
 0x1e8   :  { %1615 = vmatpush1.bf16.msra.mxu0 %v9269_v5  ;;  %1656 = vmatpush1.bf16.msra.mxu1 %v9270_v10  ;;  %v9280_v5 = vld [vmem:[#allocation56_spill] sm:$0xff]  ;;  %v9281_v10 = vld [vmem:[#allocation57_spill] sm:$0xff] }
 0x1e9   :  { %1616 = vmatprep.subr.bf16.mxu0 %v9271_v19  ;;  %1657 = vmatprep.subr.bf16.mxu1 %v9272_v20  ;;  %v9282_v19 = vld [vmem:[#allocation58_spill] sm:$0xff]  ;;  %v9283_v20 = vld [vmem:[#allocation59_spill] sm:$0xff] }
 0x1ec   :  { %1617 = vmatpush1.bf16.msra.mxu0 %v9273_v26  ;;  %1658 = vmatpush1.bf16.msra.mxu1 %v9274_v40  ;;  %v9284_v26 = vld [vmem:[#allocation60_spill] sm:$0xff]  ;;  %v9285_v40 = vld [vmem:[#allocation61_spill] sm:$0xff] }
 0x1ed   :  { %1618 = vmatprep.subr.bf16.mxu0 %v9275_v48  ;;  %1659 = vmatprep.subr.bf16.mxu1 %v9276_v21  ;;  %v9286_v48 = vld [vmem:[#allocation62_spill] sm:$0xff]  ;;  %v9287_v21 = vld [vmem:[#allocation63_spill] sm:$0xff] }
 0x1f0   :  { %1619 = vmatpush1.bf16.msra.mxu0 %v9277_v9  ;;  %1660 = vmatpush1.bf16.msra.mxu1 %v9278_v14  ;;  %v9288_v9 = vld [vmem:[#allocation64_spill] sm:$0xff]  ;;  %v9289_v14 = vld [vmem:[#allocation102_spill] sm:$0xff] }
 0x1f1   :  { %1620 = vmatprep.subr.bf16.mxu0 %v9279_v18  ;;  %1661 = vmatprep.subr.bf16.mxu1 %v9280_v5  ;;  %v9290_v5 = vld [vmem:[#allocation65_spill] sm:$0xff]  ;;  %v9303_v18 = vld [vmem:[#allocation78_spill] sm:$0xff] }
 0x1f4   :  { %1621 = vmatpush1.bf16.msra.mxu0 %v9281_v10  ;;  %1662 = vmatpush1.bf16.msra.mxu1 %v9282_v19  ;;  %v9291_v10 = vld [vmem:[#allocation66_spill] sm:$0xff]  ;;  %v9292_v19 = vld [vmem:[#allocation67_spill] sm:$0xff] }
 0x1f5   :  { %1622 = vmatprep.subr.bf16.mxu0 %v9283_v20  ;;  %1663 = vmatprep.subr.bf16.mxu1 %v9284_v26  ;;  %v9293_v20 = vld [vmem:[#allocation68_spill] sm:$0xff]  ;;  %v9298_v26 = vld [vmem:[#allocation73_spill] sm:$0xff] }
 0x1f8   :  { %1623 = vmatpush1.bf16.msra.mxu0 %v9285_v40  ;;  %1664 = vmatpush1.bf16.msra.mxu1 %v9286_v48  ;;  %v9294_v48 = vld [vmem:[#allocation69_spill] sm:$0xff]  ;;  %v9297_v40 = vld [vmem:[#allocation72_spill] sm:$0xff] }
 0x1f9   :  { %1674 = vmatprep.subr.bf16.mxu0 %v9287_v21  ;;  %1715 = vmatprep.subr.bf16.mxu1 %v9288_v9  ;;  %v9295_v21 = vld [vmem:[#allocation70_spill] sm:$0xff]  ;;  %v9296_v9 = vld [vmem:[#allocation71_spill] sm:$0xff] }
 0x1fb   :  { %1625 = vmatmul.mubr.bf16.vlgmr.msra.gmra.mrb[24].mxu0 %v9289_v14  ;;  %1666 = vmatmul.mubr.bf16.vlgmr.msra.gmra.mrb[24].mxu1 %v9289_v14 }
 0x1fc   :  { %1675 = vmatpush1.bf16.msra.mxu0 %v9290_v5  ;;  %1716 = vmatpush1.bf16.msra.mxu1 %v9291_v10  ;;  %v9299_v5 = vld [vmem:[#allocation74_spill] sm:$0xff]  ;;  %v9300_v10 = vld [vmem:[#allocation75_spill] sm:$0xff] }
 0x1fd   :  { %1676 = vmatprep.subr.bf16.mxu0 %v9292_v19  ;;  %1717 = vmatprep.subr.bf16.mxu1 %v9293_v20  ;;  %v9301_v19 = vld [vmem:[#allocation76_spill] sm:$0xff]  ;;  %v9302_v20 = vld [vmem:[#allocation77_spill] sm:$0xff] }
 0x1fe   :  { %1706 = vmatprep.mubr.bf16.mxu0 %v6493_v47  ;;  %1747 = vmatprep.mubr.bf16.mxu1 %v6493_v47  ;;  %v9304_v47 = vld [vmem:[#allocation79_spill] sm:$0xff] }
 0x200   :  { %1677 = vmatpush1.bf16.msra.mxu0 %v9294_v48  ;;  %1718 = vmatpush1.bf16.msra.mxu1 %v9295_v21  ;;  %v9305_v48 = vld [vmem:[#allocation80_spill] sm:$0xff]  ;;  %v9306_v21 = vld [vmem:[#allocation81_spill] sm:$0xff] }
 0x201   :  { %1678 = vmatprep.subr.bf16.mxu0 %v9296_v9  ;;  %1719 = vmatprep.subr.bf16.mxu1 %v9297_v40  ;;  %v9307_v9 = vld [vmem:[#allocation82_spill] sm:$0xff]  ;;  %v9308_v40 = vld [vmem:[#allocation83_spill] sm:$0xff] }
 0x204   :  { %1679 = vmatpush1.bf16.msra.mxu0 %v9298_v26  ;;  %1720 = vmatpush1.bf16.msra.mxu1 %v9299_v5  ;;  %v9309_v5 = vld [vmem:[#allocation84_spill] sm:$0xff] }
 0x205   :  { %1680 = vmatprep.subr.bf16.mxu0 %v9300_v10  ;;  %1721 = vmatprep.subr.bf16.mxu1 %v9301_v19 }
 0x208   :  { %1681 = vmatpush1.bf16.msra.mxu0 %v9302_v20  ;;  %1722 = vmatpush1.bf16.msra.mxu1 %v9303_v18 }
 0x209   :  { %1682 = vmatprep.subr.bf16.mxu0 %v9304_v47  ;;  %1723 = vmatprep.subr.bf16.mxu1 %v9305_v48 }
 0x20c   :  { %1683 = vmatpush1.bf16.msra.mxu0 %v9306_v21  ;;  %1724 = vmatpush1.bf16.msra.mxu1 %v9307_v9 }
 0x20d   :  { %1684 = vmatprep.subr.bf16.mxu0 %v9308_v40  ;;  %1725 = vmatprep.subr.bf16.mxu1 %v9309_v5 }
 0x20e   :  { %v1349_v26 = vpop.f32.mrb[12].mxu0  ;;  %v1390_v10 = vpop.f32.mrb[12].mxu1 }
 0x20f   :  { %v1351_v7 = vpop.f32.mrb[13].mxu0  ;;  %v1392_v6 = vpop.f32.mrb[13].mxu1 }
 0x210   :  { %v1403_v19 = vmax.f32 %v1349_v26, %v1351_v7  ;;  %v1353_v20 = vpop.f32.mrb[14].mxu0  ;;  %1685 = vmatpush1.bf16.msra.mxu0 %v9223_v23  ;;  %v1404_v18 = vmax.f32 %v1390_v10, %v1392_v6  ;;  %v1394_v47 = vpop.f32.mrb[14].mxu1  ;;  %1726 = vmatpush1.bf16.msra.mxu1 %v9224_v22  ;;  %v9311_v6 = vld [vmem:[#allocation94_spill] sm:$0xff]  ;;  %v9312_v7 = vld [vmem:[#allocation108_spill] sm:$0xff]  ;;  %v9319_v26 = vld [vmem:[#allocation13_spill] sm:$0xff] }
 0x211   :  { %v1354_v48 = vpop.f32.mrb[15].mxu0  ;;  %1686 = vmatprep.subr.bf16.mxu0 %v9225_v36  ;;  %v1395_v9 = vpop.f32.mrb[15].mxu1  ;;  %1727 = vmatprep.subr.bf16.mxu1 %v9226_v12  ;;  %v9313_v47 = vld [vmem:[#allocation113_spill] sm:$0xff]  ;;  %v9318_v20 = vld [vmem:[#allocation12_spill] sm:$0xff] }
 0x212   :  { %v6593_v40 = vmax.f32 %v1403_v19, %v1404_v18  ;;  %v9314_v9 = vld [vmem:[#allocation115_spill] sm:$0xff]  ;;  %v9315_v18 = vld [vmem:[#allocation106_spill] sm:$0xff] }
 0x213   :  { %v6637_v10 = vcombine.high %v9315_v18, %v9315_v18  ;;  %v9317_v19 = vld [vmem:[#allocation10_spill] sm:$0xff]  ;;  %v9322_v18 = vld [vmem:[#allocation16_spill] sm:$0xff] }
 0x214   :  { %9310 = vst [vmem:[#allocation110_spill] sm:$0xff] %v6593_v40  ;;  %1687 = vmatpush1.bf16.msra.mxu0 %v9228_v17  ;;  %1728 = vmatpush1.bf16.msra.mxu1 %v9229_v11  ;;  %v9320_v48 = vld [vmem:[#allocation14_spill] sm:$0xff]  ;;  %v9321_v40 = vld [vmem:[#allocation15_spill] sm:$0xff] }
 0x215   :  { %1688 = vmatprep.subr.bf16.mxu0 %v9230_v29  ;;  %1729 = vmatprep.subr.bf16.mxu1 %v9231_v28  ;;  %9316 = vst [vmem:[#allocation111_spill] sm:$0xff] %v6637_v10 }
 0x218   :  { %1689 = vmatpush1.bf16.msra.mxu0 %v9232_v44  ;;  %1730 = vmatpush1.bf16.msra.mxu1 %v9311_v6 }
 0x219   :  { %1690 = vmatprep.subr.bf16.mxu0 %v9234_v15  ;;  %1731 = vmatprep.subr.bf16.mxu1 %v9235_v35 }
 0x21c   :  { %1691 = vmatpush1.bf16.msra.mxu0 %v9236_v37  ;;  %1732 = vmatpush1.bf16.msra.mxu1 %v9237_v27 }
 0x21d   :  { %1692 = vmatprep.subr.bf16.mxu0 %v9238_v43  ;;  %1733 = vmatprep.subr.bf16.mxu1 %v9239_v57 }
 0x220   :  { %1693 = vmatpush1.bf16.msra.mxu0 %v9240_v34  ;;  %1734 = vmatpush1.bf16.msra.mxu1 %v9160_v41 }
 0x221   :  { %1694 = vmatprep.subr.bf16.mxu0 %v9161_v13  ;;  %1735 = vmatprep.subr.bf16.mxu1 %v9162_v46 }
 0x224   :  { %1695 = vmatpush1.bf16.msra.mxu0 %v9241_v24  ;;  %1736 = vmatpush1.bf16.msra.mxu1 %v9164_v39 }
 0x225   :  { %1696 = vmatprep.subr.bf16.mxu0 %v9165_v32  ;;  %1737 = vmatprep.subr.bf16.mxu1 %v9312_v7 }
 0x228   :  { %1697 = vmatpush1.bf16.msra.mxu0 %v9167_v25  ;;  %1738 = vmatpush1.bf16.msra.mxu1 %v9168_v38 }
 0x229   :  { %1698 = vmatprep.subr.bf16.mxu0 %v9169_v49  ;;  %1739 = vmatprep.subr.bf16.mxu1 %v9170_v53 }
 0x22c   :  { %1699 = vmatpush1.bf16.msra.mxu0 %v6150_v59  ;;  %1740 = vmatpush1.bf16.msra.mxu1 %v6154_v2 }
 0x22d   :  { %1700 = vmatprep.subr.bf16.mxu0 %v6156_v4  ;;  %1741 = vmatprep.subr.bf16.mxu1 %v9313_v47 }
 0x230   :  { %1701 = vmatpush1.bf16.msra.mxu0 %v6162_v31  ;;  %1742 = vmatpush1.bf16.msra.mxu1 %v6166_v0 }
 0x231   :  { %1702 = vmatprep.subr.bf16.mxu0 %v9242_v16  ;;  %1743 = vmatprep.subr.bf16.mxu1 %v6171_v55 }
 0x234   :  { %1703 = vmatpush1.bf16.msra.mxu0 %v6174_v58  ;;  %1744 = vmatpush1.bf16.msra.mxu1 %v9314_v9 }
 0x235   :  { %1704 = vmatprep.subr.bf16.mxu0 %v6180_v33  ;;  %1745 = vmatprep.subr.bf16.mxu1 %v6183_v56 }
 0x238   :  { %1705 = vmatpush1.bf16.msra.mxu0 %v6186_v1  ;;  %1746 = vmatpush1.bf16.msra.mxu1 %v6190_v30  ;;  %v9330_v30 = vld [vmem:[#allocation24_spill] sm:$0xff]  ;;  %v9331_v1 = vld [vmem:[#allocation25_spill] sm:$0xff] }
 0x239   :  { %1771 = vmatprep.subr.bf16.mxu0 %v5792_v3  ;;  %1812 = vmatprep.subr.bf16.mxu1 %v5796_v8  ;;  %v9323_v8 = vld [vmem:[#allocation17_spill] sm:$0xff]  ;;  %v9324_v3 = vld [vmem:[#allocation18_spill] sm:$0xff] }
 0x23b   :  { %1707 = vmatmul.mubr.bf16.vlgmr.msra.gmra.mrb[28].mxu0 %v9289_v14  ;;  %1748 = vmatmul.mubr.bf16.vlgmr.msra.gmra.mrb[28].mxu1 %v9289_v14  ;;  %v9325_v14 = vld [vmem:[#allocation19_spill] sm:$0xff] }
 0x23c   :  { %1772 = vmatpush1.bf16.msra.mxu0 %v9317_v19  ;;  %1813 = vmatpush1.bf16.msra.mxu1 %v9318_v20  ;;  %v9326_v19 = vld [vmem:[#allocation20_spill] sm:$0xff]  ;;  %v9327_v20 = vld [vmem:[#allocation21_spill] sm:$0xff] }
 0x23d   :  { %1773 = vmatprep.subr.bf16.mxu0 %v9319_v26  ;;  %1814 = vmatprep.subr.bf16.mxu1 %v9320_v48  ;;  %v9328_v26 = vld [vmem:[#allocation22_spill] sm:$0xff]  ;;  %v9329_v48 = vld [vmem:[#allocation23_spill] sm:$0xff] }
 0x23e   :  { %1803 = vmatprep.mubr.bf16.mxu0 %v6637_v10  ;;  %1844 = vmatprep.mubr.bf16.mxu1 %v6637_v10 }
 0x240   :  { %1774 = vmatpush1.bf16.msra.mxu0 %v9321_v40  ;;  %1815 = vmatpush1.bf16.msra.mxu1 %v9322_v18  ;;  %v9332_v40 = vld [vmem:[#allocation26_spill] sm:$0xff] }
 0x241   :  { %1775 = vmatprep.subr.bf16.mxu0 %v9323_v8  ;;  %1816 = vmatprep.subr.bf16.mxu1 %v9324_v3  ;;  %v9333_v8 = vld [vmem:[#allocation27_spill] sm:$0xff]  ;;  %v9334_v3 = vld [vmem:[#allocation28_spill] sm:$0xff] }
 0x244   :  { %1776 = vmatpush1.bf16.msra.mxu0 %v9325_v14  ;;  %1817 = vmatpush1.bf16.msra.mxu1 %v9326_v19 }
 0x245   :  { %1777 = vmatprep.subr.bf16.mxu0 %v9327_v20  ;;  %1818 = vmatprep.subr.bf16.mxu1 %v9328_v26 }
 0x248   :  { %1778 = vmatpush1.bf16.msra.mxu0 %v9329_v48  ;;  %1819 = vmatpush1.bf16.msra.mxu1 %v9330_v30 }
 0x249   :  { %1779 = vmatprep.subr.bf16.mxu0 %v9331_v1  ;;  %1820 = vmatprep.subr.bf16.mxu1 %v9332_v40 }
 0x24c   :  { %1780 = vmatpush1.bf16.msra.mxu0 %v5843_v42  ;;  %1821 = vmatpush1.bf16.msra.mxu1 %v9333_v8 }
 0x24d   :  { %1781 = vmatprep.subr.bf16.mxu0 %v9334_v3  ;;  %1822 = vmatprep.subr.bf16.mxu1 %v5852_v45 }
 0x24e   :  { %v1446_v14 = vpop.f32.mrb[16].mxu0  ;;  %v1487_v20 = vpop.f32.mrb[16].mxu1 }
 0x24f   :  { %v1448_v19 = vpop.f32.mrb[17].mxu0  ;;  %v1489_v18 = vpop.f32.mrb[17].mxu1 }
 0x250   :  { %v1576_v26 = vmax.f32 %v1446_v14, %v1448_v19  ;;  %v1450_v48 = vpop.f32.mrb[18].mxu0  ;;  %1782 = vmatpush1.bf16.msra.mxu0 %v5855_v50  ;;  %v1577_v30 = vmax.f32 %v1487_v20, %v1489_v18  ;;  %v1491_v1 = vpop.f32.mrb[18].mxu1  ;;  %1823 = vmatpush1.bf16.msra.mxu1 %v5859_v51  ;;  %v9336_v19 = vld [vmem:[#allocation29_spill] sm:$0xff]  ;;  %v9339_v20 = vld [vmem:[#allocation32_spill] sm:$0xff]  ;;  %v9345_v14 = vld [vmem:[#allocation38_spill] sm:$0xff] }
 0x251   :  { %v1451_v40 = vpop.f32.mrb[19].mxu0  ;;  %1783 = vmatprep.subr.bf16.mxu0 %v5861_v52  ;;  %v1492_v8 = vpop.f32.mrb[19].mxu1  ;;  %1824 = vmatprep.subr.bf16.mxu1 %v5869_v54  ;;  %v9337_v1 = vld [vmem:[#allocation30_spill] sm:$0xff]  ;;  %v9343_v48 = vld [vmem:[#allocation36_spill] sm:$0xff]  ;;  %v9344_v18 = vld [vmem:[#allocation37_spill] sm:$0xff] }
 0x252   :  { %v6667_v3 = vmax.f32 %v1576_v26, %v1577_v30  ;;  %v9338_v40 = vld [vmem:[#allocation31_spill] sm:$0xff]  ;;  %v9340_v8 = vld [vmem:[#allocation33_spill] sm:$0xff]  ;;  %v9341_v30 = vld [vmem:[#allocation34_spill] sm:$0xff] }
 0x253   :  { %v9342_v26 = vld [vmem:[#allocation35_spill] sm:$0xff] }
 0x254   :  { %9335 = vst [vmem:[#allocation112_spill] sm:$0xff] %v6667_v3  ;;  %1784 = vmatpush1.bf16.msra.mxu0 %v5876_v60  ;;  %1825 = vmatpush1.bf16.msra.mxu1 %v5881_v61  ;;  %v9346_v3 = vld [vmem:[#allocation39_spill] sm:$0xff] }
 0x255   :  { %1785 = vmatprep.subr.bf16.mxu0 %v5883_v62  ;;  %1826 = vmatprep.subr.bf16.mxu1 %v5886_v63 }
 0x258   :  { %1786 = vmatpush1.bf16.msra.mxu0 %v9336_v19  ;;  %1827 = vmatpush1.bf16.msra.mxu1 %v9337_v1  ;;  %v9347_v19 = vld [vmem:[#allocation40_spill] sm:$0xff]  ;;  %v9348_v1 = vld [vmem:[#allocation41_spill] sm:$0xff] }
 0x259   :  { %1787 = vmatprep.subr.bf16.mxu0 %v9338_v40  ;;  %1828 = vmatprep.subr.bf16.mxu1 %v9339_v20  ;;  %v9349_v40 = vld [vmem:[#allocation42_spill] sm:$0xff]  ;;  %v9350_v20 = vld [vmem:[#allocation43_spill] sm:$0xff] }
 0x25c   :  { %1788 = vmatpush1.bf16.msra.mxu0 %v9340_v8  ;;  %1829 = vmatpush1.bf16.msra.mxu1 %v9341_v30  ;;  %v9351_v8 = vld [vmem:[#allocation44_spill] sm:$0xff]  ;;  %v9352_v30 = vld [vmem:[#allocation45_spill] sm:$0xff] }
 0x25d   :  { %1789 = vmatprep.subr.bf16.mxu0 %v9342_v26  ;;  %1830 = vmatprep.subr.bf16.mxu1 %v9343_v48  ;;  %v9353_v26 = vld [vmem:[#allocation46_spill] sm:$0xff]  ;;  %v9354_v48 = vld [vmem:[#allocation47_spill] sm:$0xff] }
 0x260   :  { %1790 = vmatpush1.bf16.msra.mxu0 %v9344_v18  ;;  %1831 = vmatpush1.bf16.msra.mxu1 %v9345_v14  ;;  %v9355_v18 = vld [vmem:[#allocation48_spill] sm:$0xff]  ;;  %v9356_v14 = vld [vmem:[#allocation49_spill] sm:$0xff] }
 0x261   :  { %1791 = vmatprep.subr.bf16.mxu0 %v9346_v3  ;;  %1832 = vmatprep.subr.bf16.mxu1 %v9347_v19  ;;  %v9357_v3 = vld [vmem:[#allocation50_spill] sm:$0xff]  ;;  %v9358_v19 = vld [vmem:[#allocation51_spill] sm:$0xff] }
 0x264   :  { %1792 = vmatpush1.bf16.msra.mxu0 %v9348_v1  ;;  %1833 = vmatpush1.bf16.msra.mxu1 %v9349_v40  ;;  %v9359_v1 = vld [vmem:[#allocation52_spill] sm:$0xff]  ;;  %v9360_v40 = vld [vmem:[#allocation53_spill] sm:$0xff] }
 0x265   :  { %1793 = vmatprep.subr.bf16.mxu0 %v9350_v20  ;;  %1834 = vmatprep.subr.bf16.mxu1 %v9351_v8  ;;  %v9361_v20 = vld [vmem:[#allocation54_spill] sm:$0xff]  ;;  %v9362_v8 = vld [vmem:[#allocation55_spill] sm:$0xff] }
 0x268   :  { %1794 = vmatpush1.bf16.msra.mxu0 %v9352_v30  ;;  %1835 = vmatpush1.bf16.msra.mxu1 %v9353_v26  ;;  %v9363_v30 = vld [vmem:[#allocation56_spill] sm:$0xff]  ;;  %v9364_v26 = vld [vmem:[#allocation57_spill] sm:$0xff] }
 0x269   :  { %1795 = vmatprep.subr.bf16.mxu0 %v9354_v48  ;;  %1836 = vmatprep.subr.bf16.mxu1 %v9355_v18  ;;  %v9365_v48 = vld [vmem:[#allocation58_spill] sm:$0xff]  ;;  %v9366_v18 = vld [vmem:[#allocation59_spill] sm:$0xff] }
 0x26c   :  { %1796 = vmatpush1.bf16.msra.mxu0 %v9356_v14  ;;  %1837 = vmatpush1.bf16.msra.mxu1 %v9357_v3  ;;  %v9367_v14 = vld [vmem:[#allocation60_spill] sm:$0xff]  ;;  %v9368_v3 = vld [vmem:[#allocation61_spill] sm:$0xff] }
 0x26d   :  { %1797 = vmatprep.subr.bf16.mxu0 %v9358_v19  ;;  %1838 = vmatprep.subr.bf16.mxu1 %v9359_v1  ;;  %v9369_v19 = vld [vmem:[#allocation62_spill] sm:$0xff]  ;;  %v9370_v1 = vld [vmem:[#allocation63_spill] sm:$0xff] }
 0x270   :  { %1798 = vmatpush1.bf16.msra.mxu0 %v9360_v40  ;;  %1839 = vmatpush1.bf16.msra.mxu1 %v9361_v20  ;;  %v9371_v40 = vld [vmem:[#allocation64_spill] sm:$0xff]  ;;  %v9372_v20 = vld [vmem:[#allocation107_spill] sm:$0xff] }
 0x271   :  { %1799 = vmatprep.subr.bf16.mxu0 %v9362_v8  ;;  %1840 = vmatprep.subr.bf16.mxu1 %v9363_v30  ;;  %v9373_v30 = vld [vmem:[#allocation65_spill] sm:$0xff]  ;;  %v9386_v8 = vld [vmem:[#allocation78_spill] sm:$0xff] }
 0x274   :  { %1800 = vmatpush1.bf16.msra.mxu0 %v9364_v26  ;;  %1841 = vmatpush1.bf16.msra.mxu1 %v9365_v48  ;;  %v9374_v26 = vld [vmem:[#allocation66_spill] sm:$0xff]  ;;  %v9375_v48 = vld [vmem:[#allocation67_spill] sm:$0xff] }
 0x275   :  { %1801 = vmatprep.subr.bf16.mxu0 %v9366_v18  ;;  %1842 = vmatprep.subr.bf16.mxu1 %v9367_v14  ;;  %v9376_v18 = vld [vmem:[#allocation68_spill] sm:$0xff]  ;;  %v9381_v14 = vld [vmem:[#allocation73_spill] sm:$0xff] }
 0x278   :  { %1802 = vmatpush1.bf16.msra.mxu0 %v9368_v3  ;;  %1843 = vmatpush1.bf16.msra.mxu1 %v9369_v19  ;;  %v9377_v19 = vld [vmem:[#allocation69_spill] sm:$0xff]  ;;  %v9380_v3 = vld [vmem:[#allocation72_spill] sm:$0xff] }
 0x279   :  { %1853 = vmatprep.subr.bf16.mxu0 %v9370_v1  ;;  %1894 = vmatprep.subr.bf16.mxu1 %v9371_v40  ;;  %v9378_v1 = vld [vmem:[#allocation70_spill] sm:$0xff]  ;;  %v9379_v40 = vld [vmem:[#allocation71_spill] sm:$0xff] }
 0x27b   :  { %1804 = vmatmul.mubr.bf16.vlgmr.msra.gmra.mrb[32].mxu0 %v9372_v20  ;;  %1845 = vmatmul.mubr.bf16.vlgmr.msra.gmra.mrb[32].mxu1 %v9372_v20 }
 0x27c   :  { %1854 = vmatpush1.bf16.msra.mxu0 %v9373_v30  ;;  %1895 = vmatpush1.bf16.msra.mxu1 %v9374_v26  ;;  %v9382_v30 = vld [vmem:[#allocation74_spill] sm:$0xff]  ;;  %v9383_v26 = vld [vmem:[#allocation75_spill] sm:$0xff] }
 0x27d   :  { %1855 = vmatprep.subr.bf16.mxu0 %v9375_v48  ;;  %1896 = vmatprep.subr.bf16.mxu1 %v9376_v18  ;;  %v9384_v48 = vld [vmem:[#allocation76_spill] sm:$0xff]  ;;  %v9385_v18 = vld [vmem:[#allocation77_spill] sm:$0xff] }
 0x27e   :  { %1885 = vmatprep.mubr.bf16.mxu0 %v6637_v10  ;;  %1926 = vmatprep.mubr.bf16.mxu1 %v6637_v10  ;;  %v9387_v10 = vld [vmem:[#allocation79_spill] sm:$0xff] }
 0x280   :  { %1856 = vmatpush1.bf16.msra.mxu0 %v9377_v19  ;;  %1897 = vmatpush1.bf16.msra.mxu1 %v9378_v1  ;;  %v9388_v19 = vld [vmem:[#allocation80_spill] sm:$0xff] }
 0x281   :  { %1857 = vmatprep.subr.bf16.mxu0 %v9379_v40  ;;  %1898 = vmatprep.subr.bf16.mxu1 %v9380_v3  ;;  %v9389_v40 = vld [vmem:[#allocation82_spill] sm:$0xff]  ;;  %v9390_v3 = vld [vmem:[#allocation83_spill] sm:$0xff] }
 0x284   :  { %1858 = vmatpush1.bf16.msra.mxu0 %v9381_v14  ;;  %1899 = vmatpush1.bf16.msra.mxu1 %v9382_v30 }
 0x285   :  { %1859 = vmatprep.subr.bf16.mxu0 %v9383_v26  ;;  %1900 = vmatprep.subr.bf16.mxu1 %v9384_v48 }
 0x288   :  { %1860 = vmatpush1.bf16.msra.mxu0 %v9385_v18  ;;  %1901 = vmatpush1.bf16.msra.mxu1 %v9386_v8 }
 0x289   :  { %1861 = vmatprep.subr.bf16.mxu0 %v9387_v10  ;;  %1902 = vmatprep.subr.bf16.mxu1 %v9388_v19 }
 0x28c   :  { %1862 = vmatpush1.bf16.msra.mxu0 %v9306_v21  ;;  %1903 = vmatpush1.bf16.msra.mxu1 %v9389_v40 }
 0x28d   :  { %1863 = vmatprep.subr.bf16.mxu0 %v9390_v3  ;;  %1904 = vmatprep.subr.bf16.mxu1 %v9309_v5 }
 0x28e   :  { %v1528_v14 = vpop.f32.mrb[20].mxu0  ;;  %v1569_v26 = vpop.f32.mrb[20].mxu1 }
 0x28f   :  { %v1530_v30 = vpop.f32.mrb[21].mxu0  ;;  %v1571_v1 = vpop.f32.mrb[21].mxu1 }
 0x290   :  { %v1582_v48 = vmax.f32 %v1528_v14, %v1530_v30  ;;  %v1532_v18 = vpop.f32.mrb[22].mxu0  ;;  %1864 = vmatpush1.bf16.msra.mxu0 %v9223_v23  ;;  %v1583_v8 = vmax.f32 %v1569_v26, %v1571_v1  ;;  %v1573_v10 = vpop.f32.mrb[22].mxu1  ;;  %1905 = vmatpush1.bf16.msra.mxu1 %v9224_v22  ;;  %v9394_v1 = vld [vmem:[#allocation9_spill] sm:$0xff]  ;;  %v9396_v30 = vld [vmem:[#allocation10_spill] sm:$0xff]  ;;  %v9397_v26 = vld [vmem:[#allocation12_spill] sm:$0xff] }
 0x291   :  { %v1533_v19 = vpop.f32.mrb[23].mxu0  ;;  %1865 = vmatprep.subr.bf16.mxu0 %v9225_v36  ;;  %v1574_v40 = vpop.f32.mrb[23].mxu1  ;;  %1906 = vmatprep.subr.bf16.mxu1 %v9226_v12  ;;  %v9392_v10 = vld [vmem:[#allocation116_spill] sm:$0xff]  ;;  %v9399_v18 = vld [vmem:[#allocation14_spill] sm:$0xff]  ;;  %v9400_v14 = vld [vmem:[#allocation15_spill] sm:$0xff] }
 0x292   :  { %v6737_v3 = vmax.f32 %v1582_v48, %v1583_v8  ;;  %v9393_v19 = vld [vmem:[#allocation117_spill] sm:$0xff]  ;;  %v9395_v40 = vld [vmem:[#allocation11_spill] sm:$0xff]  ;;  %v6782_v8 = vld [vmem:[%s8444_s0 + $0x18] ss:$0 sps:$4 sm:$0xff]  }
 0x293   :  { %v9398_v48 = vld [vmem:[#allocation13_spill] sm:$0xff] }
 0x294   :  { %9391 = vst [vmem:[#allocation118_spill] sm:$0xff] %v6737_v3  ;;  %1866 = vmatpush1.bf16.msra.mxu0 %v9228_v17  ;;  %1907 = vmatpush1.bf16.msra.mxu1 %v9229_v11  ;;  %v9403_v3 = vld [vmem:[#allocation18_spill] sm:$0xff] }
 0x295   :  { %1867 = vmatprep.subr.bf16.mxu0 %v9230_v29  ;;  %1908 = vmatprep.subr.bf16.mxu1 %v9231_v28 }
 0x298   :  { %1868 = vmatpush1.bf16.msra.mxu0 %v9232_v44  ;;  %1909 = vmatpush1.bf16.msra.mxu1 %v9311_v6 }
 0x299   :  { %1869 = vmatprep.subr.bf16.mxu0 %v9234_v15  ;;  %1910 = vmatprep.subr.bf16.mxu1 %v9235_v35 }
 0x29c   :  { %1870 = vmatpush1.bf16.msra.mxu0 %v9236_v37  ;;  %1911 = vmatpush1.bf16.msra.mxu1 %v9237_v27 }
 0x29d   :  { %1871 = vmatprep.subr.bf16.mxu0 %v9238_v43  ;;  %1912 = vmatprep.subr.bf16.mxu1 %v9239_v57 }
 0x2a0   :  { %1872 = vmatpush1.bf16.msra.mxu0 %v9240_v34  ;;  %1913 = vmatpush1.bf16.msra.mxu1 %v9160_v41 }
 0x2a1   :  { %1873 = vmatprep.subr.bf16.mxu0 %v9161_v13  ;;  %1914 = vmatprep.subr.bf16.mxu1 %v9162_v46 }
 0x2a4   :  { %1874 = vmatpush1.bf16.msra.mxu0 %v9241_v24  ;;  %1915 = vmatpush1.bf16.msra.mxu1 %v9164_v39 }
 0x2a5   :  { %1875 = vmatprep.subr.bf16.mxu0 %v9165_v32  ;;  %1916 = vmatprep.subr.bf16.mxu1 %v9312_v7 }
 0x2a8   :  { %1876 = vmatpush1.bf16.msra.mxu0 %v9167_v25  ;;  %1917 = vmatpush1.bf16.msra.mxu1 %v9168_v38 }
 0x2a9   :  { %1877 = vmatprep.subr.bf16.mxu0 %v9169_v49  ;;  %1918 = vmatprep.subr.bf16.mxu1 %v9170_v53 }
 0x2ac   :  { %1878 = vmatpush1.bf16.msra.mxu0 %v6150_v59  ;;  %1919 = vmatpush1.bf16.msra.mxu1 %v6154_v2 }
 0x2ad   :  { %1879 = vmatprep.subr.bf16.mxu0 %v6156_v4  ;;  %1920 = vmatprep.subr.bf16.mxu1 %v9313_v47 }
 0x2b0   :  { %1880 = vmatpush1.bf16.msra.mxu0 %v6162_v31  ;;  %1921 = vmatpush1.bf16.msra.mxu1 %v6166_v0 }
 0x2b1   :  { %1881 = vmatprep.subr.bf16.mxu0 %v9242_v16  ;;  %1922 = vmatprep.subr.bf16.mxu1 %v6171_v55 }
 0x2b4   :  { %1882 = vmatpush1.bf16.msra.mxu0 %v6174_v58  ;;  %1923 = vmatpush1.bf16.msra.mxu1 %v9314_v9 }
 0x2b5   :  { %1883 = vmatprep.subr.bf16.mxu0 %v6180_v33  ;;  %1924 = vmatprep.subr.bf16.mxu1 %v6183_v56 }
 0x2b8   :  { %1884 = vmatpush1.bf16.msra.mxu0 %v9392_v10  ;;  %1925 = vmatpush1.bf16.msra.mxu1 %v9393_v19  ;;  %v9409_v19 = vld [vmem:[#allocation24_spill] sm:$0xff]  ;;  %v9410_v10 = vld [vmem:[#allocation25_spill] sm:$0xff] }
 0x2b9   :  { %1951 = vmatprep.subr.bf16.mxu0 %v9394_v1  ;;  %1992 = vmatprep.subr.bf16.mxu1 %v9395_v40  ;;  %v9401_v1 = vld [vmem:[#allocation16_spill] sm:$0xff]  ;;  %v9402_v40 = vld [vmem:[#allocation17_spill] sm:$0xff] }
 0x2bb   :  { %1886 = vmatmul.mubr.bf16.vlgmr.msra.gmra.mrb[36].mxu0 %v9372_v20  ;;  %1927 = vmatmul.mubr.bf16.vlgmr.msra.gmra.mrb[36].mxu1 %v9372_v20  ;;  %v9404_v20 = vld [vmem:[#allocation19_spill] sm:$0xff] }
 0x2bc   :  { %1952 = vmatpush1.bf16.msra.mxu0 %v9396_v30  ;;  %1993 = vmatpush1.bf16.msra.mxu1 %v9397_v26  ;;  %v9405_v30 = vld [vmem:[#allocation20_spill] sm:$0xff]  ;;  %v9406_v26 = vld [vmem:[#allocation21_spill] sm:$0xff] }
 0x2bd   :  { %1953 = vmatprep.subr.bf16.mxu0 %v9398_v48  ;;  %1994 = vmatprep.subr.bf16.mxu1 %v9399_v18  ;;  %v9407_v48 = vld [vmem:[#allocation22_spill] sm:$0xff]  ;;  %v9408_v18 = vld [vmem:[#allocation23_spill] sm:$0xff] }
 0x2be   :  { %1983 = vmatprep.mubr.bf16.mxu0 %v6782_v8  ;;  %2024 = vmatprep.mubr.bf16.mxu1 %v6782_v8 }
 0x2c0   :  { %1954 = vmatpush1.bf16.msra.mxu0 %v9400_v14  ;;  %1995 = vmatpush1.bf16.msra.mxu1 %v9401_v1  ;;  %v9411_v14 = vld [vmem:[#allocation26_spill] sm:$0xff]  ;;  %v9412_v1 = vld [vmem:[#allocation27_spill] sm:$0xff] }
 0x2c1   :  { %1955 = vmatprep.subr.bf16.mxu0 %v9402_v40  ;;  %1996 = vmatprep.subr.bf16.mxu1 %v9403_v3  ;;  %v9413_v3 = vld [vmem:[#allocation28_spill] sm:$0xff] }
 0x2c4   :  { %1956 = vmatpush1.bf16.msra.mxu0 %v9404_v20  ;;  %1997 = vmatpush1.bf16.msra.mxu1 %v9405_v30 }
 0x2c5   :  { %1957 = vmatprep.subr.bf16.mxu0 %v9406_v26  ;;  %1998 = vmatprep.subr.bf16.mxu1 %v9407_v48 }
 0x2c8   :  { %1958 = vmatpush1.bf16.msra.mxu0 %v9408_v18  ;;  %1999 = vmatpush1.bf16.msra.mxu1 %v9409_v19 }
 0x2c9   :  { %1959 = vmatprep.subr.bf16.mxu0 %v9410_v10  ;;  %2000 = vmatprep.subr.bf16.mxu1 %v9411_v14 }
 0x2cc   :  { %1960 = vmatpush1.bf16.msra.mxu0 %v5843_v42  ;;  %2001 = vmatpush1.bf16.msra.mxu1 %v9412_v1 }
 0x2cd   :  { %1961 = vmatprep.subr.bf16.mxu0 %v9413_v3  ;;  %2002 = vmatprep.subr.bf16.mxu1 %v5852_v45  ;;  %v9415_v45 = vld [vmem:[#allocation29_spill] sm:$0xff] }
 0x2ce   :  { %v1626_v40 = vpop.f32.mrb[24].mxu0  ;;  %v1667_v20 = vpop.f32.mrb[24].mxu1  ;;  %v9419_v3 = vld [vmem:[#allocation33_spill] sm:$0xff] }
 0x2cf   :  { %v1628_v30 = vpop.f32.mrb[25].mxu0  ;;  %v1669_v48 = vpop.f32.mrb[25].mxu1 }
 0x2d0   :  { %v1756_v26 = vmax.f32 %v1626_v40, %v1628_v30  ;;  %v1630_v18 = vpop.f32.mrb[26].mxu0  ;;  %1962 = vmatpush1.bf16.msra.mxu0 %v5855_v50  ;;  %v1757_v19 = vmax.f32 %v1667_v20, %v1669_v48  ;;  %v1671_v10 = vpop.f32.mrb[26].mxu1  ;;  %2003 = vmatpush1.bf16.msra.mxu1 %v5859_v51  ;;  %v9416_v50 = vld [vmem:[#allocation30_spill] sm:$0xff]  ;;  %v9417_v51 = vld [vmem:[#allocation31_spill] sm:$0xff]  ;;  %v9426_v20 = vld [vmem:[#allocation40_spill] sm:$0xff] }
 0x2d1   :  { %v1631_v14 = vpop.f32.mrb[27].mxu0  ;;  %1963 = vmatprep.subr.bf16.mxu0 %v5861_v52  ;;  %v1672_v42 = vpop.f32.mrb[27].mxu1  ;;  %2004 = vmatprep.subr.bf16.mxu1 %v5869_v54  ;;  %v9418_v52 = vld [vmem:[#allocation32_spill] sm:$0xff]  ;;  %v9420_v54 = vld [vmem:[#allocation34_spill] sm:$0xff]  ;;  %v9421_v40 = vld [vmem:[#allocation35_spill] sm:$0xff] }
 0x2d2   :  { %v6812_v1 = vmax.f32 %v1756_v26, %v1757_v19  ;;  %v9427_v30 = vld [vmem:[#allocation41_spill] sm:$0xff]  ;;  %v9428_v26 = vld [vmem:[#allocation42_spill] sm:$0xff]  ;;  %v9429_v48 = vld [vmem:[#allocation43_spill] sm:$0xff] }
 0x2d3   :  { %v9430_v18 = vld [vmem:[#allocation44_spill] sm:$0xff]  ;;  %v9431_v19 = vld [vmem:[#allocation45_spill] sm:$0xff]  ;;  %v9432_v10 = vld [vmem:[#allocation46_spill] sm:$0xff] }
 0x2d4   :  { %9414 = vst [vmem:[#allocation85_spill] sm:$0xff] %v6812_v1  ;;  %1964 = vmatpush1.bf16.msra.mxu0 %v5876_v60  ;;  %2005 = vmatpush1.bf16.msra.mxu1 %v5881_v61  ;;  %v9422_v60 = vld [vmem:[#allocation36_spill] sm:$0xff]  ;;  %v9423_v61 = vld [vmem:[#allocation37_spill] sm:$0xff]  ;;  %v9433_v14 = vld [vmem:[#allocation47_spill] sm:$0xff] }
 0x2d5   :  { %1965 = vmatprep.subr.bf16.mxu0 %v5883_v62  ;;  %2006 = vmatprep.subr.bf16.mxu1 %v5886_v63  ;;  %v9424_v62 = vld [vmem:[#allocation38_spill] sm:$0xff]  ;;  %v9425_v63 = vld [vmem:[#allocation39_spill] sm:$0xff]  ;;  %v9434_v42 = vld [vmem:[#allocation48_spill] sm:$0xff] }
 0x2d6   :  { %v7110_v1 = vld [vmem:[#allocation4 + $0x1c8] ss:$16 sps:$4 sm:$0xff]  }
 0x2d7   :  { %9490 = vst [vmem:[#allocation114_spill] sm:$0xff] %v7110_v1 }
 0x2d8   :  { %1966 = vmatpush1.bf16.msra.mxu0 %v9415_v45  ;;  %2007 = vmatpush1.bf16.msra.mxu1 %v9416_v50  ;;  %v9435_v45 = vld [vmem:[#allocation49_spill] sm:$0xff]  ;;  %v9436_v50 = vld [vmem:[#allocation50_spill] sm:$0xff] }
 0x2d9   :  { %1967 = vmatprep.subr.bf16.mxu0 %v9417_v51  ;;  %2008 = vmatprep.subr.bf16.mxu1 %v9418_v52  ;;  %v9437_v51 = vld [vmem:[#allocation51_spill] sm:$0xff]  ;;  %v9438_v52 = vld [vmem:[#allocation52_spill] sm:$0xff] }
 0x2dc   :  { %1968 = vmatpush1.bf16.msra.mxu0 %v9419_v3  ;;  %2009 = vmatpush1.bf16.msra.mxu1 %v9420_v54  ;;  %v9439_v3 = vld [vmem:[#allocation53_spill] sm:$0xff]  ;;  %v9440_v54 = vld [vmem:[#allocation54_spill] sm:$0xff] }
 0x2dd   :  { %1969 = vmatprep.subr.bf16.mxu0 %v9421_v40  ;;  %2010 = vmatprep.subr.bf16.mxu1 %v9422_v60  ;;  %v9441_v40 = vld [vmem:[#allocation55_spill] sm:$0xff]  ;;  %v9442_v60 = vld [vmem:[#allocation56_spill] sm:$0xff] }
 0x2e0   :  { %1970 = vmatpush1.bf16.msra.mxu0 %v9423_v61  ;;  %2011 = vmatpush1.bf16.msra.mxu1 %v9424_v62  ;;  %v9443_v61 = vld [vmem:[#allocation57_spill] sm:$0xff]  ;;  %v9444_v62 = vld [vmem:[#allocation58_spill] sm:$0xff] }
 0x2e1   :  { %1971 = vmatprep.subr.bf16.mxu0 %v9425_v63  ;;  %2012 = vmatprep.subr.bf16.mxu1 %v9426_v20  ;;  %v9445_v63 = vld [vmem:[#allocation59_spill] sm:$0xff]  ;;  %v9446_v20 = vld [vmem:[#allocation60_spill] sm:$0xff] }
 0x2e4   :  { %1972 = vmatpush1.bf16.msra.mxu0 %v9427_v30  ;;  %2013 = vmatpush1.bf16.msra.mxu1 %v9428_v26  ;;  %v9447_v30 = vld [vmem:[#allocation61_spill] sm:$0xff]  ;;  %v9448_v26 = vld [vmem:[#allocation62_spill] sm:$0xff] }
 0x2e5   :  { %1973 = vmatprep.subr.bf16.mxu0 %v9429_v48  ;;  %2014 = vmatprep.subr.bf16.mxu1 %v9430_v18  ;;  %v9449_v48 = vld [vmem:[#allocation63_spill] sm:$0xff]  ;;  %v9450_v18 = vld [vmem:[#allocation64_spill] sm:$0xff] }
 0x2e8   :  { %1974 = vmatpush1.bf16.msra.mxu0 %v9431_v19  ;;  %2015 = vmatpush1.bf16.msra.mxu1 %v9432_v10  ;;  %v9451_v19 = vld [vmem:[#allocation111_spill] sm:$0xff]  ;;  %v9452_v10 = vld [vmem:[#allocation65_spill] sm:$0xff] }
 0x2e9   :  { %1975 = vmatprep.subr.bf16.mxu0 %v9433_v14  ;;  %2016 = vmatprep.subr.bf16.mxu1 %v9434_v42  ;;  %v9453_v14 = vld [vmem:[#allocation66_spill] sm:$0xff]  ;;  %v9454_v42 = vld [vmem:[#allocation67_spill] sm:$0xff] }
 0x2ec   :  { %1976 = vmatpush1.bf16.msra.mxu0 %v9435_v45  ;;  %2017 = vmatpush1.bf16.msra.mxu1 %v9436_v50  ;;  %v9455_v45 = vld [vmem:[#allocation68_spill] sm:$0xff]  ;;  %v9456_v50 = vld [vmem:[#allocation69_spill] sm:$0xff] }
 0x2ed   :  { %1977 = vmatprep.subr.bf16.mxu0 %v9437_v51  ;;  %2018 = vmatprep.subr.bf16.mxu1 %v9438_v52  ;;  %v9457_v51 = vld [vmem:[#allocation70_spill] sm:$0xff]  ;;  %v9458_v52 = vld [vmem:[#allocation71_spill] sm:$0xff] }
 0x2f0   :  { %1978 = vmatpush1.bf16.msra.mxu0 %v9439_v3  ;;  %2019 = vmatpush1.bf16.msra.mxu1 %v9440_v54  ;;  %v9459_v3 = vld [vmem:[#allocation72_spill] sm:$0xff]  ;;  %v9460_v54 = vld [vmem:[#allocation73_spill] sm:$0xff] }
 0x2f1   :  { %1979 = vmatprep.subr.bf16.mxu0 %v9441_v40  ;;  %2020 = vmatprep.subr.bf16.mxu1 %v9442_v60  ;;  %v9461_v40 = vld [vmem:[#allocation74_spill] sm:$0xff]  ;;  %v9462_v60 = vld [vmem:[#allocation75_spill] sm:$0xff] }
 0x2f4   :  { %1980 = vmatpush1.bf16.msra.mxu0 %v9443_v61  ;;  %2021 = vmatpush1.bf16.msra.mxu1 %v9444_v62  ;;  %v9463_v61 = vld [vmem:[#allocation76_spill] sm:$0xff]  ;;  %v9464_v62 = vld [vmem:[#allocation77_spill] sm:$0xff] }
 0x2f5   :  { %1981 = vmatprep.subr.bf16.mxu0 %v9445_v63  ;;  %2022 = vmatprep.subr.bf16.mxu1 %v9446_v20  ;;  %v9465_v63 = vld [vmem:[#allocation78_spill] sm:$0xff]  ;;  %v9467_v20 = vld [vmem:[#allocation80_spill] sm:$0xff] }
 0x2f8   :  { %1982 = vmatpush1.bf16.msra.mxu0 %v9447_v30  ;;  %2023 = vmatpush1.bf16.msra.mxu1 %v9448_v26  ;;  %v9468_v30 = vld [vmem:[#allocation82_spill] sm:$0xff]  ;;  %v9469_v26 = vld [vmem:[#allocation83_spill] sm:$0xff] }
 0x2f9   :  { %2033 = vmatprep.subr.bf16.mxu0 %v9449_v48  ;;  %2074 = vmatprep.subr.bf16.mxu1 %v9450_v18 }
 0x2fb   :  { %1984 = vmatmul.mubr.bf16.vlgmr.msra.gmra.mrb[40].mxu0 %v9451_v19  ;;  %2025 = vmatmul.mubr.bf16.vlgmr.msra.gmra.mrb[40].mxu1 %v9451_v19 }
 0x2fc   :  { %2034 = vmatpush1.bf16.msra.mxu0 %v9452_v10  ;;  %2075 = vmatpush1.bf16.msra.mxu1 %v9453_v14 }
 0x2fd   :  { %2035 = vmatprep.subr.bf16.mxu0 %v9454_v42  ;;  %2076 = vmatprep.subr.bf16.mxu1 %v9455_v45 }
 0x2fe   :  { %2065 = vmatprep.mubr.bf16.mxu0 %v6782_v8  ;;  %2106 = vmatprep.mubr.bf16.mxu1 %v6782_v8  ;;  %v9466_v8 = vld [vmem:[#allocation79_spill] sm:$0xff] }
 0x300   :  { %2036 = vmatpush1.bf16.msra.mxu0 %v9456_v50  ;;  %2077 = vmatpush1.bf16.msra.mxu1 %v9457_v51 }
 0x301   :  { %2037 = vmatprep.subr.bf16.mxu0 %v9458_v52  ;;  %2078 = vmatprep.subr.bf16.mxu1 %v9459_v3 }
 0x304   :  { %2038 = vmatpush1.bf16.msra.mxu0 %v9460_v54  ;;  %2079 = vmatpush1.bf16.msra.mxu1 %v9461_v40  ;;  %v7010_v40 = vld [vmem:[#allocation4 + $0xc8] ss:$16 sps:$4 sm:$0xff]  }
 0x305   :  { %2039 = vmatprep.subr.bf16.mxu0 %v9462_v60  ;;  %2080 = vmatprep.subr.bf16.mxu1 %v9463_v61  ;;  %v7012_v60 = vld [vmem:[#allocation4 + $0xe4] ss:$16 sps:$4 sm:$0xff]  }
 0x308   :  { %2040 = vmatpush1.bf16.msra.mxu0 %v9464_v62  ;;  %2081 = vmatpush1.bf16.msra.mxu1 %v9465_v63  ;;  %v7015_v62 = vld [vmem:[#allocation4 + $0xec] ss:$16 sps:$4 sm:$0xff]  }
 0x309   :  { %2041 = vmatprep.subr.bf16.mxu0 %v9466_v8  ;;  %2082 = vmatprep.subr.bf16.mxu1 %v9467_v20  ;;  %v7020_v8 = vld [vmem:[#allocation4 + $0xe0] ss:$16 sps:$4 sm:$0xff]   ;;  %v7024_v20 = vld [vmem:[#allocation4 + $0xe8] ss:$16 sps:$4 sm:$0xff]  }
 0x30c   :  { %2042 = vmatpush1.bf16.msra.mxu0 %v9306_v21  ;;  %2083 = vmatpush1.bf16.msra.mxu1 %v9468_v30  ;;  %v7026_v30 = vld [vmem:[#allocation4 + $0x104] ss:$16 sps:$4 sm:$0xff]  }
 0x30d   :  { %2043 = vmatprep.subr.bf16.mxu0 %v9469_v26  ;;  %2084 = vmatprep.subr.bf16.mxu1 %v9309_v5  ;;  %v7029_v26 = vld [vmem:[#allocation4 + $0x10c] ss:$16 sps:$4 sm:$0xff]  }
 0x30e   :  { %v1708_v48 = vpop.f32.mrb[28].mxu0  ;;  %v1749_v18 = vpop.f32.mrb[28].mxu1 }
 0x30f   :  { %v1710_v10 = vpop.f32.mrb[29].mxu0  ;;  %v1751_v42 = vpop.f32.mrb[29].mxu1 }
 0x310   :  { %v1762_v14 = vmax.f32 %v1708_v48, %v1710_v10  ;;  %v1712_v45 = vpop.f32.mrb[30].mxu0  ;;  %2044 = vmatpush1.bf16.msra.mxu0 %v9223_v23  ;;  %v1763_v50 = vmax.f32 %v1749_v18, %v1751_v42  ;;  %v1753_v51 = vpop.f32.mrb[30].mxu1  ;;  %2085 = vmatpush1.bf16.msra.mxu1 %v9224_v22  ;;  %v6926_v23 = vld [vmem:[#allocation4 + $0x4] ss:$16 sps:$4 sm:$0xff]   ;;  %v7032_v48 = vld [vmem:[#allocation4 + $0x100] ss:$16 sps:$4 sm:$0xff]  }
 0x311   :  { %v1713_v52 = vpop.f32.mrb[31].mxu0  ;;  %2045 = vmatprep.subr.bf16.mxu0 %v9225_v36  ;;  %v1754_v21 = vpop.f32.mrb[31].mxu1  ;;  %2086 = vmatprep.subr.bf16.mxu1 %v9226_v12  ;;  %v9471_v12 = vld [vmem:[#allocation104_spill] sm:$0xff]  ;;  %v7038_v10 = vld [vmem:[#allocation4 + $0x124] ss:$16 sps:$4 sm:$0xff]  }
 0x312   :  { %v6882_v3 = vmax.f32 %v1762_v14, %v1763_v50  ;;  %v6979_v36 = vld [vmem:[#allocation4 + $0x8c] ss:$16 sps:$4 sm:$0xff]   ;;  %v7036_v18 = vld [vmem:[#allocation4 + $0x108] ss:$16 sps:$4 sm:$0xff]   ;;  %v7044_v42 = vld [vmem:[#allocation4 + $0x120] ss:$16 sps:$4 sm:$0xff]  }
 0x313   :  { %v7041_v14 = vld [vmem:[#allocation4 + $0x12c] ss:$16 sps:$4 sm:$0xff]   ;;  %v7048_v45 = vld [vmem:[#allocation4 + $0x128] ss:$16 sps:$4 sm:$0xff]   ;;  %v7050_v50 = vld [vmem:[#allocation4 + $0x144] ss:$16 sps:$4 sm:$0xff]  }
 0x314   :  { %9470 = vst [vmem:[#allocation86_spill] sm:$0xff] %v6882_v3  ;;  %2046 = vmatpush1.bf16.msra.mxu0 %v9228_v17  ;;  %2087 = vmatpush1.bf16.msra.mxu1 %v9229_v11  ;;  %v6918_v11 = vld [vmem:[%s8446_s2] ss:$0 sm:$0xff]  ;;  %v7053_v51 = vld [vmem:[#allocation4 + $0x14c] ss:$16 sps:$4 sm:$0xff]  }
 0x315   :  { %2047 = vmatprep.subr.bf16.mxu0 %v9230_v29  ;;  %2088 = vmatprep.subr.bf16.mxu1 %v9231_v28  ;;  %v1226_v22 = vadd.f32 %v6918_v11, %v9471_v12  ;;  %v6982_v17 = vld [vmem:[#allocation4 + $0x80] ss:$16 sps:$4 sm:$0xff]   ;;  %v6986_v29 = vld [vmem:[#allocation4 + $0x88] ss:$16 sps:$4 sm:$0xff]   ;;  %v6988_v28 = vld [vmem:[#allocation4 + $0xa4] ss:$16 sps:$4 sm:$0xff]  }
 0x316   :  { %v7056_v52 = vld [vmem:[#allocation4 + $0x140] ss:$16 sps:$4 sm:$0xff]   ;;  %v7060_v21 = vld [vmem:[#allocation4 + $0x148] ss:$16 sps:$4 sm:$0xff]   ;;  %v7062_v12 = vld [vmem:[#allocation4 + $0x164] ss:$16 sps:$4 sm:$0xff]  }
 0x317   :  { %v7112_v3 = vld [vmem:[#allocation4 + $0x1e4] ss:$16 sps:$4 sm:$0xff]  }
 0x318   :  { %2048 = vmatpush1.bf16.msra.mxu0 %v9232_v44  ;;  %2089 = vmatpush1.bf16.msra.mxu1 %v9311_v6  ;;  %v6991_v44 = vld [vmem:[#allocation4 + $0xac] ss:$16 sps:$4 sm:$0xff]   ;;  %9491 = vst [vmem:[#allocation102_spill] sm:$0xff] %v7112_v3 }
 0x319   :  { %2049 = vmatprep.subr.bf16.mxu0 %v9234_v15  ;;  %2090 = vmatprep.subr.bf16.mxu1 %v9235_v35  ;;  %v6998_v15 = vld [vmem:[#allocation4 + $0xa8] ss:$16 sps:$4 sm:$0xff]   ;;  %v7000_v35 = vld [vmem:[#allocation4 + $0xc4] ss:$16 sps:$4 sm:$0xff]  }
 0x31c   :  { %2050 = vmatpush1.bf16.msra.mxu0 %v9236_v37  ;;  %2091 = vmatpush1.bf16.msra.mxu1 %v9237_v27  ;;  %v7003_v27 = vld [vmem:[#allocation4 + $0xcc] ss:$16 sps:$4 sm:$0xff]  }
 0x31d   :  { %2051 = vmatprep.subr.bf16.mxu0 %v9238_v43  ;;  %2092 = vmatprep.subr.bf16.mxu1 %v9239_v57 }
 0x320   :  { %2052 = vmatpush1.bf16.msra.mxu0 %v9240_v34  ;;  %2093 = vmatpush1.bf16.msra.mxu1 %v9160_v41  ;;  %v6932_v41 = vld [vmem:[#allocation4] ss:$16 sps:$4 sm:$0xff]   ;;  %v6976_v34 = vld [vmem:[#allocation4 + $0x84] ss:$16 sps:$4 sm:$0xff]  }
 0x321   :  { %2053 = vmatprep.subr.bf16.mxu0 %v9161_v13  ;;  %2094 = vmatprep.subr.bf16.mxu1 %v9162_v46  ;;  %v6962_v13 = vld [vmem:[#allocation4 + $0x48] ss:$16 sps:$4 sm:$0xff]   ;;  %v6964_v46 = vld [vmem:[#allocation4 + $0x64] ss:$16 sps:$4 sm:$0xff]  }
 0x324   :  { %2054 = vmatpush1.bf16.msra.mxu0 %v9241_v24  ;;  %2095 = vmatpush1.bf16.msra.mxu1 %v9164_v39  ;;  %v9472_v39 = vld [vmem:[#allocation116_spill] sm:$0xff]  ;;  %v6994_v24 = vld [vmem:[#allocation4 + $0xa0] ss:$16 sps:$4 sm:$0xff]  }
 0x325   :  { %2055 = vmatprep.subr.bf16.mxu0 %v9165_v32  ;;  %2096 = vmatprep.subr.bf16.mxu1 %v9312_v7  ;;  %v6970_v32 = vld [vmem:[#allocation4 + $0x60] ss:$16 sps:$4 sm:$0xff]  }
 0x328   :  { %2056 = vmatpush1.bf16.msra.mxu0 %v9167_v25  ;;  %2097 = vmatpush1.bf16.msra.mxu1 %v9168_v38  ;;  %v6929_v25 = vld [vmem:[#allocation4 + $0xc] ss:$16 sps:$4 sm:$0xff]   ;;  %v1227_v38 = vmax.f32 %v1226_v22, 0.0 }
 0x329   :  { %2057 = vmatprep.subr.bf16.mxu0 %v9169_v49  ;;  %2098 = vmatprep.subr.bf16.mxu1 %v9170_v53  ;;  %v6958_v53 = vld [vmem:[#allocation4 + $0x40] ss:$16 sps:$4 sm:$0xff]   ;;  %v6967_v49 = vld [vmem:[#allocation4 + $0x6c] ss:$16 sps:$4 sm:$0xff]  }
 0x32a   :  { %v7065_v22 = vld [vmem:[#allocation4 + $0x16c] ss:$16 sps:$4 sm:$0xff]  }
 0x32b   :  { %9475 = vst [vmem:[#allocation88_spill] sm:$0xff] %v7065_v22 }
 0x32c   :  { %2058 = vmatpush1.bf16.msra.mxu0 %v6150_v59  ;;  %2099 = vmatpush1.bf16.msra.mxu1 %v6154_v2  ;;  %v6936_v59 = vld [vmem:[#allocation4 + $0x8] ss:$16 sps:$4 sm:$0xff]   ;;  %v6939_v2 = vld [vmem:[#allocation4 + $0x24] ss:$16 sps:$4 sm:$0xff]  }
 0x32d   :  { %2059 = vmatprep.subr.bf16.mxu0 %v6156_v4  ;;  %2100 = vmatprep.subr.bf16.mxu1 %v9313_v47  ;;  %v1228_v4 = vpack.c.bf16 %v1227_v38, %v1227_v38  ;;  %v7006_v47 = vld [vmem:[#allocation4 + $0xc0] ss:$16 sps:$4 sm:$0xff]  }
 0x32e   :  { %v7068_v38 = vld [vmem:[#allocation4 + $0x160] ss:$16 sps:$4 sm:$0xff]  }
 0x32f   :  { %9476 = vst [vmem:[#allocation89_spill] sm:$0xff] %v7068_v38 }
 0x330   :  { %2060 = vmatpush1.bf16.msra.mxu0 %v6162_v31  ;;  %2101 = vmatpush1.bf16.msra.mxu1 %v6166_v0  ;;  %v6942_v31 = vld [vmem:[#allocation4 + $0x2c] ss:$16 sps:$4 sm:$0xff]   ;;  %v6946_v0 = vld [vmem:[#allocation4 + $0x20] ss:$16 sps:$4 sm:$0xff]  }
 0x331   :  { %2061 = vmatprep.subr.bf16.mxu0 %v9242_v16  ;;  %2102 = vmatprep.subr.bf16.mxu1 %v6171_v55  ;;  %v9473_v55 = vld [vmem:[#allocation117_spill] sm:$0xff]  ;;  %v6974_v16 = vld [vmem:[#allocation4 + $0x68] ss:$16 sps:$4 sm:$0xff]  }
 0x334   :  { %2062 = vmatpush1.bf16.msra.mxu0 %v6174_v58  ;;  %2103 = vmatpush1.bf16.msra.mxu1 %v9314_v9  ;;  %v6949_v58 = vld [vmem:[#allocation4 + $0x28] ss:$16 sps:$4 sm:$0xff]  }
 0x335   :  { %2063 = vmatprep.subr.bf16.mxu0 %v6180_v33  ;;  %2104 = vmatprep.subr.bf16.mxu1 %v6183_v56  ;;  %v6951_v33 = vld [vmem:[#allocation4 + $0x44] ss:$16 sps:$4 sm:$0xff]   ;;  %v6954_v56 = vld [vmem:[#allocation4 + $0x4c] ss:$16 sps:$4 sm:$0xff]  }
 0x338   :  { %2064 = vmatpush1.bf16.msra.mxu0 %v9472_v39  ;;  %2105 = vmatpush1.bf16.msra.mxu1 %v9473_v55  ;;  %v7072_v39 = vld [vmem:[#allocation4 + $0x168] ss:$16 sps:$4 sm:$0xff]   ;;  %v7074_v55 = vld [vmem:[#allocation4 + $0x184] ss:$16 sps:$4 sm:$0xff]  }
 0x339   :  { %3087 = vmatprep.subr.bf16.mxu0 %v6926_v23  ;;  %3210 = vmatprep.subr.bf16.mxu1 %v6929_v25  ;;  %9477 = vst [vmem:[#allocation90_spill] sm:$0xff] %v7072_v39  ;;  %9478 = vst [vmem:[#allocation91_spill] sm:$0xff] %v7074_v55 }
 0x33b   :  { %2066 = vmatmul.mubr.bf16.vlgmr.msra.gmra.mrb[44].mxu0 %v9451_v19  ;;  %2107 = vmatmul.mubr.bf16.vlgmr.msra.gmra.mrb[44].mxu1 %v9451_v19 }
 0x33c   :  { %3088 = vmatpush1.bf16.msra.mxu0 %v6932_v41  ;;  %3119 = vmatprep.mubr.bf16.mxu0 %v1228_v4 }
 0x33d   :  { %3211 = vmatpush1.bf16.msra.mxu1 %v6936_v59  ;;  %3242 = vmatprep.mubr.bf16.mxu1 %v1228_v4  ;;  %v7077_v4 = vld [vmem:[#allocation4 + $0x18c] ss:$16 sps:$4 sm:$0xff]  }
 0x33e   :  { %3089 = vmatprep.subr.bf16.mxu0 %v6939_v2  ;;  %3212 = vmatprep.subr.bf16.mxu1 %v6942_v31  ;;  %9479 = vst [vmem:[#allocation92_spill] sm:$0xff] %v7077_v4 }
 0x340   :  { %3090 = vmatpush1.bf16.msra.mxu0 %v6946_v0 }
 0x341   :  { %3213 = vmatpush1.bf16.msra.mxu1 %v6949_v58  ;;  %3091 = vmatprep.subr.bf16.mxu0 %v6951_v33 }
 0x342   :  { %3214 = vmatprep.subr.bf16.mxu1 %v6954_v56 }
 0x344   :  { %3092 = vmatpush1.bf16.msra.mxu0 %v6958_v53 }
 0x345   :  { %3215 = vmatpush1.bf16.msra.mxu1 %v6962_v13  ;;  %3093 = vmatprep.subr.bf16.mxu0 %v6964_v46 }
 0x346   :  { %3216 = vmatprep.subr.bf16.mxu1 %v6967_v49 }
 0x348   :  { %3094 = vmatpush1.bf16.msra.mxu0 %v6970_v32 }
 0x349   :  { %3217 = vmatpush1.bf16.msra.mxu1 %v6974_v16  ;;  %3095 = vmatprep.subr.bf16.mxu0 %v6976_v34 }
 0x34a   :  { %3218 = vmatprep.subr.bf16.mxu1 %v6979_v36 }
 0x34c   :  { %3096 = vmatpush1.bf16.msra.mxu0 %v6982_v17 }
 0x34d   :  { %3219 = vmatpush1.bf16.msra.mxu1 %v6986_v29  ;;  %3097 = vmatprep.subr.bf16.mxu0 %v6988_v28 }
 0x34e   :  { %v1805_v37 = vpop.f32.mrb[32].mxu0  ;;  %3220 = vmatprep.subr.bf16.mxu1 %v6991_v44  ;;  %v1846_v43 = vpop.f32.mrb[32].mxu1 }
 0x34f   :  { %v1807_v57 = vpop.f32.mrb[33].mxu0  ;;  %v1848_v6 = vpop.f32.mrb[33].mxu1 }
 0x350   :  { %v1935_v5 = vmax.f32 %v1805_v37, %v1807_v57  ;;  %v1809_v7 = vpop.f32.mrb[34].mxu0  ;;  %3098 = vmatpush1.bf16.msra.mxu0 %v6994_v24  ;;  %v1936_v9 = vmax.f32 %v1846_v43, %v1848_v6  ;;  %v1850_v19 = vpop.f32.mrb[34].mxu1  ;;  %v7080_v37 = vld [vmem:[#allocation4 + $0x180] ss:$16 sps:$4 sm:$0xff]   ;;  %v7084_v43 = vld [vmem:[#allocation4 + $0x188] ss:$16 sps:$4 sm:$0xff]  }
 0x351   :  { %3221 = vmatpush1.bf16.msra.mxu1 %v6998_v15  ;;  %v1810_v54 = vpop.f32.mrb[35].mxu0  ;;  %3099 = vmatprep.subr.bf16.mxu0 %v7000_v35  ;;  %v1851_v61 = vpop.f32.mrb[35].mxu1  ;;  %9480 = vst [vmem:[#allocation93_spill] sm:$0xff] %v7080_v37  ;;  %9481 = vst [vmem:[#allocation95_spill] sm:$0xff] %v7084_v43  ;;  %v7086_v57 = vld [vmem:[#allocation4 + $0x1a4] ss:$16 sps:$4 sm:$0xff]  }
 0x352   :  { %3222 = vmatprep.subr.bf16.mxu1 %v7003_v27  ;;  %v7017_v63 = vmax.f32 %v1935_v5, %v1936_v9  ;;  %9482 = vst [vmem:[#allocation96_spill] sm:$0xff] %v7086_v57  ;;  %v7089_v5 = vld [vmem:[#allocation4 + $0x1ac] ss:$16 sps:$4 sm:$0xff]   ;;  %v7092_v6 = vld [vmem:[#allocation4 + $0x1a0] ss:$16 sps:$4 sm:$0xff]  }
 0x353   :  { %9483 = vst [vmem:[#allocation97_spill] sm:$0xff] %v7089_v5  ;;  %9484 = vst [vmem:[#allocation98_spill] sm:$0xff] %v7092_v6  ;;  %v7096_v7 = vld [vmem:[#allocation4 + $0x1a8] ss:$16 sps:$4 sm:$0xff]   ;;  %v7098_v9 = vld [vmem:[#allocation4 + $0x1c4] ss:$16 sps:$4 sm:$0xff]  }
 0x354   :  { %9474 = vst [vmem:[#allocation87_spill] sm:$0xff] %v7017_v63  ;;  %3100 = vmatpush1.bf16.msra.mxu0 %v7006_v47  ;;  %9485 = vst [vmem:[#allocation99_spill] sm:$0xff] %v7096_v7  ;;  %v7101_v19 = vld [vmem:[#allocation4 + $0x1cc] ss:$16 sps:$4 sm:$0xff]   ;;  %v7104_v54 = vld [vmem:[#allocation4 + $0x1c0] ss:$16 sps:$4 sm:$0xff]  }
 0x355   :  { %3223 = vmatpush1.bf16.msra.mxu1 %v7010_v40  ;;  %3101 = vmatprep.subr.bf16.mxu0 %v7012_v60  ;;  %9486 = vst [vmem:[#allocation100_spill] sm:$0xff] %v7098_v9  ;;  %9487 = vst [vmem:[#allocation101_spill] sm:$0xff] %v7101_v19  ;;  %v9489_v61 = vld [vmem:[#allocation103_spill] sm:$0xff] }
 0x356   :  { %3224 = vmatprep.subr.bf16.mxu1 %v7015_v62  ;;  %9488 = vst [vmem:[#allocation105_spill] sm:$0xff] %v7104_v54  ;;  %v1220_v63 = vadd.f32 %v6918_v11, %v9489_v61 }
 0x358   :  { %3102 = vmatpush1.bf16.msra.mxu0 %v7020_v8  ;;  %v1221_v61 = vmax.f32 %v1220_v63, 0.0  ;;  %v7136_v63 = vld [vmem:[#allocation4 + $0x208] ss:$16 sps:$4 sm:$0xff]  }
 0x359   :  { %3225 = vmatpush1.bf16.msra.mxu1 %v7024_v20  ;;  %3103 = vmatprep.subr.bf16.mxu0 %v7026_v30  ;;  %9499 = vst [vmem:[#allocation106_spill] sm:$0xff] %v7136_v63 }
 0x35a   :  { %3226 = vmatprep.subr.bf16.mxu1 %v7029_v26 }
 0x35c   :  { %3104 = vmatpush1.bf16.msra.mxu0 %v7032_v48 }
 0x35d   :  { %3227 = vmatpush1.bf16.msra.mxu1 %v7036_v18  ;;  %3105 = vmatprep.subr.bf16.mxu0 %v7038_v10 }
 0x35e   :  { %3228 = vmatprep.subr.bf16.mxu1 %v7041_v14 }
 0x360   :  { %3106 = vmatpush1.bf16.msra.mxu0 %v7044_v42 }
 0x361   :  { %3229 = vmatpush1.bf16.msra.mxu1 %v7048_v45  ;;  %3107 = vmatprep.subr.bf16.mxu0 %v7050_v50 }
 0x362   :  { %3230 = vmatprep.subr.bf16.mxu1 %v7053_v51 }
 0x364   :  { %3108 = vmatpush1.bf16.msra.mxu0 %v7056_v52 }
 0x365   :  { %3231 = vmatpush1.bf16.msra.mxu1 %v7060_v21  ;;  %3109 = vmatprep.subr.bf16.mxu0 %v7062_v12 }
 0x366   :  { %3232 = vmatprep.subr.bf16.mxu1 %v7065_v22 }
 0x368   :  { %3110 = vmatpush1.bf16.msra.mxu0 %v7068_v38  ;;  %v7212_v38 = vld [vmem:[#allocation4 + $0x2c8] ss:$16 sps:$4 sm:$0xff]  }
 0x369   :  { %3233 = vmatpush1.bf16.msra.mxu1 %v7072_v39  ;;  %3111 = vmatprep.subr.bf16.mxu0 %v7074_v55  ;;  %v7208_v55 = vld [vmem:[#allocation4 + $0x2c0] ss:$16 sps:$4 sm:$0xff]   ;;  %9523 = vst [vmem:[#allocation31_spill] sm:$0xff] %v7212_v38 }
 0x36a   :  { %3234 = vmatprep.subr.bf16.mxu1 %v7077_v4  ;;  %9522 = vst [vmem:[#allocation30_spill] sm:$0xff] %v7208_v55 }
 0x36c   :  { %3112 = vmatpush1.bf16.msra.mxu0 %v7080_v37 }
 0x36d   :  { %3235 = vmatpush1.bf16.msra.mxu1 %v7084_v43  ;;  %3113 = vmatprep.subr.bf16.mxu0 %v7086_v57  ;;  %v9493_v57 = vld [vmem:[#allocation110_spill] sm:$0xff]  ;;  %v7120_v43 = vld [vmem:[#allocation4 + $0x1e0] ss:$16 sps:$4 sm:$0xff]  }
 0x36e   :  { %3236 = vmatprep.subr.bf16.mxu1 %v7089_v5  ;;  %v7115_v5 = vld [vmem:[#allocation4 + $0x1ec] ss:$16 sps:$4 sm:$0xff]   ;;  %9494 = vst [vmem:[#allocation84_spill] sm:$0xff] %v7120_v43 }
 0x36f   :  { %9492 = vst [vmem:[#allocation81_spill] sm:$0xff] %v7115_v5 }
 0x370   :  { %3114 = vmatpush1.bf16.msra.mxu0 %v7092_v6  ;;  %v1406_v6 = vadd.f32 %v6918_v11, %v9493_v57  ;;  %v7132_v57 = vld [vmem:[#allocation4 + $0x200] ss:$16 sps:$4 sm:$0xff]  }
 0x371   :  { %3237 = vmatpush1.bf16.msra.mxu1 %v7096_v7  ;;  %3115 = vmatprep.subr.bf16.mxu0 %v7098_v9  ;;  %v7124_v9 = vld [vmem:[#allocation4 + $0x1e8] ss:$16 sps:$4 sm:$0xff]   ;;  %v7126_v7 = vld [vmem:[#allocation4 + $0x204] ss:$16 sps:$4 sm:$0xff]   ;;  %9498 = vst [vmem:[#allocation115_spill] sm:$0xff] %v7132_v57 }
 0x372   :  { %3238 = vmatprep.subr.bf16.mxu1 %v7101_v19  ;;  %9495 = vst [vmem:[#allocation94_spill] sm:$0xff] %v7124_v9  ;;  %9496 = vst [vmem:[#allocation108_spill] sm:$0xff] %v7126_v7  ;;  %v7129_v19 = vld [vmem:[#allocation4 + $0x20c] ss:$16 sps:$4 sm:$0xff]   ;;  %v1407_v37 = vmax.f32 %v1406_v6, 0.0 }
 0x373   :  { %9497 = vst [vmem:[#allocation113_spill] sm:$0xff] %v7129_v19  ;;  %v7146_v6 = vld [vmem:[#allocation4 + $0x220] ss:$16 sps:$4 sm:$0xff]  }
 0x374   :  { %3116 = vmatpush1.bf16.msra.mxu0 %v7104_v54  ;;  %v1222_v54 = vpack.c.bf16 %v1221_v61, %v1221_v61  ;;  %9502 = vst [vmem:[#allocation11_spill] sm:$0xff] %v7146_v6  ;;  %v7150_v61 = vld [vmem:[#allocation4 + $0x228] ss:$16 sps:$4 sm:$0xff]  }
 0x375   :  { %3239 = vmatpush1.bf16.msra.mxu1 %v7110_v1  ;;  %3117 = vmatprep.subr.bf16.mxu0 %v7112_v3  ;;  %v7139_v3 = vld [vmem:[#allocation4 + $0x224] ss:$16 sps:$4 sm:$0xff]   ;;  %v7141_v1 = vpack.c.bf16 %v1407_v37, %v1407_v37  ;;  %9503 = vst [vmem:[#allocation10_spill] sm:$0xff] %v7150_v61  ;;  %v7156_v37 = vld [vmem:[#allocation4 + $0x24c] ss:$16 sps:$4 sm:$0xff]  }
 0x376   :  { %3240 = vmatprep.subr.bf16.mxu1 %v7115_v5  ;;  %9500 = vst [vmem:[#allocation107_spill] sm:$0xff] %v7139_v3  ;;  %v7143_v5 = vld [vmem:[#allocation4 + $0x22c] ss:$16 sps:$4 sm:$0xff]   ;;  %9505 = vst [vmem:[#allocation13_spill] sm:$0xff] %v7156_v37 }
 0x377   :  { %9501 = vst [vmem:[#allocation9_spill] sm:$0xff] %v7143_v5 }
 0x378   :  { %3118 = vmatpush1.bf16.msra.mxu0 %v7120_v43 }
 0x379   :  { %3241 = vmatpush1.bf16.msra.mxu1 %v7124_v9  ;;  %3128 = vmatprep.subr.bf16.mxu0 %v7126_v7  ;;  %v7152_v7 = vld [vmem:[#allocation4 + $0x244] ss:$16 sps:$4 sm:$0xff]  }
 0x37a   :  { %3251 = vmatprep.subr.bf16.mxu1 %v7129_v19  ;;  %9504 = vst [vmem:[#allocation12_spill] sm:$0xff] %v7152_v7  ;;  %v7169_v19 = vld [vmem:[#allocation4 + $0x26c] ss:$16 sps:$4 sm:$0xff]  }
 0x37b   :  { %3120 = vmatmul.mubr.bf16.vlgmr.msra.gmra.mrb[48].mxu0 %v1222_v54  ;;  %9509 = vst [vmem:[#allocation17_spill] sm:$0xff] %v7169_v19 }
 0x37c   :  { %3243 = vmatmul.mubr.bf16.vlgmr.msra.gmra.mrb[48].mxu1 %v1222_v54  ;;  %3129 = vmatpush1.bf16.msra.mxu0 %v7132_v57  ;;  %v7160_v54 = vld [vmem:[#allocation4 + $0x240] ss:$16 sps:$4 sm:$0xff]   ;;  %v7166_v57 = vld [vmem:[#allocation4 + $0x264] ss:$16 sps:$4 sm:$0xff]  }
 0x37d   :  { %3160 = vmatprep.mubr.bf16.mxu0 %v7141_v1  ;;  %3252 = vmatpush1.bf16.msra.mxu1 %v7136_v63  ;;  %9506 = vst [vmem:[#allocation14_spill] sm:$0xff] %v7160_v54  ;;  %v7164_v63 = vld [vmem:[#allocation4 + $0x248] ss:$16 sps:$4 sm:$0xff]   ;;  %9508 = vst [vmem:[#allocation16_spill] sm:$0xff] %v7166_v57 }
 0x37e   :  { %3283 = vmatprep.mubr.bf16.mxu1 %v7141_v1  ;;  %3130 = vmatprep.subr.bf16.mxu0 %v7139_v3  ;;  %9507 = vst [vmem:[#allocation15_spill] sm:$0xff] %v7164_v63  ;;  %v7172_v3 = vld [vmem:[#allocation4 + $0x260] ss:$16 sps:$4 sm:$0xff]  }
 0x37f   :  { %3253 = vmatprep.subr.bf16.mxu1 %v7143_v5  ;;  %9510 = vst [vmem:[#allocation18_spill] sm:$0xff] %v7172_v3  ;;  %v7205_v5 = vld [vmem:[#allocation4 + $0x2cc] ss:$16 sps:$4 sm:$0xff]  }
 0x380   :  { %3131 = vmatpush1.bf16.msra.mxu0 %v7146_v6  ;;  %v7176_v6 = vld [vmem:[#allocation4 + $0x268] ss:$16 sps:$4 sm:$0xff]   ;;  %9521 = vst [vmem:[#allocation29_spill] sm:$0xff] %v7205_v5 }
 0x381   :  { %3254 = vmatpush1.bf16.msra.mxu1 %v7150_v61  ;;  %3132 = vmatprep.subr.bf16.mxu0 %v7152_v7  ;;  %9511 = vst [vmem:[#allocation19_spill] sm:$0xff] %v7176_v6  ;;  %v7178_v61 = vld [vmem:[#allocation4 + $0x284] ss:$16 sps:$4 sm:$0xff]   ;;  %v7181_v7 = vld [vmem:[#allocation4 + $0x28c] ss:$16 sps:$4 sm:$0xff]  }
 0x382   :  { %3255 = vmatprep.subr.bf16.mxu1 %v7156_v37  ;;  %9512 = vst [vmem:[#allocation20_spill] sm:$0xff] %v7178_v61  ;;  %9513 = vst [vmem:[#allocation21_spill] sm:$0xff] %v7181_v7  ;;  %v7184_v37 = vld [vmem:[#allocation4 + $0x280] ss:$16 sps:$4 sm:$0xff]  }
 0x383   :  { %9514 = vst [vmem:[#allocation22_spill] sm:$0xff] %v7184_v37 }
 0x384   :  { %3133 = vmatpush1.bf16.msra.mxu0 %v7160_v54  ;;  %v7188_v54 = vld [vmem:[#allocation4 + $0x288] ss:$16 sps:$4 sm:$0xff]  }
 0x385   :  { %3256 = vmatpush1.bf16.msra.mxu1 %v7164_v63  ;;  %3134 = vmatprep.subr.bf16.mxu0 %v7166_v57  ;;  %9515 = vst [vmem:[#allocation23_spill] sm:$0xff] %v7188_v54  ;;  %v7190_v63 = vld [vmem:[#allocation4 + $0x2a4] ss:$16 sps:$4 sm:$0xff]   ;;  %v7193_v57 = vld [vmem:[#allocation4 + $0x2ac] ss:$16 sps:$4 sm:$0xff]  }
 0x386   :  { %3257 = vmatprep.subr.bf16.mxu1 %v7169_v19  ;;  %9516 = vst [vmem:[#allocation24_spill] sm:$0xff] %v7190_v63  ;;  %9517 = vst [vmem:[#allocation25_spill] sm:$0xff] %v7193_v57  ;;  %v7196_v19 = vld [vmem:[#allocation4 + $0x2a0] ss:$16 sps:$4 sm:$0xff]  }
 0x387   :  { %9518 = vst [vmem:[#allocation26_spill] sm:$0xff] %v7196_v19 }
 0x388   :  { %3135 = vmatpush1.bf16.msra.mxu0 %v7172_v3  ;;  %v7200_v3 = vld [vmem:[#allocation4 + $0x2a8] ss:$16 sps:$4 sm:$0xff]  }
 0x389   :  { %3258 = vmatpush1.bf16.msra.mxu1 %v7176_v6  ;;  %3136 = vmatprep.subr.bf16.mxu0 %v7178_v61  ;;  %9519 = vst [vmem:[#allocation27_spill] sm:$0xff] %v7200_v3  ;;  %v7202_v6 = vld [vmem:[#allocation4 + $0x2c4] ss:$16 sps:$4 sm:$0xff]  }
 0x38a   :  { %3259 = vmatprep.subr.bf16.mxu1 %v7181_v7  ;;  %9520 = vst [vmem:[#allocation28_spill] sm:$0xff] %v7202_v6 }
 0x38c   :  { %3137 = vmatpush1.bf16.msra.mxu0 %v7184_v37 }
 0x38d   :  { %3260 = vmatpush1.bf16.msra.mxu1 %v7188_v54  ;;  %3138 = vmatprep.subr.bf16.mxu0 %v7190_v63 }
 0x38e   :  { %v1887_v61 = vpop.f32.mrb[36].mxu0  ;;  %3261 = vmatprep.subr.bf16.mxu1 %v7193_v57  ;;  %v1928_v7 = vpop.f32.mrb[36].mxu1  ;;  %v7214_v57 = vld [vmem:[#allocation4 + $0x2e4] ss:$16 sps:$4 sm:$0xff]  }
 0x38f   :  { %v1889_v9 = vpop.f32.mrb[37].mxu0  ;;  %v1930_v4 = vpop.f32.mrb[37].mxu1  ;;  %9524 = vst [vmem:[#allocation32_spill] sm:$0xff] %v7214_v57 }
 0x390   :  { %v1941_v43 = vmax.f32 %v1887_v61, %v1889_v9  ;;  %v1891_v37 = vpop.f32.mrb[38].mxu0  ;;  %3139 = vmatpush1.bf16.msra.mxu0 %v7196_v19  ;;  %v1942_v54 = vmax.f32 %v1928_v7, %v1930_v4  ;;  %v1932_v63 = vpop.f32.mrb[38].mxu1  ;;  %v7217_v9 = vld [vmem:[#allocation4 + $0x2ec] ss:$16 sps:$4 sm:$0xff]   ;;  %v7222_v4 = vld [vmem:[#allocation4 + $0x2e0] ss:$16 sps:$4 sm:$0xff]  }
 0x391   :  { %3262 = vmatpush1.bf16.msra.mxu1 %v7200_v3  ;;  %v1892_v39 = vpop.f32.mrb[39].mxu0  ;;  %3140 = vmatprep.subr.bf16.mxu0 %v7202_v6  ;;  %v1933_v22 = vpop.f32.mrb[39].mxu1  ;;  %9525 = vst [vmem:[#allocation33_spill] sm:$0xff] %v7217_v9  ;;  %9527 = vst [vmem:[#allocation35_spill] sm:$0xff] %v7222_v4  ;;  %v7228_v7 = vld [vmem:[#allocation4 + $0x304] ss:$16 sps:$4 sm:$0xff]  }
 0x392   :  { %3263 = vmatprep.subr.bf16.mxu1 %v7205_v5  ;;  %v7219_v61 = vmax.f32 %v1941_v43, %v1942_v54  ;;  %v7226_v39 = vld [vmem:[#allocation4 + $0x2e8] ss:$16 sps:$4 sm:$0xff]   ;;  %9529 = vst [vmem:[#allocation37_spill] sm:$0xff] %v7228_v7  ;;  %v7231_v22 = vld [vmem:[#allocation4 + $0x30c] ss:$16 sps:$4 sm:$0xff]  }
 0x393   :  { %9528 = vst [vmem:[#allocation36_spill] sm:$0xff] %v7226_v39  ;;  %9530 = vst [vmem:[#allocation38_spill] sm:$0xff] %v7231_v22  ;;  %v7234_v43 = vld [vmem:[#allocation4 + $0x300] ss:$16 sps:$4 sm:$0xff]   ;;  %v7238_v63 = vld [vmem:[#allocation4 + $0x308] ss:$16 sps:$4 sm:$0xff]  }
 0x394   :  { %9526 = vst [vmem:[#allocation34_spill] sm:$0xff] %v7219_v61  ;;  %3141 = vmatpush1.bf16.msra.mxu0 %v7208_v55  ;;  %9531 = vst [vmem:[#allocation39_spill] sm:$0xff] %v7234_v43  ;;  %v7240_v37 = vld [vmem:[#allocation4 + $0x324] ss:$16 sps:$4 sm:$0xff]   ;;  %v7243_v54 = vld [vmem:[#allocation4 + $0x32c] ss:$16 sps:$4 sm:$0xff]  }
 0x395   :  { %3264 = vmatpush1.bf16.msra.mxu1 %v7212_v38  ;;  %3142 = vmatprep.subr.bf16.mxu0 %v7214_v57  ;;  %9532 = vst [vmem:[#allocation40_spill] sm:$0xff] %v7238_v63  ;;  %9533 = vst [vmem:[#allocation41_spill] sm:$0xff] %v7240_v37  ;;  %v7246_v61 = vld [vmem:[#allocation4 + $0x320] ss:$16 sps:$4 sm:$0xff]   ;;  %v9560_v57 = vld [vmem:[#allocation118_spill] sm:$0xff] }
 0x396   :  { %3265 = vmatprep.subr.bf16.mxu1 %v7217_v9  ;;  %9534 = vst [vmem:[#allocation42_spill] sm:$0xff] %v7243_v54  ;;  %9535 = vst [vmem:[#allocation43_spill] sm:$0xff] %v7246_v61  ;;  %v9556_v9 = vld [vmem:[#allocation109_spill] sm:$0xff] }
 0x397   :  { %v7322_v38 = vld [vmem:[#allocation4 + $0x3e0] ss:$16 sps:$4 sm:$0xff]  }
 0x398   :  { %3143 = vmatpush1.bf16.msra.mxu0 %v7222_v4  ;;  %v7250_v4 = vld [vmem:[#allocation4 + $0x328] ss:$16 sps:$4 sm:$0xff]   ;;  %9561 = vst [vmem:[#allocation66_spill] sm:$0xff] %v7322_v38  ;;  %v7414_v3 = vld [vmem:[#allocation4 + $0x4c0] ss:$16 sps:$4 sm:$0xff]  }
 0x399   :  { %3266 = vmatpush1.bf16.msra.mxu1 %v7226_v39  ;;  %3144 = vmatprep.subr.bf16.mxu0 %v7228_v7  ;;  %9536 = vst [vmem:[#allocation44_spill] sm:$0xff] %v7250_v4  ;;  %v7252_v39 = vld [vmem:[#allocation4 + $0x344] ss:$16 sps:$4 sm:$0xff]   ;;  %v7255_v7 = vld [vmem:[#allocation4 + $0x34c] ss:$16 sps:$4 sm:$0xff]  }
 0x39a   :  { %3267 = vmatprep.subr.bf16.mxu1 %v7231_v22  ;;  %9537 = vst [vmem:[#allocation45_spill] sm:$0xff] %v7252_v39  ;;  %9538 = vst [vmem:[#allocation46_spill] sm:$0xff] %v7255_v7  ;;  %v7258_v22 = vld [vmem:[#allocation4 + $0x340] ss:$16 sps:$4 sm:$0xff]  }
 0x39b   :  { %9539 = vst [vmem:[#allocation47_spill] sm:$0xff] %v7258_v22 }
 0x39c   :  { %3145 = vmatpush1.bf16.msra.mxu0 %v7234_v43  ;;  %v7262_v43 = vld [vmem:[#allocation4 + $0x348] ss:$16 sps:$4 sm:$0xff]  }
 0x39d   :  { %3268 = vmatpush1.bf16.msra.mxu1 %v7238_v63  ;;  %3146 = vmatprep.subr.bf16.mxu0 %v7240_v37  ;;  %9540 = vst [vmem:[#allocation48_spill] sm:$0xff] %v7262_v43  ;;  %v7264_v63 = vld [vmem:[#allocation4 + $0x364] ss:$16 sps:$4 sm:$0xff]   ;;  %v7267_v37 = vld [vmem:[#allocation4 + $0x36c] ss:$16 sps:$4 sm:$0xff]  }
 0x39e   :  { %3269 = vmatprep.subr.bf16.mxu1 %v7243_v54  ;;  %9541 = vst [vmem:[#allocation49_spill] sm:$0xff] %v7264_v63  ;;  %9542 = vst [vmem:[#allocation50_spill] sm:$0xff] %v7267_v37  ;;  %v7270_v54 = vld [vmem:[#allocation4 + $0x360] ss:$16 sps:$4 sm:$0xff]  }
 0x39f   :  { %9543 = vst [vmem:[#allocation51_spill] sm:$0xff] %v7270_v54 }
 0x3a0   :  { %3147 = vmatpush1.bf16.msra.mxu0 %v7246_v61  ;;  %v7274_v61 = vld [vmem:[#allocation4 + $0x368] ss:$16 sps:$4 sm:$0xff]  }
 0x3a1   :  { %3270 = vmatpush1.bf16.msra.mxu1 %v7250_v4  ;;  %3148 = vmatprep.subr.bf16.mxu0 %v7252_v39  ;;  %9544 = vst [vmem:[#allocation52_spill] sm:$0xff] %v7274_v61  ;;  %v7276_v4 = vld [vmem:[#allocation4 + $0x384] ss:$16 sps:$4 sm:$0xff]   ;;  %v7279_v39 = vld [vmem:[#allocation4 + $0x38c] ss:$16 sps:$4 sm:$0xff]  }
 0x3a2   :  { %3271 = vmatprep.subr.bf16.mxu1 %v7255_v7  ;;  %9545 = vst [vmem:[#allocation53_spill] sm:$0xff] %v7276_v4  ;;  %9546 = vst [vmem:[#allocation54_spill] sm:$0xff] %v7279_v39  ;;  %v7282_v7 = vld [vmem:[#allocation4 + $0x380] ss:$16 sps:$4 sm:$0xff]  }
 0x3a3   :  { %9547 = vst [vmem:[#allocation55_spill] sm:$0xff] %v7282_v7 }
 0x3a4   :  { %3149 = vmatpush1.bf16.msra.mxu0 %v7258_v22  ;;  %v7286_v22 = vld [vmem:[#allocation4 + $0x388] ss:$16 sps:$4 sm:$0xff]  }
 0x3a5   :  { %3272 = vmatpush1.bf16.msra.mxu1 %v7262_v43  ;;  %3150 = vmatprep.subr.bf16.mxu0 %v7264_v63  ;;  %9548 = vst [vmem:[#allocation56_spill] sm:$0xff] %v7286_v22  ;;  %v7288_v43 = vld [vmem:[#allocation4 + $0x3a4] ss:$16 sps:$4 sm:$0xff]   ;;  %v7291_v63 = vld [vmem:[#allocation4 + $0x3ac] ss:$16 sps:$4 sm:$0xff]  }
 0x3a6   :  { %3273 = vmatprep.subr.bf16.mxu1 %v7267_v37  ;;  %9549 = vst [vmem:[#allocation57_spill] sm:$0xff] %v7288_v43  ;;  %9550 = vst [vmem:[#allocation58_spill] sm:$0xff] %v7291_v63  ;;  %v7294_v37 = vld [vmem:[#allocation4 + $0x3a0] ss:$16 sps:$4 sm:$0xff]  }
 0x3a7   :  { %9551 = vst [vmem:[#allocation59_spill] sm:$0xff] %v7294_v37 }
 0x3a8   :  { %3151 = vmatpush1.bf16.msra.mxu0 %v7270_v54  ;;  %v7298_v54 = vld [vmem:[#allocation4 + $0x3a8] ss:$16 sps:$4 sm:$0xff]  }
 0x3a9   :  { %3274 = vmatpush1.bf16.msra.mxu1 %v7274_v61  ;;  %3152 = vmatprep.subr.bf16.mxu0 %v7276_v4  ;;  %9552 = vst [vmem:[#allocation60_spill] sm:$0xff] %v7298_v54  ;;  %v7300_v61 = vld [vmem:[#allocation4 + $0x3c4] ss:$16 sps:$4 sm:$0xff]   ;;  %v7303_v4 = vld [vmem:[#allocation4 + $0x3cc] ss:$16 sps:$4 sm:$0xff]  }
 0x3aa   :  { %3275 = vmatprep.subr.bf16.mxu1 %v7279_v39  ;;  %9553 = vst [vmem:[#allocation61_spill] sm:$0xff] %v7300_v61  ;;  %9554 = vst [vmem:[#allocation62_spill] sm:$0xff] %v7303_v4  ;;  %v7306_v39 = vld [vmem:[#allocation4 + $0x3c0] ss:$16 sps:$4 sm:$0xff]  }
 0x3ab   :  { %9555 = vst [vmem:[#allocation63_spill] sm:$0xff] %v7306_v39 }
 0x3ac   :  { %3153 = vmatpush1.bf16.msra.mxu0 %v7282_v7  ;;  %v1400_v7 = vadd.f32 %v6918_v11, %v9556_v9 }
 0x3ad   :  { %3276 = vmatpush1.bf16.msra.mxu1 %v7286_v22  ;;  %3154 = vmatprep.subr.bf16.mxu0 %v7288_v43  ;;  %v7312_v43 = vld [vmem:[#allocation4 + $0x3c8] ss:$16 sps:$4 sm:$0xff]   ;;  %v7314_v22 = vld [vmem:[#allocation4 + $0x3e4] ss:$16 sps:$4 sm:$0xff]  }
 0x3ae   :  { %3277 = vmatprep.subr.bf16.mxu1 %v7291_v63  ;;  %9557 = vst [vmem:[#allocation64_spill] sm:$0xff] %v7312_v43  ;;  %9558 = vst [vmem:[#allocation111_spill] sm:$0xff] %v7314_v22  ;;  %v7317_v63 = vld [vmem:[#allocation4 + $0x3ec] ss:$16 sps:$4 sm:$0xff]   ;;  %v1401_v9 = vmax.f32 %v1400_v7, 0.0 }
 0x3af   :  { %9559 = vst [vmem:[#allocation65_spill] sm:$0xff] %v7317_v63  ;;  %v7340_v7 = vld [vmem:[#allocation4 + $0x408] ss:$16 sps:$4 sm:$0xff]  }
 0x3b0   :  { %3155 = vmatpush1.bf16.msra.mxu0 %v7294_v37  ;;  %v1585_v37 = vadd.f32 %v6918_v11, %v9560_v57  ;;  %v7334_v57 = vld [vmem:[#allocation4 + $0x400] ss:$16 sps:$4 sm:$0xff]   ;;  %9567 = vst [vmem:[#allocation72_spill] sm:$0xff] %v7340_v7 }
 0x3b1   :  { %3278 = vmatpush1.bf16.msra.mxu1 %v7298_v54  ;;  %3156 = vmatprep.subr.bf16.mxu0 %v7300_v61  ;;  %v7326_v61 = vld [vmem:[#allocation4 + $0x3e8] ss:$16 sps:$4 sm:$0xff]   ;;  %v7328_v54 = vld [vmem:[#allocation4 + $0x404] ss:$16 sps:$4 sm:$0xff]   ;;  %9565 = vst [vmem:[#allocation70_spill] sm:$0xff] %v7334_v57 }
 0x3b2   :  { %3279 = vmatprep.subr.bf16.mxu1 %v7303_v4  ;;  %9562 = vst [vmem:[#allocation67_spill] sm:$0xff] %v7326_v61  ;;  %9563 = vst [vmem:[#allocation68_spill] sm:$0xff] %v7328_v54  ;;  %v7331_v4 = vld [vmem:[#allocation4 + $0x40c] ss:$16 sps:$4 sm:$0xff]   ;;  %v1586_v55 = vmax.f32 %v1585_v37, 0.0 }
 0x3b3   :  { %9564 = vst [vmem:[#allocation69_spill] sm:$0xff] %v7331_v4  ;;  %v7348_v37 = vld [vmem:[#allocation4 + $0x42c] ss:$16 sps:$4 sm:$0xff]  }
 0x3b4   :  { %3157 = vmatpush1.bf16.msra.mxu0 %v7306_v39  ;;  %v7336_v39 = vpack.c.bf16 %v1401_v9, %v1401_v9  ;;  %9570 = vst [vmem:[#allocation75_spill] sm:$0xff] %v7348_v37  ;;  %v7352_v9 = vld [vmem:[#allocation4 + $0x420] ss:$16 sps:$4 sm:$0xff]  }
 0x3b5   :  { %3280 = vmatpush1.bf16.msra.mxu1 %v7312_v43  ;;  %3158 = vmatprep.subr.bf16.mxu0 %v7314_v22  ;;  %v7343_v22 = vld [vmem:[#allocation4 + $0x424] ss:$16 sps:$4 sm:$0xff]   ;;  %9571 = vst [vmem:[#allocation76_spill] sm:$0xff] %v7352_v9 }
 0x3b6   :  { %3281 = vmatprep.subr.bf16.mxu1 %v7317_v63  ;;  %9566 = vst [vmem:[#allocation71_spill] sm:$0xff] %v7336_v39  ;;  %9568 = vst [vmem:[#allocation73_spill] sm:$0xff] %v7343_v22  ;;  %v7345_v63 = vpack.c.bf16 %v1586_v55, %v1586_v55  ;;  %v7362_v55 = vld [vmem:[#allocation4 + $0x44c] ss:$16 sps:$4 sm:$0xff]  }
 0x3b7   :  { %9574 = vst [vmem:[#allocation79_spill] sm:$0xff] %v7362_v55 }
 0x3b8   :  { %3159 = vmatpush1.bf16.msra.mxu0 %v7322_v38  ;;  %9569 = vst [vmem:[#allocation74_spill] sm:$0xff] %v7345_v63  ;;  %v7375_v38 = vld [vmem:[#allocation4 + $0x46c] ss:$16 sps:$4 sm:$0xff]  }
 0x3b9   :  { %3282 = vmatpush1.bf16.msra.mxu1 %v7326_v61  ;;  %3169 = vmatprep.subr.bf16.mxu0 %v7328_v54  ;;  %v7356_v54 = vld [vmem:[#allocation4 + $0x428] ss:$16 sps:$4 sm:$0xff]   ;;  %v7372_v61 = vld [vmem:[#allocation4 + $0x464] ss:$16 sps:$4 sm:$0xff]   ;;  %9578 = vst [vmem:[#allocation104_spill] sm:$0xff] %v7375_v38 }
 0x3ba   :  { %3292 = vmatprep.subr.bf16.mxu1 %v7331_v4  ;;  %9572 = vst [vmem:[#allocation77_spill] sm:$0xff] %v7356_v54  ;;  %v7358_v4 = vld [vmem:[#allocation4 + $0x444] ss:$16 sps:$4 sm:$0xff]   ;;  %9577 = vst [vmem:[#allocation83_spill] sm:$0xff] %v7372_v61 }
 0x3bb   :  { %3161 = vmatmul.mubr.bf16.vlgmr.msra.gmra.mrb[48].mxu0 %v7336_v39  ;;  %9573 = vst [vmem:[#allocation78_spill] sm:$0xff] %v7358_v4 }
 0x3bc   :  { %3284 = vmatmul.mubr.bf16.vlgmr.msra.gmra.mrb[48].mxu1 %v7336_v39  ;;  %3170 = vmatpush1.bf16.msra.mxu0 %v7334_v57  ;;  %v7366_v57 = vld [vmem:[#allocation4 + $0x440] ss:$16 sps:$4 sm:$0xff]  }
 0x3bd   :  { %3201 = vmatprep.mubr.bf16.mxu0 %v7345_v63  ;;  %3293 = vmatpush1.bf16.msra.mxu1 %v7340_v7  ;;  %9575 = vst [vmem:[#allocation80_spill] sm:$0xff] %v7366_v57  ;;  %v7370_v7 = vld [vmem:[#allocation4 + $0x448] ss:$16 sps:$4 sm:$0xff]  }
 0x3be   :  { %3324 = vmatprep.mubr.bf16.mxu1 %v7345_v63  ;;  %3171 = vmatprep.subr.bf16.mxu0 %v7343_v22  ;;  %9576 = vst [vmem:[#allocation82_spill] sm:$0xff] %v7370_v7  ;;  %v7378_v22 = vld [vmem:[#allocation4 + $0x460] ss:$16 sps:$4 sm:$0xff]   ;;  %v7418_v63 = vld [vmem:[#allocation4 + $0x4c8] ss:$16 sps:$4 sm:$0xff]  }
 0x3bf   :  { %3294 = vmatprep.subr.bf16.mxu1 %v7348_v37  ;;  %9579 = vst [vmem:[#allocation116_spill] sm:$0xff] %v7378_v22  ;;  %v7411_v37 = vld [vmem:[#allocation4 + $0x4cc] ss:$16 sps:$4 sm:$0xff]  }
 0x3c0   :  { %3172 = vmatpush1.bf16.msra.mxu0 %v7352_v9  ;;  %v7382_v9 = vld [vmem:[#allocation4 + $0x468] ss:$16 sps:$4 sm:$0xff]  }
 0x3c1   :  { %3295 = vmatpush1.bf16.msra.mxu1 %v7356_v54  ;;  %3173 = vmatprep.subr.bf16.mxu0 %v7358_v4  ;;  %9580 = vst [vmem:[#allocation117_spill] sm:$0xff] %v7382_v9  ;;  %v7384_v54 = vld [vmem:[#allocation4 + $0x484] ss:$16 sps:$4 sm:$0xff]   ;;  %v7387_v4 = vld [vmem:[#allocation4 + $0x48c] ss:$16 sps:$4 sm:$0xff]  }
 0x3c2   :  { %3296 = vmatprep.subr.bf16.mxu1 %v7362_v55  ;;  %9581 = vst [vmem:[#allocation103_spill] sm:$0xff] %v7384_v54  ;;  %9582 = vst [vmem:[#allocation110_spill] sm:$0xff] %v7387_v4  ;;  %v7390_v55 = vld [vmem:[#allocation4 + $0x480] ss:$16 sps:$4 sm:$0xff]  }
 0x3c3   :  { %9583 = vst [vmem:[#allocation109_spill] sm:$0xff] %v7390_v55 }
 0x3c4   :  { %3174 = vmatpush1.bf16.msra.mxu0 %v7366_v57  ;;  %v7394_v57 = vld [vmem:[#allocation4 + $0x488] ss:$16 sps:$4 sm:$0xff]  }
 0x3c5   :  { %3297 = vmatpush1.bf16.msra.mxu1 %v7370_v7  ;;  %3175 = vmatprep.subr.bf16.mxu0 %v7372_v61  ;;  %9584 = vst [vmem:[#allocation118_spill] sm:$0xff] %v7394_v57  ;;  %v7396_v7 = vld [vmem:[#allocation4 + $0x4a4] ss:$16 sps:$4 sm:$0xff]   ;;  %v7399_v61 = vld [vmem:[#allocation4 + $0x4ac] ss:$16 sps:$4 sm:$0xff]  }
 0x3c6   :  { %3298 = vmatprep.subr.bf16.mxu1 %v7375_v38  ;;  %9585 = vst [vmem:[#allocation119_spill] sm:$0xff] %v7396_v7  ;;  %9586 = vst [vmem:[#allocation120_spill] sm:$0xff] %v7399_v61  ;;  %v7402_v38 = vld [vmem:[#allocation4 + $0x4a0] ss:$16 sps:$4 sm:$0xff]  }
 0x3c8   :  { %3176 = vmatpush1.bf16.msra.mxu0 %v7378_v22  ;;  %v7406_v22 = vld [vmem:[#allocation4 + $0x4a8] ss:$16 sps:$4 sm:$0xff]  }
 0x3c9   :  { %3299 = vmatpush1.bf16.msra.mxu1 %v7382_v9  ;;  %3177 = vmatprep.subr.bf16.mxu0 %v7384_v54  ;;  %v7408_v9 = vld [vmem:[#allocation4 + $0x4c4] ss:$16 sps:$4 sm:$0xff]  }
 0x3ca   :  { %3300 = vmatprep.subr.bf16.mxu1 %v7387_v4 }
 0x3cc   :  { %3178 = vmatpush1.bf16.msra.mxu0 %v7390_v55 }
 0x3cd   :  { %3301 = vmatpush1.bf16.msra.mxu1 %v7394_v57  ;;  %3179 = vmatprep.subr.bf16.mxu0 %v7396_v7 }
 0x3ce   :  { %v1985_v54 = vpop.f32.mrb[40].mxu0  ;;  %3302 = vmatprep.subr.bf16.mxu1 %v7399_v61  ;;  %v2026_v4 = vpop.f32.mrb[40].mxu1  ;;  %v7420_v61 = vld [vmem:[#allocation4 + $0x4e4] ss:$16 sps:$4 sm:$0xff]  }
 0x3cf   :  { %v1987_v43 = vpop.f32.mrb[41].mxu0  ;;  %v2028_v6 = vpop.f32.mrb[41].mxu1  ;;  %9587 = vst [vmem:[#allocation121_spill] sm:$0xff] %v7420_v61 }
 0x3d0   :  { %v2115_v5 = vmax.f32 %v1985_v54, %v1987_v43  ;;  %v1989_v55 = vpop.f32.mrb[42].mxu0  ;;  %3180 = vmatpush1.bf16.msra.mxu0 %v7402_v38  ;;  %v2116_v57 = vmax.f32 %v2026_v4, %v2028_v6  ;;  %v2030_v7 = vpop.f32.mrb[42].mxu1  ;;  %v7423_v43 = vld [vmem:[#allocation4 + $0x4ec] ss:$16 sps:$4 sm:$0xff]   ;;  %v7428_v6 = vld [vmem:[#allocation4 + $0x4e0] ss:$16 sps:$4 sm:$0xff]  }
 0x3d1   :  { %3303 = vmatpush1.bf16.msra.mxu1 %v7406_v22  ;;  %v1990_v19 = vpop.f32.mrb[43].mxu0  ;;  %3181 = vmatprep.subr.bf16.mxu0 %v7408_v9  ;;  %v2031_v39 = vpop.f32.mrb[43].mxu1  ;;  %9588 = vst [vmem:[#allocation122_spill] sm:$0xff] %v7423_v43  ;;  %9590 = vst [vmem:[#allocation124_spill] sm:$0xff] %v7428_v6  ;;  %v7434_v4 = vld [vmem:[#allocation4 + $0x504] ss:$16 sps:$4 sm:$0xff]  }
 0x3d2   :  { %3304 = vmatprep.subr.bf16.mxu1 %v7411_v37  ;;  %v7425_v54 = vmax.f32 %v2115_v5, %v2116_v57  ;;  %v7432_v19 = vld [vmem:[#allocation4 + $0x4e8] ss:$16 sps:$4 sm:$0xff]   ;;  %9592 = vst [vmem:[#allocation126_spill] sm:$0xff] %v7434_v4  ;;  %v7437_v39 = vld [vmem:[#allocation4 + $0x50c] ss:$16 sps:$4 sm:$0xff]  }
 0x3d3   :  { %9591 = vst [vmem:[#allocation125_spill] sm:$0xff] %v7432_v19  ;;  %9593 = vst [vmem:[#allocation127_spill] sm:$0xff] %v7437_v39  ;;  %v7440_v5 = vld [vmem:[#allocation4 + $0x500] ss:$16 sps:$4 sm:$0xff]   ;;  %v7444_v57 = vld [vmem:[#allocation4 + $0x508] ss:$16 sps:$4 sm:$0xff]  }
 0x3d4   :  { %9589 = vst [vmem:[#allocation123_spill] sm:$0xff] %v7425_v54  ;;  %3182 = vmatpush1.bf16.msra.mxu0 %v7414_v3  ;;  %9594 = vst [vmem:[#allocation128_spill] sm:$0xff] %v7440_v5  ;;  %v7446_v7 = vld [vmem:[#allocation4 + $0x524] ss:$16 sps:$4 sm:$0xff]   ;;  %v7449_v55 = vld [vmem:[#allocation4 + $0x52c] ss:$16 sps:$4 sm:$0xff]  }
 0x3d5   :  { %3305 = vmatpush1.bf16.msra.mxu1 %v7418_v63  ;;  %3183 = vmatprep.subr.bf16.mxu0 %v7420_v61  ;;  %9595 = vst [vmem:[#allocation129_spill] sm:$0xff] %v7444_v57  ;;  %9596 = vst [vmem:[#allocation130_spill] sm:$0xff] %v7446_v7  ;;  %v7452_v54 = vld [vmem:[#allocation4 + $0x520] ss:$16 sps:$4 sm:$0xff]  }
 0x3d6   :  { %3306 = vmatprep.subr.bf16.mxu1 %v7423_v43  ;;  %9597 = vst [vmem:[#allocation131_spill] sm:$0xff] %v7449_v55  ;;  %9598 = vst [vmem:[#allocation132_spill] sm:$0xff] %v7452_v54  ;;  %v9618_v43 = vld [vmem:[#allocation112_spill] sm:$0xff] }
 0x3d8   :  { %3184 = vmatpush1.bf16.msra.mxu0 %v7428_v6  ;;  %v7456_v6 = vld [vmem:[#allocation4 + $0x528] ss:$16 sps:$4 sm:$0xff]  }
 0x3d9   :  { %3307 = vmatpush1.bf16.msra.mxu1 %v7432_v19  ;;  %3185 = vmatprep.subr.bf16.mxu0 %v7434_v4  ;;  %9599 = vst [vmem:[#allocation133_spill] sm:$0xff] %v7456_v6  ;;  %v7458_v19 = vld [vmem:[#allocation4 + $0x544] ss:$16 sps:$4 sm:$0xff]   ;;  %v7461_v4 = vld [vmem:[#allocation4 + $0x54c] ss:$16 sps:$4 sm:$0xff]  }
 0x3da   :  { %3308 = vmatprep.subr.bf16.mxu1 %v7437_v39  ;;  %9600 = vst [vmem:[#allocation134_spill] sm:$0xff] %v7458_v19  ;;  %9601 = vst [vmem:[#allocation135_spill] sm:$0xff] %v7461_v4  ;;  %v7464_v39 = vld [vmem:[#allocation4 + $0x540] ss:$16 sps:$4 sm:$0xff]  }
 0x3db   :  { %9602 = vst [vmem:[#allocation136_spill] sm:$0xff] %v7464_v39 }
 0x3dc   :  { %3186 = vmatpush1.bf16.msra.mxu0 %v7440_v5  ;;  %v7468_v5 = vld [vmem:[#allocation4 + $0x548] ss:$16 sps:$4 sm:$0xff]  }
 0x3dd   :  { %3309 = vmatpush1.bf16.msra.mxu1 %v7444_v57  ;;  %3187 = vmatprep.subr.bf16.mxu0 %v7446_v7  ;;  %9603 = vst [vmem:[#allocation137_spill] sm:$0xff] %v7468_v5  ;;  %v7470_v57 = vld [vmem:[#allocation4 + $0x564] ss:$16 sps:$4 sm:$0xff]   ;;  %v7473_v7 = vld [vmem:[#allocation4 + $0x56c] ss:$16 sps:$4 sm:$0xff]  }
 0x3de   :  { %3310 = vmatprep.subr.bf16.mxu1 %v7449_v55  ;;  %9604 = vst [vmem:[#allocation138_spill] sm:$0xff] %v7470_v57  ;;  %9605 = vst [vmem:[#allocation139_spill] sm:$0xff] %v7473_v7  ;;  %v7476_v55 = vld [vmem:[#allocation4 + $0x560] ss:$16 sps:$4 sm:$0xff]  }
 0x3df   :  { %9606 = vst [vmem:[#allocation140_spill] sm:$0xff] %v7476_v55 }
 0x3e0   :  { %3188 = vmatpush1.bf16.msra.mxu0 %v7452_v54  ;;  %v7480_v54 = vld [vmem:[#allocation4 + $0x568] ss:$16 sps:$4 sm:$0xff]  }
 0x3e1   :  { %3311 = vmatpush1.bf16.msra.mxu1 %v7456_v6  ;;  %3189 = vmatprep.subr.bf16.mxu0 %v7458_v19  ;;  %9607 = vst [vmem:[#allocation141_spill] sm:$0xff] %v7480_v54  ;;  %v7482_v6 = vld [vmem:[#allocation4 + $0x584] ss:$16 sps:$4 sm:$0xff]   ;;  %v7485_v19 = vld [vmem:[#allocation4 + $0x58c] ss:$16 sps:$4 sm:$0xff]  }
 0x3e2   :  { %3312 = vmatprep.subr.bf16.mxu1 %v7461_v4  ;;  %9608 = vst [vmem:[#allocation142_spill] sm:$0xff] %v7482_v6  ;;  %9609 = vst [vmem:[#allocation143_spill] sm:$0xff] %v7485_v19  ;;  %v7488_v4 = vld [vmem:[#allocation4 + $0x580] ss:$16 sps:$4 sm:$0xff]  }
 0x3e3   :  { %9610 = vst [vmem:[#allocation144_spill] sm:$0xff] %v7488_v4 }
 0x3e4   :  { %3190 = vmatpush1.bf16.msra.mxu0 %v7464_v39  ;;  %v7492_v39 = vld [vmem:[#allocation4 + $0x588] ss:$16 sps:$4 sm:$0xff]  }
 0x3e5   :  { %3313 = vmatpush1.bf16.msra.mxu1 %v7468_v5  ;;  %3191 = vmatprep.subr.bf16.mxu0 %v7470_v57  ;;  %9611 = vst [vmem:[#allocation145_spill] sm:$0xff] %v7492_v39  ;;  %v7494_v5 = vld [vmem:[#allocation4 + $0x5a4] ss:$16 sps:$4 sm:$0xff]   ;;  %v7497_v57 = vld [vmem:[#allocation4 + $0x5ac] ss:$16 sps:$4 sm:$0xff]  }
 0x3e6   :  { %3314 = vmatprep.subr.bf16.mxu1 %v7473_v7  ;;  %9612 = vst [vmem:[#allocation146_spill] sm:$0xff] %v7494_v5  ;;  %9613 = vst [vmem:[#allocation147_spill] sm:$0xff] %v7497_v57  ;;  %v7500_v7 = vld [vmem:[#allocation4 + $0x5a0] ss:$16 sps:$4 sm:$0xff]  }
 0x3e7   :  { %9614 = vst [vmem:[#allocation148_spill] sm:$0xff] %v7500_v7 }
 0x3e8   :  { %3192 = vmatpush1.bf16.msra.mxu0 %v7476_v55  ;;  %v7504_v55 = vld [vmem:[#allocation4 + $0x5a8] ss:$16 sps:$4 sm:$0xff]  }
 0x3e9   :  { %3315 = vmatpush1.bf16.msra.mxu1 %v7480_v54  ;;  %3193 = vmatprep.subr.bf16.mxu0 %v7482_v6  ;;  %v7506_v54 = vld [vmem:[#allocation4 + $0x5c4] ss:$16 sps:$4 sm:$0xff]   ;;  %v7509_v6 = vld [vmem:[#allocation4 + $0x5cc] ss:$16 sps:$4 sm:$0xff]  }
 0x3ea   :  { %3316 = vmatprep.subr.bf16.mxu1 %v7485_v19  ;;  %9615 = vst [vmem:[#allocation149_spill] sm:$0xff] %v7506_v54  ;;  %9616 = vst [vmem:[#allocation150_spill] sm:$0xff] %v7509_v6  ;;  %v7512_v19 = vld [vmem:[#allocation4 + $0x5c0] ss:$16 sps:$4 sm:$0xff]  }
 0x3eb   :  { %9617 = vst [vmem:[#allocation151_spill] sm:$0xff] %v7512_v19 }
 0x3ec   :  { %3194 = vmatpush1.bf16.msra.mxu0 %v7488_v4  ;;  %v1579_v4 = vadd.f32 %v6918_v11, %v9618_v43  ;;  %v7530_v11 = vld [vmem:[#allocation4 + $0x5e8] ss:$16 sps:$4 sm:$0xff]  }
 0x3ed   :  { %3317 = vmatpush1.bf16.msra.mxu1 %v7492_v39  ;;  %3195 = vmatprep.subr.bf16.mxu0 %v7494_v5  ;;  %v7518_v5 = vld [vmem:[#allocation4 + $0x5c8] ss:$16 sps:$4 sm:$0xff]   ;;  %v7520_v39 = vld [vmem:[#allocation4 + $0x5e4] ss:$16 sps:$4 sm:$0xff]   ;;  %9623 = vst [vmem:[#allocation155_spill] sm:$0xff] %v7530_v11 }
 0x3ee   :  { %3318 = vmatprep.subr.bf16.mxu1 %v7497_v57  ;;  %9619 = vst [vmem:[#allocation112_spill] sm:$0xff] %v7518_v5  ;;  %9620 = vst [vmem:[#allocation152_spill] sm:$0xff] %v7520_v39  ;;  %v7523_v57 = vld [vmem:[#allocation4 + $0x5ec] ss:$16 sps:$4 sm:$0xff]   ;;  %v1580_v61 = vmax.f32 %v1579_v4, 0.0  ;;  %v9661_v4 = vld [vmem:[#allocation19_spill] sm:$0xff] }
 0x3ef   :  { %9621 = vst [vmem:[#allocation153_spill] sm:$0xff] %v7523_v57 }
 0x3f0   :  { %3196 = vmatpush1.bf16.msra.mxu0 %v7500_v7  ;;  %v7526_v7 = vld [vmem:[#allocation4 + $0x5e0] ss:$16 sps:$4 sm:$0xff]   ;;  %v7534_v43 = vpack.c.bf16 %v1580_v61, %v1580_v61  ;;  %v9660_v61 = vld [vmem:[#allocation18_spill] sm:$0xff] }
 0x3f1   :  { %3319 = vmatpush1.bf16.msra.mxu1 %v7504_v55  ;;  %3197 = vmatprep.subr.bf16.mxu0 %v7506_v54  ;;  %9622 = vst [vmem:[#allocation154_spill] sm:$0xff] %v7526_v7 }
 0x3f2   :  { %3320 = vmatprep.subr.bf16.mxu1 %v7509_v6 }
 0x3f4   :  { %3198 = vmatpush1.bf16.msra.mxu0 %v7512_v19 }
 0x3f5   :  { %3321 = vmatpush1.bf16.msra.mxu1 %v7518_v5  ;;  %3199 = vmatprep.subr.bf16.mxu0 %v7520_v39 }
 0x3f6   :  { %3322 = vmatprep.subr.bf16.mxu1 %v7523_v57 }
 0x3f8   :  { %3200 = vmatpush1.bf16.msra.mxu0 %v7526_v7 }
 0x3f9   :  { %3323 = vmatpush1.bf16.msra.mxu1 %v7530_v11  ;;  %3345 = vmatprep.subr.bf16.mxu0 %v6926_v23 }
 0x3fa   :  { %3468 = vmatprep.subr.bf16.mxu1 %v6929_v25 }
 0x3fb   :  { %3202 = vmatmul.mubr.bf16.vlgmr.msra.gmra.mrb[48].mxu0 %v7534_v43 }
 0x3fc   :  { %3325 = vmatmul.mubr.bf16.vlgmr.msra.gmra.mrb[48].mxu1 %v7534_v43  ;;  %3346 = vmatpush1.bf16.msra.mxu0 %v6932_v41 }
 0x3fd   :  { %3377 = vmatprep.mubr.bf16.mxu0 %v7141_v1  ;;  %3469 = vmatpush1.bf16.msra.mxu1 %v6936_v59 }
 0x3fe   :  { %3500 = vmatprep.mubr.bf16.mxu1 %v7141_v1  ;;  %3347 = vmatprep.subr.bf16.mxu0 %v6939_v2 }
 0x3ff   :  { %3470 = vmatprep.subr.bf16.mxu1 %v6942_v31 }
 0x400   :  { %3348 = vmatpush1.bf16.msra.mxu0 %v6946_v0 }
 0x401   :  { %3471 = vmatpush1.bf16.msra.mxu1 %v6949_v58  ;;  %3349 = vmatprep.subr.bf16.mxu0 %v6951_v33 }
 0x402   :  { %3472 = vmatprep.subr.bf16.mxu1 %v6954_v56 }
 0x404   :  { %3350 = vmatpush1.bf16.msra.mxu0 %v6958_v53  ;;  %v9625_v53 = vld [vmem:[#allocation88_spill] sm:$0xff] }
 0x405   :  { %3473 = vmatpush1.bf16.msra.mxu1 %v6962_v13  ;;  %3351 = vmatprep.subr.bf16.mxu0 %v6964_v46  ;;  %v9626_v13 = vld [vmem:[#allocation89_spill] sm:$0xff]  ;;  %v9627_v46 = vld [vmem:[#allocation90_spill] sm:$0xff] }
 0x406   :  { %3474 = vmatprep.subr.bf16.mxu1 %v6967_v49  ;;  %v9628_v49 = vld [vmem:[#allocation91_spill] sm:$0xff] }
 0x408   :  { %3352 = vmatpush1.bf16.msra.mxu0 %v6970_v32  ;;  %v9629_v32 = vld [vmem:[#allocation92_spill] sm:$0xff] }
 0x409   :  { %3475 = vmatpush1.bf16.msra.mxu1 %v6974_v16  ;;  %3353 = vmatprep.subr.bf16.mxu0 %v6976_v34  ;;  %v9630_v16 = vld [vmem:[#allocation93_spill] sm:$0xff]  ;;  %v9631_v34 = vld [vmem:[#allocation95_spill] sm:$0xff] }
 0x40a   :  { %3476 = vmatprep.subr.bf16.mxu1 %v6979_v36  ;;  %v9632_v36 = vld [vmem:[#allocation96_spill] sm:$0xff] }
 0x40c   :  { %3354 = vmatpush1.bf16.msra.mxu0 %v6982_v17  ;;  %v9633_v17 = vld [vmem:[#allocation97_spill] sm:$0xff] }
 0x40d   :  { %3477 = vmatpush1.bf16.msra.mxu1 %v6986_v29  ;;  %3355 = vmatprep.subr.bf16.mxu0 %v6988_v28  ;;  %v9634_v29 = vld [vmem:[#allocation98_spill] sm:$0xff]  ;;  %v9635_v28 = vld [vmem:[#allocation99_spill] sm:$0xff] }
 0x40e   :  { %v2067_v1 = vpop.f32.mrb[44].mxu0  ;;  %3478 = vmatprep.subr.bf16.mxu1 %v6991_v44  ;;  %v2108_v23 = vpop.f32.mrb[44].mxu1  ;;  %v9636_v44 = vld [vmem:[#allocation100_spill] sm:$0xff] }
 0x40f   :  { %v2069_v25 = vpop.f32.mrb[45].mxu0  ;;  %v2110_v59 = vpop.f32.mrb[45].mxu1 }
 0x410   :  { %v2121_v41 = vmax.f32 %v2067_v1, %v2069_v25  ;;  %v2071_v2 = vpop.f32.mrb[46].mxu0  ;;  %3356 = vmatpush1.bf16.msra.mxu0 %v6994_v24  ;;  %v2122_v31 = vmax.f32 %v2108_v23, %v2110_v59  ;;  %v2112_v0 = vpop.f32.mrb[46].mxu1  ;;  %v9637_v24 = vld [vmem:[#allocation101_spill] sm:$0xff]  ;;  %v9662_v1 = vld [vmem:[#allocation20_spill] sm:$0xff]  ;;  %v9664_v25 = vld [vmem:[#allocation22_spill] sm:$0xff] }
 0x411   :  { %3479 = vmatpush1.bf16.msra.mxu1 %v6998_v15  ;;  %v2072_v58 = vpop.f32.mrb[47].mxu0  ;;  %3357 = vmatprep.subr.bf16.mxu0 %v7000_v35  ;;  %v2113_v33 = vpop.f32.mrb[47].mxu1  ;;  %v9638_v15 = vld [vmem:[#allocation105_spill] sm:$0xff]  ;;  %v9639_v35 = vld [vmem:[#allocation114_spill] sm:$0xff]  ;;  %v9666_v59 = vld [vmem:[#allocation24_spill] sm:$0xff] }
 0x412   :  { %3480 = vmatprep.subr.bf16.mxu1 %v7003_v27  ;;  %v7567_v56 = vmax.f32 %v2121_v41, %v2122_v31  ;;  %v9640_v27 = vld [vmem:[#allocation102_spill] sm:$0xff]  ;;  %v9663_v23 = vld [vmem:[#allocation21_spill] sm:$0xff]  ;;  %v9665_v41 = vld [vmem:[#allocation23_spill] sm:$0xff] }
 0x413   :  { %v9667_v2 = vld [vmem:[#allocation25_spill] sm:$0xff]  ;;  %v9668_v31 = vld [vmem:[#allocation26_spill] sm:$0xff]  ;;  %v9669_v0 = vld [vmem:[#allocation27_spill] sm:$0xff] }
 0x414   :  { %9624 = vst [vmem:[#allocation156_spill] sm:$0xff] %v7567_v56  ;;  %3358 = vmatpush1.bf16.msra.mxu0 %v7006_v47  ;;  %v9641_v47 = vld [vmem:[#allocation81_spill] sm:$0xff]  ;;  %v9670_v58 = vld [vmem:[#allocation28_spill] sm:$0xff] }
 0x415   :  { %3481 = vmatpush1.bf16.msra.mxu1 %v7010_v40  ;;  %3359 = vmatprep.subr.bf16.mxu0 %v7012_v60  ;;  %v9642_v40 = vld [vmem:[#allocation84_spill] sm:$0xff]  ;;  %v9643_v60 = vld [vmem:[#allocation94_spill] sm:$0xff]  ;;  %v9671_v33 = vld [vmem:[#allocation29_spill] sm:$0xff] }
 0x416   :  { %3482 = vmatprep.subr.bf16.mxu1 %v7015_v62  ;;  %v9644_v62 = vld [vmem:[#allocation108_spill] sm:$0xff]  ;;  %v7772_v56 = vld [vmem:[#allocation4 + $0x24] ss:$16 sps:$4 sm:$0xff]  }
 0x417   :  { %9765 = vst [vmem:[#allocation92_spill] sm:$0xff] %v7772_v56 }
 0x418   :  { %3360 = vmatpush1.bf16.msra.mxu0 %v7020_v8  ;;  %v9645_v8 = vld [vmem:[#allocation113_spill] sm:$0xff] }
 0x419   :  { %3483 = vmatpush1.bf16.msra.mxu1 %v7024_v20  ;;  %3361 = vmatprep.subr.bf16.mxu0 %v7026_v30  ;;  %v9646_v20 = vld [vmem:[#allocation71_spill] sm:$0xff] }
 0x41a   :  { %3484 = vmatprep.subr.bf16.mxu1 %v7029_v26  ;;  %v9647_v30 = vld [vmem:[#allocation115_spill] sm:$0xff]  ;;  %v9648_v26 = vld [vmem:[#allocation74_spill] sm:$0xff] }
 0x41c   :  { %3362 = vmatpush1.bf16.msra.mxu0 %v7032_v48  ;;  %v9649_v48 = vld [vmem:[#allocation106_spill] sm:$0xff] }
 0x41d   :  { %3485 = vmatpush1.bf16.msra.mxu1 %v7036_v18  ;;  %3363 = vmatprep.subr.bf16.mxu0 %v7038_v10  ;;  %v9650_v18 = vld [vmem:[#allocation107_spill] sm:$0xff]  ;;  %v9651_v10 = vld [vmem:[#allocation9_spill] sm:$0xff] }
 0x41e   :  { %3486 = vmatprep.subr.bf16.mxu1 %v7041_v14  ;;  %v9652_v14 = vld [vmem:[#allocation11_spill] sm:$0xff] }
 0x420   :  { %3364 = vmatpush1.bf16.msra.mxu0 %v7044_v42  ;;  %v9653_v42 = vld [vmem:[#allocation10_spill] sm:$0xff] }
 0x421   :  { %3487 = vmatpush1.bf16.msra.mxu1 %v7048_v45  ;;  %3365 = vmatprep.subr.bf16.mxu0 %v7050_v50  ;;  %v9654_v45 = vld [vmem:[#allocation12_spill] sm:$0xff]  ;;  %v9655_v50 = vld [vmem:[#allocation13_spill] sm:$0xff] }
 0x422   :  { %3488 = vmatprep.subr.bf16.mxu1 %v7053_v51  ;;  %v9656_v51 = vld [vmem:[#allocation14_spill] sm:$0xff] }
 0x424   :  { %3366 = vmatpush1.bf16.msra.mxu0 %v7056_v52  ;;  %v9657_v52 = vld [vmem:[#allocation15_spill] sm:$0xff] }
 0x425   :  { %3489 = vmatpush1.bf16.msra.mxu1 %v7060_v21  ;;  %3367 = vmatprep.subr.bf16.mxu0 %v7062_v12  ;;  %v9658_v21 = vld [vmem:[#allocation16_spill] sm:$0xff]  ;;  %v9659_v12 = vld [vmem:[#allocation17_spill] sm:$0xff] }
 0x426   :  { %3490 = vmatprep.subr.bf16.mxu1 %v9625_v53  ;;  %v9672_v53 = vld [vmem:[#allocation30_spill] sm:$0xff] }
 0x428   :  { %3368 = vmatpush1.bf16.msra.mxu0 %v9626_v13  ;;  %v9673_v13 = vld [vmem:[#allocation31_spill] sm:$0xff] }
 0x429   :  { %3491 = vmatpush1.bf16.msra.mxu1 %v9627_v46  ;;  %3369 = vmatprep.subr.bf16.mxu0 %v9628_v49  ;;  %v9674_v46 = vld [vmem:[#allocation32_spill] sm:$0xff]  ;;  %v9675_v49 = vld [vmem:[#allocation33_spill] sm:$0xff] }
 0x42a   :  { %3492 = vmatprep.subr.bf16.mxu1 %v9629_v32  ;;  %v9676_v32 = vld [vmem:[#allocation35_spill] sm:$0xff] }
 0x42c   :  { %3370 = vmatpush1.bf16.msra.mxu0 %v9630_v16  ;;  %v9677_v16 = vld [vmem:[#allocation36_spill] sm:$0xff] }
 0x42d   :  { %3493 = vmatpush1.bf16.msra.mxu1 %v9631_v34  ;;  %3371 = vmatprep.subr.bf16.mxu0 %v9632_v36  ;;  %v9678_v34 = vld [vmem:[#allocation37_spill] sm:$0xff]  ;;  %v9679_v36 = vld [vmem:[#allocation38_spill] sm:$0xff] }
 0x42e   :  { %3494 = vmatprep.subr.bf16.mxu1 %v9633_v17  ;;  %v9680_v17 = vld [vmem:[#allocation39_spill] sm:$0xff] }
 0x430   :  { %3372 = vmatpush1.bf16.msra.mxu0 %v9634_v29  ;;  %v9681_v29 = vld [vmem:[#allocation40_spill] sm:$0xff] }
 0x431   :  { %3495 = vmatpush1.bf16.msra.mxu1 %v9635_v28  ;;  %3373 = vmatprep.subr.bf16.mxu0 %v9636_v44  ;;  %v9682_v28 = vld [vmem:[#allocation41_spill] sm:$0xff]  ;;  %v9683_v44 = vld [vmem:[#allocation42_spill] sm:$0xff] }
 0x432   :  { %3496 = vmatprep.subr.bf16.mxu1 %v9637_v24  ;;  %v9684_v24 = vld [vmem:[#allocation43_spill] sm:$0xff] }
 0x434   :  { %3374 = vmatpush1.bf16.msra.mxu0 %v9638_v15  ;;  %v9685_v15 = vld [vmem:[#allocation44_spill] sm:$0xff] }
 0x435   :  { %3497 = vmatpush1.bf16.msra.mxu1 %v9639_v35  ;;  %3375 = vmatprep.subr.bf16.mxu0 %v9640_v27  ;;  %v9686_v35 = vld [vmem:[#allocation45_spill] sm:$0xff]  ;;  %v9687_v27 = vld [vmem:[#allocation46_spill] sm:$0xff] }
 0x436   :  { %3498 = vmatprep.subr.bf16.mxu1 %v9641_v47  ;;  %v9688_v47 = vld [vmem:[#allocation47_spill] sm:$0xff] }
 0x438   :  { %3376 = vmatpush1.bf16.msra.mxu0 %v9642_v40  ;;  %v9689_v40 = vld [vmem:[#allocation48_spill] sm:$0xff] }
 0x439   :  { %3499 = vmatpush1.bf16.msra.mxu1 %v9643_v60  ;;  %3386 = vmatprep.subr.bf16.mxu0 %v9644_v62  ;;  %v9690_v60 = vld [vmem:[#allocation49_spill] sm:$0xff]  ;;  %v9691_v62 = vld [vmem:[#allocation50_spill] sm:$0xff] }
 0x43a   :  { %3509 = vmatprep.subr.bf16.mxu1 %v9645_v8  ;;  %v9692_v8 = vld [vmem:[#allocation51_spill] sm:$0xff] }
 0x43b   :  { %3378 = vmatmul.mubr.bf16.vlgmr.msra.gmra.mrb[52].mxu0 %v9646_v20 }
 0x43c   :  { %3501 = vmatmul.mubr.bf16.vlgmr.msra.gmra.mrb[52].mxu1 %v9646_v20  ;;  %3387 = vmatpush1.bf16.msra.mxu0 %v9647_v30  ;;  %v9693_v20 = vld [vmem:[#allocation52_spill] sm:$0xff]  ;;  %v9694_v30 = vld [vmem:[#allocation53_spill] sm:$0xff] }
 0x43d   :  { %3418 = vmatprep.mubr.bf16.mxu0 %v9648_v26  ;;  %3510 = vmatpush1.bf16.msra.mxu1 %v9649_v48  ;;  %v9695_v48 = vld [vmem:[#allocation54_spill] sm:$0xff] }
 0x43e   :  { %3541 = vmatprep.mubr.bf16.mxu1 %v9648_v26  ;;  %3388 = vmatprep.subr.bf16.mxu0 %v9650_v18  ;;  %v9696_v18 = vld [vmem:[#allocation55_spill] sm:$0xff] }
 0x43f   :  { %3511 = vmatprep.subr.bf16.mxu1 %v9651_v10  ;;  %v9697_v10 = vld [vmem:[#allocation56_spill] sm:$0xff] }
 0x440   :  { %3389 = vmatpush1.bf16.msra.mxu0 %v9652_v14  ;;  %v9698_v14 = vld [vmem:[#allocation57_spill] sm:$0xff] }
 0x441   :  { %3512 = vmatpush1.bf16.msra.mxu1 %v9653_v42  ;;  %3390 = vmatprep.subr.bf16.mxu0 %v9654_v45  ;;  %v9699_v42 = vld [vmem:[#allocation58_spill] sm:$0xff]  ;;  %v9700_v45 = vld [vmem:[#allocation59_spill] sm:$0xff] }
 0x442   :  { %3513 = vmatprep.subr.bf16.mxu1 %v9655_v50  ;;  %v9701_v50 = vld [vmem:[#allocation60_spill] sm:$0xff] }
 0x444   :  { %3391 = vmatpush1.bf16.msra.mxu0 %v9656_v51  ;;  %v9702_v51 = vld [vmem:[#allocation61_spill] sm:$0xff] }
 0x445   :  { %3514 = vmatpush1.bf16.msra.mxu1 %v9657_v52  ;;  %3392 = vmatprep.subr.bf16.mxu0 %v9658_v21  ;;  %v9703_v52 = vld [vmem:[#allocation62_spill] sm:$0xff]  ;;  %v7672_v21 = vld [vmem:[%s8446_s2] ss:$0 sm:$0xff] }
 0x446   :  { %3515 = vmatprep.subr.bf16.mxu1 %v9659_v12  ;;  %v9704_v12 = vld [vmem:[#allocation86_spill] sm:$0xff] }
 0x448   :  { %3393 = vmatpush1.bf16.msra.mxu0 %v9660_v61  ;;  %v1765_v61 = vadd.f32 %v7672_v21, %v9704_v12  ;;  %v9746_v12 = vld [vmem:[#allocation135_spill] sm:$0xff] }
 0x449   :  { %3516 = vmatpush1.bf16.msra.mxu1 %v9661_v4  ;;  %3394 = vmatprep.subr.bf16.mxu0 %v9662_v1  ;;  %v9705_v4 = vld [vmem:[#allocation63_spill] sm:$0xff]  ;;  %v9706_v1 = vld [vmem:[#allocation64_spill] sm:$0xff] }
 0x44a   :  { %3517 = vmatprep.subr.bf16.mxu1 %v9663_v23  ;;  %v9707_v23 = vld [vmem:[#allocation111_spill] sm:$0xff] }
 0x44c   :  { %3395 = vmatpush1.bf16.msra.mxu0 %v9664_v25  ;;  %v9708_v25 = vld [vmem:[#allocation65_spill] sm:$0xff] }
 0x44d   :  { %3518 = vmatpush1.bf16.msra.mxu1 %v9665_v41  ;;  %3396 = vmatprep.subr.bf16.mxu0 %v9666_v59  ;;  %v1766_v41 = vmax.f32 %v1765_v61, 0.0  ;;  %v9709_v59 = vld [vmem:[#allocation66_spill] sm:$0xff]  ;;  %v9747_v61 = vld [vmem:[#allocation136_spill] sm:$0xff] }
 0x44e   :  { %3519 = vmatprep.subr.bf16.mxu1 %v9667_v2  ;;  %v9710_v2 = vld [vmem:[#allocation67_spill] sm:$0xff] }
 0x450   :  { %3397 = vmatpush1.bf16.msra.mxu0 %v9668_v31  ;;  %v9711_v31 = vld [vmem:[#allocation68_spill] sm:$0xff] }
 0x451   :  { %3520 = vmatpush1.bf16.msra.mxu1 %v9669_v0  ;;  %3398 = vmatprep.subr.bf16.mxu0 %v9670_v58  ;;  %v9712_v0 = vld [vmem:[#allocation69_spill] sm:$0xff]  ;;  %v7684_v58 = vpack.c.bf16 %v1766_v41, %v1766_v41 }
 0x452   :  { %3521 = vmatprep.subr.bf16.mxu1 %v9671_v33  ;;  %v9713_v33 = vld [vmem:[#allocation70_spill] sm:$0xff]  ;;  %v9752_v41 = vld [vmem:[#allocation141_spill] sm:$0xff] }
 0x454   :  { %3399 = vmatpush1.bf16.msra.mxu0 %v9672_v53  ;;  %v9714_v53 = vld [vmem:[#allocation72_spill] sm:$0xff] }
 0x455   :  { %3522 = vmatpush1.bf16.msra.mxu1 %v9673_v13  ;;  %3400 = vmatprep.subr.bf16.mxu0 %v9674_v46  ;;  %v9715_v13 = vld [vmem:[#allocation73_spill] sm:$0xff]  ;;  %v9716_v46 = vld [vmem:[#allocation75_spill] sm:$0xff] }
 0x456   :  { %3523 = vmatprep.subr.bf16.mxu1 %v9675_v49  ;;  %v9717_v49 = vld [vmem:[#allocation76_spill] sm:$0xff] }
 0x458   :  { %3401 = vmatpush1.bf16.msra.mxu0 %v9676_v32  ;;  %v9718_v32 = vld [vmem:[#allocation77_spill] sm:$0xff] }
 0x459   :  { %3524 = vmatpush1.bf16.msra.mxu1 %v9677_v16  ;;  %3402 = vmatprep.subr.bf16.mxu0 %v9678_v34  ;;  %v9719_v16 = vld [vmem:[#allocation78_spill] sm:$0xff]  ;;  %v9720_v34 = vld [vmem:[#allocation79_spill] sm:$0xff] }
 0x45a   :  { %3525 = vmatprep.subr.bf16.mxu1 %v9679_v36  ;;  %v9721_v36 = vld [vmem:[#allocation80_spill] sm:$0xff] }
 0x45c   :  { %3403 = vmatpush1.bf16.msra.mxu0 %v9680_v17  ;;  %v9722_v17 = vld [vmem:[#allocation82_spill] sm:$0xff] }
 0x45d   :  { %3526 = vmatpush1.bf16.msra.mxu1 %v9681_v29  ;;  %3404 = vmatprep.subr.bf16.mxu0 %v9682_v28  ;;  %v9723_v29 = vld [vmem:[#allocation83_spill] sm:$0xff]  ;;  %v9724_v28 = vld [vmem:[#allocation104_spill] sm:$0xff] }
 0x45e   :  { %3527 = vmatprep.subr.bf16.mxu1 %v9683_v44  ;;  %v9725_v44 = vld [vmem:[#allocation116_spill] sm:$0xff] }
 0x460   :  { %3405 = vmatpush1.bf16.msra.mxu0 %v9684_v24  ;;  %v9726_v24 = vld [vmem:[#allocation117_spill] sm:$0xff] }
 0x461   :  { %3528 = vmatpush1.bf16.msra.mxu1 %v9685_v15  ;;  %3406 = vmatprep.subr.bf16.mxu0 %v9686_v35  ;;  %v9727_v15 = vld [vmem:[#allocation103_spill] sm:$0xff]  ;;  %v9728_v35 = vld [vmem:[#allocation110_spill] sm:$0xff] }
 0x462   :  { %3529 = vmatprep.subr.bf16.mxu1 %v9687_v27  ;;  %v9729_v27 = vld [vmem:[#allocation109_spill] sm:$0xff] }
 0x464   :  { %3407 = vmatpush1.bf16.msra.mxu0 %v9688_v47  ;;  %v9730_v47 = vld [vmem:[#allocation118_spill] sm:$0xff] }
 0x465   :  { %3530 = vmatpush1.bf16.msra.mxu1 %v9689_v40  ;;  %3408 = vmatprep.subr.bf16.mxu0 %v9690_v60  ;;  %v9731_v40 = vld [vmem:[#allocation119_spill] sm:$0xff]  ;;  %v9732_v60 = vld [vmem:[#allocation120_spill] sm:$0xff] }
 0x466   :  { %3531 = vmatprep.subr.bf16.mxu1 %v9691_v62  ;;  %v9733_v62 = vld [vmem:[#allocation121_spill] sm:$0xff] }
 0x468   :  { %3409 = vmatpush1.bf16.msra.mxu0 %v9692_v8  ;;  %v9734_v8 = vld [vmem:[#allocation122_spill] sm:$0xff] }
 0x469   :  { %3532 = vmatpush1.bf16.msra.mxu1 %v9693_v20  ;;  %3410 = vmatprep.subr.bf16.mxu0 %v9694_v30  ;;  %v9735_v20 = vld [vmem:[#allocation124_spill] sm:$0xff]  ;;  %v9736_v30 = vld [vmem:[#allocation125_spill] sm:$0xff] }
 0x46a   :  { %3533 = vmatprep.subr.bf16.mxu1 %v9695_v48  ;;  %v9737_v48 = vld [vmem:[#allocation126_spill] sm:$0xff] }
 0x46c   :  { %3411 = vmatpush1.bf16.msra.mxu0 %v9696_v18  ;;  %v9738_v18 = vld [vmem:[#allocation127_spill] sm:$0xff] }
 0x46d   :  { %3534 = vmatpush1.bf16.msra.mxu1 %v9697_v10  ;;  %3412 = vmatprep.subr.bf16.mxu0 %v9698_v14  ;;  %v9739_v10 = vld [vmem:[#allocation128_spill] sm:$0xff]  ;;  %v9740_v14 = vld [vmem:[#allocation129_spill] sm:$0xff] }
 0x46e   :  { %3535 = vmatprep.subr.bf16.mxu1 %v9699_v42  ;;  %v9741_v42 = vld [vmem:[#allocation130_spill] sm:$0xff] }
 0x470   :  { %3413 = vmatpush1.bf16.msra.mxu0 %v9700_v45  ;;  %v9742_v45 = vld [vmem:[#allocation131_spill] sm:$0xff] }
 0x471   :  { %3536 = vmatpush1.bf16.msra.mxu1 %v9701_v50  ;;  %3414 = vmatprep.subr.bf16.mxu0 %v9702_v51  ;;  %v9743_v50 = vld [vmem:[#allocation132_spill] sm:$0xff]  ;;  %v9744_v51 = vld [vmem:[#allocation133_spill] sm:$0xff] }
 0x472   :  { %3537 = vmatprep.subr.bf16.mxu1 %v9703_v52  ;;  %v9745_v52 = vld [vmem:[#allocation134_spill] sm:$0xff] }
 0x474   :  { %3415 = vmatpush1.bf16.msra.mxu0 %v9705_v4  ;;  %v9748_v4 = vld [vmem:[#allocation137_spill] sm:$0xff] }
 0x475   :  { %3538 = vmatpush1.bf16.msra.mxu1 %v9706_v1  ;;  %3416 = vmatprep.subr.bf16.mxu0 %v9707_v23  ;;  %v9749_v1 = vld [vmem:[#allocation138_spill] sm:$0xff]  ;;  %v9750_v23 = vld [vmem:[#allocation139_spill] sm:$0xff] }
 0x476   :  { %3539 = vmatprep.subr.bf16.mxu1 %v9708_v25  ;;  %v9751_v25 = vld [vmem:[#allocation140_spill] sm:$0xff] }
 0x478   :  { %3417 = vmatpush1.bf16.msra.mxu0 %v9709_v59  ;;  %v9753_v59 = vld [vmem:[#allocation142_spill] sm:$0xff] }
 0x479   :  { %3540 = vmatpush1.bf16.msra.mxu1 %v9710_v2  ;;  %3427 = vmatprep.subr.bf16.mxu0 %v9711_v31  ;;  %v9754_v2 = vld [vmem:[#allocation143_spill] sm:$0xff]  ;;  %v9755_v31 = vld [vmem:[#allocation144_spill] sm:$0xff] }
 0x47a   :  { %3550 = vmatprep.subr.bf16.mxu1 %v9712_v0  ;;  %v9756_v0 = vld [vmem:[#allocation145_spill] sm:$0xff] }
 0x47b   :  { %3419 = vmatmul.mubr.bf16.vlgmr.msra.gmra.mrb[52].mxu0 %v7534_v43 }
 0x47c   :  { %3542 = vmatmul.mubr.bf16.vlgmr.msra.gmra.mrb[52].mxu1 %v7534_v43  ;;  %3428 = vmatpush1.bf16.msra.mxu0 %v9713_v33  ;;  %v9757_v33 = vld [vmem:[#allocation146_spill] sm:$0xff] }
 0x47d   :  { %3459 = vmatprep.mubr.bf16.mxu0 %v7684_v58  ;;  %3551 = vmatpush1.bf16.msra.mxu1 %v9714_v53  ;;  %v9758_v53 = vld [vmem:[#allocation147_spill] sm:$0xff] }
 0x47e   :  { %3582 = vmatprep.mubr.bf16.mxu1 %v7684_v58  ;;  %3429 = vmatprep.subr.bf16.mxu0 %v9715_v13  ;;  %v9759_v13 = vld [vmem:[#allocation148_spill] sm:$0xff] }
 0x47f   :  { %3552 = vmatprep.subr.bf16.mxu1 %v9716_v46  ;;  %v9760_v46 = vld [vmem:[#allocation85_spill] sm:$0xff] }
 0x480   :  { %3430 = vmatpush1.bf16.msra.mxu0 %v9717_v49  ;;  %v1759_v49 = vadd.f32 %v7672_v21, %v9760_v46  ;;  %v7759_v46 = vld [vmem:[#allocation4 + $0xc] ss:$16 sps:$4 sm:$0xff]  }
 0x481   :  { %3553 = vmatpush1.bf16.msra.mxu1 %v9718_v32  ;;  %3431 = vmatprep.subr.bf16.mxu0 %v9719_v16  ;;  %9762 = vst [vmem:[#allocation89_spill] sm:$0xff] %v7759_v46 }
 0x482   :  { %3554 = vmatprep.subr.bf16.mxu1 %v9720_v34  ;;  %v1760_v32 = vmax.f32 %v1759_v49, 0.0  ;;  %v7756_v34 = vld [vmem:[#allocation4 + $0x4] ss:$16 sps:$4 sm:$0xff]   ;;  %v7764_v49 = vld [vmem:[#allocation4] ss:$16 sps:$4 sm:$0xff]  }
 0x483   :  { %9761 = vst [vmem:[#allocation88_spill] sm:$0xff] %v7756_v34  ;;  %9763 = vst [vmem:[#allocation90_spill] sm:$0xff] %v7764_v49 }
 0x484   :  { %3432 = vmatpush1.bf16.msra.mxu0 %v9721_v36  ;;  %v7753_v16 = vpack.c.bf16 %v1760_v32, %v1760_v32  ;;  %v7768_v32 = vld [vmem:[#allocation4 + $0x8] ss:$16 sps:$4 sm:$0xff]  }
 0x485   :  { %3555 = vmatpush1.bf16.msra.mxu1 %v9722_v17  ;;  %3433 = vmatprep.subr.bf16.mxu0 %v9723_v29  ;;  %9764 = vst [vmem:[#allocation91_spill] sm:$0xff] %v7768_v32 }
 0x486   :  { %3556 = vmatprep.subr.bf16.mxu1 %v9724_v28 }
 0x488   :  { %3434 = vmatpush1.bf16.msra.mxu0 %v9725_v44 }
 0x489   :  { %3557 = vmatpush1.bf16.msra.mxu1 %v9726_v24  ;;  %3435 = vmatprep.subr.bf16.mxu0 %v9727_v15 }
 0x48a   :  { %3558 = vmatprep.subr.bf16.mxu1 %v9728_v35 }
 0x48c   :  { %3436 = vmatpush1.bf16.msra.mxu0 %v9729_v27 }
 0x48d   :  { %3559 = vmatpush1.bf16.msra.mxu1 %v9730_v47  ;;  %3437 = vmatprep.subr.bf16.mxu0 %v9731_v40 }
 0x48e   :  { %3560 = vmatprep.subr.bf16.mxu1 %v9732_v60 }
 0x490   :  { %3438 = vmatpush1.bf16.msra.mxu0 %v7402_v38 }
 0x491   :  { %3561 = vmatpush1.bf16.msra.mxu1 %v7406_v22  ;;  %3439 = vmatprep.subr.bf16.mxu0 %v7408_v9 }
 0x492   :  { %3562 = vmatprep.subr.bf16.mxu1 %v7411_v37 }
 0x494   :  { %3440 = vmatpush1.bf16.msra.mxu0 %v7414_v3 }
 0x495   :  { %3563 = vmatpush1.bf16.msra.mxu1 %v7418_v63  ;;  %3441 = vmatprep.subr.bf16.mxu0 %v9733_v62 }
 0x496   :  { %3564 = vmatprep.subr.bf16.mxu1 %v9734_v8 }
 0x498   :  { %3442 = vmatpush1.bf16.msra.mxu0 %v9735_v20 }
 0x499   :  { %3565 = vmatpush1.bf16.msra.mxu1 %v9736_v30  ;;  %3443 = vmatprep.subr.bf16.mxu0 %v9737_v48 }
 0x49a   :  { %3566 = vmatprep.subr.bf16.mxu1 %v9738_v18 }
 0x49c   :  { %3444 = vmatpush1.bf16.msra.mxu0 %v9739_v10 }
 0x49d   :  { %3567 = vmatpush1.bf16.msra.mxu1 %v9740_v14  ;;  %3445 = vmatprep.subr.bf16.mxu0 %v9741_v42 }
 0x49e   :  { %3568 = vmatprep.subr.bf16.mxu1 %v9742_v45 }
 0x4a0   :  { %3446 = vmatpush1.bf16.msra.mxu0 %v9743_v50 }
 0x4a1   :  { %3569 = vmatpush1.bf16.msra.mxu1 %v9744_v51  ;;  %3447 = vmatprep.subr.bf16.mxu0 %v9745_v52 }
 0x4a2   :  { %3570 = vmatprep.subr.bf16.mxu1 %v9746_v12 }
 0x4a4   :  { %3448 = vmatpush1.bf16.msra.mxu0 %v9747_v61 }
 0x4a5   :  { %3571 = vmatpush1.bf16.msra.mxu1 %v9748_v4  ;;  %3449 = vmatprep.subr.bf16.mxu0 %v9749_v1 }
 0x4a6   :  { %3572 = vmatprep.subr.bf16.mxu1 %v9750_v23 }
 0x4a8   :  { %3450 = vmatpush1.bf16.msra.mxu0 %v9751_v25 }
 0x4a9   :  { %3573 = vmatpush1.bf16.msra.mxu1 %v9752_v41  ;;  %3451 = vmatprep.subr.bf16.mxu0 %v9753_v59 }
 0x4aa   :  { %3574 = vmatprep.subr.bf16.mxu1 %v9754_v2 }
 0x4ac   :  { %3452 = vmatpush1.bf16.msra.mxu0 %v9755_v31 }
 0x4ad   :  { %3575 = vmatpush1.bf16.msra.mxu1 %v9756_v0  ;;  %3453 = vmatprep.subr.bf16.mxu0 %v9757_v33 }
 0x4ae   :  { %3576 = vmatprep.subr.bf16.mxu1 %v9758_v53 }
 0x4b0   :  { %3454 = vmatpush1.bf16.msra.mxu0 %v9759_v13 }
 0x4b1   :  { %3577 = vmatpush1.bf16.msra.mxu1 %v7504_v55  ;;  %3455 = vmatprep.subr.bf16.mxu0 %v7506_v54  ;;  %v7835_v54 = vld [vmem:[#allocation4 + $0xcc] ss:$16 sps:$4 sm:$0xff]  }
 0x4b2   :  { %3578 = vmatprep.subr.bf16.mxu1 %v7509_v6  ;;  %v7832_v6 = vld [vmem:[#allocation4 + $0xc4] ss:$16 sps:$4 sm:$0xff]  }
 0x4b4   :  { %3456 = vmatpush1.bf16.msra.mxu0 %v7512_v19  ;;  %v7829_v19 = vld [vmem:[#allocation4 + $0xa8] ss:$16 sps:$4 sm:$0xff]  }
 0x4b5   :  { %3579 = vmatpush1.bf16.msra.mxu1 %v7518_v5  ;;  %3457 = vmatprep.subr.bf16.mxu0 %v7520_v39  ;;  %v7826_v5 = vld [vmem:[#allocation4 + $0xa0] ss:$16 sps:$4 sm:$0xff]  }
 0x4b6   :  { %3580 = vmatprep.subr.bf16.mxu1 %v7523_v57 }
 0x4b8   :  { %3458 = vmatpush1.bf16.msra.mxu0 %v7526_v7 }
 0x4b9   :  { %3581 = vmatpush1.bf16.msra.mxu1 %v7530_v11  ;;  %3597 = vmatprep.subr.bf16.mxu0 %v7756_v34  ;;  %v7778_v34 = vld [vmem:[#allocation4 + $0x20] ss:$16 sps:$4 sm:$0xff]   ;;  %v7784_v11 = vld [vmem:[#allocation4 + $0x44] ss:$16 sps:$4 sm:$0xff]  }
 0x4ba   :  { %3720 = vmatprep.subr.bf16.mxu1 %v7759_v46  ;;  %v7775_v46 = vld [vmem:[#allocation4 + $0x2c] ss:$16 sps:$4 sm:$0xff]   ;;  %9767 = vst [vmem:[#allocation95_spill] sm:$0xff] %v7778_v34  ;;  %9769 = vst [vmem:[#allocation97_spill] sm:$0xff] %v7784_v11 }
 0x4bb   :  { %3460 = vmatmul.mubr.bf16.vlgmr.msra.gmra.mrb[52].mxu0 %v7753_v16  ;;  %9766 = vst [vmem:[#allocation93_spill] sm:$0xff] %v7775_v46 }
 0x4bc   :  { %3583 = vmatmul.mubr.bf16.vlgmr.msra.gmra.mrb[52].mxu1 %v7753_v16  ;;  %3598 = vmatpush1.bf16.msra.mxu0 %v7764_v49  ;;  %v7781_v49 = vld [vmem:[#allocation4 + $0x28] ss:$16 sps:$4 sm:$0xff]  }
 0x4bd   :  { %3629 = vmatprep.mubr.bf16.mxu0 %v9648_v26  ;;  %3721 = vmatpush1.bf16.msra.mxu1 %v7768_v32  ;;  %9768 = vst [vmem:[#allocation96_spill] sm:$0xff] %v7781_v49  ;;  %v7823_v32 = vld [vmem:[#allocation4 + $0xac] ss:$16 sps:$4 sm:$0xff]  }
 0x4be   :  { %3752 = vmatprep.mubr.bf16.mxu1 %v9648_v26  ;;  %3599 = vmatprep.subr.bf16.mxu0 %v7772_v56  ;;  %v7787_v26 = vld [vmem:[#allocation4 + $0x4c] ss:$16 sps:$4 sm:$0xff]   ;;  %v7790_v56 = vld [vmem:[#allocation4 + $0x40] ss:$16 sps:$4 sm:$0xff]   ;;  %9782 = vst [vmem:[#allocation71_spill] sm:$0xff] %v7823_v32 }
 0x4bf   :  { %3722 = vmatprep.subr.bf16.mxu1 %v7775_v46  ;;  %9770 = vst [vmem:[#allocation98_spill] sm:$0xff] %v7787_v26  ;;  %9771 = vst [vmem:[#allocation99_spill] sm:$0xff] %v7790_v56  ;;  %v7793_v46 = vld [vmem:[#allocation4 + $0x48] ss:$16 sps:$4 sm:$0xff]  }
 0x4c0   :  { %3600 = vmatpush1.bf16.msra.mxu0 %v7778_v34  ;;  %9772 = vst [vmem:[#allocation100_spill] sm:$0xff] %v7793_v46  ;;  %v7796_v34 = vld [vmem:[#allocation4 + $0x64] ss:$16 sps:$4 sm:$0xff]  }
 0x4c1   :  { %3723 = vmatpush1.bf16.msra.mxu1 %v7781_v49  ;;  %3601 = vmatprep.subr.bf16.mxu0 %v7784_v11  ;;  %9773 = vst [vmem:[#allocation101_spill] sm:$0xff] %v7796_v34  ;;  %v7799_v49 = vld [vmem:[#allocation4 + $0x6c] ss:$16 sps:$4 sm:$0xff]   ;;  %v7802_v11 = vld [vmem:[#allocation4 + $0x60] ss:$16 sps:$4 sm:$0xff]  }
 0x4c2   :  { %3724 = vmatprep.subr.bf16.mxu1 %v7787_v26  ;;  %9774 = vst [vmem:[#allocation105_spill] sm:$0xff] %v7799_v49  ;;  %9775 = vst [vmem:[#allocation114_spill] sm:$0xff] %v7802_v11  ;;  %v7805_v26 = vld [vmem:[#allocation4 + $0x68] ss:$16 sps:$4 sm:$0xff]  }
 0x4c3   :  { %9776 = vst [vmem:[#allocation102_spill] sm:$0xff] %v7805_v26 }
 0x4c4   :  { %3602 = vmatpush1.bf16.msra.mxu0 %v7790_v56  ;;  %v7808_v56 = vld [vmem:[#allocation4 + $0x84] ss:$16 sps:$4 sm:$0xff]  }
 0x4c5   :  { %3725 = vmatpush1.bf16.msra.mxu1 %v7793_v46  ;;  %3603 = vmatprep.subr.bf16.mxu0 %v7796_v34  ;;  %9777 = vst [vmem:[#allocation81_spill] sm:$0xff] %v7808_v56  ;;  %v7811_v46 = vld [vmem:[#allocation4 + $0x8c] ss:$16 sps:$4 sm:$0xff]   ;;  %v7814_v34 = vld [vmem:[#allocation4 + $0x80] ss:$16 sps:$4 sm:$0xff]  }
 0x4c6   :  { %3726 = vmatprep.subr.bf16.mxu1 %v7799_v49  ;;  %9778 = vst [vmem:[#allocation84_spill] sm:$0xff] %v7811_v46  ;;  %9779 = vst [vmem:[#allocation94_spill] sm:$0xff] %v7814_v34  ;;  %v7817_v49 = vld [vmem:[#allocation4 + $0x88] ss:$16 sps:$4 sm:$0xff]  }
 0x4c7   :  { %9780 = vst [vmem:[#allocation108_spill] sm:$0xff] %v7817_v49 }
 0x4c8   :  { %3604 = vmatpush1.bf16.msra.mxu0 %v7802_v11  ;;  %v7820_v11 = vld [vmem:[#allocation4 + $0xa4] ss:$16 sps:$4 sm:$0xff]  }
 0x4c9   :  { %3727 = vmatpush1.bf16.msra.mxu1 %v7805_v26  ;;  %3605 = vmatprep.subr.bf16.mxu0 %v7808_v56  ;;  %9781 = vst [vmem:[#allocation113_spill] sm:$0xff] %v7820_v11 }
 0x4ca   :  { %3728 = vmatprep.subr.bf16.mxu1 %v7811_v46 }
 0x4cc   :  { %3606 = vmatpush1.bf16.msra.mxu0 %v7814_v34 }
 0x4cd   :  { %3729 = vmatpush1.bf16.msra.mxu1 %v7817_v49  ;;  %3607 = vmatprep.subr.bf16.mxu0 %v7820_v11 }
 0x4ce   :  { %v3203_v26 = vpop.f32.mrb[48].mxu0  ;;  %3730 = vmatprep.subr.bf16.mxu1 %v7823_v32 }
 0x4cf   :  { %v3326_v56 = vpop.f32.mrb[48].mxu1  ;;  %v3205_v7 = vpop.f32.mrb[49].mxu0 }
 0x4d0   :  { %v3333_v46 = vmax.f32 %v3203_v26, %v3205_v7  ;;  %v3328_v57 = vpop.f32.mrb[49].mxu1  ;;  %v3207_v39 = vpop.f32.mrb[50].mxu0  ;;  %3608 = vmatpush1.bf16.msra.mxu0 %v7826_v5  ;;  %v7840_v7 = vld [vmem:[#allocation4 + $0xc0] ss:$16 sps:$4 sm:$0xff]  }
 0x4d1   :  { %v3334_v34 = vmax.f32 %v3326_v56, %v3328_v57  ;;  %v3330_v49 = vpop.f32.mrb[50].mxu1  ;;  %3731 = vmatpush1.bf16.msra.mxu1 %v7829_v19  ;;  %v3208_v11 = vpop.f32.mrb[51].mxu0  ;;  %3609 = vmatprep.subr.bf16.mxu0 %v7832_v6  ;;  %v7843_v57 = vld [vmem:[#allocation4 + $0xc8] ss:$16 sps:$4 sm:$0xff]   ;;  %v7849_v56 = vld [vmem:[#allocation4 + $0xec] ss:$16 sps:$4 sm:$0xff]  }
 0x4d2   :  { %v3331_v32 = vpop.f32.mrb[51].mxu1  ;;  %3732 = vmatprep.subr.bf16.mxu1 %v7835_v54  ;;  %v7846_v11 = vld [vmem:[#allocation4 + $0xe4] ss:$16 sps:$4 sm:$0xff]   ;;  %9784 = vst [vmem:[#allocation74_spill] sm:$0xff] %v7849_v56  ;;  %v7852_v49 = vld [vmem:[#allocation4 + $0xe0] ss:$16 sps:$4 sm:$0xff]  }
 0x4d3   :  { %v7838_v39 = vmax.f32 %v3333_v46, %v3334_v34  ;;  %9785 = vst [vmem:[#allocation106_spill] sm:$0xff] %v7852_v49  ;;  %v7855_v34 = vld [vmem:[#allocation4 + $0xe8] ss:$16 sps:$4 sm:$0xff]   ;;  %v7858_v46 = vld [vmem:[#allocation4 + $0x104] ss:$16 sps:$4 sm:$0xff]  }
 0x4d4   :  { %3610 = vmatpush1.bf16.msra.mxu0 %v7840_v7  ;;  %9786 = vst [vmem:[#allocation107_spill] sm:$0xff] %v7855_v34  ;;  %9787 = vst [vmem:[#allocation9_spill] sm:$0xff] %v7858_v46  ;;  %v7861_v32 = vld [vmem:[#allocation4 + $0x10c] ss:$16 sps:$4 sm:$0xff]   ;;  %v7864_v26 = vld [vmem:[#allocation4 + $0x100] ss:$16 sps:$4 sm:$0xff]  }
 0x4d5   :  { %9783 = vst [vmem:[#allocation115_spill] sm:$0xff] %v7838_v39  ;;  %3733 = vmatpush1.bf16.msra.mxu1 %v7843_v57  ;;  %3611 = vmatprep.subr.bf16.mxu0 %v7846_v11  ;;  %9788 = vst [vmem:[#allocation11_spill] sm:$0xff] %v7861_v32  ;;  %v7867_v39 = vld [vmem:[#allocation4 + $0x108] ss:$16 sps:$4 sm:$0xff]  }
 0x4d6   :  { %3734 = vmatprep.subr.bf16.mxu1 %v7849_v56  ;;  %9789 = vst [vmem:[#allocation10_spill] sm:$0xff] %v7864_v26  ;;  %9790 = vst [vmem:[#allocation12_spill] sm:$0xff] %v7867_v39  ;;  %v8146_v56 = vld [vmem:[#allocation4 + $0x3e0] ss:$16 sps:$4 sm:$0xff]  }
 0x4d7   :  { %9881 = vst [vmem:[#allocation133_spill] sm:$0xff] %v8146_v56 }
 0x4d8   :  { %3612 = vmatpush1.bf16.msra.mxu0 %v7852_v49  ;;  %v7870_v49 = vld [vmem:[#allocation4 + $0x124] ss:$16 sps:$4 sm:$0xff]  }
 0x4d9   :  { %3735 = vmatpush1.bf16.msra.mxu1 %v7855_v34  ;;  %3613 = vmatprep.subr.bf16.mxu0 %v7858_v46  ;;  %9791 = vst [vmem:[#allocation13_spill] sm:$0xff] %v7870_v49  ;;  %v7873_v34 = vld [vmem:[#allocation4 + $0x12c] ss:$16 sps:$4 sm:$0xff]   ;;  %v7876_v46 = vld [vmem:[#allocation4 + $0x120] ss:$16 sps:$4 sm:$0xff]  }
 0x4da   :  { %3736 = vmatprep.subr.bf16.mxu1 %v7861_v32  ;;  %9792 = vst [vmem:[#allocation14_spill] sm:$0xff] %v7873_v34  ;;  %9793 = vst [vmem:[#allocation15_spill] sm:$0xff] %v7876_v46  ;;  %v7879_v32 = vld [vmem:[#allocation4 + $0x128] ss:$16 sps:$4 sm:$0xff]  }
 0x4db   :  { %9794 = vst [vmem:[#allocation16_spill] sm:$0xff] %v7879_v32 }
 0x4dc   :  { %3614 = vmatpush1.bf16.msra.mxu0 %v7864_v26  ;;  %v7882_v26 = vld [vmem:[#allocation4 + $0x144] ss:$16 sps:$4 sm:$0xff]  }
 0x4dd   :  { %3737 = vmatpush1.bf16.msra.mxu1 %v7867_v39  ;;  %3615 = vmatprep.subr.bf16.mxu0 %v7870_v49  ;;  %9795 = vst [vmem:[#allocation17_spill] sm:$0xff] %v7882_v26  ;;  %v7885_v39 = vld [vmem:[#allocation4 + $0x14c] ss:$16 sps:$4 sm:$0xff]   ;;  %v7888_v49 = vld [vmem:[#allocation4 + $0x140] ss:$16 sps:$4 sm:$0xff]  }
 0x4de   :  { %3738 = vmatprep.subr.bf16.mxu1 %v7873_v34  ;;  %9796 = vst [vmem:[#allocation18_spill] sm:$0xff] %v7885_v39  ;;  %9797 = vst [vmem:[#allocation19_spill] sm:$0xff] %v7888_v49  ;;  %v7891_v34 = vld [vmem:[#allocation4 + $0x148] ss:$16 sps:$4 sm:$0xff]  }
 0x4df   :  { %9798 = vst [vmem:[#allocation20_spill] sm:$0xff] %v7891_v34 }
 0x4e0   :  { %3616 = vmatpush1.bf16.msra.mxu0 %v7876_v46  ;;  %v7894_v46 = vld [vmem:[#allocation4 + $0x164] ss:$16 sps:$4 sm:$0xff]  }
 0x4e1   :  { %3739 = vmatpush1.bf16.msra.mxu1 %v7879_v32  ;;  %3617 = vmatprep.subr.bf16.mxu0 %v7882_v26  ;;  %9799 = vst [vmem:[#allocation21_spill] sm:$0xff] %v7894_v46  ;;  %v7897_v32 = vld [vmem:[#allocation4 + $0x16c] ss:$16 sps:$4 sm:$0xff]   ;;  %v7900_v26 = vld [vmem:[#allocation4 + $0x160] ss:$16 sps:$4 sm:$0xff]  }
 0x4e2   :  { %3740 = vmatprep.subr.bf16.mxu1 %v7885_v39  ;;  %9800 = vst [vmem:[#allocation22_spill] sm:$0xff] %v7897_v32  ;;  %9801 = vst [vmem:[#allocation23_spill] sm:$0xff] %v7900_v26  ;;  %v7903_v39 = vld [vmem:[#allocation4 + $0x168] ss:$16 sps:$4 sm:$0xff]  }
 0x4e3   :  { %9802 = vst [vmem:[#allocation24_spill] sm:$0xff] %v7903_v39 }
 0x4e4   :  { %3618 = vmatpush1.bf16.msra.mxu0 %v7888_v49  ;;  %v7906_v49 = vld [vmem:[#allocation4 + $0x184] ss:$16 sps:$4 sm:$0xff]  }
 0x4e5   :  { %3741 = vmatpush1.bf16.msra.mxu1 %v7891_v34  ;;  %3619 = vmatprep.subr.bf16.mxu0 %v7894_v46  ;;  %9803 = vst [vmem:[#allocation25_spill] sm:$0xff] %v7906_v49  ;;  %v7909_v34 = vld [vmem:[#allocation4 + $0x18c] ss:$16 sps:$4 sm:$0xff]   ;;  %v7912_v46 = vld [vmem:[#allocation4 + $0x180] ss:$16 sps:$4 sm:$0xff]  }
 0x4e6   :  { %3742 = vmatprep.subr.bf16.mxu1 %v7897_v32  ;;  %9804 = vst [vmem:[#allocation26_spill] sm:$0xff] %v7909_v34  ;;  %9805 = vst [vmem:[#allocation27_spill] sm:$0xff] %v7912_v46  ;;  %v7915_v32 = vld [vmem:[#allocation4 + $0x188] ss:$16 sps:$4 sm:$0xff]  }
 0x4e7   :  { %9806 = vst [vmem:[#allocation28_spill] sm:$0xff] %v7915_v32 }
 0x4e8   :  { %3620 = vmatpush1.bf16.msra.mxu0 %v7900_v26  ;;  %v7918_v26 = vld [vmem:[#allocation4 + $0x1a4] ss:$16 sps:$4 sm:$0xff]  }
 0x4e9   :  { %3743 = vmatpush1.bf16.msra.mxu1 %v7903_v39  ;;  %3621 = vmatprep.subr.bf16.mxu0 %v7906_v49  ;;  %9807 = vst [vmem:[#allocation29_spill] sm:$0xff] %v7918_v26  ;;  %v7921_v39 = vld [vmem:[#allocation4 + $0x1ac] ss:$16 sps:$4 sm:$0xff]   ;;  %v7924_v49 = vld [vmem:[#allocation4 + $0x1a0] ss:$16 sps:$4 sm:$0xff]  }
 0x4ea   :  { %3744 = vmatprep.subr.bf16.mxu1 %v7909_v34  ;;  %9808 = vst [vmem:[#allocation30_spill] sm:$0xff] %v7921_v39  ;;  %9809 = vst [vmem:[#allocation31_spill] sm:$0xff] %v7924_v49  ;;  %v7927_v34 = vld [vmem:[#allocation4 + $0x1a8] ss:$16 sps:$4 sm:$0xff]  }
 0x4eb   :  { %9810 = vst [vmem:[#allocation32_spill] sm:$0xff] %v7927_v34 }
 0x4ec   :  { %3622 = vmatpush1.bf16.msra.mxu0 %v7912_v46  ;;  %v7930_v46 = vld [vmem:[#allocation4 + $0x1c4] ss:$16 sps:$4 sm:$0xff]  }
 0x4ed   :  { %3745 = vmatpush1.bf16.msra.mxu1 %v7915_v32  ;;  %3623 = vmatprep.subr.bf16.mxu0 %v7918_v26  ;;  %9811 = vst [vmem:[#allocation33_spill] sm:$0xff] %v7930_v46  ;;  %v7933_v32 = vld [vmem:[#allocation4 + $0x1cc] ss:$16 sps:$4 sm:$0xff]   ;;  %v7936_v26 = vld [vmem:[#allocation4 + $0x1c0] ss:$16 sps:$4 sm:$0xff]  }
 0x4ee   :  { %3746 = vmatprep.subr.bf16.mxu1 %v7921_v39  ;;  %9812 = vst [vmem:[#allocation35_spill] sm:$0xff] %v7933_v32  ;;  %9813 = vst [vmem:[#allocation36_spill] sm:$0xff] %v7936_v26  ;;  %v7939_v39 = vld [vmem:[#allocation4 + $0x1c8] ss:$16 sps:$4 sm:$0xff]  }
 0x4ef   :  { %9814 = vst [vmem:[#allocation37_spill] sm:$0xff] %v7939_v39 }
 0x4f0   :  { %3624 = vmatpush1.bf16.msra.mxu0 %v7924_v49  ;;  %v7942_v49 = vld [vmem:[#allocation4 + $0x1e4] ss:$16 sps:$4 sm:$0xff]  }
 0x4f1   :  { %3747 = vmatpush1.bf16.msra.mxu1 %v7927_v34  ;;  %3625 = vmatprep.subr.bf16.mxu0 %v7930_v46  ;;  %9815 = vst [vmem:[#allocation38_spill] sm:$0xff] %v7942_v49  ;;  %v7945_v34 = vld [vmem:[#allocation4 + $0x1ec] ss:$16 sps:$4 sm:$0xff]   ;;  %v7948_v46 = vld [vmem:[#allocation4 + $0x1e0] ss:$16 sps:$4 sm:$0xff]  }
 0x4f2   :  { %3748 = vmatprep.subr.bf16.mxu1 %v7933_v32  ;;  %9816 = vst [vmem:[#allocation39_spill] sm:$0xff] %v7945_v34  ;;  %9817 = vst [vmem:[#allocation40_spill] sm:$0xff] %v7948_v46  ;;  %v7951_v32 = vld [vmem:[#allocation4 + $0x1e8] ss:$16 sps:$4 sm:$0xff]  }
 0x4f3   :  { %9818 = vst [vmem:[#allocation41_spill] sm:$0xff] %v7951_v32 }
 0x4f4   :  { %3626 = vmatpush1.bf16.msra.mxu0 %v7936_v26  ;;  %v7954_v26 = vld [vmem:[#allocation4 + $0x204] ss:$16 sps:$4 sm:$0xff]  }
 0x4f5   :  { %3749 = vmatpush1.bf16.msra.mxu1 %v7939_v39  ;;  %3627 = vmatprep.subr.bf16.mxu0 %v7942_v49  ;;  %9819 = vst [vmem:[#allocation42_spill] sm:$0xff] %v7954_v26  ;;  %v7957_v39 = vld [vmem:[#allocation4 + $0x20c] ss:$16 sps:$4 sm:$0xff]  }
 0x4f6   :  { %3750 = vmatprep.subr.bf16.mxu1 %v7945_v34  ;;  %9820 = vst [vmem:[#allocation43_spill] sm:$0xff] %v7957_v39  ;;  %v7962_v34 = vld [vmem:[#allocation4 + $0x200] ss:$16 sps:$4 sm:$0xff]  }
 0x4f7   :  { %9821 = vst [vmem:[#allocation44_spill] sm:$0xff] %v7962_v34 }
 0x4f8   :  { %3628 = vmatpush1.bf16.msra.mxu0 %v7948_v46  ;;  %v7966_v46 = vld [vmem:[#allocation4 + $0x208] ss:$16 sps:$4 sm:$0xff]  }
 0x4f9   :  { %3751 = vmatpush1.bf16.msra.mxu1 %v7951_v32  ;;  %3638 = vmatprep.subr.bf16.mxu0 %v7954_v26  ;;  %9822 = vst [vmem:[#allocation45_spill] sm:$0xff] %v7966_v46  ;;  %v7970_v26 = vld [vmem:[#allocation4 + $0x224] ss:$16 sps:$4 sm:$0xff]  }
 0x4fa   :  { %3761 = vmatprep.subr.bf16.mxu1 %v7957_v39  ;;  %9823 = vst [vmem:[#allocation46_spill] sm:$0xff] %v7970_v26  ;;  %v7973_v39 = vld [vmem:[#allocation4 + $0x22c] ss:$16 sps:$4 sm:$0xff]   ;;  %v7982_v32 = vld [vmem:[#allocation4 + $0x244] ss:$16 sps:$4 sm:$0xff]  }
 0x4fb   :  { %3630 = vmatmul.mubr.bf16.vlgmr.msra.gmra.mrb[56].mxu0 %v7534_v43  ;;  %9824 = vst [vmem:[#allocation47_spill] sm:$0xff] %v7973_v39  ;;  %9827 = vst [vmem:[#allocation50_spill] sm:$0xff] %v7982_v32 }
 0x4fc   :  { %3753 = vmatmul.mubr.bf16.vlgmr.msra.gmra.mrb[56].mxu1 %v7534_v43  ;;  %3639 = vmatpush1.bf16.msra.mxu0 %v7962_v34  ;;  %v7976_v43 = vld [vmem:[#allocation4 + $0x220] ss:$16 sps:$4 sm:$0xff]   ;;  %v7979_v34 = vld [vmem:[#allocation4 + $0x228] ss:$16 sps:$4 sm:$0xff]  }
 0x4fd   :  { %3670 = vmatprep.mubr.bf16.mxu0 %v7684_v58  ;;  %3762 = vmatpush1.bf16.msra.mxu1 %v7966_v46  ;;  %9825 = vst [vmem:[#allocation48_spill] sm:$0xff] %v7976_v43  ;;  %9826 = vst [vmem:[#allocation49_spill] sm:$0xff] %v7979_v34  ;;  %v7985_v46 = vld [vmem:[#allocation4 + $0x24c] ss:$16 sps:$4 sm:$0xff]  }
 0x4fe   :  { %3793 = vmatprep.mubr.bf16.mxu1 %v7684_v58  ;;  %3640 = vmatprep.subr.bf16.mxu0 %v7970_v26  ;;  %9828 = vst [vmem:[#allocation51_spill] sm:$0xff] %v7985_v46  ;;  %v7988_v26 = vld [vmem:[#allocation4 + $0x240] ss:$16 sps:$4 sm:$0xff]  }
 0x4ff   :  { %3763 = vmatprep.subr.bf16.mxu1 %v7973_v39  ;;  %9829 = vst [vmem:[#allocation52_spill] sm:$0xff] %v7988_v26  ;;  %v7991_v39 = vld [vmem:[#allocation4 + $0x248] ss:$16 sps:$4 sm:$0xff]  }
 0x500   :  { %3641 = vmatpush1.bf16.msra.mxu0 %v7976_v43  ;;  %9830 = vst [vmem:[#allocation53_spill] sm:$0xff] %v7991_v39  ;;  %v7994_v43 = vld [vmem:[#allocation4 + $0x264] ss:$16 sps:$4 sm:$0xff]  }
 0x501   :  { %3764 = vmatpush1.bf16.msra.mxu1 %v7979_v34  ;;  %3642 = vmatprep.subr.bf16.mxu0 %v7982_v32  ;;  %9831 = vst [vmem:[#allocation54_spill] sm:$0xff] %v7994_v43  ;;  %v7997_v34 = vld [vmem:[#allocation4 + $0x26c] ss:$16 sps:$4 sm:$0xff]   ;;  %v8000_v32 = vld [vmem:[#allocation4 + $0x260] ss:$16 sps:$4 sm:$0xff]  }
 0x502   :  { %3765 = vmatprep.subr.bf16.mxu1 %v7985_v46  ;;  %9832 = vst [vmem:[#allocation55_spill] sm:$0xff] %v7997_v34  ;;  %9833 = vst [vmem:[#allocation56_spill] sm:$0xff] %v8000_v32  ;;  %v8003_v46 = vld [vmem:[#allocation4 + $0x268] ss:$16 sps:$4 sm:$0xff]  }
 0x503   :  { %9834 = vst [vmem:[#allocation57_spill] sm:$0xff] %v8003_v46 }
 0x504   :  { %3643 = vmatpush1.bf16.msra.mxu0 %v7988_v26  ;;  %v8006_v26 = vld [vmem:[#allocation4 + $0x284] ss:$16 sps:$4 sm:$0xff]  }
 0x505   :  { %3766 = vmatpush1.bf16.msra.mxu1 %v7991_v39  ;;  %3644 = vmatprep.subr.bf16.mxu0 %v7994_v43  ;;  %9835 = vst [vmem:[#allocation58_spill] sm:$0xff] %v8006_v26  ;;  %v8009_v39 = vld [vmem:[#allocation4 + $0x28c] ss:$16 sps:$4 sm:$0xff]   ;;  %v8012_v43 = vld [vmem:[#allocation4 + $0x280] ss:$16 sps:$4 sm:$0xff]  }
 0x506   :  { %3767 = vmatprep.subr.bf16.mxu1 %v7997_v34  ;;  %9836 = vst [vmem:[#allocation59_spill] sm:$0xff] %v8009_v39  ;;  %9837 = vst [vmem:[#allocation60_spill] sm:$0xff] %v8012_v43  ;;  %v8015_v34 = vld [vmem:[#allocation4 + $0x288] ss:$16 sps:$4 sm:$0xff]  }
 0x507   :  { %9838 = vst [vmem:[#allocation61_spill] sm:$0xff] %v8015_v34 }
 0x508   :  { %3645 = vmatpush1.bf16.msra.mxu0 %v8000_v32  ;;  %v8018_v32 = vld [vmem:[#allocation4 + $0x2a4] ss:$16 sps:$4 sm:$0xff]  }
 0x509   :  { %3768 = vmatpush1.bf16.msra.mxu1 %v8003_v46  ;;  %3646 = vmatprep.subr.bf16.mxu0 %v8006_v26  ;;  %9839 = vst [vmem:[#allocation62_spill] sm:$0xff] %v8018_v32  ;;  %v8021_v46 = vld [vmem:[#allocation4 + $0x2ac] ss:$16 sps:$4 sm:$0xff]   ;;  %v8024_v26 = vld [vmem:[#allocation4 + $0x2a0] ss:$16 sps:$4 sm:$0xff]  }
 0x50a   :  { %3769 = vmatprep.subr.bf16.mxu1 %v8009_v39  ;;  %9840 = vst [vmem:[#allocation86_spill] sm:$0xff] %v8021_v46  ;;  %9841 = vst [vmem:[#allocation63_spill] sm:$0xff] %v8024_v26  ;;  %v8027_v39 = vld [vmem:[#allocation4 + $0x2a8] ss:$16 sps:$4 sm:$0xff]  }
 0x50b   :  { %9842 = vst [vmem:[#allocation64_spill] sm:$0xff] %v8027_v39 }
 0x50c   :  { %3647 = vmatpush1.bf16.msra.mxu0 %v8012_v43  ;;  %v8030_v43 = vld [vmem:[#allocation4 + $0x2c4] ss:$16 sps:$4 sm:$0xff]  }
 0x50d   :  { %3770 = vmatpush1.bf16.msra.mxu1 %v8015_v34  ;;  %3648 = vmatprep.subr.bf16.mxu0 %v8018_v32  ;;  %9843 = vst [vmem:[#allocation111_spill] sm:$0xff] %v8030_v43  ;;  %v8033_v34 = vld [vmem:[#allocation4 + $0x2cc] ss:$16 sps:$4 sm:$0xff]   ;;  %v8036_v32 = vld [vmem:[#allocation4 + $0x2c0] ss:$16 sps:$4 sm:$0xff]  }
 0x50e   :  { %3771 = vmatprep.subr.bf16.mxu1 %v8021_v46  ;;  %9844 = vst [vmem:[#allocation65_spill] sm:$0xff] %v8033_v34  ;;  %9845 = vst [vmem:[#allocation66_spill] sm:$0xff] %v8036_v32  ;;  %v8039_v46 = vld [vmem:[#allocation4 + $0x2c8] ss:$16 sps:$4 sm:$0xff]  }
 0x50f   :  { %9846 = vst [vmem:[#allocation67_spill] sm:$0xff] %v8039_v46 }
 0x510   :  { %3649 = vmatpush1.bf16.msra.mxu0 %v8024_v26  ;;  %v8042_v26 = vld [vmem:[#allocation4 + $0x2e4] ss:$16 sps:$4 sm:$0xff]  }
 0x511   :  { %3772 = vmatpush1.bf16.msra.mxu1 %v8027_v39  ;;  %3650 = vmatprep.subr.bf16.mxu0 %v8030_v43  ;;  %9847 = vst [vmem:[#allocation68_spill] sm:$0xff] %v8042_v26  ;;  %v8045_v39 = vld [vmem:[#allocation4 + $0x2ec] ss:$16 sps:$4 sm:$0xff]   ;;  %v8048_v43 = vld [vmem:[#allocation4 + $0x2e0] ss:$16 sps:$4 sm:$0xff]  }
 0x512   :  { %3773 = vmatprep.subr.bf16.mxu1 %v8033_v34  ;;  %9848 = vst [vmem:[#allocation69_spill] sm:$0xff] %v8045_v39  ;;  %9849 = vst [vmem:[#allocation70_spill] sm:$0xff] %v8048_v43  ;;  %v8051_v34 = vld [vmem:[#allocation4 + $0x2e8] ss:$16 sps:$4 sm:$0xff]  }
 0x513   :  { %9850 = vst [vmem:[#allocation72_spill] sm:$0xff] %v8051_v34 }
 0x514   :  { %3651 = vmatpush1.bf16.msra.mxu0 %v8036_v32  ;;  %v8054_v32 = vld [vmem:[#allocation4 + $0x304] ss:$16 sps:$4 sm:$0xff]  }
 0x515   :  { %3774 = vmatpush1.bf16.msra.mxu1 %v8039_v46  ;;  %3652 = vmatprep.subr.bf16.mxu0 %v8042_v26  ;;  %9851 = vst [vmem:[#allocation73_spill] sm:$0xff] %v8054_v32  ;;  %v8057_v46 = vld [vmem:[#allocation4 + $0x30c] ss:$16 sps:$4 sm:$0xff]   ;;  %v8060_v26 = vld [vmem:[#allocation4 + $0x300] ss:$16 sps:$4 sm:$0xff]  }
 0x516   :  { %3775 = vmatprep.subr.bf16.mxu1 %v8045_v39  ;;  %9852 = vst [vmem:[#allocation75_spill] sm:$0xff] %v8057_v46  ;;  %9853 = vst [vmem:[#allocation76_spill] sm:$0xff] %v8060_v26  ;;  %v8063_v39 = vld [vmem:[#allocation4 + $0x308] ss:$16 sps:$4 sm:$0xff]  }
 0x517   :  { %9854 = vst [vmem:[#allocation77_spill] sm:$0xff] %v8063_v39 }
 0x518   :  { %3653 = vmatpush1.bf16.msra.mxu0 %v8048_v43  ;;  %v8066_v43 = vld [vmem:[#allocation4 + $0x324] ss:$16 sps:$4 sm:$0xff]  }
 0x519   :  { %3776 = vmatpush1.bf16.msra.mxu1 %v8051_v34  ;;  %3654 = vmatprep.subr.bf16.mxu0 %v8054_v32  ;;  %9855 = vst [vmem:[#allocation78_spill] sm:$0xff] %v8066_v43  ;;  %v8069_v34 = vld [vmem:[#allocation4 + $0x32c] ss:$16 sps:$4 sm:$0xff]   ;;  %v8072_v32 = vld [vmem:[#allocation4 + $0x320] ss:$16 sps:$4 sm:$0xff]  }
 0x51a   :  { %3777 = vmatprep.subr.bf16.mxu1 %v8057_v46  ;;  %9856 = vst [vmem:[#allocation79_spill] sm:$0xff] %v8069_v34  ;;  %9857 = vst [vmem:[#allocation80_spill] sm:$0xff] %v8072_v32  ;;  %v8075_v46 = vld [vmem:[#allocation4 + $0x328] ss:$16 sps:$4 sm:$0xff]  }
 0x51b   :  { %9858 = vst [vmem:[#allocation82_spill] sm:$0xff] %v8075_v46 }
 0x51c   :  { %3655 = vmatpush1.bf16.msra.mxu0 %v8060_v26  ;;  %v8078_v26 = vld [vmem:[#allocation4 + $0x344] ss:$16 sps:$4 sm:$0xff]  }
 0x51d   :  { %3778 = vmatpush1.bf16.msra.mxu1 %v8063_v39  ;;  %3656 = vmatprep.subr.bf16.mxu0 %v8066_v43  ;;  %9859 = vst [vmem:[#allocation83_spill] sm:$0xff] %v8078_v26  ;;  %v8081_v39 = vld [vmem:[#allocation4 + $0x34c] ss:$16 sps:$4 sm:$0xff]   ;;  %v8084_v43 = vld [vmem:[#allocation4 + $0x340] ss:$16 sps:$4 sm:$0xff]  }
 0x51e   :  { %3779 = vmatprep.subr.bf16.mxu1 %v8069_v34  ;;  %9860 = vst [vmem:[#allocation104_spill] sm:$0xff] %v8081_v39  ;;  %9861 = vst [vmem:[#allocation116_spill] sm:$0xff] %v8084_v43  ;;  %v8087_v34 = vld [vmem:[#allocation4 + $0x348] ss:$16 sps:$4 sm:$0xff]  }
 0x51f   :  { %9862 = vst [vmem:[#allocation117_spill] sm:$0xff] %v8087_v34 }
 0x520   :  { %3657 = vmatpush1.bf16.msra.mxu0 %v8072_v32  ;;  %v8090_v32 = vld [vmem:[#allocation4 + $0x364] ss:$16 sps:$4 sm:$0xff]  }
 0x521   :  { %3780 = vmatpush1.bf16.msra.mxu1 %v8075_v46  ;;  %3658 = vmatprep.subr.bf16.mxu0 %v8078_v26  ;;  %9863 = vst [vmem:[#allocation103_spill] sm:$0xff] %v8090_v32  ;;  %v8093_v46 = vld [vmem:[#allocation4 + $0x36c] ss:$16 sps:$4 sm:$0xff]   ;;  %v8096_v26 = vld [vmem:[#allocation4 + $0x360] ss:$16 sps:$4 sm:$0xff]  }
 0x522   :  { %3781 = vmatprep.subr.bf16.mxu1 %v8081_v39  ;;  %9864 = vst [vmem:[#allocation110_spill] sm:$0xff] %v8093_v46  ;;  %9865 = vst [vmem:[#allocation109_spill] sm:$0xff] %v8096_v26  ;;  %v8099_v39 = vld [vmem:[#allocation4 + $0x368] ss:$16 sps:$4 sm:$0xff]  }
 0x523   :  { %9866 = vst [vmem:[#allocation118_spill] sm:$0xff] %v8099_v39 }
 0x524   :  { %3659 = vmatpush1.bf16.msra.mxu0 %v8084_v43  ;;  %v8102_v43 = vld [vmem:[#allocation4 + $0x384] ss:$16 sps:$4 sm:$0xff]  }
 0x525   :  { %3782 = vmatpush1.bf16.msra.mxu1 %v8087_v34  ;;  %3660 = vmatprep.subr.bf16.mxu0 %v8090_v32  ;;  %9867 = vst [vmem:[#allocation119_spill] sm:$0xff] %v8102_v43  ;;  %v8105_v34 = vld [vmem:[#allocation4 + $0x38c] ss:$16 sps:$4 sm:$0xff]   ;;  %v8108_v32 = vld [vmem:[#allocation4 + $0x380] ss:$16 sps:$4 sm:$0xff]  }
 0x526   :  { %3783 = vmatprep.subr.bf16.mxu1 %v8093_v46  ;;  %9868 = vst [vmem:[#allocation120_spill] sm:$0xff] %v8105_v34  ;;  %9869 = vst [vmem:[#allocation121_spill] sm:$0xff] %v8108_v32  ;;  %v8111_v46 = vld [vmem:[#allocation4 + $0x388] ss:$16 sps:$4 sm:$0xff]  }
 0x527   :  { %9870 = vst [vmem:[#allocation122_spill] sm:$0xff] %v8111_v46 }
 0x528   :  { %3661 = vmatpush1.bf16.msra.mxu0 %v8096_v26  ;;  %v8114_v26 = vld [vmem:[#allocation4 + $0x3a4] ss:$16 sps:$4 sm:$0xff]  }
 0x529   :  { %3784 = vmatpush1.bf16.msra.mxu1 %v8099_v39  ;;  %3662 = vmatprep.subr.bf16.mxu0 %v8102_v43  ;;  %9871 = vst [vmem:[#allocation124_spill] sm:$0xff] %v8114_v26  ;;  %v8117_v39 = vld [vmem:[#allocation4 + $0x3ac] ss:$16 sps:$4 sm:$0xff]   ;;  %v8120_v43 = vld [vmem:[#allocation4 + $0x3a0] ss:$16 sps:$4 sm:$0xff]  }
 0x52a   :  { %3785 = vmatprep.subr.bf16.mxu1 %v8105_v34  ;;  %9872 = vst [vmem:[#allocation125_spill] sm:$0xff] %v8117_v39  ;;  %9873 = vst [vmem:[#allocation126_spill] sm:$0xff] %v8120_v43  ;;  %v8123_v34 = vld [vmem:[#allocation4 + $0x3a8] ss:$16 sps:$4 sm:$0xff]  }
 0x52b   :  { %9874 = vst [vmem:[#allocation127_spill] sm:$0xff] %v8123_v34 }
 0x52c   :  { %3663 = vmatpush1.bf16.msra.mxu0 %v8108_v32  ;;  %v8126_v32 = vld [vmem:[#allocation4 + $0x3c4] ss:$16 sps:$4 sm:$0xff]  }
 0x52d   :  { %3786 = vmatpush1.bf16.msra.mxu1 %v8111_v46  ;;  %3664 = vmatprep.subr.bf16.mxu0 %v8114_v26  ;;  %9875 = vst [vmem:[#allocation128_spill] sm:$0xff] %v8126_v32  ;;  %v8129_v46 = vld [vmem:[#allocation4 + $0x3cc] ss:$16 sps:$4 sm:$0xff]  }
 0x52e   :  { %3787 = vmatprep.subr.bf16.mxu1 %v8117_v39  ;;  %9876 = vst [vmem:[#allocation129_spill] sm:$0xff] %v8129_v46  ;;  %v9877_v26 = vld [vmem:[#allocation34_spill] sm:$0xff]  ;;  %v8134_v39 = vld [vmem:[#allocation4 + $0x3c0] ss:$16 sps:$4 sm:$0xff]  }
 0x52f   :  { %v1944_v49 = vadd.f32 %v7672_v21, %v9877_v26  ;;  %9878 = vst [vmem:[#allocation130_spill] sm:$0xff] %v8134_v39  ;;  %v8149_v26 = vld [vmem:[#allocation4 + $0x3e8] ss:$16 sps:$4 sm:$0xff]  }
 0x530   :  { %3665 = vmatpush1.bf16.msra.mxu0 %v8120_v43  ;;  %v8137_v43 = vld [vmem:[#allocation4 + $0x3c8] ss:$16 sps:$4 sm:$0xff]   ;;  %9882 = vst [vmem:[#allocation134_spill] sm:$0xff] %v8149_v26 }
 0x531   :  { %3788 = vmatpush1.bf16.msra.mxu1 %v8123_v34  ;;  %3666 = vmatprep.subr.bf16.mxu0 %v8126_v32  ;;  %9879 = vst [vmem:[#allocation131_spill] sm:$0xff] %v8137_v43  ;;  %v8140_v34 = vld [vmem:[#allocation4 + $0x3e4] ss:$16 sps:$4 sm:$0xff]   ;;  %v8143_v32 = vld [vmem:[#allocation4 + $0x3ec] ss:$16 sps:$4 sm:$0xff]  }
 0x532   :  { %3789 = vmatprep.subr.bf16.mxu1 %v8129_v46  ;;  %9880 = vst [vmem:[#allocation132_spill] sm:$0xff] %v8140_v34  ;;  %v1945_v46 = vmax.f32 %v1944_v49, 0.0  ;;  %v8162_v49 = vld [vmem:[#allocation4 + $0x400] ss:$16 sps:$4 sm:$0xff]  }
 0x533   :  { %9885 = vst [vmem:[#allocation137_spill] sm:$0xff] %v8162_v49 }
 0x534   :  { %3667 = vmatpush1.bf16.msra.mxu0 %v8134_v39  ;;  %v8152_v39 = vld [vmem:[#allocation4 + $0x404] ss:$16 sps:$4 sm:$0xff]  }
 0x535   :  { %3790 = vmatpush1.bf16.msra.mxu1 %v8137_v43  ;;  %3668 = vmatprep.subr.bf16.mxu0 %v8140_v34  ;;  %9883 = vst [vmem:[#allocation135_spill] sm:$0xff] %v8152_v39  ;;  %v8155_v43 = vld [vmem:[#allocation4 + $0x40c] ss:$16 sps:$4 sm:$0xff]   ;;  %v8158_v34 = vpack.c.bf16 %v1945_v46, %v1945_v46 }
 0x536   :  { %3791 = vmatprep.subr.bf16.mxu1 %v8143_v32  ;;  %9884 = vst [vmem:[#allocation136_spill] sm:$0xff] %v8155_v43  ;;  %v8173_v46 = vld [vmem:[#allocation4 + $0x42c] ss:$16 sps:$4 sm:$0xff]  }
 0x538   :  { %3669 = vmatpush1.bf16.msra.mxu0 %v8146_v56  ;;  %v8182_v56 = vld [vmem:[#allocation4 + $0x444] ss:$16 sps:$4 sm:$0xff]  }
 0x539   :  { %3792 = vmatpush1.bf16.msra.mxu1 %v8149_v26  ;;  %3679 = vmatprep.subr.bf16.mxu0 %v8152_v39  ;;  %v8166_v26 = vld [vmem:[#allocation4 + $0x408] ss:$16 sps:$4 sm:$0xff]   ;;  %v8170_v39 = vld [vmem:[#allocation4 + $0x424] ss:$16 sps:$4 sm:$0xff]  }
 0x53a   :  { %3802 = vmatprep.subr.bf16.mxu1 %v8155_v43  ;;  %9886 = vst [vmem:[#allocation138_spill] sm:$0xff] %v8166_v26  ;;  %v8176_v43 = vld [vmem:[#allocation4 + $0x420] ss:$16 sps:$4 sm:$0xff]  }
 0x53b   :  { %3671 = vmatmul.mubr.bf16.vlgmr.msra.gmra.mrb[56].mxu0 %v7753_v16 }
 0x53c   :  { %3794 = vmatmul.mubr.bf16.vlgmr.msra.gmra.mrb[56].mxu1 %v7753_v16  ;;  %3680 = vmatpush1.bf16.msra.mxu0 %v8162_v49  ;;  %v8179_v49 = vld [vmem:[#allocation4 + $0x428] ss:$16 sps:$4 sm:$0xff]  }
 0x53d   :  { %3711 = vmatprep.mubr.bf16.mxu0 %v8158_v34  ;;  %3803 = vmatpush1.bf16.msra.mxu1 %v8166_v26  ;;  %v8185_v26 = vld [vmem:[#allocation4 + $0x44c] ss:$16 sps:$4 sm:$0xff]  }
 0x53e   :  { %3834 = vmatprep.mubr.bf16.mxu1 %v8158_v34  ;;  %3681 = vmatprep.subr.bf16.mxu0 %v8170_v39 }
 0x53f   :  { %3804 = vmatprep.subr.bf16.mxu1 %v8173_v46 }
 0x540   :  { %3682 = vmatpush1.bf16.msra.mxu0 %v8176_v43 }
 0x541   :  { %3805 = vmatpush1.bf16.msra.mxu1 %v8179_v49  ;;  %3683 = vmatprep.subr.bf16.mxu0 %v8182_v56 }
 0x542   :  { %3806 = vmatprep.subr.bf16.mxu1 %v8185_v26 }
 0x544   :  { %3684 = vmatpush1.bf16.msra.mxu0 %v9721_v36  ;;  %v9891_v36 = vld [vmem:[#allocation112_spill] sm:$0xff] }
 0x545   :  { %3807 = vmatpush1.bf16.msra.mxu1 %v9722_v17  ;;  %3685 = vmatprep.subr.bf16.mxu0 %v9723_v29  ;;  %v9892_v17 = vld [vmem:[#allocation152_spill] sm:$0xff]  ;;  %v9893_v29 = vld [vmem:[#allocation153_spill] sm:$0xff] }
 0x546   :  { %3808 = vmatprep.subr.bf16.mxu1 %v9724_v28  ;;  %v9894_v28 = vld [vmem:[#allocation154_spill] sm:$0xff] }
 0x548   :  { %3686 = vmatpush1.bf16.msra.mxu0 %v9725_v44 }
 0x549   :  { %3809 = vmatpush1.bf16.msra.mxu1 %v9726_v24  ;;  %3687 = vmatprep.subr.bf16.mxu0 %v9727_v15  ;;  %v9895_v24 = vld [vmem:[#allocation155_spill] sm:$0xff]  ;;  %v9897_v15 = vld [vmem:[#allocation89_spill] sm:$0xff] }
 0x54a   :  { %3810 = vmatprep.subr.bf16.mxu1 %v9728_v35  ;;  %v9898_v35 = vld [vmem:[#allocation90_spill] sm:$0xff] }
 0x54c   :  { %3688 = vmatpush1.bf16.msra.mxu0 %v9729_v27  ;;  %v9899_v27 = vld [vmem:[#allocation91_spill] sm:$0xff] }
 0x54d   :  { %3811 = vmatpush1.bf16.msra.mxu1 %v9730_v47  ;;  %3689 = vmatprep.subr.bf16.mxu0 %v9731_v40  ;;  %v9900_v47 = vld [vmem:[#allocation92_spill] sm:$0xff]  ;;  %v9901_v40 = vld [vmem:[#allocation93_spill] sm:$0xff] }
 0x54e   :  { %3812 = vmatprep.subr.bf16.mxu1 %v9732_v60  ;;  %v9902_v60 = vld [vmem:[#allocation95_spill] sm:$0xff] }
 0x550   :  { %3690 = vmatpush1.bf16.msra.mxu0 %v7402_v38 }
 0x551   :  { %3813 = vmatpush1.bf16.msra.mxu1 %v7406_v22  ;;  %3691 = vmatprep.subr.bf16.mxu0 %v7408_v9  ;;  %v9888_v22 = vld [vmem:[#allocation149_spill] sm:$0xff] }
 0x552   :  { %3814 = vmatprep.subr.bf16.mxu1 %v7411_v37  ;;  %v9890_v37 = vld [vmem:[#allocation151_spill] sm:$0xff] }
 0x554   :  { %3692 = vmatpush1.bf16.msra.mxu0 %v7414_v3  ;;  %v9887_v3 = vld [vmem:[#allocation87_spill] sm:$0xff] }
 0x555   :  { %3815 = vmatpush1.bf16.msra.mxu1 %v7418_v63  ;;  %3693 = vmatprep.subr.bf16.mxu0 %v9733_v62  ;;  %v1938_v38 = vadd.f32 %v7672_v21, %v9887_v3  ;;  %v9889_v63 = vld [vmem:[#allocation150_spill] sm:$0xff]  ;;  %v9903_v62 = vld [vmem:[#allocation96_spill] sm:$0xff] }
 0x556   :  { %3816 = vmatprep.subr.bf16.mxu1 %v9734_v8  ;;  %v9904_v8 = vld [vmem:[#allocation97_spill] sm:$0xff]  ;;  %v9923_v3 = vld [vmem:[#allocation10_spill] sm:$0xff] }
 0x557   :  { %v1939_v9 = vmax.f32 %v1938_v38, 0.0  ;;  %v9925_v38 = vld [vmem:[#allocation13_spill] sm:$0xff] }
 0x558   :  { %3694 = vmatpush1.bf16.msra.mxu0 %v9735_v20  ;;  %v9905_v20 = vld [vmem:[#allocation98_spill] sm:$0xff] }
 0x559   :  { %3817 = vmatpush1.bf16.msra.mxu1 %v9736_v30  ;;  %3695 = vmatprep.subr.bf16.mxu0 %v9737_v48  ;;  %v8243_v44 = vpack.c.bf16 %v1939_v9, %v1939_v9  ;;  %v9906_v30 = vld [vmem:[#allocation99_spill] sm:$0xff]  ;;  %v9907_v48 = vld [vmem:[#allocation100_spill] sm:$0xff] }
 0x55a   :  { %3818 = vmatprep.subr.bf16.mxu1 %v9738_v18  ;;  %v9908_v18 = vld [vmem:[#allocation101_spill] sm:$0xff]  ;;  %v9932_v9 = vld [vmem:[#allocation20_spill] sm:$0xff] }
 0x55c   :  { %3696 = vmatpush1.bf16.msra.mxu0 %v9739_v10  ;;  %v9909_v10 = vld [vmem:[#allocation105_spill] sm:$0xff] }
 0x55d   :  { %3819 = vmatpush1.bf16.msra.mxu1 %v9740_v14  ;;  %3697 = vmatprep.subr.bf16.mxu0 %v9741_v42  ;;  %v9911_v14 = vld [vmem:[#allocation102_spill] sm:$0xff]  ;;  %v9912_v42 = vld [vmem:[#allocation81_spill] sm:$0xff] }
 0x55e   :  { %3820 = vmatprep.subr.bf16.mxu1 %v9742_v45  ;;  %v9913_v45 = vld [vmem:[#allocation84_spill] sm:$0xff] }
 0x560   :  { %3698 = vmatpush1.bf16.msra.mxu0 %v9743_v50  ;;  %v9914_v50 = vld [vmem:[#allocation94_spill] sm:$0xff] }
 0x561   :  { %3821 = vmatpush1.bf16.msra.mxu1 %v9744_v51  ;;  %3699 = vmatprep.subr.bf16.mxu0 %v9745_v52  ;;  %v9915_v51 = vld [vmem:[#allocation108_spill] sm:$0xff]  ;;  %v9916_v52 = vld [vmem:[#allocation113_spill] sm:$0xff] }
 0x562   :  { %3822 = vmatprep.subr.bf16.mxu1 %v9746_v12 }
 0x564   :  { %3700 = vmatpush1.bf16.msra.mxu0 %v9747_v61  ;;  %v9917_v61 = vld [vmem:[#allocation71_spill] sm:$0xff] }
 0x565   :  { %3823 = vmatpush1.bf16.msra.mxu1 %v9748_v4  ;;  %3701 = vmatprep.subr.bf16.mxu0 %v9749_v1 }
 0x566   :  { %3824 = vmatprep.subr.bf16.mxu1 %v9750_v23 }
 0x568   :  { %3702 = vmatpush1.bf16.msra.mxu0 %v9751_v25 }
 0x569   :  { %3825 = vmatpush1.bf16.msra.mxu1 %v9752_v41  ;;  %3703 = vmatprep.subr.bf16.mxu0 %v9753_v59 }
 0x56a   :  { %3826 = vmatprep.subr.bf16.mxu1 %v9754_v2 }
 0x56c   :  { %3704 = vmatpush1.bf16.msra.mxu0 %v9755_v31 }
 0x56d   :  { %3827 = vmatpush1.bf16.msra.mxu1 %v9756_v0  ;;  %3705 = vmatprep.subr.bf16.mxu0 %v9757_v33 }
 0x56e   :  { %3828 = vmatprep.subr.bf16.mxu1 %v9758_v53  ;;  %v9918_v53 = vld [vmem:[#allocation74_spill] sm:$0xff] }
 0x570   :  { %3706 = vmatpush1.bf16.msra.mxu0 %v9759_v13  ;;  %v9920_v13 = vld [vmem:[#allocation107_spill] sm:$0xff] }
 0x571   :  { %3829 = vmatpush1.bf16.msra.mxu1 %v7504_v55  ;;  %3707 = vmatprep.subr.bf16.mxu0 %v9888_v22  ;;  %v9896_v55 = vld [vmem:[#allocation88_spill] sm:$0xff]  ;;  %v9929_v22 = vld [vmem:[#allocation17_spill] sm:$0xff] }
 0x572   :  { %3830 = vmatprep.subr.bf16.mxu1 %v9889_v63  ;;  %v9930_v63 = vld [vmem:[#allocation18_spill] sm:$0xff] }
 0x574   :  { %3708 = vmatpush1.bf16.msra.mxu0 %v9890_v37  ;;  %v9931_v37 = vld [vmem:[#allocation19_spill] sm:$0xff] }
 0x575   :  { %3831 = vmatpush1.bf16.msra.mxu1 %v9891_v36  ;;  %3709 = vmatprep.subr.bf16.mxu0 %v9892_v17  ;;  %v9933_v36 = vld [vmem:[#allocation21_spill] sm:$0xff]  ;;  %v9934_v17 = vld [vmem:[#allocation22_spill] sm:$0xff] }
 0x576   :  { %3832 = vmatprep.subr.bf16.mxu1 %v9893_v29  ;;  %v9935_v29 = vld [vmem:[#allocation23_spill] sm:$0xff] }
 0x578   :  { %3710 = vmatpush1.bf16.msra.mxu0 %v9894_v28  ;;  %v9936_v28 = vld [vmem:[#allocation24_spill] sm:$0xff] }
 0x579   :  { %3833 = vmatpush1.bf16.msra.mxu1 %v9895_v24  ;;  %3849 = vmatprep.subr.bf16.mxu0 %v9896_v55  ;;  %v9937_v24 = vld [vmem:[#allocation25_spill] sm:$0xff]  ;;  %v9938_v55 = vld [vmem:[#allocation26_spill] sm:$0xff] }
 0x57a   :  { %3972 = vmatprep.subr.bf16.mxu1 %v9897_v15  ;;  %v9939_v15 = vld [vmem:[#allocation27_spill] sm:$0xff] }
 0x57b   :  { %3712 = vmatmul.mubr.bf16.vlgmr.msra.gmra.mrb[56].mxu0 %v8243_v44 }
 0x57c   :  { %3835 = vmatmul.mubr.bf16.vlgmr.msra.gmra.mrb[56].mxu1 %v8243_v44  ;;  %3850 = vmatpush1.bf16.msra.mxu0 %v9898_v35  ;;  %v9940_v35 = vld [vmem:[#allocation28_spill] sm:$0xff] }
 0x57d   :  { %3881 = vmatprep.mubr.bf16.mxu0 %v7684_v58  ;;  %3973 = vmatpush1.bf16.msra.mxu1 %v9899_v27  ;;  %v9941_v27 = vld [vmem:[#allocation29_spill] sm:$0xff] }
 0x57e   :  { %4004 = vmatprep.mubr.bf16.mxu1 %v7684_v58  ;;  %3851 = vmatprep.subr.bf16.mxu0 %v9900_v47  ;;  %v9910_v58 = vld [vmem:[#allocation114_spill] sm:$0xff] }
 0x57f   :  { %3974 = vmatprep.subr.bf16.mxu1 %v9901_v40  ;;  %v9942_v47 = vld [vmem:[#allocation30_spill] sm:$0xff]  ;;  %v9943_v40 = vld [vmem:[#allocation31_spill] sm:$0xff] }
 0x580   :  { %3852 = vmatpush1.bf16.msra.mxu0 %v9902_v60  ;;  %v9944_v60 = vld [vmem:[#allocation32_spill] sm:$0xff] }
 0x581   :  { %3975 = vmatpush1.bf16.msra.mxu1 %v9903_v62  ;;  %3853 = vmatprep.subr.bf16.mxu0 %v9904_v8  ;;  %v9945_v62 = vld [vmem:[#allocation33_spill] sm:$0xff]  ;;  %v9946_v8 = vld [vmem:[#allocation35_spill] sm:$0xff] }
 0x582   :  { %3976 = vmatprep.subr.bf16.mxu1 %v9905_v20  ;;  %v9947_v20 = vld [vmem:[#allocation36_spill] sm:$0xff] }
 0x584   :  { %3854 = vmatpush1.bf16.msra.mxu0 %v9906_v30  ;;  %v9948_v30 = vld [vmem:[#allocation37_spill] sm:$0xff] }
 0x585   :  { %3977 = vmatpush1.bf16.msra.mxu1 %v9907_v48  ;;  %3855 = vmatprep.subr.bf16.mxu0 %v9908_v18  ;;  %v9949_v48 = vld [vmem:[#allocation38_spill] sm:$0xff]  ;;  %v9950_v18 = vld [vmem:[#allocation39_spill] sm:$0xff] }
 0x586   :  { %3978 = vmatprep.subr.bf16.mxu1 %v9909_v10  ;;  %v9951_v10 = vld [vmem:[#allocation40_spill] sm:$0xff] }
 0x588   :  { %3856 = vmatpush1.bf16.msra.mxu0 %v9910_v58  ;;  %v9952_v58 = vld [vmem:[#allocation41_spill] sm:$0xff] }
 0x589   :  { %3979 = vmatpush1.bf16.msra.mxu1 %v9911_v14  ;;  %3857 = vmatprep.subr.bf16.mxu0 %v9912_v42  ;;  %v9953_v14 = vld [vmem:[#allocation42_spill] sm:$0xff]  ;;  %v9954_v42 = vld [vmem:[#allocation43_spill] sm:$0xff] }
 0x58a   :  { %3980 = vmatprep.subr.bf16.mxu1 %v9913_v45  ;;  %v9955_v45 = vld [vmem:[#allocation44_spill] sm:$0xff] }
 0x58c   :  { %3858 = vmatpush1.bf16.msra.mxu0 %v9914_v50  ;;  %v9956_v50 = vld [vmem:[#allocation45_spill] sm:$0xff] }
 0x58d   :  { %3981 = vmatpush1.bf16.msra.mxu1 %v9915_v51  ;;  %3859 = vmatprep.subr.bf16.mxu0 %v9916_v52  ;;  %v9957_v51 = vld [vmem:[#allocation46_spill] sm:$0xff]  ;;  %v9958_v52 = vld [vmem:[#allocation47_spill] sm:$0xff] }
 0x58e   :  { %v3461_v12 = vpop.f32.mrb[52].mxu0  ;;  %3982 = vmatprep.subr.bf16.mxu1 %v9917_v61  ;;  %v9960_v61 = vld [vmem:[#allocation49_spill] sm:$0xff] }
 0x58f   :  { %v3584_v4 = vpop.f32.mrb[52].mxu1  ;;  %v3463_v1 = vpop.f32.mrb[53].mxu0 }
 0x590   :  { %v3591_v23 = vmax.f32 %v3461_v12, %v3463_v1  ;;  %v3586_v25 = vpop.f32.mrb[53].mxu1  ;;  %v3465_v41 = vpop.f32.mrb[54].mxu0  ;;  %3860 = vmatpush1.bf16.msra.mxu0 %v7826_v5  ;;  %v9919_v5 = vld [vmem:[#allocation106_spill] sm:$0xff]  ;;  %v9959_v12 = vld [vmem:[#allocation48_spill] sm:$0xff]  ;;  %v9962_v1 = vld [vmem:[#allocation51_spill] sm:$0xff] }
 0x591   :  { %v3592_v59 = vmax.f32 %v3584_v4, %v3586_v25  ;;  %v3588_v2 = vpop.f32.mrb[54].mxu1  ;;  %3983 = vmatpush1.bf16.msra.mxu1 %v7829_v19  ;;  %v3466_v31 = vpop.f32.mrb[55].mxu0  ;;  %3861 = vmatprep.subr.bf16.mxu0 %v7832_v6  ;;  %v9921_v19 = vld [vmem:[#allocation9_spill] sm:$0xff]  ;;  %v9922_v6 = vld [vmem:[#allocation11_spill] sm:$0xff]  ;;  %v9961_v4 = vld [vmem:[#allocation50_spill] sm:$0xff] }
 0x592   :  { %v3589_v0 = vpop.f32.mrb[55].mxu1  ;;  %3984 = vmatprep.subr.bf16.mxu1 %v7835_v54  ;;  %v9924_v54 = vld [vmem:[#allocation12_spill] sm:$0xff]  ;;  %v9965_v25 = vld [vmem:[#allocation54_spill] sm:$0xff]  ;;  %v9966_v41 = vld [vmem:[#allocation55_spill] sm:$0xff] }
 0x593   :  { %v8276_v33 = vmax.f32 %v3591_v23, %v3592_v59  ;;  %v9964_v23 = vld [vmem:[#allocation53_spill] sm:$0xff]  ;;  %v9969_v2 = vld [vmem:[#allocation58_spill] sm:$0xff]  ;;  %v9970_v31 = vld [vmem:[#allocation59_spill] sm:$0xff] }
 0x594   :  { %3862 = vmatpush1.bf16.msra.mxu0 %v7840_v7  ;;  %v9926_v7 = vld [vmem:[#allocation14_spill] sm:$0xff]  ;;  %v9968_v59 = vld [vmem:[#allocation57_spill] sm:$0xff]  ;;  %v9971_v0 = vld [vmem:[#allocation60_spill] sm:$0xff] }
 0x595   :  { %3985 = vmatpush1.bf16.msra.mxu1 %v7843_v57  ;;  %3863 = vmatprep.subr.bf16.mxu0 %v7846_v11  ;;  %v9927_v57 = vld [vmem:[#allocation15_spill] sm:$0xff]  ;;  %v9928_v11 = vld [vmem:[#allocation16_spill] sm:$0xff] }
 0x596   :  { %3986 = vmatprep.subr.bf16.mxu1 %v9918_v53  ;;  %v9972_v53 = vld [vmem:[#allocation61_spill] sm:$0xff] }
 0x598   :  { %3864 = vmatpush1.bf16.msra.mxu0 %v9919_v5  ;;  %v9973_v5 = vld [vmem:[#allocation62_spill] sm:$0xff] }
 0x599   :  { %3987 = vmatpush1.bf16.msra.mxu1 %v9920_v13  ;;  %3865 = vmatprep.subr.bf16.mxu0 %v9921_v19  ;;  %v9974_v13 = vld [vmem:[#allocation86_spill] sm:$0xff]  ;;  %v9975_v19 = vld [vmem:[#allocation63_spill] sm:$0xff] }
 0x59a   :  { %3988 = vmatprep.subr.bf16.mxu1 %v9922_v6  ;;  %v9976_v6 = vld [vmem:[#allocation64_spill] sm:$0xff] }
 0x59c   :  { %3866 = vmatpush1.bf16.msra.mxu0 %v9923_v3  ;;  %v9977_v3 = vld [vmem:[#allocation111_spill] sm:$0xff] }
 0x59d   :  { %3989 = vmatpush1.bf16.msra.mxu1 %v9924_v54  ;;  %3867 = vmatprep.subr.bf16.mxu0 %v9925_v38  ;;  %v9978_v54 = vld [vmem:[#allocation65_spill] sm:$0xff]  ;;  %v9979_v38 = vld [vmem:[#allocation66_spill] sm:$0xff] }
 0x59e   :  { %3990 = vmatprep.subr.bf16.mxu1 %v9926_v7  ;;  %v9980_v7 = vld [vmem:[#allocation67_spill] sm:$0xff] }
 0x5a0   :  { %3868 = vmatpush1.bf16.msra.mxu0 %v9927_v57  ;;  %v9981_v57 = vld [vmem:[#allocation68_spill] sm:$0xff] }
 0x5a1   :  { %3991 = vmatpush1.bf16.msra.mxu1 %v9928_v11  ;;  %3869 = vmatprep.subr.bf16.mxu0 %v9929_v22  ;;  %v9982_v11 = vld [vmem:[#allocation69_spill] sm:$0xff]  ;;  %v9983_v22 = vld [vmem:[#allocation70_spill] sm:$0xff] }
 0x5a2   :  { %3992 = vmatprep.subr.bf16.mxu1 %v9930_v63  ;;  %v9984_v63 = vld [vmem:[#allocation72_spill] sm:$0xff] }
 0x5a4   :  { %3870 = vmatpush1.bf16.msra.mxu0 %v9931_v37  ;;  %v9985_v37 = vld [vmem:[#allocation73_spill] sm:$0xff] }
 0x5a5   :  { %3993 = vmatpush1.bf16.msra.mxu1 %v9932_v9  ;;  %3871 = vmatprep.subr.bf16.mxu0 %v9933_v36  ;;  %v9986_v9 = vld [vmem:[#allocation75_spill] sm:$0xff]  ;;  %v9987_v36 = vld [vmem:[#allocation76_spill] sm:$0xff] }
 0x5a6   :  { %3994 = vmatprep.subr.bf16.mxu1 %v9934_v17  ;;  %v9988_v17 = vld [vmem:[#allocation77_spill] sm:$0xff] }
 0x5a8   :  { %3872 = vmatpush1.bf16.msra.mxu0 %v9935_v29  ;;  %v9989_v29 = vld [vmem:[#allocation78_spill] sm:$0xff] }
 0x5a9   :  { %3995 = vmatpush1.bf16.msra.mxu1 %v9936_v28  ;;  %3873 = vmatprep.subr.bf16.mxu0 %v9937_v24  ;;  %v9990_v28 = vld [vmem:[#allocation79_spill] sm:$0xff]  ;;  %v9991_v24 = vld [vmem:[#allocation80_spill] sm:$0xff] }
 0x5aa   :  { %3996 = vmatprep.subr.bf16.mxu1 %v9938_v55  ;;  %v9992_v55 = vld [vmem:[#allocation82_spill] sm:$0xff] }
 0x5ac   :  { %3874 = vmatpush1.bf16.msra.mxu0 %v9939_v15  ;;  %v9993_v15 = vld [vmem:[#allocation83_spill] sm:$0xff] }
 0x5ad   :  { %3997 = vmatpush1.bf16.msra.mxu1 %v9940_v35  ;;  %3875 = vmatprep.subr.bf16.mxu0 %v9941_v27  ;;  %v9994_v35 = vld [vmem:[#allocation104_spill] sm:$0xff] }
 0x5ae   :  { %3998 = vmatprep.subr.bf16.mxu1 %v9942_v47  ;;  %v9995_v27 = vld [vmem:[#allocation116_spill] sm:$0xff]  ;;  %v9996_v47 = vld [vmem:[#allocation117_spill] sm:$0xff] }
 0x5b0   :  { %3876 = vmatpush1.bf16.msra.mxu0 %v9943_v40  ;;  %v9997_v40 = vld [vmem:[#allocation103_spill] sm:$0xff] }
 0x5b1   :  { %3999 = vmatpush1.bf16.msra.mxu1 %v9944_v60  ;;  %3877 = vmatprep.subr.bf16.mxu0 %v9945_v62  ;;  %v9998_v60 = vld [vmem:[#allocation110_spill] sm:$0xff]  ;;  %v9999_v62 = vld [vmem:[#allocation109_spill] sm:$0xff] }
 0x5b2   :  { %4000 = vmatprep.subr.bf16.mxu1 %v9946_v8  ;;  %v10000_v8 = vld [vmem:[#allocation118_spill] sm:$0xff] }
 0x5b4   :  { %3878 = vmatpush1.bf16.msra.mxu0 %v9947_v20  ;;  %v10001_v20 = vld [vmem:[#allocation119_spill] sm:$0xff] }
 0x5b5   :  { %4001 = vmatpush1.bf16.msra.mxu1 %v9948_v30  ;;  %3879 = vmatprep.subr.bf16.mxu0 %v9949_v48  ;;  %v10002_v30 = vld [vmem:[#allocation120_spill] sm:$0xff]  ;;  %v10003_v48 = vld [vmem:[#allocation121_spill] sm:$0xff] }
 0x5b6   :  { %4002 = vmatprep.subr.bf16.mxu1 %v9950_v18  ;;  %v10004_v18 = vld [vmem:[#allocation122_spill] sm:$0xff] }
 0x5b8   :  { %3880 = vmatpush1.bf16.msra.mxu0 %v9951_v10  ;;  %v10005_v10 = vld [vmem:[#allocation124_spill] sm:$0xff] }
 0x5b9   :  { %4003 = vmatpush1.bf16.msra.mxu1 %v9952_v58  ;;  %3890 = vmatprep.subr.bf16.mxu0 %v9953_v14  ;;  %v10006_v58 = vld [vmem:[#allocation125_spill] sm:$0xff]  ;;  %v10007_v14 = vld [vmem:[#allocation126_spill] sm:$0xff] }
 0x5ba   :  { %4013 = vmatprep.subr.bf16.mxu1 %v9954_v42  ;;  %v10008_v42 = vld [vmem:[#allocation127_spill] sm:$0xff] }
 0x5bb   :  { %3882 = vmatmul.mubr.bf16.vlgmr.msra.gmra.mrb[60].mxu0 %v7753_v16 }
 0x5bc   :  { %4005 = vmatmul.mubr.bf16.vlgmr.msra.gmra.mrb[60].mxu1 %v7753_v16  ;;  %3891 = vmatpush1.bf16.msra.mxu0 %v9955_v45  ;;  %v9963_v16 = vld [vmem:[#allocation52_spill] sm:$0xff] }
 0x5bd   :  { %3922 = vmatprep.mubr.bf16.mxu0 %v8158_v34  ;;  %4014 = vmatpush1.bf16.msra.mxu1 %v9956_v50  ;;  %v10009_v45 = vld [vmem:[#allocation128_spill] sm:$0xff]  ;;  %v10010_v50 = vld [vmem:[#allocation129_spill] sm:$0xff] }
 0x5be   :  { %4045 = vmatprep.mubr.bf16.mxu1 %v8158_v34  ;;  %3892 = vmatprep.subr.bf16.mxu0 %v9957_v51  ;;  %v9967_v34 = vld [vmem:[#allocation56_spill] sm:$0xff] }
 0x5bf   :  { %4015 = vmatprep.subr.bf16.mxu1 %v9958_v52  ;;  %v10011_v51 = vld [vmem:[#allocation156_spill] sm:$0xff] }
 0x5c0   :  { %3893 = vmatpush1.bf16.msra.mxu0 %v9959_v12  ;;  %v2124_v52 = vadd.f32 %v7672_v21, %v10011_v51  ;;  %v10012_v12 = vld [vmem:[#allocation130_spill] sm:$0xff]  ;;  %v8403_v51 = vld [vmem:[%s8448_s4] ss:$0 sm:$0xff] }
 0x5c1   :  { %4016 = vmatpush1.bf16.msra.mxu1 %v9960_v61  ;;  %3894 = vmatprep.subr.bf16.mxu0 %v9961_v4  ;;  %v10013_v61 = vld [vmem:[#allocation131_spill] sm:$0xff]  ;;  %v10014_v4 = vld [vmem:[#allocation132_spill] sm:$0xff] }
 0x5c2   :  { %4017 = vmatprep.subr.bf16.mxu1 %v9962_v1  ;;  %v2125_v1 = vmax.f32 %v2124_v52, 0.0  ;;  %v5618_v52 = vld [vmem:[#allocation4 + $0x5cc] ss:$16 sps:$4 sm:$0xff]  }
 0x5c4   :  { %3895 = vmatpush1.bf16.msra.mxu0 %v9963_v16  ;;  %v10015_v16 = vld [vmem:[#allocation133_spill] sm:$0xff] }
 0x5c5   :  { %4018 = vmatpush1.bf16.msra.mxu1 %v9964_v23  ;;  %3896 = vmatprep.subr.bf16.mxu0 %v9965_v25  ;;  %v10016_v23 = vld [vmem:[#allocation134_spill] sm:$0xff]  ;;  %v10017_v25 = vld [vmem:[#allocation135_spill] sm:$0xff] }
 0x5c6   :  { %4019 = vmatprep.subr.bf16.mxu1 %v9966_v41  ;;  %v10018_v41 = vld [vmem:[#allocation136_spill] sm:$0xff] }
 0x5c8   :  { %3897 = vmatpush1.bf16.msra.mxu0 %v9967_v34  ;;  %v2126_v34 = vpack.c.bf16 %v2125_v1, %v2125_v1  ;;  %v5620_v1 = vld [vmem:[#allocation4 + $0x5c8] ss:$16 sps:$4 sm:$0xff]  }
 0x5c9   :  { %4020 = vmatpush1.bf16.msra.mxu1 %v9968_v59  ;;  %3898 = vmatprep.subr.bf16.mxu0 %v9969_v2  ;;  %v10019_v59 = vld [vmem:[#allocation137_spill] sm:$0xff]  ;;  %v10020_v2 = vld [vmem:[#allocation138_spill] sm:$0xff] }
 0x5ca   :  { %4021 = vmatprep.subr.bf16.mxu1 %v9970_v31  ;;  %v5573_v31 = vld [vmem:[#allocation4 + $0x464] ss:$16 sps:$4 sm:$0xff]  }
 0x5cc   :  { %3899 = vmatpush1.bf16.msra.mxu0 %v9971_v0  ;;  %v5574_v0 = vld [vmem:[#allocation4 + $0x46c] ss:$16 sps:$4 sm:$0xff]  }
 0x5cd   :  { %4022 = vmatpush1.bf16.msra.mxu1 %v9972_v53  ;;  %3900 = vmatprep.subr.bf16.mxu0 %v9973_v5  ;;  %v5575_v53 = vld [vmem:[#allocation4 + $0x460] ss:$16 sps:$4 sm:$0xff]   ;;  %v5582_v5 = vld [vmem:[#allocation4 + $0x4ac] ss:$16 sps:$4 sm:$0xff]  }
 0x5ce   :  { %4023 = vmatprep.subr.bf16.mxu1 %v9974_v13  ;;  %v5583_v13 = vld [vmem:[#allocation4 + $0x4a0] ss:$16 sps:$4 sm:$0xff]  }
 0x5d0   :  { %3901 = vmatpush1.bf16.msra.mxu0 %v9975_v19  ;;  %v5584_v19 = vld [vmem:[#allocation4 + $0x4a8] ss:$16 sps:$4 sm:$0xff]  }
 0x5d1   :  { %4024 = vmatpush1.bf16.msra.mxu1 %v9976_v6  ;;  %3902 = vmatprep.subr.bf16.mxu0 %v9977_v3  ;;  %v5585_v6 = vld [vmem:[#allocation4 + $0x4c4] ss:$16 sps:$4 sm:$0xff]   ;;  %v5586_v3 = vld [vmem:[#allocation4 + $0x4cc] ss:$16 sps:$4 sm:$0xff]  }
 0x5d2   :  { %4025 = vmatprep.subr.bf16.mxu1 %v9978_v54  ;;  %v5587_v54 = vld [vmem:[#allocation4 + $0x4c0] ss:$16 sps:$4 sm:$0xff]  }
 0x5d4   :  { %3903 = vmatpush1.bf16.msra.mxu0 %v9979_v38  ;;  %v5588_v38 = vld [vmem:[#allocation4 + $0x4c8] ss:$16 sps:$4 sm:$0xff]  }
 0x5d5   :  { %4026 = vmatpush1.bf16.msra.mxu1 %v9980_v7  ;;  %3904 = vmatprep.subr.bf16.mxu0 %v9981_v57  ;;  %v5589_v7 = vld [vmem:[#allocation4 + $0x4e4] ss:$16 sps:$4 sm:$0xff]   ;;  %v5590_v57 = vld [vmem:[#allocation4 + $0x4ec] ss:$16 sps:$4 sm:$0xff]  }
 0x5d6   :  { %4027 = vmatprep.subr.bf16.mxu1 %v9982_v11  ;;  %v5591_v11 = vld [vmem:[#allocation4 + $0x4e0] ss:$16 sps:$4 sm:$0xff]  }
 0x5d8   :  { %3905 = vmatpush1.bf16.msra.mxu0 %v9983_v22  ;;  %v5592_v22 = vld [vmem:[#allocation4 + $0x4e8] ss:$16 sps:$4 sm:$0xff]  }
 0x5d9   :  { %4028 = vmatpush1.bf16.msra.mxu1 %v9984_v63  ;;  %3906 = vmatprep.subr.bf16.mxu0 %v9985_v37  ;;  %v5593_v63 = vld [vmem:[#allocation4 + $0x504] ss:$16 sps:$4 sm:$0xff]   ;;  %v5594_v37 = vld [vmem:[#allocation4 + $0x50c] ss:$16 sps:$4 sm:$0xff]  }
 0x5da   :  { %4029 = vmatprep.subr.bf16.mxu1 %v9986_v9  ;;  %v5595_v9 = vld [vmem:[#allocation4 + $0x500] ss:$16 sps:$4 sm:$0xff]  }
 0x5dc   :  { %3907 = vmatpush1.bf16.msra.mxu0 %v9987_v36  ;;  %v5596_v36 = vld [vmem:[#allocation4 + $0x508] ss:$16 sps:$4 sm:$0xff]  }
 0x5dd   :  { %4030 = vmatpush1.bf16.msra.mxu1 %v9988_v17  ;;  %3908 = vmatprep.subr.bf16.mxu0 %v9989_v29  ;;  %v5597_v17 = vld [vmem:[#allocation4 + $0x524] ss:$16 sps:$4 sm:$0xff]   ;;  %v5598_v29 = vld [vmem:[#allocation4 + $0x52c] ss:$16 sps:$4 sm:$0xff]  }
 0x5de   :  { %4031 = vmatprep.subr.bf16.mxu1 %v9990_v28  ;;  %v5599_v28 = vld [vmem:[#allocation4 + $0x520] ss:$16 sps:$4 sm:$0xff]  }
 0x5e0   :  { %3909 = vmatpush1.bf16.msra.mxu0 %v9991_v24  ;;  %v5600_v24 = vld [vmem:[#allocation4 + $0x528] ss:$16 sps:$4 sm:$0xff]  }
 0x5e1   :  { %4032 = vmatpush1.bf16.msra.mxu1 %v9992_v55  ;;  %3910 = vmatprep.subr.bf16.mxu0 %v9993_v15  ;;  %v5601_v55 = vld [vmem:[#allocation4 + $0x544] ss:$16 sps:$4 sm:$0xff]   ;;  %v5602_v15 = vld [vmem:[#allocation4 + $0x54c] ss:$16 sps:$4 sm:$0xff]  }
 0x5e2   :  { %4033 = vmatprep.subr.bf16.mxu1 %v9994_v35  ;;  %v5603_v35 = vld [vmem:[#allocation4 + $0x540] ss:$16 sps:$4 sm:$0xff]  }
 0x5e4   :  { %3911 = vmatpush1.bf16.msra.mxu0 %v9995_v27  ;;  %v5604_v27 = vld [vmem:[#allocation4 + $0x548] ss:$16 sps:$4 sm:$0xff]  }
 0x5e5   :  { %4034 = vmatpush1.bf16.msra.mxu1 %v9996_v47  ;;  %3912 = vmatprep.subr.bf16.mxu0 %v9997_v40  ;;  %v5605_v47 = vld [vmem:[#allocation4 + $0x564] ss:$16 sps:$4 sm:$0xff]   ;;  %v5606_v40 = vld [vmem:[#allocation4 + $0x56c] ss:$16 sps:$4 sm:$0xff]  }
 0x5e6   :  { %4035 = vmatprep.subr.bf16.mxu1 %v9998_v60  ;;  %v5607_v60 = vld [vmem:[#allocation4 + $0x560] ss:$16 sps:$4 sm:$0xff]  }
 0x5e8   :  { %3913 = vmatpush1.bf16.msra.mxu0 %v9999_v62  ;;  %v5608_v62 = vld [vmem:[#allocation4 + $0x568] ss:$16 sps:$4 sm:$0xff]  }
 0x5e9   :  { %4036 = vmatpush1.bf16.msra.mxu1 %v10000_v8  ;;  %3914 = vmatprep.subr.bf16.mxu0 %v10001_v20  ;;  %v5609_v8 = vld [vmem:[#allocation4 + $0x584] ss:$16 sps:$4 sm:$0xff]   ;;  %v5610_v20 = vld [vmem:[#allocation4 + $0x58c] ss:$16 sps:$4 sm:$0xff]  }
 0x5ea   :  { %4037 = vmatprep.subr.bf16.mxu1 %v10002_v30  ;;  %v5611_v30 = vld [vmem:[#allocation4 + $0x580] ss:$16 sps:$4 sm:$0xff]  }
 0x5ec   :  { %3915 = vmatpush1.bf16.msra.mxu0 %v10003_v48  ;;  %v5612_v48 = vld [vmem:[#allocation4 + $0x588] ss:$16 sps:$4 sm:$0xff]  }
 0x5ed   :  { %4038 = vmatpush1.bf16.msra.mxu1 %v10004_v18  ;;  %3916 = vmatprep.subr.bf16.mxu0 %v10005_v10  ;;  %v5613_v18 = vld [vmem:[#allocation4 + $0x5a4] ss:$16 sps:$4 sm:$0xff]   ;;  %v5614_v10 = vld [vmem:[#allocation4 + $0x5ac] ss:$16 sps:$4 sm:$0xff]  }
 0x5ee   :  { %4039 = vmatprep.subr.bf16.mxu1 %v10006_v58  ;;  %v5615_v58 = vld [vmem:[#allocation4 + $0x5a0] ss:$16 sps:$4 sm:$0xff]  }
 0x5f0   :  { %3917 = vmatpush1.bf16.msra.mxu0 %v10007_v14  ;;  %v10021_v14 = vld [vmem:[#allocation123_spill] sm:$0xff] }
 0x5f1   :  { %4040 = vmatpush1.bf16.msra.mxu1 %v10008_v42  ;;  %3918 = vmatprep.subr.bf16.mxu0 %v10009_v45  ;;  %v2118_v42 = vadd.f32 %v7672_v21, %v10021_v14  ;;  %v5616_v45 = vld [vmem:[#allocation4 + $0x5a8] ss:$16 sps:$4 sm:$0xff]   ;;  %v5621_v21 = vld [vmem:[#allocation4 + $0x5e4] ss:$16 sps:$4 sm:$0xff]  }
 0x5f2   :  { %4041 = vmatprep.subr.bf16.mxu1 %v10010_v50  ;;  %v5617_v50 = vld [vmem:[#allocation4 + $0x5c4] ss:$16 sps:$4 sm:$0xff]  }
 0x5f3   :  { %v5420_v14 = vld [vmem:[%s8451_s7] sm:$0xff]  }
 0x5f4   :  { %3919 = vmatpush1.bf16.msra.mxu0 %v10012_v12  ;;  %v3594_v12 = vadd.f32 %v8403_v51, %v8276_v33  ;;  %v5390_v33 = vld [vmem:[#allocation6 + $0x48] sm:$0xff]  }
 0x5f5   :  { %4042 = vmatpush1.bf16.msra.mxu1 %v10013_v61  ;;  %3920 = vmatprep.subr.bf16.mxu0 %v10014_v4  ;;  %v5619_v61 = vld [vmem:[#allocation4 + $0x5c0] ss:$16 sps:$4 sm:$0xff]   ;;  %v2119_v4 = vmax.f32 %v2118_v42, 0.0  ;;  %v5704_v42 = vmov 0.0  }
 0x5f6   :  { %4043 = vmatprep.subr.bf16.mxu1 %v8143_v32  ;;  %v5571_v32 = vld [vmem:[#allocation4 + $0x440] ss:$16 sps:$4 sm:$0xff]  }
 0x5f8   :  { %3921 = vmatpush1.bf16.msra.mxu0 %v10015_v16  ;;  %v5388_v16 = vld [vmem:[#allocation6 + $0x40] sm:$0xff]  }
 0x5f9   :  { %4044 = vmatpush1.bf16.msra.mxu1 %v10016_v23  ;;  %3931 = vmatprep.subr.bf16.mxu0 %v10017_v25  ;;  %v5622_v23 = vld [vmem:[#allocation4 + $0x5ec] ss:$16 sps:$4 sm:$0xff]   ;;  %v5404_v25 = vld [vmem:[#allocation6 + $0xc0] sm:$0xff]  }
 0x5fa   :  { %4054 = vmatprep.subr.bf16.mxu1 %v10018_v41  ;;  %v3595_v41 = vmax.f32 %v3594_v12, 0.0  ;;  %v5424_v12 = vld [vmem:[%s8451_s7 + $0x20] sm:$0xff]  }
 0x5fb   :  { %3923 = vmatmul.mubr.bf16.vlgmr.msra.gmra.mrb[60].mxu0 %v8243_v44 }
 0x5fc   :  { %4046 = vmatmul.mubr.bf16.vlgmr.msra.gmra.mrb[60].mxu1 %v8243_v44  ;;  %3932 = vmatpush1.bf16.msra.mxu0 %v10019_v59  ;;  %v5572_v44 = vld [vmem:[#allocation4 + $0x448] ss:$16 sps:$4 sm:$0xff]   ;;  %v5389_v59 = vld [vmem:[#allocation6] sm:$0xff]  }
 0x5fd   :  { %3963 = vmatprep.mubr.bf16.mxu0 %v2126_v34  ;;  %4055 = vmatpush1.bf16.msra.mxu1 %v10020_v2  ;;  %v2120_v2 = vpack.c.bf16 %v2119_v4, %v2119_v4 }
 0x5fe   :  { %4086 = vmatprep.mubr.bf16.mxu1 %v2126_v34  ;;  %3933 = vmatprep.subr.bf16.mxu0 %v8170_v39  ;;  %v5576_v39 = vld [vmem:[#allocation4 + $0x468] ss:$16 sps:$4 sm:$0xff]   ;;  %v5623_v34 = vld [vmem:[#allocation4 + $0x5e0] ss:$16 sps:$4 sm:$0xff]  }
 0x5ff   :  { %4056 = vmatprep.subr.bf16.mxu1 %v8173_v46  ;;  %v5577_v46 = vld [vmem:[#allocation4 + $0x484] ss:$16 sps:$4 sm:$0xff]  }
 0x600   :  { %3934 = vmatpush1.bf16.msra.mxu0 %v8176_v43  ;;  %v5578_v43 = vld [vmem:[#allocation4 + $0x48c] ss:$16 sps:$4 sm:$0xff]  }
 0x601   :  { %4057 = vmatpush1.bf16.msra.mxu1 %v8179_v49  ;;  %3935 = vmatprep.subr.bf16.mxu0 %v8182_v56  ;;  %v5579_v49 = vld [vmem:[#allocation4 + $0x480] ss:$16 sps:$4 sm:$0xff]   ;;  %v5580_v56 = vld [vmem:[#allocation4 + $0x488] ss:$16 sps:$4 sm:$0xff]  }
 0x602   :  { %4058 = vmatprep.subr.bf16.mxu1 %v8185_v26  ;;  %v5581_v26 = vld [vmem:[#allocation4 + $0x4a4] ss:$16 sps:$4 sm:$0xff]  }
 0x604   :  { %3936 = vmatpush1.bf16.msra.mxu0 %v5571_v32  ;;  %v5624_v32 = vld [vmem:[#allocation4 + $0x5e8] ss:$16 sps:$4 sm:$0xff]  }
 0x605   :  { %4059 = vmatpush1.bf16.msra.mxu1 %v5572_v44  ;;  %3937 = vmatprep.subr.bf16.mxu0 %v5573_v31  ;;  %v5405_v44 = vld [vmem:[#allocation6 + $0x80] sm:$0xff]   ;;  %v3596_v31 = vpack.c.bf16 %v3595_v41, %v3595_v41 }
 0x606   :  { %4060 = vmatprep.subr.bf16.mxu1 %v5574_v0  ;;  %v5406_v0 = vld [vmem:[#allocation6 + $0xc8] sm:$0xff]  }
 0x608   :  { %3938 = vmatpush1.bf16.msra.mxu0 %v5575_v53  ;;  %v5391_v53 = vld [vmem:[#allocation6 + $0x8] sm:$0xff]  }
 0x609   :  { %4061 = vmatpush1.bf16.msra.mxu1 %v5576_v39  ;;  %3939 = vmatprep.subr.bf16.mxu0 %v5577_v46  ;;  %v5392_v39 = vld [vmem:[#allocation6 + $0x50] sm:$0xff]   ;;  %v5407_v46 = vld [vmem:[#allocation6 + $0x88] sm:$0xff]  }
 0x60a   :  { %4062 = vmatprep.subr.bf16.mxu1 %v5578_v43  ;;  %v5408_v43 = vld [vmem:[#allocation6 + $0xd0] sm:$0xff]  }
 0x60c   :  { %3940 = vmatpush1.bf16.msra.mxu0 %v5579_v49  ;;  %v5393_v49 = vld [vmem:[#allocation6 + $0x10] sm:$0xff]  }
 0x60d   :  { %4063 = vmatpush1.bf16.msra.mxu1 %v5580_v56  ;;  %3941 = vmatprep.subr.bf16.mxu0 %v5581_v26  ;;  %v5394_v56 = vld [vmem:[#allocation6 + $0x58] sm:$0xff]   ;;  %v5409_v26 = vld [vmem:[#allocation6 + $0x90] sm:$0xff]  }
 0x60e   :  { %4064 = vmatprep.subr.bf16.mxu1 %v5582_v5  ;;  %v5410_v5 = vld [vmem:[#allocation6 + $0xd8] sm:$0xff]  }
 0x610   :  { %3942 = vmatpush1.bf16.msra.mxu0 %v5583_v13  ;;  %v5395_v13 = vld [vmem:[#allocation6 + $0x18] sm:$0xff]  }
 0x611   :  { %4065 = vmatpush1.bf16.msra.mxu1 %v5584_v19  ;;  %3943 = vmatprep.subr.bf16.mxu0 %v5585_v6  ;;  %v5396_v19 = vld [vmem:[#allocation6 + $0x60] sm:$0xff]   ;;  %v5411_v6 = vld [vmem:[#allocation6 + $0x98] sm:$0xff]  }
 0x612   :  { %4066 = vmatprep.subr.bf16.mxu1 %v5586_v3  ;;  %v5412_v3 = vld [vmem:[#allocation6 + $0xe0] sm:$0xff]  }
 0x614   :  { %3944 = vmatpush1.bf16.msra.mxu0 %v5587_v54  ;;  %v5397_v54 = vld [vmem:[#allocation6 + $0x20] sm:$0xff]  }
 0x615   :  { %4067 = vmatpush1.bf16.msra.mxu1 %v5588_v38  ;;  %3945 = vmatprep.subr.bf16.mxu0 %v5589_v7  ;;  %v5398_v38 = vld [vmem:[#allocation6 + $0x68] sm:$0xff]   ;;  %v5413_v7 = vld [vmem:[#allocation6 + $0xa0] sm:$0xff]  }
 0x616   :  { %4068 = vmatprep.subr.bf16.mxu1 %v5590_v57  ;;  %v5399_v57 = vld [vmem:[#allocation6 + $0x28] sm:$0xff]  }
 0x618   :  { %3946 = vmatpush1.bf16.msra.mxu0 %v5591_v11  ;;  %v5400_v11 = vld [vmem:[#allocation6 + $0x70] sm:$0xff]  }
 0x619   :  { %4069 = vmatpush1.bf16.msra.mxu1 %v5592_v22  ;;  %3947 = vmatprep.subr.bf16.mxu0 %v5593_v63 }
 0x61a   :  { %4070 = vmatprep.subr.bf16.mxu1 %v5594_v37 }
 0x61c   :  { %3948 = vmatpush1.bf16.msra.mxu0 %v5595_v9 }
 0x61d   :  { %4071 = vmatpush1.bf16.msra.mxu1 %v5596_v36  ;;  %3949 = vmatprep.subr.bf16.mxu0 %v5597_v17 }
 0x61e   :  { %4072 = vmatprep.subr.bf16.mxu1 %v5598_v29  ;;  %v5401_v29 = vld [vmem:[#allocation6 + $0x30] sm:$0xff]  }
 0x620   :  { %3950 = vmatpush1.bf16.msra.mxu0 %v5599_v28  ;;  %v10022_v28 = vld [vmem:[#allocation115_spill] sm:$0xff] }
 0x621   :  { %4073 = vmatpush1.bf16.msra.mxu1 %v5600_v24  ;;  %3951 = vmatprep.subr.bf16.mxu0 %v5601_v55  ;;  %v3342_v24 = vadd.f32 %v8403_v51, %v10022_v28 }
 0x622   :  { %4074 = vmatprep.subr.bf16.mxu1 %v5602_v15 }
 0x624   :  { %3952 = vmatpush1.bf16.msra.mxu0 %v5603_v35 }
 0x625   :  { %4075 = vmatpush1.bf16.msra.mxu1 %v5604_v27  ;;  %3953 = vmatprep.subr.bf16.mxu0 %v5605_v47  ;;  %v5402_v27 = vld [vmem:[#allocation6 + $0x78] sm:$0xff]  }
 0x626   :  { %4076 = vmatprep.subr.bf16.mxu1 %v5606_v40 }
 0x628   :  { %3954 = vmatpush1.bf16.msra.mxu0 %v5607_v60  ;;  %v5403_v60 = vld [vmem:[#allocation6 + $0x38] sm:$0xff]  }
 0x629   :  { %4077 = vmatpush1.bf16.msra.mxu1 %v5608_v62  ;;  %3955 = vmatprep.subr.bf16.mxu0 %v5609_v8  ;;  %v3343_v62 = vmax.f32 %v3342_v24, 0.0 }
 0x62a   :  { %4078 = vmatprep.subr.bf16.mxu1 %v5610_v20  ;;  %v5414_v20 = vld [vmem:[#allocation6 + $0xe8] sm:$0xff]  }
 0x62b   :  { %v3344_v8 = vpack.c.bf16 %v3343_v62, %v3343_v62 }
 0x62c   :  { %3956 = vmatpush1.bf16.msra.mxu0 %v5611_v30  ;;  %v5415_v30 = vld [vmem:[#allocation6 + $0xa8] sm:$0xff]  }
 0x62d   :  { %4079 = vmatpush1.bf16.msra.mxu1 %v5612_v48  ;;  %3957 = vmatprep.subr.bf16.mxu0 %v5613_v18  ;;  %v5416_v48 = vld [vmem:[#allocation6 + $0xf0] sm:$0xff]  }
 0x62e   :  { %4080 = vmatprep.subr.bf16.mxu1 %v5614_v10  ;;  %v5417_v18 = vld [vmem:[#allocation6 + $0xb0] sm:$0xff]   ;;  %v5418_v10 = vld [vmem:[#allocation6 + $0xf8] sm:$0xff]  }
 0x630   :  { %3958 = vmatpush1.bf16.msra.mxu0 %v5615_v58  ;;  %v5419_v58 = vld [vmem:[#allocation6 + $0xb8] sm:$0xff]  }
 0x631   :  { %4081 = vmatpush1.bf16.msra.mxu1 %v5616_v45  ;;  %3959 = vmatprep.subr.bf16.mxu0 %v5617_v50  ;;  %v5421_v45 = vld [vmem:[%s8451_s7 + $0x8] sm:$0xff]   ;;  %v5422_v50 = vld [vmem:[%s8451_s7 + $0x10] sm:$0xff]  }
 0x632   :  { %4082 = vmatprep.subr.bf16.mxu1 %v5618_v52  ;;  %v5423_v52 = vld [vmem:[%s8451_s7 + $0x18] sm:$0xff]  }
 0x634   :  { %3960 = vmatpush1.bf16.msra.mxu0 %v5619_v61  ;;  %v5425_v61 = vld [vmem:[%s8451_s7 + $0x28] sm:$0xff]  }
 0x635   :  { %4083 = vmatpush1.bf16.msra.mxu1 %v5620_v1  ;;  %3961 = vmatprep.subr.bf16.mxu0 %v5621_v21 }
 0x636   :  { %4084 = vmatprep.subr.bf16.mxu1 %v5622_v23 }
 0x638   :  { %3962 = vmatpush1.bf16.msra.mxu0 %v5623_v34 }
 0x639   :  { %4085 = vmatpush1.bf16.msra.mxu1 %v5624_v32  ;;  %4945 = vmatprep.subr.bf16.mxu0 %v5388_v16 }
 0x63a   :  { %4967 = vmatprep.subr.bf16.mxu1 %v5404_v25 }
 0x63b   :  { %3964 = vmatmul.mubr.bf16.vlgmr.msra.gmra.mrb[60].mxu0 %v2120_v2 }
 0x63c   :  { %4087 = vmatmul.mubr.bf16.vlgmr.msra.gmra.mrb[60].mxu1 %v2120_v2  ;;  %4946 = vmatpush3.bf16.msra.mxu0 %v5389_v59 }
 0x63d   :  { %4396 = vmatprep.mubr.bf16.mxu0 %v3596_v31  ;;  %4947 = vmatprep.subr.bf16.mxu0 %v5390_v33 }
 0x63e   :  { %4968 = vmatpush3.bf16.msra.mxu1 %v5405_v44 }
 0x63f   :  { %4969 = vmatprep.subr.bf16.mxu1 %v5406_v0 }
 0x640   :  { %4948 = vmatpush3.bf16.msra.mxu0 %v5391_v53 }
 0x641   :  { %4949 = vmatprep.subr.bf16.mxu0 %v5392_v39 }
 0x642   :  { %4970 = vmatpush3.bf16.msra.mxu1 %v5407_v46 }
 0x643   :  { %4971 = vmatprep.subr.bf16.mxu1 %v5408_v43 }
 0x644   :  { %4950 = vmatpush3.bf16.msra.mxu0 %v5393_v49 }
 0x645   :  { %4951 = vmatprep.subr.bf16.mxu0 %v5394_v56 }
 0x646   :  { %4972 = vmatpush3.bf16.msra.mxu1 %v5409_v26 }
 0x647   :  { %4973 = vmatprep.subr.bf16.mxu1 %v5410_v5  ;;  %v5426_v5 = vld [vmem:[%s8451_s7 + $0x30] sm:$0xff]  }
 0x648   :  { %4952 = vmatpush3.bf16.msra.mxu0 %v5395_v13  ;;  %v4903_v13 = vld [vmem:[%s8450_s6] ss:$0 sm:$0xff] }
 0x649   :  { %4953 = vmatprep.subr.bf16.mxu0 %v5396_v19 }
 0x64a   :  { %4974 = vmatpush3.bf16.msra.mxu1 %v5411_v6 }
 0x64b   :  { %4975 = vmatprep.subr.bf16.mxu1 %v5412_v3 }
 0x64c   :  { %4954 = vmatpush3.bf16.msra.mxu0 %v5397_v54 }
 0x64d   :  { %4955 = vmatprep.subr.bf16.mxu0 %v5398_v38 }
 0x64e   :  { %v3713_v22 = vpop.f32.mrb[56].mxu0  ;;  %4976 = vmatpush3.bf16.msra.mxu1 %v5413_v7 }
 0x64f   :  { %v3836_v63 = vpop.f32.mrb[56].mxu1  ;;  %v3715_v37 = vpop.f32.mrb[57].mxu0  ;;  %4977 = vmatprep.subr.bf16.mxu1 %v5414_v20 }
 0x650   :  { %v3843_v9 = vmax.f32 %v3713_v22, %v3715_v37  ;;  %v3838_v36 = vpop.f32.mrb[57].mxu1  ;;  %v3717_v17 = vpop.f32.mrb[58].mxu0  ;;  %4956 = vmatpush3.bf16.msra.mxu0 %v5399_v57 }
 0x651   :  { %v3844_v55 = vmax.f32 %v3836_v63, %v3838_v36  ;;  %v3840_v15 = vpop.f32.mrb[58].mxu1  ;;  %v3718_v35 = vpop.f32.mrb[59].mxu0  ;;  %4957 = vmatprep.subr.bf16.mxu0 %v5400_v11  ;;  %v4936_v63 = vld [vmem:[%s8452_s8] ss:$0 sm:$0xff] }
 0x652   :  { %v3841_v47 = vpop.f32.mrb[59].mxu1  ;;  %4978 = vmatpush3.bf16.msra.mxu1 %v5415_v30 }
 0x653   :  { %v3845_v40 = vmax.f32 %v3843_v9, %v3844_v55  ;;  %4979 = vmatprep.subr.bf16.mxu1 %v5416_v48 }
 0x654   :  { %4958 = vmatpush3.bf16.msra.mxu0 %v5401_v29 }
 0x655   :  { %4959 = vmatprep.subr.bf16.mxu0 %v5402_v27  ;;  %v3846_v2 = vadd.f32 %v8403_v51, %v3845_v40 }
 0x656   :  { %4980 = vmatpush3.bf16.msra.mxu1 %v5417_v18 }
 0x657   :  { %4981 = vmatprep.subr.bf16.mxu1 %v5418_v10  ;;  %v3847_v31 = vmax.f32 %v3846_v2, 0.0 }
 0x658   :  { %4960 = vmatpush3.bf16.msra.mxu0 %v5403_v60 }
 0x659   :  { %4998 = vmatprep.subr.bf16.mxu0 %v5704_v42  ;;  %v3848_v39 = vpack.c.bf16 %v3847_v31, %v3847_v31 }
 0x65a   :  { %4982 = vmatpush3.bf16.msra.mxu1 %v5419_v58 }
 0x65b   :  { %4397 = vmatmul.mubr.bf16.vlgmr.msra.gmra.mrb[64].mxu0 %v3344_v8 }
 0x65c   :  { %4999 = vmatpush3.bf16.msra.mxu0 %v5420_v14  ;;  %5014 = vmatprep.mubr.msk.bf16.mxu0 %vm5705_vm0, %v5704_v42 }
 0x65d   :  { %5000 = vmatprep.subr.bf16.mxu0 %v5704_v42 }
 0x660   :  { %5001 = vmatpush3.bf16.msra.mxu0 %v5421_v45 }
 0x661   :  { %5002 = vmatprep.subr.bf16.mxu0 %v5704_v42 }
 0x664   :  { %5003 = vmatpush3.bf16.msra.mxu0 %v5422_v50 }
 0x665   :  { %5004 = vmatprep.subr.bf16.mxu0 %v5704_v42 }
 0x668   :  { %5005 = vmatpush3.bf16.msra.mxu0 %v5423_v52 }
 0x669   :  { %5006 = vmatprep.subr.bf16.mxu0 %v5704_v42 }
 0x66c   :  { %5007 = vmatpush3.bf16.msra.mxu0 %v5424_v12 }
 0x66d   :  { %5008 = vmatprep.subr.bf16.mxu0 %v5704_v42 }
 0x670   :  { %5009 = vmatpush3.bf16.msra.mxu0 %v5425_v61 }
 0x671   :  { %5010 = vmatprep.subr.bf16.mxu0 %v5704_v42 }
 0x674   :  { %5011 = vmatpush3.bf16.msra.mxu0 %v5426_v5 }
 0x675   :  { %5012 = vmatprep.subr.bf16.mxu0 %v5704_v42 }
 0x70e   :  { %v3965_v4 = vpop.f32.mrb[60].mxu0 }
 0x70f   :  { %v4088_v1 = vpop.f32.mrb[60].mxu1  ;;  %v3967_v21 = vpop.f32.mrb[61].mxu0 }
 0x710   :  { %v4095_v16 = vmax.f32 %v3965_v4, %v3967_v21  ;;  %v4090_v23 = vpop.f32.mrb[61].mxu1  ;;  %v3969_v25 = vpop.f32.mrb[62].mxu0 }
 0x711   :  { %v4096_v41 = vmax.f32 %v4088_v1, %v4090_v23  ;;  %v4092_v34 = vpop.f32.mrb[62].mxu1  ;;  %v3970_v59 = vpop.f32.mrb[63].mxu0 }
 0x712   :  { %v4093_v32 = vpop.f32.mrb[63].mxu1 }
 0x713   :  { %v4097_v33 = vmax.f32 %v4095_v16, %v4096_v41 }
 0x715   :  { %v4098_v44 = vadd.f32 %v8403_v51, %v4097_v33  ;;  %v5427_v51 = vld [vmem:[%s8451_s7 + $0x38] sm:$0xff]  }
 0x716   :  { %5013 = vmatpush3.bf16.msra.mxu0 %v5427_v51 }
 0x717   :  { %v4099_v0 = vmax.f32 %v4098_v44, 0.0 }
 0x719   :  { %v4100_v53 = vpack.c.bf16 %v4099_v0, %v4099_v0 }
 0x71b   :  { %4436 = vmatprep.mubr.bf16.mxu1 %v4100_v53 }
 0x71c   :  { %4437 = vmatmul.mubr.bf16.vlgmr.msra.gmra.mrb[64].mxu1 %v3848_v39 }
 0x72e   :  { %v4961_v46 = vpop.f32.mrb[64].mxu0 }
 0x72f   :  { %v4962_v43 = vpop.f32.mrb[65].mxu0 }
 0x730   :  { %v4963_v49 = vadd.f32 %v4962_v43, %v4961_v46  ;;  %v4964_v56 = vpop.f32.mrb[66].mxu0 }
 0x731   :  { %v4965_v26 = vpop.f32.mrb[67].mxu0 }
 0x732   :  { %v4399_v3 = vadd.f32 %v4963_v49, %v4903_v13 }
 0x7ef   :  { %v4983_v19 = vpop.f32.mrb[64].mxu1 }
 0x7f0   :  { %v4984_v6 = vpop.f32.mrb[65].mxu1 }
 0x7f1   :  { %v4985_v54 = vadd.f32 %v4984_v6, %v4983_v19  ;;  %v4986_v38 = vpop.f32.mrb[66].mxu1 }
 0x7f2   :  { %v4987_v7 = vpop.f32.mrb[67].mxu1 }
 0x7f3   :  { %v4439_v57 = vadd.f32 %v4985_v54, %v4399_v3 }
 0x7f5   :  { %v4444_v11 = vmax.f32 %v4439_v57, 0.0 }
 0x7f7   :  { %v4445_v22 = vpack.c.bf16 %v4444_v11, %v4444_v11 }
 0x7f9   :  { %5015 = vmatmul.mubr.bf16.vlgmr.msra.gmra.mrb[68].mxu0 %v4445_v22 }
 0x8cc   :  { %v4551_v37 = vpop.f32.mrb[68].mxu0 }
 0x8cd   :  { %v4552_v9 = vadd.f32 %v4936_v63, %v4551_v37  ;;  %v5016_v36 = vpop.f32.mrb[69].mxu0 }
 0x8ce   :  { %v4554_v17 = vpop.f32.mrb[70].mxu0 }
 0x8cf   :  { %4557 = vmax.xlane.f32.xlu0 %v4552_v9  ;;  %v5017_v29 = vpop.f32.mrb[71].mxu0 }
 0x95c   :  { %v4558_v28 = vpop.xlane.xlu0 %4557 }
 0x95d   :  { %v4559_v24 = vsub.f32 %v4552_v9, %v4558_v28 }
 0x95f   :  { %v4560_v55 = vmul.f32 1.442695, %v4559_v24 }
 0x961   :  { %5428 = vpow2.f32 %v4560_v55 }
 0x96b   :  { %v5429_v15 = vpop.eup %5428 }
 0x96c   :  { %4562 = vadd.xlane.f32.xlu0 %v5429_v15 }
 0x9f9   :  { %v4563_v35 = vpop.xlane.xlu0 %4562 }
 0x9fa   :  { %5430 = vlog2.f32 %v4563_v35 }
 0xa04   :  { %v5431_v27 = vpop.eup %5430 }
 0xa05   :  { %v4565_v47 = vmul.f32 0.6931472, %v5431_v27 }
 0xa07   :  { %v4566_v40 = vsub.f32 %v4559_v24, %v4565_v47 }
 0xa09   :  { %4567 = vst [vmem:[%s8453_s9] sm:$0xff] %v4566_v40 }
 0xa0a   :  { %4572 = vsyncpa [#allocation3], 1 }
 0xa0b   :  { %4573 = vsyncpa [#allocation5], 1 }

</bundles_post_ra>
